<compile_context>
chip_gen: v6e
topology: v6e:2x2x1
jax: 0.10.0
libtpu: 0.0.40
codegen_flags: <defaults>
</compile_context>

<pallas_src>
import functools
import math

import jax
import jax.numpy as jnp
from jax.experimental import pallas as pl
from jax.experimental.pallas import tpu as pltpu

QK_PAD = 128                        # qk_dim / v_dim (96) zero-padded to 128 lanes
EVO_DIM = 30
V_IN_DIM = 1024
# evo-side fused projection column layout: [ q | k_evo | cn3 t0..t2 | cn5 t0..t4 ]
Q_OFF = 0
KE_OFF = QK_PAD
C3_OFF = 2 * QK_PAD
C5_OFF = 5 * QK_PAD
EVO_PROJ_COLS = 10 * QK_PAD         # 1280


# ----------------------------------------------------------------------------
# Kernel A: fused Contextual_Attention (one launch, all batches in one block)
# ----------------------------------------------------------------------------
def ca_kernel(evo_ref, prot0_ref, len_ref,
              w_evo_ref, bq_ref, bc3_ref, bc5_ref,
              wk35_ref, bk_ref, wv_ref, bv_ref,
              o_ref, *, bsz, seq_len, norm):
    bl = bsz * seq_len
    evo = evo_ref[...]                                   # (BL, 30) bf16

    # position of every flattened row inside its sequence, built in-kernel
    row = jax.lax.broadcasted_iota(jnp.int32, (bsz, seq_len, 1), 1).reshape(bl, 1)
    # hoisted batch-boundary validity masks for conv offsets d != 0
    masks = {d: jnp.logical_and(row + d >= 0, row + d < seq_len)
             for d in (-2, -1, 1, 2)}

    # ONE (BL,30)x(30,1280) matmul for q, k_evo and all 8 conv taps.
    proj = jnp.dot(evo, w_evo_ref[...], preferred_element_type=jnp.float32)

    def conv_from_taps(off, ksize, bias):
        # 'same' Conv1d from pre-computed per-tap partials: contribution of tap
        # t (offset d = t - pad) to output row i is y_t[i + d]; realized as a
        # circular roll by -d plus a batch-boundary mask.
        pad = (ksize - 1) // 2
        acc = jnp.zeros((bl, QK_PAD), jnp.float32) + bias
        for t in range(ksize):                           # static unroll
            d = t - pad
            y = proj[:, off + t * QK_PAD: off + (t + 1) * QK_PAD]
            if d != 0:
                y = pltpu.roll(y, shift=(-d) % bl, axis=0)
                y = jnp.where(masks[d], y, 0.0)
            acc = acc + y
        return acc

    q = proj[:, Q_OFF:Q_OFF + QK_PAD] + bq_ref[...]
    k_evo = proj[:, KE_OFF:KE_OFF + QK_PAD]
    k3 = conv_from_taps(C3_OFF, 3, bc3_ref[...])         # cn3 output (BL,128) f32
    k5 = conv_from_taps(C5_OFF, 5, bc5_ref[...])         # cn5 output (BL,128) f32

    # K = Linear(cat([evo, k3, k5])): evo part already in k_evo, k3/k5 fused
    # into one (BL,256)x(256,128) matmul.
    k35 = jnp.concatenate([k3, k5], axis=1).astype(jnp.bfloat16)
    k = (k_evo
         + jnp.dot(k35, wk35_ref[...], preferred_element_type=jnp.float32)
         + bk_ref[...])
    v = (jnp.dot(prot0_ref[...], wv_ref[...], preferred_element_type=jnp.float32)
         + bv_ref[...])

    qb = q.astype(jnp.bfloat16).reshape(bsz, seq_len, QK_PAD)
    kb = k.astype(jnp.bfloat16).reshape(bsz, seq_len, QK_PAD)
    vb = v.reshape(bsz, seq_len, QK_PAD)                  # f32

    # masked softmax attention (d2l-style: mask key columns >= valid length)
    scores = jnp.einsum('bqd,bkd->bqk', qb, kb,
                        preferred_element_type=jnp.float32) * norm
    col = jax.lax.broadcasted_iota(jnp.int32, scores.shape, 2)
    valid_len = len_ref[...].reshape(bsz, 1, 1)
    scores = jnp.where(col < valid_len, scores, jnp.float32(-1e6))
    m = jnp.max(scores, axis=-1, keepdims=True)
    e = jnp.exp(scores - m)
    atten = e * pl.reciprocal(jnp.sum(e, axis=-1, keepdims=True), approx=True)
    ctx = jnp.einsum('bqk,bkd->bqd', atten.astype(jnp.bfloat16),
                     vb.astype(jnp.bfloat16), preferred_element_type=jnp.float32)
    out = ctx + vb                                        # residual (+V)
    o_ref[...] = out.reshape(bl, QK_PAD).astype(o_ref.dtype)


# ----------------------------------------------------------------------------
# Kernel B: full trunk (protcnn1 + protcnn2 + protcnn3 + folded fc chain)
# ----------------------------------------------------------------------------
def trunk_kernel(prot0_ref, f0agv_ref, evosa_ref,
                 w1p_ref, w1f_ref, w1e_ref, b1_ref,
                 w2_ref, b2_ref, w3_ref, b3_ref, wfc_ref, bfc_ref,
                 o_ref, *, bsz, seq_len):
    bl = bsz * seq_len
    row = jax.lax.broadcasted_iota(jnp.int32, (bsz, seq_len, 1), 1).reshape(bl, 1)
    masks = {d: jnp.logical_and(row + d >= 0, row + d < seq_len) for d in (-1, 1)}

    def conv3(partial, bias, cout):
        # partial: (BL, 3*cout) f32, tap-major columns; roll + mask + add taps.
        acc = jnp.zeros((bl, cout), jnp.float32) + bias
        for t in range(3):
            d = t - 1
            y = partial[:, t * cout:(t + 1) * cout]
            if d != 0:
                y = pltpu.roll(y, shift=(-d) % bl, axis=0)
                y = jnp.where(masks[d], y, 0.0)
            acc = acc + y
        return acc

    # protcnn1: Cin split (1024 | 1024 | 128), taps fused along Cout (3*512)
    p1 = (jnp.dot(prot0_ref[...], w1p_ref[...], preferred_element_type=jnp.float32)
          + jnp.dot(f0agv_ref[...], w1f_ref[...], preferred_element_type=jnp.float32)
          + jnp.dot(evosa_ref[...], w1e_ref[...], preferred_element_type=jnp.float32))
    h = jnp.maximum(conv3(p1, b1_ref[...], 512), 0.0).astype(jnp.bfloat16)

    # protcnn2 (512 -> 256), taps fused along Cout (3*256)
    p2 = jnp.dot(h, w2_ref[...], preferred_element_type=jnp.float32)
    h = jnp.maximum(conv3(p2, b2_ref[...], 256), 0.0).astype(jnp.bfloat16)

    # protcnn3 (256 -> 128), taps fused along Cout (3*128)
    p3 = jnp.dot(h, w3_ref[...], preferred_element_type=jnp.float32)
    h = jnp.maximum(conv3(p3, b3_ref[...], 128), 0.0).astype(jnp.bfloat16)

    # fc2 -> drop -> fc3 -> drop -> fc4 is purely linear in eval mode, folded
    # at prep time into a single (128, 128-padded) matmul; real output = 2 cols.
    # TODO(synk): nn.Dropout(0.5) runs in eval mode (identity); training-mode
    # dropout would prevent this algebraic fold.
    out = jnp.dot(h, wfc_ref[...], preferred_element_type=jnp.float32) + bfc_ref[...]
    o_ref[...] = out.astype(o_ref.dtype)


# ----------------------------------------------------------------------------
# Host-side wrappers (pallas_call plumbing)
# ----------------------------------------------------------------------------
def contextual_attention(fp, evo_f, prot0_f, lens, bsz, seq_len):
    norm = 1.0 / math.sqrt(96.0)
    kern = functools.partial(ca_kernel, bsz=bsz, seq_len=seq_len, norm=norm)
    # Everything fits easily in VMEM at these shapes -> single block, no grid.
    return pl.pallas_call(
        kern,
        out_shape=jax.ShapeDtypeStruct((bsz * seq_len, QK_PAD), jnp.bfloat16),
    )(evo_f, prot0_f, lens,
      fp["w_evo"], fp["bq"], fp["bc3"], fp["bc5"],
      fp["wk35"], fp["bk"], fp["wv"], fp["bv"])


def trunk(fp, prot0_f, f0agv_f, evosa, bsz, seq_len):
    bl = bsz * seq_len
    kern = functools.partial(trunk_kernel, bsz=bsz, seq_len=seq_len)
    return pl.pallas_call(
        kern,
        out_shape=jax.ShapeDtypeStruct((bl, QK_PAD), jnp.float32),
        # ~7.7 MB bf16 of resident weights; 32 MiB scoped VMEM is safe on every
        # generation (v7x physical is 64 MiB) and clears v5e's 16 MiB default.
        compiler_params=pltpu.CompilerParams(vmem_limit_bytes=32 << 20),
    )(prot0_f, f0agv_f, evosa,
      fp["w1p"], fp["w1f"], fp["w1e"], fp["b1"],
      fp["w2f"], fp["b2"], fp["w3f"], fp["b3"], fp["wfc"], fp["bfc"])


# ----------------------------------------------------------------------------
# Parameter init (deterministic, shapes from the PyTorch __init__)
# ----------------------------------------------------------------------------
def _lin_init(key, cin, cout):
    k1, k2 = jax.random.split(key)
    bound = 1.0 / math.sqrt(cin)
    w = jax.random.uniform(k1, (cin, cout), jnp.float32, -bound, bound)
    b = jax.random.uniform(k2, (cout,), jnp.float32, -bound, bound)
    return w, b


def _conv_init(key, ksize, cin, cout):
    k1, k2 = jax.random.split(key)
    bound = 1.0 / math.sqrt(cin * ksize)
    w = jax.random.uniform(k1, (ksize, cin, cout), jnp.float32, -bound, bound)
    b = jax.random.uniform(k2, (cout,), jnp.float32, -bound, bound)
    return w, b


def init_params(key):
    keys = jax.random.split(key, 11)
    p = {}
    # Contextual_Attention(q_input_dim=30, v_input_dim=1024, qk_dim=96, v_dim=96)
    p["cn3_w"], p["cn3_b"] = _conv_init(keys[0], 3, 30, 96)
    p["cn5_w"], p["cn5_b"] = _conv_init(keys[1], 5, 30, 96)
    p["q_w"], p["q_b"] = _lin_init(keys[2], 30, 96)
    p["k_w"], p["k_b"] = _lin_init(keys[3], 96 * 2 + 30, 96)   # 222 -> 96
    p["v_w"], p["v_b"] = _lin_init(keys[4], 1024, 96)
    # DCTModule convs / fcs
    p["p1_w"], p["p1_b"] = _conv_init(keys[5], 3, 1024 + 1024 + 96, 512)  # 2144
    p["p2_w"], p["p2_b"] = _conv_init(keys[6], 3, 512, 256)
    p["p3_w"], p["p3_b"] = _conv_init(keys[7], 3, 256, 128)
    p["fc2_w"], p["fc2_b"] = _lin_init(keys[8], 128, 512)
    p["fc3_w"], p["fc3_b"] = _lin_init(keys[9], 512, 64)
    p["fc4_w"], p["fc4_b"] = _lin_init(keys[10], 64, 2)
    return p


def _pad_last(x, n):
    return jnp.pad(x, [(0, 0)] * (x.ndim - 1) + [(0, n - x.shape[-1])])


def prepare_params(p):
    """Split / fuse / zero-pad / cast params for the two fused kernels.

    qk/v width 96 is zero-padded to a lane-dense 128; padded rows/columns are
    zero so results match the unpadded model.  Conv taps are concatenated along
    Cout at prep time so each conv is a single matmul in-kernel.  Weights are
    bf16 (native MXU input); biases stay f32 (added to f32 accumulators).
    """
    bf = jnp.bfloat16
    f = {}

    def pad_cols(w):
        return _pad_last(w, QK_PAD)

    # --- evo-side fused projection: [ q | k_evo | cn3 taps | cn5 taps ] -> (30,1280)
    wq = pad_cols(p["q_w"])                                  # (30,128)
    wke = pad_cols(p["k_w"][0:30])                           # (30,128)
    c3 = [pad_cols(p["cn3_w"][t]) for t in range(3)]
    c5 = [pad_cols(p["cn5_w"][t]) for t in range(5)]
    f["w_evo"] = jnp.concatenate([wq, wke] + c3 + c5, axis=1).astype(bf)
    assert f["w_evo"].shape == (EVO_DIM, EVO_PROJ_COLS)
    f["bq"] = pad_cols(p["q_b"].reshape(1, -1))
    f["bc3"] = pad_cols(p["cn3_b"].reshape(1, -1))
    f["bc5"] = pad_cols(p["cn5_b"].reshape(1, -1))
    wk3 = pad_cols(jnp.pad(p["k_w"][30:126], ((0, QK_PAD - 96), (0, 0))))   # (128,128)
    wk5 = pad_cols(jnp.pad(p["k_w"][126:222], ((0, QK_PAD - 96), (0, 0))))  # (128,128)
    f["wk35"] = jnp.concatenate([wk3, wk5], axis=0).astype(bf)              # (256,128)
    f["bk"] = pad_cols(p["k_b"].reshape(1, -1))
    f["wv"] = pad_cols(p["v_w"]).astype(bf)                                 # (1024,128)
    f["bv"] = pad_cols(p["v_b"].reshape(1, -1))

    # --- trunk convs: taps fused along Cout ---
    def taps_to_cols(w):        # (K, Cin, Cout) -> (Cin, K*Cout), tap-major cols
        k, cin, cout = w.shape
        return jnp.transpose(w, (1, 0, 2)).reshape(cin, k * cout)

    w1 = p["p1_w"]                                           # (3, 2144, 512)
    f["w1p"] = taps_to_cols(w1[:, :1024]).astype(bf)         # (1024, 1536)
    f["w1f"] = taps_to_cols(w1[:, 1024:2048]).astype(bf)     # (1024, 1536)
    w1e = jnp.pad(w1[:, 2048:], ((0, 0), (0, QK_PAD - 96), (0, 0)))
    f["w1e"] = taps_to_cols(w1e).astype(bf)                  # (128, 1536)
    f["b1"] = p["p1_b"].reshape(1, -1)
    f["w2f"] = taps_to_cols(p["p2_w"]).astype(bf)            # (512, 768)
    f["b2"] = p["p2_b"].reshape(1, -1)
    f["w3f"] = taps_to_cols(p["p3_w"]).astype(bf)            # (256, 384)
    f["b3"] = p["p3_b"].reshape(1, -1)

    # --- fc2 -> fc3 -> fc4 folded (dropout = eval-mode identity), lane-padded ---
    wfc = p["fc2_w"] @ p["fc3_w"] @ p["fc4_w"]                             # (128, 2)
    bfc = (p["fc2_b"] @ p["fc3_w"] @ p["fc4_w"]
           + p["fc3_b"] @ p["fc4_w"] + p["fc4_b"])                         # (2,)
    f["wfc"] = _pad_last(wfc, QK_PAD).astype(bf)                           # (128, 128)
    f["bfc"] = _pad_last(bfc.reshape(1, -1), QK_PAD)                       # (1, 128)
    return f


# ----------------------------------------------------------------------------
# Full forward pass (2 fused pallas_calls, glue in plain JAX)
# ----------------------------------------------------------------------------
def dct_forward(fparams, prot0, f0agv, evo, data_length):
    bsz, seq_len, _ = prot0.shape
    bl = bsz * seq_len
    evo_f = evo.reshape(bl, EVO_DIM).astype(jnp.bfloat16)
    prot0_f = prot0.reshape(bl, V_IN_DIM).astype(jnp.bfloat16)
    f0agv_f = f0agv.reshape(bl, V_IN_DIM).astype(jnp.bfloat16)
    lens = data_length.astype(jnp.int32).reshape(bsz, 1)

    # ---- Contextual_Attention (one fused kernel) ----
    evosa = contextual_attention(fparams, evo_f, prot0_f, lens, bsz, seq_len)
    # ---- DCTModule trunk (one fused kernel; inputs kept separate, no HBM concat) ----
    out = trunk(fparams, prot0_f, f0agv_f, evosa, bsz, seq_len)   # (BL, 128) f32
    return out[:, :2].reshape(bsz, seq_len, 2)                    # 2 real columns


# ----------------------------------------------------------------------------
# Main
# ----------------------------------------------------------------------------
if __name__ == "__main__":
    key = jax.random.PRNGKey(0)
    kp, k1, k2, k3k = jax.random.split(key, 4)

    B, L = 2, 16
    params = init_params(kp)
    fparams = prepare_params(params)
    prot0 = jax.random.normal(k1, (B, L, 1024), jnp.float32)   # plm_embedding
    f0agv = jax.random.normal(k2, (B, L, 1024), jnp.float32)
    evo = jax.random.normal(k3k, (B, L, 30), jnp.float32)
    data_length = jnp.array([16, 10], dtype=jnp.int32)

    fwd = jax.jit(dct_forward)
    out = jax.block_until_ready(fwd(fparams, prot0, f0agv, evo, data_length))
    assert out.shape == (B, L, 2), out.shape
    assert bool(jnp.all(jnp.isfinite(out)))
    print("KERNEL_OK")
</pallas_src>

<mosaic_0001>
module attributes {stable_mosaic.version = 11 : i64} {
  func.func @ca_kernel(%arg0: memref<32x30xbf16, #tpu.memory_space<vmem>>, %arg1: memref<32x1024xbf16, #tpu.memory_space<vmem>>, %arg2: memref<2x1xi32, #tpu.memory_space<vmem>>, %arg3: memref<30x1280xbf16, #tpu.memory_space<vmem>>, %arg4: memref<1x128xf32, #tpu.memory_space<vmem>>, %arg5: memref<1x128xf32, #tpu.memory_space<vmem>>, %arg6: memref<1x128xf32, #tpu.memory_space<vmem>>, %arg7: memref<256x128xbf16, #tpu.memory_space<vmem>>, %arg8: memref<1x128xf32, #tpu.memory_space<vmem>>, %arg9: memref<1024x128xbf16, #tpu.memory_space<vmem>>, %arg10: memref<1x128xf32, #tpu.memory_space<vmem>>, %arg11: memref<32x128xbf16, #tpu.memory_space<vmem>>) attributes {dimension_semantics = [], scalar_prefetch = 0 : i64, scratch_operands = 0 : i64, tpu.core_type = #tpu.core_type<tc>} {
    %c0 = arith.constant 0 : index
    %c0_0 = arith.constant 0 : index
    %0 = vector.load %arg0[%c0, %c0_0] : memref<32x30xbf16, #tpu.memory_space<vmem>>, vector<32x30xbf16>
    %1 = tpu.iota {dimensions = array<i32: 1>} : vector<2x16x1xi32>
    %2 = vector.shape_cast %1 : vector<2x16x1xi32> to vector<32x1xi32>
    %c-2_i32 = arith.constant -2 : i32
    %3 = vector.broadcast %c-2_i32 : i32 to vector<32x1xi32>
    %4 = arith.addi %2, %3 : vector<32x1xi32>
    %c0_i32 = arith.constant 0 : i32
    %5 = vector.broadcast %c0_i32 : i32 to vector<32x1xi32>
    %6 = arith.cmpi sge, %4, %5 : vector<32x1xi32>
    %c-2_i32_1 = arith.constant -2 : i32
    %7 = vector.broadcast %c-2_i32_1 : i32 to vector<32x1xi32>
    %8 = arith.addi %2, %7 : vector<32x1xi32>
    %c16_i32 = arith.constant 16 : i32
    %9 = vector.broadcast %c16_i32 : i32 to vector<32x1xi32>
    %10 = arith.cmpi slt, %8, %9 : vector<32x1xi32>
    %11 = arith.andi %6, %10 : vector<32x1xi1>
    %c-1_i32 = arith.constant -1 : i32
    %12 = vector.broadcast %c-1_i32 : i32 to vector<32x1xi32>
    %13 = arith.addi %2, %12 : vector<32x1xi32>
    %c0_i32_2 = arith.constant 0 : i32
    %14 = vector.broadcast %c0_i32_2 : i32 to vector<32x1xi32>
    %15 = arith.cmpi sge, %13, %14 : vector<32x1xi32>
    %c-1_i32_3 = arith.constant -1 : i32
    %16 = vector.broadcast %c-1_i32_3 : i32 to vector<32x1xi32>
    %17 = arith.addi %2, %16 : vector<32x1xi32>
    %c16_i32_4 = arith.constant 16 : i32
    %18 = vector.broadcast %c16_i32_4 : i32 to vector<32x1xi32>
    %19 = arith.cmpi slt, %17, %18 : vector<32x1xi32>
    %20 = arith.andi %15, %19 : vector<32x1xi1>
    %c1_i32 = arith.constant 1 : i32
    %21 = vector.broadcast %c1_i32 : i32 to vector<32x1xi32>
    %22 = arith.addi %2, %21 : vector<32x1xi32>
    %c0_i32_5 = arith.constant 0 : i32
    %23 = vector.broadcast %c0_i32_5 : i32 to vector<32x1xi32>
    %24 = arith.cmpi sge, %22, %23 : vector<32x1xi32>
    %c1_i32_6 = arith.constant 1 : i32
    %25 = vector.broadcast %c1_i32_6 : i32 to vector<32x1xi32>
    %26 = arith.addi %2, %25 : vector<32x1xi32>
    %c16_i32_7 = arith.constant 16 : i32
    %27 = vector.broadcast %c16_i32_7 : i32 to vector<32x1xi32>
    %28 = arith.cmpi slt, %26, %27 : vector<32x1xi32>
    %29 = arith.andi %24, %28 : vector<32x1xi1>
    %c2_i32 = arith.constant 2 : i32
    %30 = vector.broadcast %c2_i32 : i32 to vector<32x1xi32>
    %31 = arith.addi %2, %30 : vector<32x1xi32>
    %c0_i32_8 = arith.constant 0 : i32
    %32 = vector.broadcast %c0_i32_8 : i32 to vector<32x1xi32>
    %33 = arith.cmpi sge, %31, %32 : vector<32x1xi32>
    %c2_i32_9 = arith.constant 2 : i32
    %34 = vector.broadcast %c2_i32_9 : i32 to vector<32x1xi32>
    %35 = arith.addi %2, %34 : vector<32x1xi32>
    %c16_i32_10 = arith.constant 16 : i32
    %36 = vector.broadcast %c16_i32_10 : i32 to vector<32x1xi32>
    %37 = arith.cmpi slt, %35, %36 : vector<32x1xi32>
    %38 = arith.andi %33, %37 : vector<32x1xi1>
    %c0_11 = arith.constant 0 : index
    %c0_12 = arith.constant 0 : index
    %39 = vector.load %arg3[%c0_11, %c0_12] : memref<30x1280xbf16, #tpu.memory_space<vmem>>, vector<30x1280xbf16>
    %cst = arith.constant dense<0.000000e+00> : vector<32x1280xf32>
    %40 = tpu.matmul %0, %39, %cst {dimension_numbers = #tpu.dot_dimension_numbers<[1], [0], [0], [1], [0, 0, 1, 1], [], []>} : vector<32x30xbf16>, vector<30x1280xbf16>, vector<32x1280xf32> -> vector<32x1280xf32>
    %41 = vector.extract_strided_slice %40 {offsets = [0, 0], sizes = [32, 128], strides = [1, 1]} : vector<32x1280xf32> to vector<32x128xf32>
    %c0_13 = arith.constant 0 : index
    %c0_14 = arith.constant 0 : index
    %42 = vector.load %arg4[%c0_13, %c0_14] : memref<1x128xf32, #tpu.memory_space<vmem>>, vector<1x128xf32>
    %43 = vector.broadcast %42 : vector<1x128xf32> to vector<32x128xf32>
    %44 = arith.addf %41, %43 : vector<32x128xf32>
    %45 = vector.extract_strided_slice %40 {offsets = [0, 128], sizes = [32, 128], strides = [1, 1]} : vector<32x1280xf32> to vector<32x128xf32>
    %c0_15 = arith.constant 0 : index
    %c0_16 = arith.constant 0 : index
    %46 = vector.load %arg5[%c0_15, %c0_16] : memref<1x128xf32, #tpu.memory_space<vmem>>, vector<1x128xf32>
    %cst_17 = arith.constant 0.000000e+00 : f32
    %47 = vector.broadcast %cst_17 : f32 to vector<32x128xf32>
    %48 = vector.broadcast %46 : vector<1x128xf32> to vector<32x128xf32>
    %49 = arith.addf %47, %48 : vector<32x128xf32>
    %50 = vector.extract_strided_slice %40 {offsets = [0, 256], sizes = [32, 128], strides = [1, 1]} : vector<32x1280xf32> to vector<32x128xf32>
    %c1_i32_18 = arith.constant 1 : i32
    %51 = tpu.dynamic_rotate %50 by %c1_i32_18 dim 0 : vector<32x128xf32>, i32 -> vector<32x128xf32>
    %cst_19 = arith.constant 0.000000e+00 : f32
    %52 = vector.shape_cast %20 : vector<32x1xi1> to vector<32x1xi1>
    %53 = vector.broadcast %52 : vector<32x1xi1> to vector<32x128xi1>
    %54 = vector.broadcast %cst_19 : f32 to vector<32x128xf32>
    %55 = arith.select %53, %51, %54 : vector<32x128xi1>, vector<32x128xf32>
    %56 = arith.addf %49, %55 : vector<32x128xf32>
    %57 = vector.extract_strided_slice %40 {offsets = [0, 384], sizes = [32, 128], strides = [1, 1]} : vector<32x1280xf32> to vector<32x128xf32>
    %58 = arith.addf %56, %57 : vector<32x128xf32>
    %59 = vector.extract_strided_slice %40 {offsets = [0, 512], sizes = [32, 128], strides = [1, 1]} : vector<32x1280xf32> to vector<32x128xf32>
    %c31_i32 = arith.constant 31 : i32
    %60 = tpu.dynamic_rotate %59 by %c31_i32 dim 0 : vector<32x128xf32>, i32 -> vector<32x128xf32>
    %cst_20 = arith.constant 0.000000e+00 : f32
    %61 = vector.shape_cast %29 : vector<32x1xi1> to vector<32x1xi1>
    %62 = vector.broadcast %61 : vector<32x1xi1> to vector<32x128xi1>
    %63 = vector.broadcast %cst_20 : f32 to vector<32x128xf32>
    %64 = arith.select %62, %60, %63 : vector<32x128xi1>, vector<32x128xf32>
    %65 = arith.addf %58, %64 : vector<32x128xf32>
    %c0_21 = arith.constant 0 : index
    %c0_22 = arith.constant 0 : index
    %66 = vector.load %arg6[%c0_21, %c0_22] : memref<1x128xf32, #tpu.memory_space<vmem>>, vector<1x128xf32>
    %cst_23 = arith.constant 0.000000e+00 : f32
    %67 = vector.broadcast %cst_23 : f32 to vector<32x128xf32>
    %68 = vector.broadcast %66 : vector<1x128xf32> to vector<32x128xf32>
    %69 = arith.addf %67, %68 : vector<32x128xf32>
    %70 = vector.extract_strided_slice %40 {offsets = [0, 640], sizes = [32, 128], strides = [1, 1]} : vector<32x1280xf32> to vector<32x128xf32>
    %c2_i32_24 = arith.constant 2 : i32
    %71 = tpu.dynamic_rotate %70 by %c2_i32_24 dim 0 : vector<32x128xf32>, i32 -> vector<32x128xf32>
    %cst_25 = arith.constant 0.000000e+00 : f32
    %72 = vector.shape_cast %11 : vector<32x1xi1> to vector<32x1xi1>
    %73 = vector.broadcast %72 : vector<32x1xi1> to vector<32x128xi1>
    %74 = vector.broadcast %cst_25 : f32 to vector<32x128xf32>
    %75 = arith.select %73, %71, %74 : vector<32x128xi1>, vector<32x128xf32>
    %76 = arith.addf %69, %75 : vector<32x128xf32>
    %77 = vector.extract_strided_slice %40 {offsets = [0, 768], sizes = [32, 128], strides = [1, 1]} : vector<32x1280xf32> to vector<32x128xf32>
    %c1_i32_26 = arith.constant 1 : i32
    %78 = tpu.dynamic_rotate %77 by %c1_i32_26 dim 0 : vector<32x128xf32>, i32 -> vector<32x128xf32>
    %cst_27 = arith.constant 0.000000e+00 : f32
    %79 = vector.shape_cast %20 : vector<32x1xi1> to vector<32x1xi1>
    %80 = vector.broadcast %79 : vector<32x1xi1> to vector<32x128xi1>
    %81 = vector.broadcast %cst_27 : f32 to vector<32x128xf32>
    %82 = arith.select %80, %78, %81 : vector<32x128xi1>, vector<32x128xf32>
    %83 = arith.addf %76, %82 : vector<32x128xf32>
    %84 = vector.extract_strided_slice %40 {offsets = [0, 896], sizes = [32, 128], strides = [1, 1]} : vector<32x1280xf32> to vector<32x128xf32>
    %85 = arith.addf %83, %84 : vector<32x128xf32>
    %86 = vector.extract_strided_slice %40 {offsets = [0, 1024], sizes = [32, 128], strides = [1, 1]} : vector<32x1280xf32> to vector<32x128xf32>
    %c31_i32_28 = arith.constant 31 : i32
    %87 = tpu.dynamic_rotate %86 by %c31_i32_28 dim 0 : vector<32x128xf32>, i32 -> vector<32x128xf32>
    %cst_29 = arith.constant 0.000000e+00 : f32
    %88 = vector.shape_cast %29 : vector<32x1xi1> to vector<32x1xi1>
    %89 = vector.broadcast %88 : vector<32x1xi1> to vector<32x128xi1>
    %90 = vector.broadcast %cst_29 : f32 to vector<32x128xf32>
    %91 = arith.select %89, %87, %90 : vector<32x128xi1>, vector<32x128xf32>
    %92 = arith.addf %85, %91 : vector<32x128xf32>
    %93 = vector.extract_strided_slice %40 {offsets = [0, 1152], sizes = [32, 128], strides = [1, 1]} : vector<32x1280xf32> to vector<32x128xf32>
    %c30_i32 = arith.constant 30 : i32
    %94 = tpu.dynamic_rotate %93 by %c30_i32 dim 0 : vector<32x128xf32>, i32 -> vector<32x128xf32>
    %cst_30 = arith.constant 0.000000e+00 : f32
    %95 = vector.shape_cast %38 : vector<32x1xi1> to vector<32x1xi1>
    %96 = vector.broadcast %95 : vector<32x1xi1> to vector<32x128xi1>
    %97 = vector.broadcast %cst_30 : f32 to vector<32x128xf32>
    %98 = arith.select %96, %94, %97 : vector<32x128xi1>, vector<32x128xf32>
    %99 = arith.addf %92, %98 : vector<32x128xf32>
    %100 = tpu.concatenate %65, %99 in 1 : vector<32x128xf32>, vector<32x128xf32> -> vector<32x256xf32>
    %101 = arith.truncf %100 : vector<32x256xf32> to vector<32x256xbf16>
    %c0_31 = arith.constant 0 : index
    %c0_32 = arith.constant 0 : index
    %102 = vector.load %arg7[%c0_31, %c0_32] : memref<256x128xbf16, #tpu.memory_space<vmem>>, vector<256x128xbf16>
    %cst_33 = arith.constant dense<0.000000e+00> : vector<32x128xf32>
    %103 = tpu.matmul %101, %102, %cst_33 {dimension_numbers = #tpu.dot_dimension_numbers<[1], [0], [0], [1], [0, 0, 1, 1], [], []>} : vector<32x256xbf16>, vector<256x128xbf16>, vector<32x128xf32> -> vector<32x128xf32>
    %104 = arith.addf %45, %103 : vector<32x128xf32>
    %c0_34 = arith.constant 0 : index
    %c0_35 = arith.constant 0 : index
    %105 = vector.load %arg8[%c0_34, %c0_35] : memref<1x128xf32, #tpu.memory_space<vmem>>, vector<1x128xf32>
    %106 = vector.broadcast %105 : vector<1x128xf32> to vector<32x128xf32>
    %107 = arith.addf %104, %106 : vector<32x128xf32>
    %c0_36 = arith.constant 0 : index
    %c0_37 = arith.constant 0 : index
    %108 = vector.load %arg1[%c0_36, %c0_37] : memref<32x1024xbf16, #tpu.memory_space<vmem>>, vector<32x1024xbf16>
    %c0_38 = arith.constant 0 : index
    %c0_39 = arith.constant 0 : index
    %109 = vector.load %arg9[%c0_38, %c0_39] : memref<1024x128xbf16, #tpu.memory_space<vmem>>, vector<1024x128xbf16>
    %cst_40 = arith.constant dense<0.000000e+00> : vector<32x128xf32>
    %110 = tpu.matmul %108, %109, %cst_40 {dimension_numbers = #tpu.dot_dimension_numbers<[1], [0], [0], [1], [0, 0, 1, 1], [], []>} : vector<32x1024xbf16>, vector<1024x128xbf16>, vector<32x128xf32> -> vector<32x128xf32>
    %c0_41 = arith.constant 0 : index
    %c0_42 = arith.constant 0 : index
    %111 = vector.load %arg10[%c0_41, %c0_42] : memref<1x128xf32, #tpu.memory_space<vmem>>, vector<1x128xf32>
    %112 = vector.broadcast %111 : vector<1x128xf32> to vector<32x128xf32>
    %113 = arith.addf %110, %112 : vector<32x128xf32>
    %114 = arith.truncf %44 : vector<32x128xf32> to vector<32x128xbf16>
    %115 = vector.shape_cast %114 : vector<32x128xbf16> to vector<2x16x128xbf16>
    %116 = arith.truncf %107 : vector<32x128xf32> to vector<32x128xbf16>
    %117 = vector.shape_cast %116 : vector<32x128xbf16> to vector<2x16x128xbf16>
    %118 = vector.shape_cast %113 : vector<32x128xf32> to vector<2x16x128xf32>
    "tpu.trace_start"() <{level = 10 : i32, message = "bqd,bkd->bqk"}> : () -> ()
    %cst_43 = arith.constant dense<0.000000e+00> : vector<2x16x16xf32>
    %119 = tpu.matmul %115, %117, %cst_43 {dimension_numbers = #tpu.dot_dimension_numbers<[2], [2], [1], [1], [0, 0, 0, 1, 1, 1], [0], [0]>} : vector<2x16x128xbf16>, vector<2x16x128xbf16>, vector<2x16x16xf32> -> vector<2x16x16xf32>
    "tpu.trace_stop"() : () -> ()
    %cst_44 = arith.constant 0.102062076 : f32
    %120 = vector.broadcast %cst_44 : f32 to vector<2x16x16xf32>
    %121 = arith.mulf %119, %120 : vector<2x16x16xf32>
    %122 = tpu.iota {dimensions = array<i32: 2>} : vector<2x16x16xi32>
    %c0_45 = arith.constant 0 : index
    %c0_46 = arith.constant 0 : index
    %123 = vector.load %arg2[%c0_45, %c0_46] : memref<2x1xi32, #tpu.memory_space<vmem>>, vector<2x1xi32>
    %124 = vector.shape_cast %123 : vector<2x1xi32> to vector<2x1x1xi32>
    %125 = vector.broadcast %124 : vector<2x1x1xi32> to vector<2x16x16xi32>
    %126 = arith.cmpi slt, %122, %125 : vector<2x16x16xi32>
    %cst_47 = arith.constant -1.000000e+06 : f32
    %127 = vector.broadcast %cst_47 : f32 to vector<2x16x16xf32>
    %128 = arith.select %126, %121, %127 : vector<2x16x16xi1>, vector<2x16x16xf32>
    %cst_48 = arith.constant dense<0xFF800000> : vector<2x16xf32>
    %129 = vector.multi_reduction <maximumf>, %128, %cst_48 [2] : vector<2x16x16xf32> to vector<2x16xf32>
    %130 = vector.shape_cast %129 : vector<2x16xf32> to vector<2x16x1xf32>
    %131 = vector.broadcast %130 : vector<2x16x1xf32> to vector<2x16x16xf32>
    %132 = arith.subf %128, %131 : vector<2x16x16xf32>
    %133 = math.exp %132 : vector<2x16x16xf32>
    %cst_49 = arith.constant dense<0.000000e+00> : vector<2x16xf32>
    %134 = vector.multi_reduction <add>, %133, %cst_49 [2] : vector<2x16x16xf32> to vector<2x16xf32>
    %135 = vector.shape_cast %134 : vector<2x16xf32> to vector<2x16x1xf32>
    %136 = tpu.reciprocal %135 {approx = true} : vector<2x16x1xf32> -> vector<2x16x1xf32>
    %137 = vector.broadcast %136 : vector<2x16x1xf32> to vector<2x16x16xf32>
    %138 = arith.mulf %133, %137 : vector<2x16x16xf32>
    %139 = arith.truncf %138 : vector<2x16x16xf32> to vector<2x16x16xbf16>
    %140 = arith.truncf %118 : vector<2x16x128xf32> to vector<2x16x128xbf16>
    "tpu.trace_start"() <{level = 10 : i32, message = "bqk,bkd->bqd"}> : () -> ()
    %cst_50 = arith.constant dense<0.000000e+00> : vector<2x16x128xf32>
    %141 = tpu.matmul %139, %140, %cst_50 {dimension_numbers = #tpu.dot_dimension_numbers<[2], [1], [1], [2], [0, 0, 0, 1, 1, 2], [0], [0]>} : vector<2x16x16xbf16>, vector<2x16x128xbf16>, vector<2x16x128xf32> -> vector<2x16x128xf32>
    "tpu.trace_stop"() : () -> ()
    %142 = arith.addf %141, %118 : vector<2x16x128xf32>
    %143 = vector.shape_cast %142 : vector<2x16x128xf32> to vector<32x128xf32>
    %144 = arith.truncf %143 : vector<32x128xf32> to vector<32x128xbf16>
    %c0_51 = arith.constant 0 : index
    %c0_52 = arith.constant 0 : index
    %145 = vector.load %arg11[%c0_51, %c0_52] : memref<32x128xbf16, #tpu.memory_space<vmem>>, vector<32x128xbf16>
    tpu.vector_store %arg11[%c0_51, %c0_52], %144 {strides = array<i32>} : memref<32x128xbf16, #tpu.memory_space<vmem>>, vector<32x128xbf16>,
    return
  }
}

module attributes {stable_mosaic.version = 11 : i64} {
  func.func @trunk_kernel(%arg0: memref<32x1024xbf16, #tpu.memory_space<vmem>>, %arg1: memref<32x1024xbf16, #tpu.memory_space<vmem>>, %arg2: memref<32x128xbf16, #tpu.memory_space<vmem>>, %arg3: memref<1024x1536xbf16, #tpu.memory_space<vmem>>, %arg4: memref<1024x1536xbf16, #tpu.memory_space<vmem>>, %arg5: memref<128x1536xbf16, #tpu.memory_space<vmem>>, %arg6: memref<1x512xf32, #tpu.memory_space<vmem>>, %arg7: memref<512x768xbf16, #tpu.memory_space<vmem>>, %arg8: memref<1x256xf32, #tpu.memory_space<vmem>>, %arg9: memref<256x384xbf16, #tpu.memory_space<vmem>>, %arg10: memref<1x128xf32, #tpu.memory_space<vmem>>, %arg11: memref<128x128xbf16, #tpu.memory_space<vmem>>, %arg12: memref<1x128xf32, #tpu.memory_space<vmem>>, %arg13: memref<32x128xf32, #tpu.memory_space<vmem>>) attributes {dimension_semantics = [], scalar_prefetch = 0 : i64, scratch_operands = 0 : i64, tpu.core_type = #tpu.core_type<tc>} {
    %0 = tpu.iota {dimensions = array<i32: 1>} : vector<2x16x1xi32>
    %1 = vector.shape_cast %0 : vector<2x16x1xi32> to vector<32x1xi32>
    %c-1_i32 = arith.constant -1 : i32
    %2 = vector.broadcast %c-1_i32 : i32 to vector<32x1xi32>
    %3 = arith.addi %1, %2 : vector<32x1xi32>
    %c0_i32 = arith.constant 0 : i32
    %4 = vector.broadcast %c0_i32 : i32 to vector<32x1xi32>
    %5 = arith.cmpi sge, %3, %4 : vector<32x1xi32>
    %c-1_i32_0 = arith.constant -1 : i32
    %6 = vector.broadcast %c-1_i32_0 : i32 to vector<32x1xi32>
    %7 = arith.addi %1, %6 : vector<32x1xi32>
    %c16_i32 = arith.constant 16 : i32
    %8 = vector.broadcast %c16_i32 : i32 to vector<32x1xi32>
    %9 = arith.cmpi slt, %7, %8 : vector<32x1xi32>
    %10 = arith.andi %5, %9 : vector<32x1xi1>
    %c1_i32 = arith.constant 1 : i32
    %11 = vector.broadcast %c1_i32 : i32 to vector<32x1xi32>
    %12 = arith.addi %1, %11 : vector<32x1xi32>
    %c0_i32_1 = arith.constant 0 : i32
    %13 = vector.broadcast %c0_i32_1 : i32 to vector<32x1xi32>
    %14 = arith.cmpi sge, %12, %13 : vector<32x1xi32>
    %c1_i32_2 = arith.constant 1 : i32
    %15 = vector.broadcast %c1_i32_2 : i32 to vector<32x1xi32>
    %16 = arith.addi %1, %15 : vector<32x1xi32>
    %c16_i32_3 = arith.constant 16 : i32
    %17 = vector.broadcast %c16_i32_3 : i32 to vector<32x1xi32>
    %18 = arith.cmpi slt, %16, %17 : vector<32x1xi32>
    %19 = arith.andi %14, %18 : vector<32x1xi1>
    %c0 = arith.constant 0 : index
    %c0_4 = arith.constant 0 : index
    %20 = vector.load %arg0[%c0, %c0_4] : memref<32x1024xbf16, #tpu.memory_space<vmem>>, vector<32x1024xbf16>
    %c0_5 = arith.constant 0 : index
    %c0_6 = arith.constant 0 : index
    %21 = vector.load %arg3[%c0_5, %c0_6] : memref<1024x1536xbf16, #tpu.memory_space<vmem>>, vector<1024x1536xbf16>
    %cst = arith.constant dense<0.000000e+00> : vector<32x1536xf32>
    %22 = tpu.matmul %20, %21, %cst {dimension_numbers = #tpu.dot_dimension_numbers<[1], [0], [0], [1], [0, 0, 1, 1], [], []>} : vector<32x1024xbf16>, vector<1024x1536xbf16>, vector<32x1536xf32> -> vector<32x1536xf32>
    %c0_7 = arith.constant 0 : index
    %c0_8 = arith.constant 0 : index
    %23 = vector.load %arg1[%c0_7, %c0_8] : memref<32x1024xbf16, #tpu.memory_space<vmem>>, vector<32x1024xbf16>
    %c0_9 = arith.constant 0 : index
    %c0_10 = arith.constant 0 : index
    %24 = vector.load %arg4[%c0_9, %c0_10] : memref<1024x1536xbf16, #tpu.memory_space<vmem>>, vector<1024x1536xbf16>
    %cst_11 = arith.constant dense<0.000000e+00> : vector<32x1536xf32>
    %25 = tpu.matmul %23, %24, %cst_11 {dimension_numbers = #tpu.dot_dimension_numbers<[1], [0], [0], [1], [0, 0, 1, 1], [], []>} : vector<32x1024xbf16>, vector<1024x1536xbf16>, vector<32x1536xf32> -> vector<32x1536xf32>
    %26 = arith.addf %22, %25 : vector<32x1536xf32>
    %c0_12 = arith.constant 0 : index
    %c0_13 = arith.constant 0 : index
    %27 = vector.load %arg2[%c0_12, %c0_13] : memref<32x128xbf16, #tpu.memory_space<vmem>>, vector<32x128xbf16>
    %c0_14 = arith.constant 0 : index
    %c0_15 = arith.constant 0 : index
    %28 = vector.load %arg5[%c0_14, %c0_15] : memref<128x1536xbf16, #tpu.memory_space<vmem>>, vector<128x1536xbf16>
    %cst_16 = arith.constant dense<0.000000e+00> : vector<32x1536xf32>
    %29 = tpu.matmul %27, %28, %cst_16 {dimension_numbers = #tpu.dot_dimension_numbers<[1], [0], [0], [1], [0, 0, 1, 1], [], []>} : vector<32x128xbf16>, vector<128x1536xbf16>, vector<32x1536xf32> -> vector<32x1536xf32>
    %30 = arith.addf %26, %29 : vector<32x1536xf32>
    %c0_17 = arith.constant 0 : index
    %c0_18 = arith.constant 0 : index
    %31 = vector.load %arg6[%c0_17, %c0_18] : memref<1x512xf32, #tpu.memory_space<vmem>>, vector<1x512xf32>
    %cst_19 = arith.constant 0.000000e+00 : f32
    %32 = vector.broadcast %cst_19 : f32 to vector<32x512xf32>
    %33 = vector.broadcast %31 : vector<1x512xf32> to vector<32x512xf32>
    %34 = arith.addf %32, %33 : vector<32x512xf32>
    %35 = vector.extract_strided_slice %30 {offsets = [0, 0], sizes = [32, 512], strides = [1, 1]} : vector<32x1536xf32> to vector<32x512xf32>
    %c1_i32_20 = arith.constant 1 : i32
    %36 = tpu.dynamic_rotate %35 by %c1_i32_20 dim 0 : vector<32x512xf32>, i32 -> vector<32x512xf32>
    %cst_21 = arith.constant 0.000000e+00 : f32
    %37 = vector.shape_cast %10 : vector<32x1xi1> to vector<32x1xi1>
    %38 = vector.broadcast %37 : vector<32x1xi1> to vector<32x512xi1>
    %39 = vector.broadcast %cst_21 : f32 to vector<32x512xf32>
    %40 = arith.select %38, %36, %39 : vector<32x512xi1>, vector<32x512xf32>
    %41 = arith.addf %34, %40 : vector<32x512xf32>
    %42 = vector.extract_strided_slice %30 {offsets = [0, 512], sizes = [32, 512], strides = [1, 1]} : vector<32x1536xf32> to vector<32x512xf32>
    %43 = arith.addf %41, %42 : vector<32x512xf32>
    %44 = vector.extract_strided_slice %30 {offsets = [0, 1024], sizes = [32, 512], strides = [1, 1]} : vector<32x1536xf32> to vector<32x512xf32>
    %c31_i32 = arith.constant 31 : i32
    %45 = tpu.dynamic_rotate %44 by %c31_i32 dim 0 : vector<32x512xf32>, i32 -> vector<32x512xf32>
    %cst_22 = arith.constant 0.000000e+00 : f32
    %46 = vector.shape_cast %19 : vector<32x1xi1> to vector<32x1xi1>
    %47 = vector.broadcast %46 : vector<32x1xi1> to vector<32x512xi1>
    %48 = vector.broadcast %cst_22 : f32 to vector<32x512xf32>
    %49 = arith.select %47, %45, %48 : vector<32x512xi1>, vector<32x512xf32>
    %50 = arith.addf %43, %49 : vector<32x512xf32>
    %cst_23 = arith.constant 0.000000e+00 : f32
    %51 = vector.broadcast %cst_23 : f32 to vector<32x512xf32>
    %52 = arith.maximumf %50, %51 : vector<32x512xf32>
    %53 = arith.truncf %52 : vector<32x512xf32> to vector<32x512xbf16>
    %c0_24 = arith.constant 0 : index
    %c0_25 = arith.constant 0 : index
    %54 = vector.load %arg7[%c0_24, %c0_25] : memref<512x768xbf16, #tpu.memory_space<vmem>>, vector<512x768xbf16>
    %cst_26 = arith.constant dense<0.000000e+00> : vector<32x768xf32>
    %55 = tpu.matmul %53, %54, %cst_26 {dimension_numbers = #tpu.dot_dimension_numbers<[1], [0], [0], [1], [0, 0, 1, 1], [], []>} : vector<32x512xbf16>, vector<512x768xbf16>, vector<32x768xf32> -> vector<32x768xf32>
    %c0_27 = arith.constant 0 : index
    %c0_28 = arith.constant 0 : index
    %56 = vector.load %arg8[%c0_27, %c0_28] : memref<1x256xf32, #tpu.memory_space<vmem>>, vector<1x256xf32>
    %cst_29 = arith.constant 0.000000e+00 : f32
    %57 = vector.broadcast %cst_29 : f32 to vector<32x256xf32>
    %58 = vector.broadcast %56 : vector<1x256xf32> to vector<32x256xf32>
    %59 = arith.addf %57, %58 : vector<32x256xf32>
    %60 = vector.extract_strided_slice %55 {offsets = [0, 0], sizes = [32, 256], strides = [1, 1]} : vector<32x768xf32> to vector<32x256xf32>
    %c1_i32_30 = arith.constant 1 : i32
    %61 = tpu.dynamic_rotate %60 by %c1_i32_30 dim 0 : vector<32x256xf32>, i32 -> vector<32x256xf32>
    %cst_31 = arith.constant 0.000000e+00 : f32
    %62 = vector.shape_cast %10 : vector<32x1xi1> to vector<32x1xi1>
    %63 = vector.broadcast %62 : vector<32x1xi1> to vector<32x256xi1>
    %64 = vector.broadcast %cst_31 : f32 to vector<32x256xf32>
    %65 = arith.select %63, %61, %64 : vector<32x256xi1>, vector<32x256xf32>
    %66 = arith.addf %59, %65 : vector<32x256xf32>
    %67 = vector.extract_strided_slice %55 {offsets = [0, 256], sizes = [32, 256], strides = [1, 1]} : vector<32x768xf32> to vector<32x256xf32>
    %68 = arith.addf %66, %67 : vector<32x256xf32>
    %69 = vector.extract_strided_slice %55 {offsets = [0, 512], sizes = [32, 256], strides = [1, 1]} : vector<32x768xf32> to vector<32x256xf32>
    %c31_i32_32 = arith.constant 31 : i32
    %70 = tpu.dynamic_rotate %69 by %c31_i32_32 dim 0 : vector<32x256xf32>, i32 -> vector<32x256xf32>
    %cst_33 = arith.constant 0.000000e+00 : f32
    %71 = vector.shape_cast %19 : vector<32x1xi1> to vector<32x1xi1>
    %72 = vector.broadcast %71 : vector<32x1xi1> to vector<32x256xi1>
    %73 = vector.broadcast %cst_33 : f32 to vector<32x256xf32>
    %74 = arith.select %72, %70, %73 : vector<32x256xi1>, vector<32x256xf32>
    %75 = arith.addf %68, %74 : vector<32x256xf32>
    %cst_34 = arith.constant 0.000000e+00 : f32
    %76 = vector.broadcast %cst_34 : f32 to vector<32x256xf32>
    %77 = arith.maximumf %75, %76 : vector<32x256xf32>
    %78 = arith.truncf %77 : vector<32x256xf32> to vector<32x256xbf16>
    %c0_35 = arith.constant 0 : index
    %c0_36 = arith.constant 0 : index
    %79 = vector.load %arg9[%c0_35, %c0_36] : memref<256x384xbf16, #tpu.memory_space<vmem>>, vector<256x384xbf16>
    %cst_37 = arith.constant dense<0.000000e+00> : vector<32x384xf32>
    %80 = tpu.matmul %78, %79, %cst_37 {dimension_numbers = #tpu.dot_dimension_numbers<[1], [0], [0], [1], [0, 0, 1, 1], [], []>} : vector<32x256xbf16>, vector<256x384xbf16>, vector<32x384xf32> -> vector<32x384xf32>
    %c0_38 = arith.constant 0 : index
    %c0_39 = arith.constant 0 : index
    %81 = vector.load %arg10[%c0_38, %c0_39] : memref<1x128xf32, #tpu.memory_space<vmem>>, vector<1x128xf32>
    %cst_40 = arith.constant 0.000000e+00 : f32
    %82 = vector.broadcast %cst_40 : f32 to vector<32x128xf32>
    %83 = vector.broadcast %81 : vector<1x128xf32> to vector<32x128xf32>
    %84 = arith.addf %82, %83 : vector<32x128xf32>
    %85 = vector.extract_strided_slice %80 {offsets = [0, 0], sizes = [32, 128], strides = [1, 1]} : vector<32x384xf32> to vector<32x128xf32>
    %c1_i32_41 = arith.constant 1 : i32
    %86 = tpu.dynamic_rotate %85 by %c1_i32_41 dim 0 : vector<32x128xf32>, i32 -> vector<32x128xf32>
    %cst_42 = arith.constant 0.000000e+00 : f32
    %87 = vector.shape_cast %10 : vector<32x1xi1> to vector<32x1xi1>
    %88 = vector.broadcast %87 : vector<32x1xi1> to vector<32x128xi1>
    %89 = vector.broadcast %cst_42 : f32 to vector<32x128xf32>
    %90 = arith.select %88, %86, %89 : vector<32x128xi1>, vector<32x128xf32>
    %91 = arith.addf %84, %90 : vector<32x128xf32>
    %92 = vector.extract_strided_slice %80 {offsets = [0, 128], sizes = [32, 128], strides = [1, 1]} : vector<32x384xf32> to vector<32x128xf32>
    %93 = arith.addf %91, %92 : vector<32x128xf32>
    %94 = vector.extract_strided_slice %80 {offsets = [0, 256], sizes = [32, 128], strides = [1, 1]} : vector<32x384xf32> to vector<32x128xf32>
    %c31_i32_43 = arith.constant 31 : i32
    %95 = tpu.dynamic_rotate %94 by %c31_i32_43 dim 0 : vector<32x128xf32>, i32 -> vector<32x128xf32>
    %cst_44 = arith.constant 0.000000e+00 : f32
    %96 = vector.shape_cast %19 : vector<32x1xi1> to vector<32x1xi1>
    %97 = vector.broadcast %96 : vector<32x1xi1> to vector<32x128xi1>
    %98 = vector.broadcast %cst_44 : f32 to vector<32x128xf32>
    %99 = arith.select %97, %95, %98 : vector<32x128xi1>, vector<32x128xf32>
    %100 = arith.addf %93, %99 : vector<32x128xf32>
    %cst_45 = arith.constant 0.000000e+00 : f32
    %101 = vector.broadcast %cst_45 : f32 to vector<32x128xf32>
    %102 = arith.maximumf %100, %101 : vector<32x128xf32>
    %103 = arith.truncf %102 : vector<32x128xf32> to vector<32x128xbf16>
    %c0_46 = arith.constant 0 : index
    %c0_47 = arith.constant 0 : index
    %104 = vector.load %arg11[%c0_46, %c0_47] : memref<128x128xbf16, #tpu.memory_space<vmem>>, vector<128x128xbf16>
    %cst_48 = arith.constant dense<0.000000e+00> : vector<32x128xf32>
    %105 = tpu.matmul %103, %104, %cst_48 {dimension_numbers = #tpu.dot_dimension_numbers<[1], [0], [0], [1], [0, 0, 1, 1], [], []>} : vector<32x128xbf16>, vector<128x128xbf16>, vector<32x128xf32> -> vector<32x128xf32>
    %c0_49 = arith.constant 0 : index
    %c0_50 = arith.constant 0 : index
    %106 = vector.load %arg12[%c0_49, %c0_50] : memref<1x128xf32, #tpu.memory_space<vmem>>, vector<1x128xf32>
    %107 = vector.broadcast %106 : vector<1x128xf32> to vector<32x128xf32>
    %108 = arith.addf %105, %107 : vector<32x128xf32>
    %c0_51 = arith.constant 0 : index
    %c0_52 = arith.constant 0 : index
    %109 = vector.load %arg13[%c0_51, %c0_52] : memref<32x128xf32, #tpu.memory_space<vmem>>, vector<32x128xf32>
    tpu.vector_store %arg13[%c0_51, %c0_52], %108 {strides = array<i32>} : memref<32x128xf32, #tpu.memory_space<vmem>>, vector<32x128xf32>,
    return
  }
}

</mosaic_0001>

<bundles_post_ra>
// kernel: dct_forward.2
= control target key start
LH: loop header
LB: loop body
LE: loop exit
PB: predicated region body
PF: predicated region fallthrough
CT: control target
= control target key end

     0   :  { %16 = vsyncpa [#allocation3], 0  ;;  %s3116_s0 = inlined_call_operand.vmem [shape: bf16[32,30], index: 0, kind: input, shape index: {}]   ;;  %s3117_s1 = inlined_call_operand.vmem [shape: bf16[32,1024], index: 1, kind: input, shape index: {}]   ;;  %s3118_s2 = inlined_call_operand.vmem [shape: s32[2,1], index: 2, kind: input, shape index: {}]   ;;  %s3119_s3 = inlined_call_operand.hbm [shape: bf16[30,1280], index: 3, kind: input, shape index: {}]   ;;  %s3120_s4 = inlined_call_operand.hbm [shape: f32[1,128], index: 4, kind: input, shape index: {}]   ;;  %s3121_s5 = inlined_call_operand.hbm [shape: f32[1,128], index: 5, kind: input, shape index: {}]   ;;  %s3122_s6 = inlined_call_operand.hbm [shape: f32[1,128], index: 6, kind: input, shape index: {}]   ;;  %s3123_s7 = inlined_call_operand.hbm [shape: bf16[256,128], index: 7, kind: input, shape index: {}]   ;;  %s3124_s8 = inlined_call_operand.hbm [shape: f32[1,128], index: 8, kind: input, shape index: {}]   ;;  %s3125_s9 = inlined_call_operand.hbm [shape: bf16[1024,128], index: 9, kind: input, shape index: {}]   ;;  %s3126_s10 = inlined_call_operand.hbm [shape: f32[1,128], index: 10, kind: input, shape index: {}]   ;;  %s3127_s11 = inlined_call_operand.vmem [shape: bf16[32,128], index: 11, kind: output, shape index: {}]  }
   0x1   :  { %17 = vsyncpa [#allocation5], 0 }
   0x2   :  { %18 = vsyncpa [#allocation8], 0 }
   0x3   :  { %19 = vsyncpa [#allocation11], 0 }
   0x4   :  { %20 = vsyncpa [#allocation14], 0  ;;  %s2706_s17 = smov [#allocation4]   ;;  %s2707_s19 = smov [#allocation7]  }
   0x5   :  { %s45_s18 = sshll.u32 %s2706_s17, 4  ;;  %s65_s20 = sshll.u32 %s2707_s19, 4  ;;  %s46_s18 = int_to_ptr.vmem [resolvable:$true] %s45_s18  ;;  %s66_s20 = int_to_ptr.vmem [resolvable:$true] %s65_s20 }
   0x6   :  { %s2544_s21 = scalar_lea.vmem %s46_s18, 16  ;;  %s2548_s22 = scalar_lea.vmem %s46_s18, 32 }
   0x7   :  { %p2545_p0 = scmp.ne.s32.totalorder %s46_s18, %s2544_s21  ;;  %p2549_p1 = scmp.lt.s32.totalorder %s46_s18, %s46_s18 }
   0x8   :  { %p2550_p2 = scmp.lt.s32.totalorder %s2548_s22, %s2544_s21 }
   0xa   :  { %p2551_p3 = por %p2550_p2, %p2549_p1 }
   0xc   :  { %p2552_p4 = pnand %p2551_p3, %p2545_p0 }
   0xe   :  { %2555 = shalt.err (!%p2552_p4)
}
   0xf   :  { %48 = dma.hbm_to_vmem [thread:$0]  %s3120_s4, 16, %s46_s18, [#allocation5]  }
  0x10   :  { %s2564_s25 = scalar_lea.vmem %s66_s20, 16  ;;  %s2568_s26 = scalar_lea.vmem %s66_s20, 32 }
  0x11   :  { %p2565_p5 = scmp.ne.s32.totalorder %s66_s20, %s2564_s25  ;;  %p2569_p6 = scmp.lt.s32.totalorder %s66_s20, %s66_s20 }
  0x12   :  { %p2570_p7 = scmp.lt.s32.totalorder %s2568_s26, %s2564_s25 }
  0x14   :  { %p2571_p8 = por %p2570_p7, %p2569_p6 }
  0x16   :  { %p2572_p9 = pnand %p2571_p8, %p2565_p5 }
  0x18   :  { %2575 = shalt.err (!%p2572_p9)
}
  0x19   :  { %68 = dma.hbm_to_vmem [thread:$0]  %s3122_s6, 16, %s66_s20, [#allocation8]  }
  0x1a   :  { %s2708_s29 = smov [#allocation10]   ;;  %s2709_s12 = smov [#allocation2]  }
  0x1b   :  { %s87_s30 = sshll.u32 %s2708_s29, 4  ;;  %s32_s13 = sshll.u32 %s2709_s12, 4  ;;  %s88_s30 = int_to_ptr.vmem [resolvable:$true] %s87_s30  ;;  %s33_s13 = int_to_ptr.vmem [resolvable:$true] %s32_s13 }
  0x1c   :  { %s2584_s14 = scalar_lea.vmem %s88_s30, 16  ;;  %s2588_s4 = scalar_lea.vmem %s88_s30, 32 }
  0x1d   :  { %p2585_p10 = scmp.ne.s32.totalorder %s88_s30, %s2584_s14  ;;  %p2589_p11 = scmp.lt.s32.totalorder %s88_s30, %s88_s30 }
  0x1e   :  { %p2590_p12 = scmp.lt.s32.totalorder %s2588_s4, %s2584_s14 }
  0x20   :  { %p2591_p13 = por %p2590_p12, %p2589_p11 }
  0x22   :  { %p2592_p0 = pnand %p2591_p13, %p2585_p10 }
  0x24   :  { %2595 = shalt.err (!%p2592_p0)
}
  0x25   :  { %90 = dma.hbm_to_vmem [thread:$0]  %s3124_s8, 16, %s88_s30, [#allocation11]  }
  0x26   :  { %s2604_s17 = scalar_lea.vmem %s33_s13, 2560  ;;  %p2609_p2 = scmp.lt.s32.totalorder %s33_s13, %s33_s13 }
  0x27   :  { %p2605_p1 = scmp.ne.s32.totalorder %s33_s13, %s2604_s17  ;;  %p2610_p3 = scmp.lt.s32.totalorder %s2604_s17, %s2604_s17 }
  0x29   :  { %p2611_p4 = por %p2610_p3, %p2609_p2 }
  0x2b   :  { %p2612_p5 = pnand %p2611_p4, %p2605_p1 }
  0x2d   :  { %2615 = shalt.err (!%p2612_p5)
}
  0x2e   :  { %s2710_s6 = smov 640   ;;  %s2711_s18 = smov 40  }
  0x2f   :  { %38 = dma.hbm_to_vmem [thread:$0]  %s3119_s3, 2560, %s33_s13, [#allocation3], %s2710_s6, %s2710_s6, %s2711_s18  }
  0x30   :  { %s2712_s21 = smov [#allocation6]   ;;  %s2713_s23 = smov [#allocation9]  }
  0x31   :  { %s55_s22 = sshll.u32 %s2712_s21, 4  ;;  %s74_s24 = sshll.u32 %s2713_s23, 4  ;;  %s56_s22 = int_to_ptr.vmem [resolvable:$true] %s55_s22  ;;  %s75_s24 = int_to_ptr.vmem [resolvable:$true] %s74_s24 }
  0x32   :  { %s2624_s8 = scalar_lea.vmem %s56_s22, 16  ;;  %s2628_s25 = scalar_lea.vmem %s56_s22, 32 }
  0x33   :  { %p2625_p6 = scmp.ne.s32.totalorder %s56_s22, %s2624_s8  ;;  %p2629_p7 = scmp.lt.s32.totalorder %s56_s22, %s56_s22 }
  0x34   :  { %p2630_p8 = scmp.lt.s32.totalorder %s2628_s25, %s2624_s8 }
  0x36   :  { %p2631_p9 = por %p2630_p8, %p2629_p7 }
  0x38   :  { %p2632_p10 = pnand %p2631_p9, %p2625_p6 }
  0x3a   :  { %2635 = shalt.err (!%p2632_p10)
}
  0x3b   :  { %58 = dma.hbm_to_vmem [thread:$0]  %s3121_s5, 16, %s56_s22, [#allocation5]  }
  0x3c   :  { %s2644_s28 = scalar_lea.vmem %s75_s24, 2048  ;;  %p2649_p12 = scmp.lt.s32.totalorder %s75_s24, %s75_s24 }
  0x3d   :  { %p2645_p11 = scmp.ne.s32.totalorder %s75_s24, %s2644_s28  ;;  %p2650_p13 = scmp.lt.s32.totalorder %s2644_s28, %s2644_s28 }
  0x3f   :  { %p2651_p0 = por %p2650_p13, %p2649_p12 }
  0x41   :  { %p2652_p1 = pnand %p2651_p0, %p2645_p11 }
  0x43   :  { %2655 = shalt.err (!%p2652_p1)
}
  0x44   :  { %s2714_s3 = smov 64   ;;  %s2715_s29 = smov 4  }
  0x45   :  { %80 = dma.hbm_to_vmem [thread:$0]  %s3123_s7, 2048, %s75_s24, [#allocation8], %s2714_s3, %s2714_s3, %s2715_s29  }
  0x46   :  { %s2716_s13 = smov [#allocation12]   ;;  %s2717_s4 = smov [#allocation13]  }
  0x47   :  { %s96_s14 = sshll.u32 %s2716_s13, 4  ;;  %s109_s15 = sshll.u32 %s2717_s4, 4  ;;  %s97_s14 = int_to_ptr.vmem [resolvable:$true] %s96_s14  ;;  %s110_s15 = int_to_ptr.vmem [resolvable:$true] %s109_s15 }
  0x48   :  { %s2664_s5 = scalar_lea.vmem %s97_s14, 8192  ;;  %p2669_p3 = scmp.lt.s32.totalorder %s97_s14, %s97_s14 }
  0x49   :  { %p2665_p2 = scmp.ne.s32.totalorder %s97_s14, %s2664_s5  ;;  %p2670_p4 = scmp.lt.s32.totalorder %s2664_s5, %s2664_s5 }
  0x4b   :  { %p2671_p5 = por %p2670_p4, %p2669_p3 }
  0x4d   :  { %p2672_p6 = pnand %p2671_p5, %p2665_p2 }
  0x4f   :  { %2675 = shalt.err (!%p2672_p6)
}
  0x50   :  { %102 = dma.hbm_to_vmem [thread:$0]  %s3125_s9, 8192, %s97_s14, [#allocation11], %s2714_s3, %s2714_s3, %s2715_s29  }
  0x51   :  { %s2684_s6 = scalar_lea.vmem %s110_s15, 16  ;;  %s2688_s7 = scalar_lea.vmem %s110_s15, 32 }
  0x52   :  { %p2685_p7 = scmp.ne.s32.totalorder %s110_s15, %s2684_s6  ;;  %p2689_p8 = scmp.lt.s32.totalorder %s110_s15, %s110_s15 }
  0x53   :  { %p2690_p9 = scmp.lt.s32.totalorder %s2688_s7, %s2684_s6 }
  0x55   :  { %p2691_p10 = por %p2690_p9, %p2689_p8 }
  0x57   :  { %p2692_p11 = pnand %p2691_p10, %p2685_p7 }
  0x59   :  { %2695 = shalt.err (!%p2692_p11)
}
  0x5a   :  { %112 = dma.hbm_to_vmem [thread:$0]  %s3126_s10, 16, %s110_s15, [#allocation14]  }
  0x5b   :  { %2696 = dma.done.wait [#allocation3], 2560  }
  0x5c   :  { %2697 = vsyncadd [#allocation3], 4294964736 }
  0x5d   :  { %2698 = dma.done.wait [#allocation5], 32  }
  0x5e   :  { %2699 = vsyncadd [#allocation5], 4294967264 }
  0x5f   :  { %2700 = dma.done.wait [#allocation8], 2064  }
  0x60   :  { %2701 = vsyncadd [#allocation8], 4294965232 }
  0x61   :  { %2702 = dma.done.wait [#allocation11], 8208  }
  0x62   :  { %2703 = vsyncadd [#allocation11], 4294959088 }
  0x63   :  { %2704 = dma.done.wait [#allocation14], 16  }
  0x64   :  { %2705 = vsyncadd [#allocation14], 4294967280  ;;  %v2718_v0 = vmov 0   ;;  %vm304_vm0 = vcmask 1046528   ;;  %v2414_v5 = vld [vmem:[#allocation2 + $0x4] ss:$40 sps:$4 sm:$0xff]  }
  0x65   :  { %367 = vmatprep.mubr.bf16.mxu0 %v2718_v0  ;;  %420 = vmatprep.mubr.bf16.mxu1 %v2718_v0  ;;  %v2408_v1 = vld [vmem:[#allocation2 + $0x54] ss:$40 sps:$4 sm:$0x7f]   ;;  %v2412_v3 = vld [vmem:[#allocation2 + $0x50] ss:$40 sps:$4 sm:$0x7f]  }
  0x66   :  { %2407 = vset.pattern.permute.xlu0 %v2718_v0  ;;  %v2410_v2 = vld [vmem:[#allocation2 + $0x5c] ss:$40 sps:$4 sm:$0x7f]   ;;  %2081 = vmatprep.subr.msk.bf16.mxu0 %vm304_vm0, %v2408_v1  ;;  %v2413_v4 = vld [vmem:[#allocation2 + $0x58] ss:$40 sps:$4 sm:$0x7f]  }
  0x67   :  { %2084 = vmatprep.subr.msk.bf16.mxu1 %vm304_vm0, %v2410_v2  ;;  %v306_v6 = vsel %vm304_vm0, %v2412_v3, 0  ;;  %v312_v7 = vsel %vm304_vm0, %v2413_v4, 0  ;;  %v2416_v8 = vld [vmem:[#allocation2 + $0xc] ss:$40 sps:$4 sm:$0xff]   ;;  %v2418_v9 = vld [vmem:[#allocation2] ss:$40 sps:$4 sm:$0xff]  }
  0x68   :  { %348 = vmatpush1.bf16.msra.mxu0 %v306_v6  ;;  %401 = vmatpush1.bf16.msra.mxu1 %v312_v7  ;;  %v2419_v10 = vld [vmem:[#allocation2 + $0x8] ss:$40 sps:$4 sm:$0xff]   ;;  %v2420_v11 = vld [vmem:[%s3116_s0] sm:$0xff]   ;;  %vm297_vm1 = vcmask 244736   ;;  %v2430_v16 = vld [vmem:[#allocation2 + $0x14] ss:$40 sps:$4 sm:$0xff]  }
  0x69   :  { %349 = vmatprep.subr.bf16.mxu0 %v2414_v5  ;;  %402 = vmatprep.subr.bf16.mxu1 %v2416_v8  ;;  %v2422_v12 = vld [vmem:[#allocation2 + $0x64] ss:$40 sps:$4 sm:$0x7f]   ;;  %v2426_v14 = vld [vmem:[#allocation2 + $0x60] ss:$40 sps:$4 sm:$0x7f]  }
  0x6a   :  { %v2424_v13 = vld [vmem:[#allocation2 + $0x6c] ss:$40 sps:$4 sm:$0x7f]   ;;  %v2427_v15 = vld [vmem:[#allocation2 + $0x68] ss:$40 sps:$4 sm:$0x7f]  }
  0x6b   :  { %v318_v17 = vsel %vm304_vm0, %v2426_v14, 0  ;;  %v324_v18 = vsel %vm304_vm0, %v2427_v15, 0  ;;  %v2428_v19 = vld [vmem:[#allocation2 + $0x10] ss:$40 sps:$4 sm:$0xff]   ;;  %v2433_v20 = vld [vmem:[#allocation2 + $0x1c] ss:$40 sps:$4 sm:$0xff]  }
  0x6c   :  { %350 = vmatpush1.bf16.msra.mxu0 %v2418_v9  ;;  %403 = vmatpush1.bf16.msra.mxu1 %v2419_v10  ;;  %v2431_v21 = vld [vmem:[#allocation2 + $0x18] ss:$40 sps:$4 sm:$0xff]   ;;  %v2434_v23 = vld [vmem:[#allocation2 + $0x74] ss:$40 sps:$4 sm:$0x7f]   ;;  %v2421_v24 = vld [vmem:[%s3116_s0 + $0x8] sm:$0xff]  }
  0x6d   :  { %2087 = vmatprep.subr.msk.bf16.mxu0 %vm304_vm0, %v2422_v12  ;;  %2090 = vmatprep.subr.msk.bf16.mxu1 %vm304_vm0, %v2424_v13  ;;  %v2436_v22 = vld [vmem:[#allocation2 + $0x70] ss:$40 sps:$4 sm:$0x7f]   ;;  %v2439_v26 = vld [vmem:[#allocation2 + $0x24] ss:$40 sps:$4 sm:$0xff]   ;;  %vm2720_vm10 = vmmov 0  }
  0x6e   :  { %v330_v25 = vsel %vm304_vm0, %v2436_v22, 0  ;;  %v2437_v27 = vld [vmem:[#allocation2 + $0x20] ss:$40 sps:$4 sm:$0xff]   ;;  %v2442_v30 = vld [vmem:[#allocation9 + $0x70] sm:$0xff]   ;;  %v2444_v32 = vld [vmem:[#allocation9 + $0x68] sm:$0xff]   ;;  %vm1893_vm12 = vcmask 130048  }
  0x6f   :  { %2082 = vmatmul.mubr.msk.bf16.vlgmr.msra.gmra.mxu0 %vm297_vm1, %v2420_v11  ;;  %2085 = vmatmul.mubr.msk.bf16.vlgmr.msra.gmra.mxu1 %vm297_vm1, %v2420_v11  ;;  %v2440_v28 = vld [vmem:[#allocation9 + $0x78] sm:$0xff]   ;;  %v2443_v31 = vld [vmem:[#allocation9 + $0x30] sm:$0xff]   ;;  %v2445_v33 = vld [vmem:[#allocation9 + $0x28] sm:$0xff]  }
  0x70   :  { %377 = vmatprep.mubr.bf16.mxu0 %v2718_v0  ;;  %430 = vmatprep.mubr.bf16.mxu1 %v2718_v0  ;;  %v2441_v29 = vld [vmem:[#allocation9 + $0x38] sm:$0xff]   ;;  %v2446_v34 = vld [vmem:[#allocation9 + $0x60] sm:$0xff]   ;;  %v2450_v38 = vld [vmem:[#allocation9 + $0x50] sm:$0xff]  }
  0x71   :  { %454 = vmatpush1.bf16.msra.mxu0 %v318_v17  ;;  %507 = vmatpush1.bf16.msra.mxu1 %v324_v18  ;;  %v2447_v35 = vld [vmem:[#allocation9 + $0x20] sm:$0xff]   ;;  %v2448_v36 = vld [vmem:[#allocation9 + $0x58] sm:$0xff]   ;;  %v2451_v39 = vld [vmem:[#allocation9 + $0x10] sm:$0xff]  }
  0x72   :  { %455 = vmatprep.subr.bf16.mxu0 %v2430_v16  ;;  %508 = vmatprep.subr.bf16.mxu1 %v2433_v20  ;;  %v2449_v37 = vld [vmem:[#allocation9 + $0x18] sm:$0xff]   ;;  %v2452_v40 = vld [vmem:[#allocation9 + $0x48] sm:$0xff]   ;;  %v2454_v42 = vld [vmem:[#allocation9 + $0x40] sm:$0xff]  }
  0x73   :  { %v2453_v41 = vld [vmem:[#allocation9 + $0x8] sm:$0xff]   ;;  %v2455_v43 = vld [vmem:[#allocation9] sm:$0xff]   ;;  %v2460_v47 = vld [vmem:[#allocation12 + $0x70] sm:$0xff]  }
  0x74   :  { %v2456_v44 = vld [vmem:[#allocation12 + $0x78] sm:$0xff]   ;;  %v2461_v48 = vld [vmem:[#allocation12 + $0x30] sm:$0xff]   ;;  %v2464_v49 = vld [vmem:[#allocation12 + $0x68] sm:$0xff]  }
  0x75   :  { %456 = vmatpush1.bf16.msra.mxu0 %v2428_v19  ;;  %509 = vmatpush1.bf16.msra.mxu1 %v2431_v21  ;;  %v2457_v45 = vld [vmem:[#allocation12 + $0x38] sm:$0xff]   ;;  %v2465_v50 = vld [vmem:[#allocation12 + $0x28] sm:$0xff]   ;;  %v2468_v51 = vld [vmem:[#allocation12 + $0x60] sm:$0xff]  }
  0x76   :  { %2093 = vmatprep.subr.msk.bf16.mxu0 %vm304_vm0, %v2434_v23  ;;  %2219 = vmatprep.subr.bf16.mxu1 %v2440_v28  ;;  %v2458_v46 = vld [vmem:[#allocation12 + $0xf8] sm:$0xff]   ;;  %v2469_v52 = vld [vmem:[#allocation12 + $0x20] sm:$0xff]   ;;  %v2476_v55 = vld [vmem:[#allocation12 + $0x50] sm:$0xff]  }
  0x77   :  { %2083 = vmatmul.mubr.msk.bf16.gmra.mxu0 %vm297_vm1, %v2421_v24  ;;  %2086 = vmatmul.mubr.msk.bf16.gmra.mxu1 %vm297_vm1, %v2421_v24  ;;  %v2472_v53 = vld [vmem:[#allocation12 + $0x58] sm:$0xff]   ;;  %v2477_v56 = vld [vmem:[#allocation12 + $0x10] sm:$0xff]   ;;  %v2480_v57 = vld [vmem:[#allocation12 + $0x48] sm:$0xff]  }
  0x78   :  { %473 = vmatprep.mubr.bf16.mxu0 %v2718_v0  ;;  %526 = vmatprep.mubr.bf16.mxu1 %v2718_v0  ;;  %v2473_v54 = vld [vmem:[#allocation12 + $0x18] sm:$0xff]   ;;  %v2481_v61 = vld [vmem:[#allocation12 + $0x8] sm:$0xff]   ;;  %v2484_v62 = vld [vmem:[#allocation12 + $0x40] sm:$0xff]  }
  0x79   :  { %v947_v58 = vld [vmem:[%s3117_s1] sm:$0xff]  ;;  %v2485_v63 = vld [vmem:[#allocation12] sm:$0xff]   ;;  %v2492_v3 = vld [vmem:[#allocation12 + $0x170] sm:$0xff]  }
  0x7a   :  { %v951_v59 = vld [vmem:[%s3117_s1 + $0x20] sm:$0xff]  ;;  %v2493_v4 = vld [vmem:[#allocation12 + $0x130] sm:$0xff]   ;;  %v2496_v5 = vld [vmem:[#allocation12 + $0x168] sm:$0xff]  }
  0x7b   :  { %v2118_v60 = vcombine.high %v947_v58, %v951_v59  ;;  %v2117_v1 = vcombine.low %v947_v58, %v951_v59  ;;  %v2489_v2 = vld [vmem:[#allocation12 + $0x138] sm:$0xff]   ;;  %v2497_v6 = vld [vmem:[#allocation12 + $0x128] sm:$0xff]   ;;  %v2500_v7 = vld [vmem:[#allocation12 + $0x160] sm:$0xff]  }
  0x7c   :  { %v955_v8 = vld [vmem:[%s3117_s1 + $0x40] sm:$0xff]  ;;  %v2501_v10 = vld [vmem:[#allocation12 + $0x120] sm:$0xff]   ;;  %v2508_v15 = vld [vmem:[#allocation12 + $0x150] sm:$0xff]  }
  0x7d   :  { %v959_v9 = vld [vmem:[%s3117_s1 + $0x60] sm:$0xff]  ;;  %v949_v16 = vld [vmem:[%s3117_s1 + $0x10] sm:$0xff]  ;;  %v2509_v18 = vld [vmem:[#allocation12 + $0x110] sm:$0xff]  }
  0x7e   :  { %v2504_v12 = vld [vmem:[#allocation12 + $0x158] sm:$0xff]   ;;  %v2125_v13 = vcombine.low %v955_v8, %v959_v9  ;;  %v953_v17 = vld [vmem:[%s3117_s1 + $0x30] sm:$0xff]  ;;  %v2516_v22 = vld [vmem:[#allocation12 + $0x140] sm:$0xff]  }
  0x7f   :  { %2088 = vmatmul.mubr.msk.bf16.vlgmr.msra.gmra.mxu0 %vm297_vm1, %v2420_v11  ;;  %2091 = vmatmul.mubr.msk.bf16.vlgmr.msra.gmra.mxu1 %vm297_vm1, %v2420_v11  ;;  %v2505_v14 = vld [vmem:[#allocation12 + $0x118] sm:$0xff]   ;;  %v2122_v19 = vcombine.high %v949_v16, %v953_v17  ;;  %v2512_v20 = vld [vmem:[#allocation12 + $0x148] sm:$0xff]   ;;  %v2517_v23 = vld [vmem:[#allocation12 + $0x100] sm:$0xff]  }
  0x80   :  { %483 = vmatprep.mubr.bf16.mxu0 %v2718_v0  ;;  %536 = vmatprep.mubr.bf16.mxu1 %v2718_v0  ;;  %v2513_v21 = vld [vmem:[#allocation12 + $0x108] sm:$0xff]  }
  0x81   :  { %560 = vmatpush1.bf16.msra.mxu0 %v330_v25  ;;  %2220 = vmatpush3.bf16.msra.mxu1 %v2441_v29 }
  0x82   :  { %561 = vmatprep.subr.bf16.mxu0 %v2439_v26  ;;  %2221 = vmatprep.subr.bf16.mxu1 %v2442_v30 }
  0x85   :  { %562 = vmatpush1.bf16.msra.mxu0 %v2437_v27  ;;  %2222 = vmatpush3.bf16.msra.mxu1 %v2443_v31  ;;  %v2096_v27 = vld [vmem:[#allocation4] ss:$0 sm:$0xff] }
  0x86   :  { %2223 = vmatprep.subr.bf16.mxu1 %v2444_v32  ;;  %2247 = vmatprep.subr.bf16.mxu0 %v2456_v44 }
  0x87   :  { %2089 = vmatmul.mubr.msk.bf16.gmra.mxu0 %vm297_vm1, %v2421_v24  ;;  %2092 = vmatmul.mubr.msk.bf16.gmra.mxu1 %vm297_vm1, %v2421_v24 }
  0x88   :  { %579 = vmatprep.mubr.bf16.mxu0 %v2718_v0 }
  0x89   :  { %2224 = vmatpush3.bf16.msra.mxu1 %v2445_v33 }
  0x8a   :  { %2225 = vmatprep.subr.bf16.mxu1 %v2446_v34 }
  0x8d   :  { %2226 = vmatpush3.bf16.msra.mxu1 %v2447_v35 }
  0x8e   :  { %2227 = vmatprep.subr.bf16.mxu1 %v2448_v36 }
  0x8f   :  { %2094 = vmatmul.mubr.msk.bf16.vlgmr.msra.gmra.mxu0 %vm297_vm1, %v2420_v11  ;;  %v2126_v11 = vcombine.high %v955_v8, %v959_v9 }
  0x90   :  { %589 = vmatprep.mubr.bf16.mxu0 %v2718_v0  ;;  %2248 = vmatpush3.bf16.msra.mxu0 %v2457_v45  ;;  %v2488_v0 = vld [vmem:[#allocation12 + $0x178] sm:$0xff]  }
  0x91   :  { %2228 = vmatpush3.bf16.msra.mxu1 %v2449_v37  ;;  %2249 = vmatprep.subr.bf16.mxu0 %v2460_v47  ;;  %v142_v47 = vlaneseq }
  0x92   :  { %2229 = vmatprep.subr.bf16.mxu1 %v2450_v38 }
  0x94   :  { %2250 = vmatpush3.bf16.msra.mxu0 %v2461_v48 }
  0x95   :  { %2230 = vmatpush3.bf16.msra.mxu1 %v2451_v39  ;;  %2251 = vmatprep.subr.bf16.mxu0 %v2464_v49 }
  0x96   :  { %2231 = vmatprep.subr.bf16.mxu1 %v2452_v40 }
  0x97   :  { %2095 = vmatmul.mubr.msk.bf16.gmra.mxu0 %vm297_vm1, %v2421_v24  ;;  %v2121_v24 = vcombine.low %v949_v16, %v953_v17 }
  0x98   :  { %2252 = vmatpush3.bf16.msra.mxu0 %v2465_v50  ;;  %1594 = vmatprep.mubr.bf16.mxu0 %v2118_v60 }
  0x99   :  { %2232 = vmatpush3.bf16.msra.mxu1 %v2453_v41  ;;  %2253 = vmatprep.subr.bf16.mxu0 %v2468_v51 }
  0x9a   :  { %2233 = vmatprep.subr.bf16.mxu1 %v2454_v42 }
  0x9c   :  { %2254 = vmatpush3.bf16.msra.mxu0 %v2469_v52 }
  0x9d   :  { %2234 = vmatpush3.bf16.msra.mxu1 %v2455_v43  ;;  %2255 = vmatprep.subr.bf16.mxu0 %v2472_v53  ;;  %v2900_v53 = vshrl.u32 %v142_v47, 7 }
  0x9e   :  { %2275 = vmatprep.subr.bf16.mxu1 %v2458_v46 }
  0x9f   :  { %vm623_vm2 = vcmp.lt.s32.totalorder %v2900_v53, 1  ;;  %v144_v60 = vadd.s32 8, %v2900_v53  ;;  %vm677_vm4 = vcmp.lt.s32.totalorder %v2900_v53, 2  ;;  %vm648_vm5 = vcmp.lt.s32.totalorder %v2900_v53, 7 }
  0xa0   :  { %2256 = vmatpush3.bf16.msra.mxu0 %v2473_v54  ;;  %vm734_vm8 = vcmp.lt.s32.totalorder %v2900_v53, 6 }
  0xa1   :  { %2257 = vmatprep.subr.bf16.mxu0 %v2476_v55 }
  0xa4   :  { %2258 = vmatpush3.bf16.msra.mxu0 %v2477_v56 }
  0xa5   :  { %2259 = vmatprep.subr.bf16.mxu0 %v2480_v57 }
  0xa8   :  { %2260 = vmatpush3.bf16.msra.mxu0 %v2481_v61 }
  0xa9   :  { %2261 = vmatprep.subr.bf16.mxu0 %v2484_v62 }
  0xac   :  { %2262 = vmatpush3.bf16.msra.mxu0 %v2485_v63  ;;  %v2916_v63 = vadd.s32 4294967295, %v2900_v53 }
  0xad   :  { %2303 = vmatprep.subr.bf16.mxu0 %v2488_v0  ;;  %v2918_v0 = vld [vmem:[#allocation6] ss:$0 sm:$0xff] }
  0xae   :  { %vm155_vm3 = vcmp.ge.s32.totalorder %v2916_v63, 0 }
  0xaf   :  { %1595 = vmatmul.mubr.bf16.vlgmr.msra.gmra.mxu0 %v2117_v1 }
  0xb0   :  { %2304 = vmatpush3.bf16.msra.mxu0 %v2489_v2  ;;  %1602 = vmatprep.mubr.bf16.mxu0 %v2126_v11 }
  0xb1   :  { %2305 = vmatprep.subr.bf16.mxu0 %v2492_v3 }
  0xb4   :  { %2306 = vmatpush3.bf16.msra.mxu0 %v2493_v4 }
  0xb5   :  { %2307 = vmatprep.subr.bf16.mxu0 %v2496_v5  ;;  %v2925_v5 = vadd.s32 1, %v144_v60 }
  0xb7   :  { %1603 = vmatmul.mubr.bf16.gmra.mxu0 %v2125_v13  ;;  %vm166_vm6 = vcmp.lt.s32.totalorder %v2925_v5, 16  ;;  %v952_v5 = vld [vmem:[%s3117_s1 + $0x28] sm:$0xff] }
  0xb8   :  { %2308 = vmatpush3.bf16.msra.mxu0 %v2497_v6  ;;  %1692 = vmatprep.mubr.bf16.mxu0 %v2122_v19  ;;  %v145_v6 = vadd.s32 4294967294, %v2900_v53 }
  0xb9   :  { %2309 = vmatprep.subr.bf16.mxu0 %v2500_v7 }
  0xba   :  { %vm147_vm7 = vcmp.ge.s32.totalorder %v145_v6, 0 }
  0xbc   :  { %2310 = vmatpush3.bf16.msra.mxu0 %v2501_v10 }
  0xbd   :  { %2311 = vmatprep.subr.bf16.mxu0 %v2504_v12 }
  0xc0   :  { %2312 = vmatpush3.bf16.msra.mxu0 %v2505_v14 }
  0xc1   :  { %2313 = vmatprep.subr.bf16.mxu0 %v2508_v15 }
  0xc4   :  { %2314 = vmatpush3.bf16.msra.mxu0 %v2509_v18  ;;  %v2939_v18 = vadd.s32 2, %v144_v60 }
  0xc5   :  { %2315 = vmatprep.subr.bf16.mxu0 %v2512_v20 }
  0xc6   :  { %vm174_vm9 = vcmp.lt.s32.totalorder %v2939_v18, 16  ;;  %v2463_v18 = vld [vmem:[#allocation12 + $0xb0] sm:$0xff]  }
  0xc8   :  { %2316 = vmatpush3.bf16.msra.mxu0 %v2513_v21  ;;  %v2098_v21 = vld [vmem:[#allocation7] ss:$0 sm:$0xff] }
  0xc9   :  { %2317 = vmatprep.subr.bf16.mxu0 %v2516_v22 }
  0xcc   :  { %2318 = vmatpush3.bf16.msra.mxu0 %v2517_v23 }
  0xcf   :  { %1693 = vmatmul.mubr.bf16.vlgmr.msra.gmra.mxu0 %v2121_v24 }
 0x12f   :  { %v369_v25 = vpop.f32.mrf.mxu0  ;;  %v2861_v26 = vpop.f32.mrf.mxu1 }
 0x130   :  { %v2867_v32 = vadd.f32 %v2096_v27, %v369_v25  ;;  %v619_v56 = vrot.slane %v2861_v26, 7 }
 0x131   :  { %v2863_v28 = vpop.f32.mrf.mxu0  ;;  %v2865_v29 = vpop.f32.mrf.mxu1 }
 0x133   :  { %v373_v30 = vpop.f32.mrf.mxu0  ;;  %v426_v31 = vpop.f32.mrf.mxu1 }
 0x134   :  { %v2869_v33 = vadd.f32 %v2096_v27, %v373_v30  ;;  %v620_v57 = vrot.slane %v426_v31, 7 }
 0x135   :  { %v2871_v34 = vpop.f32.mrf.mxu0  ;;  %v428_v35 = vpop.f32.mrf.mxu1 }
 0x136   :  { %v1758_v36 = vpack.c.bf16 %v2869_v33, %v2867_v32  ;;  %v626_v1 = vsel %vm623_vm2, %v619_v56, %v620_v57 }
 0x137   :  { %v379_v37 = vpop.f32.mrf.mxu0  ;;  %v2875_v38 = vpop.f32.mrf.mxu1  ;;  %v637_v11 = vadd.f32 %v2918_v0, %v626_v1 }
 0x138   :  { %v2883_v43 = vadd.f32 %v2096_v27, %v379_v37  ;;  %v621_v2 = vrot.slane %v2875_v38, 7 }
 0x139   :  { %v2877_v39 = vpop.f32.mrf.mxu0  ;;  %v2879_v40 = vpop.f32.mrf.mxu1  ;;  %v641_v25 = vadd.f32 %v637_v11, %v428_v35 }
 0x13a   :  { %v625_v13 = vsel %vm623_vm2, %v620_v57, %v621_v2 }
 0x13b   :  { %v383_v41 = vpop.f32.mrf.mxu0  ;;  %v2881_v42 = vpop.f32.mrf.mxu1  ;;  %v634_v26 = vsel %vm155_vm3, %v625_v13, 0.0 }
 0x13c   :  { %v2885_v44 = vadd.f32 %v2096_v27, %v383_v41  ;;  %v622_v12 = vrot.slane %v2881_v42, 7 }
 0x13d   :  { %v2887_v45 = vpop.f32.mrf.mxu0  ;;  %v2889_v46 = vpop.f32.mrf.mxu1 }
 0x13e   :  { %v1759_v48 = vpack.c.bf16 %v2885_v44, %v2883_v43  ;;  %v627_v27 = vsel %vm623_vm2, %v622_v12, %v619_v56  ;;  %v624_v56 = vsel %vm623_vm2, %v621_v2, %v622_v12 }
 0x13f   :  { %v2893_v49 = vpop.f32.mrf.mxu0  ;;  %v2895_v50 = vpop.f32.mrf.mxu1 }
 0x140   :  { %v694_v17 = vrot.slane %v2895_v50, 7 }
 0x141   :  { %v477_v51 = vpop.f32.mrf.mxu0  ;;  %v2897_v52 = vpop.f32.mrf.mxu1 }
 0x142   :  { %v673_v14 = vrot.slane %v477_v51, 6 }
 0x143   :  { %v2902_v54 = vpop.f32.mrf.mxu0  ;;  %v2904_v55 = vpop.f32.mrf.mxu1 }
 0x144   :  { %v695_v19 = vrot.slane %v2904_v55, 7  ;;  %v645_v31 = vrot.slane %v2902_v54, 1  ;;  %v632_v54 = vsel %vm155_vm3, %v627_v27, 0.0 }
 0x145   :  { %v481_v58 = vpop.f32.mrf.mxu0  ;;  %v2907_v59 = vpop.f32.mrf.mxu1 }
 0x146   :  { %v674_v7 = vrot.slane %v481_v58, 6  ;;  %v700_v57 = vsel %vm623_vm2, %v694_v17, %v695_v19 }
 0x147   :  { %v2911_v61 = vpop.f32.mrf.mxu0  ;;  %v2913_v62 = vpop.f32.mrf.mxu1 }
 0x148   :  { %v680_v20 = vsel %vm677_vm4, %v673_v14, %v674_v7  ;;  %v646_v30 = vrot.slane %v2911_v61, 1  ;;  %v696_v37 = vrot.slane %v2913_v62, 7  ;;  %v2466_v61 = vld [vmem:[#allocation12 + $0xe8] sm:$0xff]  }
 0x149   :  { %v487_v3 = vpop.f32.mrf.mxu0  ;;  %v2923_v4 = vpop.f32.mrf.mxu1  ;;  %v691_v35 = vadd.f32 %v2098_v21, %v680_v20  ;;  %v636_v20 = vadd.f32 %v2918_v0, %v632_v54 }
 0x14a   :  { %v675_v8 = vrot.slane %v487_v3, 6  ;;  %v650_v62 = vsel %vm648_vm5, %v645_v31, %v646_v30  ;;  %v699_v2 = vsel %vm623_vm2, %v695_v19, %v696_v37 }
 0x14b   :  { %v2928_v9 = vpop.f32.mrf.mxu0  ;;  %v542_v10 = vpop.f32.mrf.mxu1  ;;  %v707_v12 = vadd.f32 %v700_v57, %v691_v35 }
 0x14c   :  { %v697_v15 = vrot.slane %v542_v10, 7  ;;  %v679_v22 = vsel %vm677_vm4, %v674_v7, %v675_v8 }
 0x14d   :  { %v491_v16 = vpop.f32.mrf.mxu0  ;;  %v688_v50 = vsel %vm147_vm7, %v679_v22, 0.0  ;;  %v639_v22 = vadd.f32 %v2918_v0, %v624_v56 }
 0x14e   :  { %v676_v23 = vrot.slane %v491_v16, 6  ;;  %v701_v38 = vsel %vm623_vm2, %v697_v15, %v694_v17  ;;  %v692_v7 = vadd.f32 %v2098_v21, %v688_v50  ;;  %v698_v13 = vsel %vm623_vm2, %v696_v37, %v697_v15 }
 0x14f   :  { %v2946_v24 = vpop.f32.mrf.mxu0  ;;  %v702_v1 = vsel %vm155_vm3, %v701_v38, 0.0  ;;  %v638_v17 = vadd.f32 %v2918_v0, %v634_v26  ;;  %v658_v37 = vsel %vm166_vm6, %v650_v62, 0.0  ;;  %v711_v0 = vadd.f32 %v707_v12, %v2907_v59  ;;  %v544_v59 = vpop.f32.mrf.mxu1 }
 0x150   :  { %v681_v41 = vsel %vm677_vm4, %v676_v23, %v673_v14  ;;  %v678_v51 = vsel %vm677_vm4, %v675_v8, %v676_v23  ;;  %v714_v3 = vrot.slane %v2946_v24, 1  ;;  %v704_v24 = vsel %vm155_vm3, %v699_v2, 0.0 }
 0x151   :  { %v2960_v42 = vpop.f32.mrf.mxu0  ;;  %v686_v55 = vsel %vm147_vm7, %v681_v41, 0.0  ;;  %v693_v10 = vadd.f32 %v2098_v21, %v678_v51  ;;  %v708_v38 = vadd.f32 %v704_v24, %v692_v7  ;;  %v640_v50 = vadd.f32 %v636_v20, %v2865_v29  ;;  %v2459_v20 = vld [vmem:[#allocation12 + $0xb8] sm:$0xff]   ;;  %v2462_v24 = vld [vmem:[#allocation12 + $0xf0] sm:$0xff]  }
 0x152   :  { %v690_v58 = vadd.f32 %v2098_v21, %v686_v55  ;;  %v644_v21 = vrot.slane %v2893_v49, 1  ;;  %v730_v15 = vrot.slane %v2960_v42, 2  ;;  %v647_v51 = vrot.slane %v2928_v9, 1 }
 0x153   :  { %v585_v60 = vpop.f32.mrf.mxu0  ;;  %v709_v26 = vadd.f32 %v698_v13, %v693_v10  ;;  %v662_v56 = vadd.f32 %v658_v37, %v641_v25  ;;  %v712_v62 = vadd.f32 %v708_v38, %v2923_v4  ;;  %v643_v38 = vadd.f32 %v639_v22, %v2889_v46  ;;  %v2470_v22 = vld [vmem:[#allocation12 + $0xe0] sm:$0xff]  }
 0x154   :  { %v715_v6 = vrot.slane %v585_v60, 1  ;;  %v706_v8 = vadd.f32 %v702_v1, %v690_v58  ;;  %v651_v42 = vsel %vm648_vm5, %v644_v21, %v645_v31  ;;  %v652_v10 = vsel %vm648_vm5, %v647_v51, %v644_v21 }
 0x155   :  { %v587_v11 = vpop.f32.mrf.mxu0  ;;  %v713_v1 = vadd.f32 %v709_v26, %v544_v59  ;;  %v649_v21 = vsel %vm648_vm5, %v646_v30, %v647_v51  ;;  %v948_v30 = vld [vmem:[%s3117_s1 + $0x8] sm:$0xff]  ;;  %v2483_v51 = vld [vmem:[#allocation12 + $0x88] sm:$0xff]  }
 0x156   :  { %v720_v14 = vsel %vm648_vm5, %v714_v3, %v715_v6  ;;  %v731_v16 = vrot.slane %v587_v11, 2  ;;  %v710_v23 = vadd.f32 %v706_v8, %v2897_v52  ;;  %v661_v8 = vadd.f32 %v651_v42, %v640_v50  ;;  %v2479_v50 = vld [vmem:[#allocation12 + $0x90] sm:$0xff]   ;;  %v2482_v42 = vld [vmem:[#allocation12 + $0xc8] sm:$0xff]   ;;  %v956_v59 = vld [vmem:[%s3117_s1 + $0x48] sm:$0xff] }
 0x157   :  { %v591_v19 = vpop.f32.mrf.mxu0  ;;  %v2120_v46 = vcombine.high %v948_v30, %v952_v5 }
 0x158   :  { %v716_v27 = vrot.slane %v591_v19, 1  ;;  %v726_v41 = vadd.f32 %v720_v14, %v710_v23  ;;  %v737_v52 = vsel %vm734_vm8, %v730_v15, %v731_v16 }
 0x159   :  { %v593_v35 = vpop.f32.mrf.mxu0 }
 0x15a   :  { %v719_v49 = vsel %vm648_vm5, %v715_v6, %v716_v27  ;;  %v732_v63 = vrot.slane %v593_v35, 2  ;;  %v747_v6 = vadd.f32 %v737_v52, %v726_v41  ;;  %v2474_v52 = vld [vmem:[#allocation12 + $0xd8] sm:$0xff]  }
 0x15b   :  { %v723_v55 = vsel %vm166_vm6, %v719_v49, 0.0  ;;  %v595_v54 = vpop.f32.mrf.mxu0  ;;  %v2475_v49 = vld [vmem:[#allocation12 + $0x98] sm:$0xff]  }
 0x15c   :  { %v727_v57 = vadd.f32 %v723_v55, %v711_v0  ;;  %v736_v58 = vsel %vm734_vm8, %v731_v16, %v732_v63  ;;  %v717_v60 = vrot.slane %v595_v54, 1  ;;  %v2471_v0 = vld [vmem:[#allocation12 + $0xa0] sm:$0xff]  }
 0x15d   :  { %v744_v29 = vsel %vm174_vm9, %v736_v58, 0.0  ;;  %v597_v31 = vpop.f32.mrf.mxu0  ;;  %v2486_v55 = vld [vmem:[#allocation12 + $0xc0] sm:$0xff]   ;;  %v2119_v58 = vcombine.low %v948_v30, %v952_v5 }
 0x15e   :  { %v718_v9 = vsel %vm648_vm5, %v716_v27, %v717_v60  ;;  %v721_v25 = vsel %vm648_vm5, %v717_v60, %v714_v3  ;;  %v733_v7 = vrot.slane %v597_v31, 2  ;;  %v748_v2 = vadd.f32 %v744_v29, %v727_v57  ;;  %v2487_v54 = vld [vmem:[#allocation12 + $0x80] sm:$0xff]   ;;  %v2491_v60 = vld [vmem:[#allocation12 + $0x1b8] sm:$0xff]   ;;  %v2495_v29 = vld [vmem:[#allocation12 + $0x1b0] sm:$0xff]  }
 0x15f   :  { %v725_v4 = vsel %vm166_vm6, %v721_v25, 0.0  ;;  %v728_v11 = vadd.f32 %v718_v9, %v712_v62  ;;  %v751_v3 = vpack.c.bf16 %v662_v56, %v661_v8  ;;  %v660_v27 = vsel %vm166_vm6, %v652_v10, 0.0  ;;  %v2490_v56 = vld [vmem:[#allocation12 + $0x1f8] sm:$0xff]   ;;  %v960_v57 = vld [vmem:[%s3117_s1 + $0x68] sm:$0xff]  ;;  %v2498_v31 = vld [vmem:[#allocation12 + $0x1e8] sm:$0xff]  }
 0x160   :  { %v729_v12 = vadd.f32 %v725_v4, %v713_v1  ;;  %v735_v13 = vsel %vm734_vm8, %v732_v63, %v733_v7  ;;  %v738_v14 = vsel %vm734_vm8, %v733_v7, %v730_v15  ;;  %v752_v16 = vpack.c.bf16 %v748_v2, %v747_v6  ;;  %v2478_v63 = vld [vmem:[#allocation12 + $0xd0] sm:$0xff]   ;;  %v2499_v7 = vld [vmem:[#allocation12 + $0x1a8] sm:$0xff]   ;;  %v2502_v8 = vld [vmem:[#allocation12 + $0x1e0] sm:$0xff]  }
 0x161   :  { %v746_v23 = vsel %vm174_vm9, %v738_v14, 0.0  ;;  %v749_v19 = vadd.f32 %v735_v13, %v728_v11  ;;  %v642_v15 = vadd.f32 %v638_v17, %v2879_v40  ;;  %v664_v35 = vadd.f32 %v660_v27, %v643_v38  ;;  %v2467_v40 = vld [vmem:[#allocation12 + $0xa8] sm:$0xff]   ;;  %v2494_v1 = vld [vmem:[#allocation12 + $0x1f0] sm:$0xff]   ;;  %v2503_v10 = vld [vmem:[#allocation12 + $0x1a0] sm:$0xff]  }
 0x162   :  { %915 = vmatprep.mubr.bf16.mxu1 %v752_v16  ;;  %v750_v37 = vadd.f32 %v746_v23, %v729_v12  ;;  %v2128_v62 = vcombine.high %v956_v59, %v960_v57  ;;  %v950_v6 = vld [vmem:[%s3117_s1 + $0x18] sm:$0xff]  ;;  %v2127_v25 = vcombine.low %v956_v59, %v960_v57  ;;  %v2506_v4 = vld [vmem:[#allocation12 + $0x1d8] sm:$0xff]   ;;  %v2514_v14 = vld [vmem:[#allocation12 + $0x1c8] sm:$0xff]  }
 0x163   :  { %916 = vmatmul.mubr.bf16.vlgmr.msra.gmra.mxu1 %v751_v3  ;;  %v663_v41 = vadd.f32 %v649_v21, %v642_v15  ;;  %v954_v9 = vld [vmem:[%s3117_s1 + $0x38] sm:$0xff]  ;;  %v2507_v11 = vld [vmem:[#allocation12 + $0x198] sm:$0xff]   ;;  %v2515_v16 = vld [vmem:[#allocation12 + $0x188] sm:$0xff]  }
 0x164   :  { %v754_v26 = vpack.c.bf16 %v750_v37, %v749_v19  ;;  %2276 = vmatpush3.bf16.msra.mxu1 %v2459_v20  ;;  %v2124_v2 = vcombine.high %v950_v6, %v954_v9  ;;  %v2510_v12 = vld [vmem:[#allocation12 + $0x1d0] sm:$0xff]   ;;  %v2518_v20 = vld [vmem:[#allocation12 + $0x1c0] sm:$0xff]   ;;  %v957_v23 = vld [vmem:[%s3117_s1 + $0x50] sm:$0xff]  ;;  %v2123_v15 = vcombine.low %v950_v6, %v954_v9 }
 0x165   :  { %2277 = vmatprep.subr.bf16.mxu1 %v2462_v24  ;;  %v753_v17 = vpack.c.bf16 %v664_v35, %v663_v41  ;;  %v2511_v13 = vld [vmem:[#allocation12 + $0x190] sm:$0xff]   ;;  %v2519_v3 = vld [vmem:[#allocation12 + $0x180] sm:$0xff]   ;;  %v961_v19 = vld [vmem:[%s3117_s1 + $0x70] sm:$0xff]  ;;  %v2721_v41 = vmov 1966171168  }
 0x166   :  { %923 = vmatprep.mubr.bf16.mxu1 %v754_v26  ;;  %v2130_v24 = vcombine.high %v957_v23, %v961_v19  ;;  %v2129_v21 = vcombine.low %v957_v23, %v961_v19  ;;  %v958_v27 = vld [vmem:[%s3117_s1 + $0x58] sm:$0xff]  ;;  %v1860_v35 = vunpack.c.l.s4 %v2721_v41 }
 0x167   :  { %v962_v37 = vld [vmem:[%s3117_s1 + $0x78] sm:$0xff] }
 0x168   :  { %2278 = vmatpush3.bf16.msra.mxu1 %v2463_v18  ;;  %1700 = vmatprep.mubr.bf16.mxu0 %v2130_v24  ;;  %v2132_v38 = vcombine.high %v958_v27, %v962_v37  ;;  %v2131_v26 = vcombine.low %v958_v27, %v962_v37  ;;  %v2719_v18 = vmov 0.0   ;;  %v1861_v30 = vunpack.c.0.s8 %v1860_v35  ;;  %v2116_v24 = vld [vmem:[#allocation13] ss:$0 sm:$0xff] }
 0x169   :  { %2279 = vmatprep.subr.bf16.mxu1 %v2466_v61  ;;  %1701 = vmatmul.mubr.bf16.gmra.mxu0 %v2129_v21  ;;  %v2197_v61 = vld.sshfl [vmem:[%s3118_s2] sm:$0x11 pattern:$0x75316420] }
 0x16a   :  { %2367 = vmatprep.subr.bf16.mxu0 %v2719_v18  ;;  %2369 = vmatprep.mubr.msk.bf16.mxu0 %vm2720_vm10, %v2719_v18  ;;  %v1858_v5 = vcombine.high %v2197_v61, %v2197_v61 }
 0x16b   :  { %924 = vmatmul.mubr.bf16.gmra.mxu1 %v753_v17 }
 0x16c   :  { %2280 = vmatpush3.bf16.msra.mxu1 %v2467_v40  ;;  %1643 = vmatprep.mubr.bf16.mxu1 %v2120_v46  ;;  %v1864_v40 = vsub.s32 %v1861_v30, %v2900_v53  ;;  %v1875_v46 = vsub.s32 0, %v2900_v53 }
 0x16d   :  { %2281 = vmatprep.subr.bf16.mxu1 %v2470_v22 }
 0x16e   :  { %v1865_v17 = vrot.slane %v2197_v61, %v1864_v40  ;;  %v1872_v22 = vrot.slane %v1858_v5, %v1864_v40 }
 0x170   :  { %2282 = vmatpush3.bf16.msra.mxu1 %v2471_v0  ;;  %v1876_v0 = vrot.slane %v1865_v17, %v1875_v46 }
 0x171   :  { %2283 = vmatprep.subr.bf16.mxu1 %v2474_v52  ;;  %v1880_v52 = vrot.slane %v1872_v22, %v1875_v46 }
 0x172   :  { %1882 = vperm.xlu0 %2407, %v1876_v0  }
 0x174   :  { %2284 = vmatpush3.bf16.msra.mxu1 %v2475_v49 }
 0x175   :  { %2285 = vmatprep.subr.bf16.mxu1 %v2478_v63 }
 0x176   :  { %1885 = vperm.xlu0 %2407, %v1880_v52  }
 0x178   :  { %2286 = vmatpush3.bf16.msra.mxu1 %v2479_v50 }
 0x179   :  { %2287 = vmatprep.subr.bf16.mxu1 %v2482_v42 }
 0x17c   :  { %2288 = vmatpush3.bf16.msra.mxu1 %v2483_v51 }
 0x17d   :  { %2289 = vmatprep.subr.bf16.mxu1 %v2486_v55 }
 0x180   :  { %2290 = vmatpush3.bf16.msra.mxu1 %v2487_v54 }
 0x181   :  { %2331 = vmatprep.subr.bf16.mxu1 %v2490_v56  ;;  %v2115_v56 = vld [vmem:[#allocation10] ss:$0 sm:$0xff] }
 0x183   :  { %1644 = vmatmul.mubr.bf16.vlgmr.msra.gmra.mxu1 %v2119_v58 }
 0x184   :  { %2332 = vmatpush3.bf16.msra.mxu1 %v2491_v60  ;;  %1651 = vmatprep.mubr.bf16.mxu1 %v2128_v62 }
 0x185   :  { %2333 = vmatprep.subr.bf16.mxu1 %v2494_v1 }
 0x188   :  { %2334 = vmatpush3.bf16.msra.mxu1 %v2495_v29 }
 0x189   :  { %2335 = vmatprep.subr.bf16.mxu1 %v2498_v31 }
 0x18b   :  { %1652 = vmatmul.mubr.bf16.gmra.mxu1 %v2127_v25  ;;  %v2263_v25 = vpop.f32.mrf.mxu0 }
 0x18c   :  { %2336 = vmatpush3.bf16.msra.mxu1 %v2499_v7  ;;  %1741 = vmatprep.mubr.bf16.mxu1 %v2124_v2 }
 0x18d   :  { %2337 = vmatprep.subr.bf16.mxu1 %v2502_v8  ;;  %v2264_v8 = vpop.f32.mrf.mxu0 }
 0x18e   :  { %v2265_v23 = vadd.f32 %v2264_v8, %v2263_v25 }
 0x190   :  { %2338 = vmatpush3.bf16.msra.mxu1 %v2503_v10  ;;  %v1597_v44 = vadd.f32 %v2265_v23, %v2116_v24 }
 0x191   :  { %2339 = vmatprep.subr.bf16.mxu1 %v2506_v4 }
 0x194   :  { %2340 = vmatpush3.bf16.msra.mxu1 %v2507_v11 }
 0x195   :  { %2341 = vmatprep.subr.bf16.mxu1 %v2510_v12 }
 0x198   :  { %2342 = vmatpush3.bf16.msra.mxu1 %v2511_v13 }
 0x199   :  { %2343 = vmatprep.subr.bf16.mxu1 %v2514_v14 }
 0x19c   :  { %2344 = vmatpush3.bf16.msra.mxu1 %v2515_v16 }
 0x19d   :  { %2345 = vmatprep.subr.bf16.mxu1 %v2518_v20 }
 0x1a0   :  { %2346 = vmatpush3.bf16.msra.mxu1 %v2519_v3 }
 0x1a1   :  { %2385 = vmatprep.subr.bf16.mxu1 %v2719_v18 }
 0x1a3   :  { %1742 = vmatmul.mubr.bf16.vlgmr.msra.gmra.mxu1 %v2123_v15 }
 0x1a4   :  { %1749 = vmatprep.mubr.bf16.mxu1 %v2132_v38 }
 0x1ab   :  { %1750 = vmatmul.mubr.bf16.gmra.mxu1 %v2131_v26 }
 0x1ac   :  { %2387 = vmatprep.mubr.msk.bf16.mxu1 %vm2720_vm10, %v2719_v18 }
 0x223   :  { %v2235_v49 = vpop.f32.mrf.mxu1 }
 0x225   :  { %v2236_v63 = vpop.f32.mrf.mxu1 }
 0x226   :  { %v2237_v50 = vadd.f32 %v2236_v63, %v2235_v49 }
 0x227   :  { %v2238_v42 = vpop.f32.mrf.mxu1 }
 0x228   :  { %v932_v55 = vadd.f32 %v2237_v50, %v2863_v28 }
 0x229   :  { %v2239_v51 = vpop.f32.mrf.mxu1 }
 0x22a   :  { %v2240_v54 = vadd.f32 %v2239_v51, %v2238_v42  ;;  %v943_v53 = vadd.f32 %v2115_v56, %v932_v55 }
 0x22b   :  { %v2241_v59 = vpop.f32.mrf.mxu1 }
 0x22c   :  { %v933_v57 = vadd.f32 %v2240_v54, %v2871_v34  ;;  %v2266_v34 = vpop.f32.mrf.mxu0 }
 0x22d   :  { %v2242_v58 = vpop.f32.mrf.mxu1 }
 0x22e   :  { %v944_v60 = vadd.f32 %v2115_v56, %v933_v57  ;;  %v2243_v62 = vadd.f32 %v2242_v58, %v2241_v59 }
 0x22f   :  { %v2244_v1 = vpop.f32.mrf.mxu1 }
 0x230   :  { %v1760_v29 = vpack.c.bf16 %v944_v60, %v943_v53  ;;  %v934_v6 = vadd.f32 %v2243_v62, %v2877_v39  ;;  %v2267_v39 = vpop.f32.mrf.mxu0 }
 0x231   :  { %v2245_v31 = vpop.f32.mrf.mxu1  ;;  %v2268_v43 = vadd.f32 %v2267_v39, %v2266_v34 }
 0x232   :  { %v2246_v9 = vadd.f32 %v2245_v31, %v2244_v1  ;;  %2368 = vmatpush3.bf16.xpose.msra.mxu0 %v1760_v29  ;;  %v945_v7 = vadd.f32 %v2115_v56, %v934_v6  ;;  %v2269_v4 = vpop.f32.mrf.mxu0 }
 0x233   :  { %2373 = vmatprep.subr.bf16.mxu0 %v2719_v18  ;;  %v1600_v15 = vadd.f32 %v2268_v43, %v2116_v24 }
 0x234   :  { %v935_v28 = vadd.f32 %v2246_v9, %v2887_v45  ;;  %v2270_v11 = vpop.f32.mrf.mxu0 }
 0x235   :  { %v2271_v41 = vadd.f32 %v2270_v11, %v2269_v4  ;;  %v1849_v4 = vand.u32 127, %v142_v47 }
 0x236   :  { %v946_v2 = vadd.f32 %v2115_v56, %v935_v28  ;;  %v2272_v13 = vpop.f32.mrf.mxu0 }
 0x237   :  { %v1605_v0 = vadd.f32 %v2271_v41, %v2116_v24 }
 0x238   :  { %v1761_v10 = vpack.c.bf16 %v946_v2, %v945_v7  ;;  %v2273_v32 = vpop.f32.mrf.mxu0 }
 0x239   :  { %2370 = vmatmul.mubr.bf16.vlgmr.msra.gmra.mxu0 %v1758_v36  ;;  %v2274_v40 = vadd.f32 %v2273_v32, %v2272_v13 }
 0x23a   :  { %2374 = vmatpush3.bf16.xpose.msra.mxu0 %v1761_v10  ;;  %2375 = vmatprep.mubr.msk.bf16.mxu0 %vm2720_vm10, %v2719_v18  ;;  %v2319_v36 = vpop.f32.mrf.mxu0 }
 0x23b   :  { %2379 = vmatprep.subr.bf16.mxu0 %v2719_v18  ;;  %v1608_v42 = vadd.f32 %v2274_v40, %v2116_v24 }
 0x23c   :  { %v2320_v20 = vpop.f32.mrf.mxu0 }
 0x23d   :  { %v2321_v35 = vadd.f32 %v2320_v20, %v2319_v36 }
 0x23e   :  { %v2322_v19 = vpop.f32.mrf.mxu0 }
 0x240   :  { %v2323_v27 = vpop.f32.mrf.mxu0 }
 0x241   :  { %2376 = vmatmul.mubr.bf16.vlgmr.msra.gmra.mxu0 %v1759_v48  ;;  %v2324_v46 = vadd.f32 %v2323_v27, %v2322_v19 }
 0x242   :  { %2381 = vmatprep.mubr.msk.bf16.mxu0 %vm2720_vm10, %v2719_v18  ;;  %v2325_v26 = vpop.f32.mrf.mxu0 }
 0x243   :  { %v2291_v45 = vpop.f32.mrf.mxu1 }
 0x244   :  { %v2326_v61 = vpop.f32.mrf.mxu0 }
 0x245   :  { %v2292_v12 = vpop.f32.mrf.mxu1  ;;  %v2327_v53 = vadd.f32 %v2326_v61, %v2325_v26 }
 0x246   :  { %v2293_v48 = vadd.f32 %v2292_v12, %v2291_v45  ;;  %v2328_v22 = vpop.f32.mrf.mxu0  ;;  %v1883_v45 = vpop.permute.xlu0 %1882 }
 0x247   :  { %v2294_v14 = vpop.f32.mrf.mxu1  ;;  %vm1887_vm11 = vcmp.lt.s32.totalorder %v1849_v4, %v1883_v45 }
 0x248   :  { %v1646_v18 = vadd.f32 %v2293_v48, %v1597_v44  ;;  %v2329_v56 = vpop.f32.mrf.mxu0 }
 0x249   :  { %v2295_v33 = vpop.f32.mrf.mxu1  ;;  %v2330_v29 = vadd.f32 %v2329_v56, %v2328_v22 }
 0x24a   :  { %v2296_v38 = vadd.f32 %v2295_v33, %v2294_v14  ;;  %v1695_v49 = vadd.f32 %v2321_v35, %v1646_v18  ;;  %v1886_v20 = vpop.permute.xlu0 %1885 }
 0x24b   :  { %v2297_v16 = vpop.f32.mrf.mxu1  ;;  %vm1888_vm13 = vcmp.lt.s32.totalorder %v1849_v4, %v1886_v20 }
 0x24c   :  { %v1649_v5 = vadd.f32 %v2296_v38, %v1600_v15 }
 0x24d   :  { %v2298_v3 = vpop.f32.mrf.mxu1 }
 0x24e   :  { %v2299_v52 = vadd.f32 %v2298_v3, %v2297_v16  ;;  %v1698_v55 = vadd.f32 %v2324_v46, %v1649_v5 }
 0x24f   :  { %v2300_v21 = vpop.f32.mrf.mxu1 }
 0x250   :  { %v1654_v59 = vadd.f32 %v2299_v52, %v1605_v0 }
 0x251   :  { %v2301_v37 = vpop.f32.mrf.mxu1 }
 0x252   :  { %v2302_v51 = vadd.f32 %v2301_v37, %v2300_v21  ;;  %v1703_v9 = vadd.f32 %v2327_v53, %v1654_v59 }
 0x254   :  { %v1657_v62 = vadd.f32 %v2302_v51, %v1608_v42 }
 0x256   :  { %v1706_v7 = vadd.f32 %v2330_v29, %v1657_v62 }
 0x263   :  { %v2347_v30 = vpop.f32.mrf.mxu1 }
 0x265   :  { %v2348_v17 = vpop.f32.mrf.mxu1 }
 0x266   :  { %v2349_v63 = vadd.f32 %v2348_v17, %v2347_v30 }
 0x267   :  { %v2350_v50 = vpop.f32.mrf.mxu1 }
 0x268   :  { %v3083_v57 = vadd.f32 %v2349_v63, %v1695_v49 }
 0x269   :  { %v2351_v54 = vpop.f32.mrf.mxu1 }
 0x26a   :  { %v2352_v58 = vadd.f32 %v2351_v54, %v2350_v50 }
 0x26b   :  { %v2353_v60 = vpop.f32.mrf.mxu1 }
 0x26c   :  { %v3085_v1 = vadd.f32 %v2352_v58, %v1698_v55 }
 0x26d   :  { %v2354_v31 = vpop.f32.mrf.mxu1 }
 0x26e   :  { %v1940_v6 = vpack.c.bf16 %v3085_v1, %v3083_v57  ;;  %v2355_v25 = vadd.f32 %v2354_v31, %v2353_v60 }
 0x26f   :  { %v2356_v28 = vpop.f32.mrf.mxu1 }
 0x270   :  { %2380 = vmatpush3.bf16.msra.mxu0 %v1940_v6  ;;  %v3089_v8 = vadd.f32 %v2355_v25, %v1703_v9 }
 0x271   :  { %v2357_v2 = vpop.f32.mrf.mxu1 }
 0x272   :  { %v2358_v10 = vadd.f32 %v2357_v2, %v2356_v28 }
 0x274   :  { %v3091_v34 = vadd.f32 %v2358_v10, %v1706_v7 }
 0x276   :  { %v1941_v39 = vpack.c.bf16 %v3091_v34, %v3089_v8 }
 0x278   :  { %2386 = vmatpush3.bf16.msra.mxu1 %v1941_v39 }
 0x2f9   :  { %v1796_v11 = vpop.f32.mrf.mxu0 }
 0x2fa   :  { %v1844_v12 = vmul.f32 0.10206208, %v1796_v11 }
 0x2fb   :  { %v2371_v13 = vpop.f32.mrf.mxu0 }
 0x2fc   :  { %v1889_v14 = vsel %vm1887_vm11, %v1844_v12, -1000000.0 }
 0x2fd   :  { %v1799_v32 = vpop.f32.mrf.mxu0  ;;  %v1894_v33 = vsel %vm1893_vm12, %v1889_v14, -inf }
 0x2fe   :  { %v1845_v36 = vmul.f32 0.10206208, %v1799_v32  ;;  %1895 = vmax.xlane.f32.xlu1 %v1894_v33 }
 0x2ff   :  { %v2372_v16 = vpop.f32.mrf.mxu0 }
 0x300   :  { %v1890_v3 = vsel %vm1887_vm11, %v1845_v36, -1000000.0 }
 0x301   :  { %v1837_v23 = vpop.f32.mrf.mxu0  ;;  %v1897_v19 = vsel %vm1893_vm12, %v1890_v3, -inf }
 0x302   :  { %v1846_v24 = vmul.f32 0.10206208, %v1837_v23  ;;  %1898 = vmax.xlane.f32.xlu1 %v1897_v19 }
 0x303   :  { %v2377_v47 = vpop.f32.mrf.mxu0 }
 0x304   :  { %v1891_v21 = vsel %vm1888_vm13, %v1846_v24, -1000000.0 }
 0x305   :  { %v1840_v43 = vpop.f32.mrf.mxu0  ;;  %v1900_v44 = vsel %vm1893_vm12, %v1891_v21, -inf }
 0x306   :  { %v1847_v48 = vmul.f32 0.10206208, %v1840_v43  ;;  %1901 = vmax.xlane.f32.xlu0 %v1900_v44 }
 0x307   :  { %v2378_v27 = vpop.f32.mrf.mxu0 }
 0x308   :  { %v1892_v37 = vsel %vm1888_vm13, %v1847_v48, -1000000.0 }
 0x309   :  { %v1903_v15 = vsel %vm1893_vm12, %v1892_v37, -inf }
 0x30a   :  { %1904 = vmax.xlane.f32.xlu1 %v1903_v15 }
 0x387   :  { %v1896_v38 = vpop.xlane.xlu1 %1895 }
 0x388   :  { %v1906_v26 = vsub.f32 %v1889_v14, %v1896_v38 }
 0x38a   :  { %v1910_v18 = vmul.f32 1.442695, %v1906_v26 }
 0x38b   :  { %v1899_v41 = vpop.xlane.xlu1 %1898 }
 0x38c   :  { %2520 = vpow2.f32 %v1910_v18  ;;  %v1907_v35 = vsub.f32 %v1890_v3, %v1899_v41 }
 0x38e   :  { %v1912_v61 = vmul.f32 1.442695, %v1907_v35 }
 0x38f   :  { %v1902_v30 = vpop.xlane.xlu0 %1901 }
 0x390   :  { %2522 = vpow2.f32 %v1912_v61  ;;  %v1908_v5 = vsub.f32 %v1891_v21, %v1902_v30 }
 0x392   :  { %v1914_v40 = vmul.f32 1.442695, %v1908_v5 }
 0x393   :  { %v1905_v46 = vpop.xlane.xlu1 %1904 }
 0x394   :  { %2524 = vpow2.f32 %v1914_v40  ;;  %v1909_v17 = vsub.f32 %v1892_v37, %v1905_v46 }
 0x396   :  { %v1916_v22 = vmul.f32 1.442695, %v1909_v17 }
 0x398   :  { %2526 = vpow2.f32 %v1916_v22 }
 0x399   :  { %v2521_v0 = vpop.eup %2520 }
 0x39a   :  { %v1918_v52 = vsel %vm1893_vm12, %v2521_v0, 0.0 }
 0x39b   :  { %1919 = vadd.xlane.f32.xlu1 %v1918_v52 }
 0x39d   :  { %v2523_v49 = vpop.eup %2522 }
 0x39e   :  { %v1921_v63 = vsel %vm1893_vm12, %v2523_v49, 0.0 }
 0x39f   :  { %1922 = vadd.xlane.f32.xlu1 %v1921_v63 }
 0x3a1   :  { %v2525_v50 = vpop.eup %2524 }
 0x3a2   :  { %v1924_v42 = vsel %vm1893_vm12, %v2525_v50, 0.0 }
 0x3a3   :  { %1925 = vadd.xlane.f32.xlu1 %v1924_v42 }
 0x3a5   :  { %v2527_v51 = vpop.eup %2526 }
 0x3a6   :  { %v1927_v55 = vsel %vm1893_vm12, %v2527_v51, 0.0 }
 0x3a7   :  { %1928 = vadd.xlane.f32.xlu1 %v1927_v55 }
 0x424   :  { %v1920_v54 = vpop.xlane.xlu1 %1919 }
 0x425   :  { %2528 = vrcp.f32 %v1920_v54 }
 0x428   :  { %v1923_v56 = vpop.xlane.xlu1 %1922 }
 0x429   :  { %2530 = vrcp.f32 %v1923_v56 }
 0x42c   :  { %v1926_v59 = vpop.xlane.xlu1 %1925 }
 0x42d   :  { %2532 = vrcp.f32 %v1926_v59 }
 0x430   :  { %v1929_v58 = vpop.xlane.xlu1 %1928 }
 0x431   :  { %2534 = vrcp.f32 %v1929_v58 }
 0x432   :  { %v2529_v53 = vpop.eup %2528 }
 0x433   :  { %v1934_v62 = vmul.f32 %v2529_v53, %v2521_v0 }
 0x436   :  { %v2531_v60 = vpop.eup %2530 }
 0x437   :  { %v1935_v29 = vmul.f32 %v2531_v60, %v2523_v49 }
 0x439   :  { %v1938_v31 = vpack.c.bf16 %v1935_v29, %v1934_v62 }
 0x43a   :  { %v2533_v6 = vpop.eup %2532 }
 0x43b   :  { %2382 = vmatmul.mubr.msk.bf16.vlgmr.msra.gmra.mxu0 %vm1893_vm12, %v1938_v31  ;;  %v1936_v25 = vmul.f32 %v2533_v6, %v2525_v50 }
 0x43e   :  { %v2535_v9 = vpop.eup %2534 }
 0x43f   :  { %v1937_v28 = vmul.f32 %v2535_v9, %v2527_v51 }
 0x441   :  { %v1939_v7 = vpack.c.bf16 %v1937_v28, %v1936_v25 }
 0x443   :  { %2388 = vmatmul.mubr.msk.bf16.vlgmr.msra.gmra.mxu1 %vm1893_vm12, %v1939_v7 }
 0x4fb   :  { %v1979_v2 = vpop.f32.mrf.mxu0 }
 0x4fc   :  { %v1980_v4 = vadd.f32 %v1979_v2, %v3083_v57 }
 0x4fd   :  { %v2383_v10 = vpop.f32.mrf.mxu0 }
 0x4ff   :  { %v1982_v39 = vpop.f32.mrf.mxu0 }
 0x500   :  { %v1983_v45 = vadd.f32 %v1982_v39, %v3085_v1 }
 0x501   :  { %v2384_v11 = vpop.f32.mrf.mxu0 }
 0x502   :  { %v2211_v12 = vpack.c.bf16 %v1983_v45, %v1980_v4 }
 0x503   :  { %v2023_v13 = vpop.f32.mrf.mxu1 }
 0x504   :  { %2212 = vst [vmem:[%s3127_s11] sm:$0xff] %v2211_v12   ;;  %v2024_v33 = vadd.f32 %v2023_v13, %v3089_v8 }
 0x505   :  { %v2389_v14 = vpop.f32.mrf.mxu1 }
 0x507   :  { %v2026_v32 = vpop.f32.mrf.mxu1 }
 0x508   :  { %v2027_v36 = vadd.f32 %v2026_v32, %v3091_v34 }
 0x509   :  { %v2390_v16 = vpop.f32.mrf.mxu1 }
 0x50a   :  { %v2216_v20 = vpack.c.bf16 %v2027_v36, %v2024_v33 }
 0x50c   :  { %2218 = vst [vmem:[%s3127_s11 + $0x8] sm:$0xff] %v2216_v20  }
 0x50d   :  { %2054 = vsyncpa [#allocation3], 1 }
 0x50e   :  { %2055 = vsyncpa [#allocation5], 1 }
 0x50f   :  { %2056 = vsyncpa [#allocation8], 1 }
 0x510   :  { %2057 = vsyncpa [#allocation11], 1 }
 0x511   :  { %2058 = vsyncpa [#allocation14], 1 }

// kernel: dct_forward.3
= control target key start
LH: loop header
LB: loop body
LE: loop exit
PB: predicated region body
PF: predicated region fallthrough
CT: control target
= control target key end

     0   :  { %18 = vsyncpa [#allocation3], 0  ;;  %s22198_s0 = inlined_call_operand.vmem [shape: bf16[32,1024], index: 0, kind: input, shape index: {}]   ;;  %s22199_s1 = inlined_call_operand.vmem [shape: bf16[32,1024], index: 1, kind: input, shape index: {}]   ;;  %s22200_s2 = inlined_call_operand.vmem [shape: bf16[32,128], index: 2, kind: input, shape index: {}]   ;;  %s22201_s3 = inlined_call_operand.hbm [shape: bf16[1024,1536], index: 3, kind: input, shape index: {}]   ;;  %s22202_s4 = inlined_call_operand.hbm [shape: bf16[1024,1536], index: 4, kind: input, shape index: {}]   ;;  %s22203_s5 = inlined_call_operand.hbm [shape: bf16[128,1536], index: 5, kind: input, shape index: {}]   ;;  %s22204_s6 = inlined_call_operand.hbm [shape: f32[1,512], index: 6, kind: input, shape index: {}]   ;;  %s22205_s7 = inlined_call_operand.hbm [shape: bf16[512,768], index: 7, kind: input, shape index: {}]   ;;  %s22206_s8 = inlined_call_operand.hbm [shape: f32[1,256], index: 8, kind: input, shape index: {}]   ;;  %s22207_s9 = inlined_call_operand.hbm [shape: bf16[256,384], index: 9, kind: input, shape index: {}]   ;;  %s22208_s10 = inlined_call_operand.hbm [shape: f32[1,128], index: 10, kind: input, shape index: {}]   ;;  %s22209_s11 = inlined_call_operand.hbm [shape: bf16[128,128], index: 11, kind: input, shape index: {}]   ;;  %s22210_s12 = inlined_call_operand.hbm [shape: f32[1,128], index: 12, kind: input, shape index: {}]   ;;  %s22211_s13 = inlined_call_operand.vmem [shape: f32[32,128], index: 13, kind: output, shape index: {}]  }
   0x1   :  { %19 = vsyncpa [#allocation5], 0 }
   0x2   :  { %20 = vsyncpa [#allocation8], 0 }
   0x3   :  { %21 = vsyncpa [#allocation11], 0 }
   0x4   :  { %22 = vsyncpa [#allocation14], 0 }
   0x5   :  { %23 = vsyncpa [#allocation17], 0  ;;  %s20495_s25 = smov [#allocation4]   ;;  %s20496_s27 = smov [#allocation7]  }
   0x6   :  { %s47_s26 = sshll.u32 %s20495_s25, 4  ;;  %s72_s28 = sshll.u32 %s20496_s27, 4  ;;  %s48_s26 = int_to_ptr.vmem [resolvable:$true] %s47_s26  ;;  %s73_s28 = int_to_ptr.vmem [resolvable:$true] %s72_s28 }
   0x7   :  { %s20291_s29 = scalar_lea.vmem %s48_s26, 98304  ;;  %p20296_p1 = scmp.lt.s32.totalorder %s48_s26, %s48_s26 }
   0x8   :  { %p20292_p0 = scmp.ne.s32.totalorder %s48_s26, %s20291_s29  ;;  %p20297_p2 = scmp.lt.s32.totalorder %s20291_s29, %s20291_s29 }
   0xa   :  { %p20298_p3 = por %p20297_p2, %p20296_p1 }
   0xc   :  { %p20299_p4 = pnand %p20298_p3, %p20292_p0 }
   0xe   :  { %20302 = shalt.err (!%p20299_p4)
}
   0xf   :  { %s20497_s30 = smov 768   ;;  %s20498_s14 = smov 48  }
  0x10   :  { %53 = dma.hbm_to_vmem [thread:$0]  %s22202_s4, 98304, %s48_s26, [#allocation5], %s20497_s30, %s20497_s30, %s20498_s14  }
  0x11   :  { %s20311_s17 = scalar_lea.vmem %s73_s28, 64  ;;  %p20316_p6 = scmp.lt.s32.totalorder %s73_s28, %s73_s28 }
  0x12   :  { %p20312_p5 = scmp.ne.s32.totalorder %s73_s28, %s20311_s17  ;;  %p20317_p7 = scmp.lt.s32.totalorder %s20311_s17, %s20311_s17 }
  0x14   :  { %p20318_p8 = por %p20317_p7, %p20316_p6 }
  0x16   :  { %p20319_p9 = pnand %p20318_p8, %p20312_p5 }
  0x18   :  { %20322 = shalt.err (!%p20319_p9)
}
  0x19   :  { %75 = dma.hbm_to_vmem [thread:$0]  %s22204_s6, 64, %s73_s28, [#allocation8]  }
  0x1a   :  { %s20499_s20 = smov [#allocation10]   ;;  %s20500_s22 = smov [#allocation13]  }
  0x1b   :  { %s94_s21 = sshll.u32 %s20499_s20, 4  ;;  %s116_s23 = sshll.u32 %s20500_s22, 4  ;;  %s95_s21 = int_to_ptr.vmem [resolvable:$true] %s94_s21  ;;  %s117_s23 = int_to_ptr.vmem [resolvable:$true] %s116_s23 }
  0x1c   :  { %s20331_s24 = scalar_lea.vmem %s95_s21, 32  ;;  %p20336_p11 = scmp.lt.s32.totalorder %s95_s21, %s95_s21 }
  0x1d   :  { %p20332_p10 = scmp.ne.s32.totalorder %s95_s21, %s20331_s24  ;;  %p20337_p12 = scmp.lt.s32.totalorder %s20331_s24, %s20331_s24 }
  0x1f   :  { %p20338_p13 = por %p20337_p12, %p20336_p11 }
  0x21   :  { %p20339_p0 = pnand %p20338_p13, %p20332_p10 }
  0x23   :  { %20342 = shalt.err (!%p20339_p0)
}
  0x24   :  { %97 = dma.hbm_to_vmem [thread:$0]  %s22206_s8, 32, %s95_s21, [#allocation11]  }
  0x25   :  { %s20351_s26 = scalar_lea.vmem %s117_s23, 16  ;;  %s20355_s6 = scalar_lea.vmem %s117_s23, 32 }
  0x26   :  { %p20352_p1 = scmp.ne.s32.totalorder %s117_s23, %s20351_s26  ;;  %p20356_p2 = scmp.lt.s32.totalorder %s117_s23, %s117_s23 }
  0x27   :  { %p20357_p3 = scmp.lt.s32.totalorder %s20355_s6, %s20351_s26 }
  0x29   :  { %p20358_p4 = por %p20357_p3, %p20356_p2 }
  0x2b   :  { %p20359_p5 = pnand %p20358_p4, %p20352_p1 }
  0x2d   :  { %20362 = shalt.err (!%p20359_p5)
}
  0x2e   :  { %119 = dma.hbm_to_vmem [thread:$0]  %s22208_s10, 16, %s117_s23, [#allocation14]  }
  0x2f   :  { %s20501_s29 = smov [#allocation2]   ;;  %s20502_s16 = smov [#allocation6]  }
  0x30   :  { %s35_s15 = sshll.u32 %s20501_s29, 4  ;;  %s59_s17 = sshll.u32 %s20502_s16, 4  ;;  %s36_s15 = int_to_ptr.vmem [resolvable:$true] %s35_s15  ;;  %s60_s17 = int_to_ptr.vmem [resolvable:$true] %s59_s17 }
  0x31   :  { %s20371_s18 = scalar_lea.vmem %s36_s15, 98304  ;;  %p20376_p7 = scmp.lt.s32.totalorder %s36_s15, %s36_s15 }
  0x32   :  { %p20372_p6 = scmp.ne.s32.totalorder %s36_s15, %s20371_s18  ;;  %p20377_p8 = scmp.lt.s32.totalorder %s20371_s18, %s20371_s18 }
  0x34   :  { %p20378_p9 = por %p20377_p8, %p20376_p7 }
  0x36   :  { %p20379_p10 = pnand %p20378_p9, %p20372_p6 }
  0x38   :  { %20382 = shalt.err (!%p20379_p10)
}
  0x39   :  { %41 = dma.hbm_to_vmem [thread:$0]  %s22201_s3, 98304, %s36_s15, [#allocation3], %s20497_s30, %s20497_s30, %s20498_s14  }
  0x3a   :  { %s20391_s10 = scalar_lea.vmem %s60_s17, 12288  ;;  %p20396_p12 = scmp.lt.s32.totalorder %s60_s17, %s60_s17 }
  0x3b   :  { %p20392_p11 = scmp.ne.s32.totalorder %s60_s17, %s20391_s10  ;;  %p20397_p13 = scmp.lt.s32.totalorder %s20391_s10, %s20391_s10 }
  0x3d   :  { %p20398_p0 = por %p20397_p13, %p20396_p12 }
  0x3f   :  { %p20399_p1 = pnand %p20398_p0, %p20392_p11 }
  0x41   :  { %20402 = shalt.err (!%p20399_p1)
}
  0x42   :  { %65 = dma.hbm_to_vmem [thread:$0]  %s22203_s5, 12288, %s60_s17, [#allocation5], %s20497_s30, %s20497_s30, %s20498_s14  }
  0x43   :  { %s20503_s22 = smov [#allocation9]  }
  0x44   :  { %s81_s23 = sshll.u32 %s20503_s22, 4  ;;  %s82_s23 = int_to_ptr.vmem [resolvable:$true] %s81_s23 }
  0x45   :  { %s20411_s24 = scalar_lea.vmem %s82_s23, 24576  ;;  %p20416_p3 = scmp.lt.s32.totalorder %s82_s23, %s82_s23 }
  0x46   :  { %p20412_p2 = scmp.ne.s32.totalorder %s82_s23, %s20411_s24  ;;  %p20417_p4 = scmp.lt.s32.totalorder %s20411_s24, %s20411_s24 }
  0x48   :  { %p20418_p5 = por %p20417_p4, %p20416_p3 }
  0x4a   :  { %p20419_p6 = pnand %p20418_p5, %p20412_p2 }
  0x4c   :  { %20422 = shalt.err (!%p20419_p6)
}
  0x4d   :  { %s20504_s3 = smov 384   ;;  %s20505_s4 = smov 24  }
  0x4e   :  { %87 = dma.hbm_to_vmem [thread:$0]  %s22205_s7, 24576, %s82_s23, [#allocation8], %s20504_s3, %s20504_s3, %s20505_s4  }
  0x4f   :  { %s20506_s6 = smov [#allocation12]  }
  0x50   :  { %s103_s27 = sshll.u32 %s20506_s6, 4  ;;  %s104_s27 = int_to_ptr.vmem [resolvable:$true] %s103_s27 }
  0x51   :  { %s20431_s5 = scalar_lea.vmem %s104_s27, 6144  ;;  %p20436_p8 = scmp.lt.s32.totalorder %s104_s27, %s104_s27 }
  0x52   :  { %p20432_p7 = scmp.ne.s32.totalorder %s104_s27, %s20431_s5  ;;  %p20437_p9 = scmp.lt.s32.totalorder %s20431_s5, %s20431_s5 }
  0x54   :  { %p20438_p10 = por %p20437_p9, %p20436_p8 }
  0x56   :  { %p20439_p11 = pnand %p20438_p10, %p20432_p7 }
  0x58   :  { %20442 = shalt.err (!%p20439_p11)
}
  0x59   :  { %s20507_s30 = smov 192   ;;  %s20508_s14 = smov 12  }
  0x5a   :  { %109 = dma.hbm_to_vmem [thread:$0]  %s22207_s9, 6144, %s104_s27, [#allocation11], %s20507_s30, %s20507_s30, %s20508_s14  }
  0x5b   :  { %s20509_s15 = smov [#allocation15]  }
  0x5c   :  { %s125_s16 = sshll.u32 %s20509_s15, 4  ;;  %s126_s16 = int_to_ptr.vmem [resolvable:$true] %s125_s16 }
  0x5d   :  { %s20451_s7 = scalar_lea.vmem %s126_s16, 1024  ;;  %p20456_p13 = scmp.lt.s32.totalorder %s126_s16, %s126_s16 }
  0x5e   :  { %p20452_p12 = scmp.ne.s32.totalorder %s126_s16, %s20451_s7  ;;  %p20457_p0 = scmp.lt.s32.totalorder %s20451_s7, %s20451_s7 }
  0x60   :  { %p20458_p1 = por %p20457_p0, %p20456_p13 }
  0x62   :  { %p20459_p2 = pnand %p20458_p1, %p20452_p12 }
  0x64   :  { %20462 = shalt.err (!%p20459_p2)
}
  0x65   :  { %s20510_s17 = smov 64   ;;  %s20511_s18 = smov 4  }
  0x66   :  { %131 = dma.hbm_to_vmem [thread:$0]  %s22209_s11, 1024, %s126_s16, [#allocation14], %s20510_s17, %s20510_s17, %s20511_s18  }
  0x67   :  { %s20512_s10 = smov [#allocation16]  }
  0x68   :  { %s138_s20 = sshll.u32 %s20512_s10, 4  ;;  %s139_s20 = int_to_ptr.vmem [resolvable:$true] %s138_s20 }
  0x69   :  { %s20471_s9 = scalar_lea.vmem %s139_s20, 16  ;;  %s20475_s21 = scalar_lea.vmem %s139_s20, 32 }
  0x6a   :  { %p20472_p3 = scmp.ne.s32.totalorder %s139_s20, %s20471_s9  ;;  %p20476_p4 = scmp.lt.s32.totalorder %s139_s20, %s139_s20 }
  0x6b   :  { %p20477_p5 = scmp.lt.s32.totalorder %s20475_s21, %s20471_s9 }
  0x6d   :  { %p20478_p6 = por %p20477_p5, %p20476_p4 }
  0x6f   :  { %p20479_p7 = pnand %p20478_p6, %p20472_p3 }
  0x71   :  { %20482 = shalt.err (!%p20479_p7)
}
  0x72   :  { %141 = dma.hbm_to_vmem [thread:$0]  %s22210_s12, 16, %s139_s20, [#allocation17]  }
  0x73   :  { %20483 = dma.done.wait [#allocation3], 98304  }
  0x74   :  { %20484 = vsyncadd [#allocation3], 4294868992 }
  0x75   :  { %20485 = dma.done.wait [#allocation5], 110592  }
  0x76   :  { %20486 = vsyncadd [#allocation5], 4294856704 }
  0x77   :  { %20487 = dma.done.wait [#allocation8], 24640  }
  0x78   :  { %20488 = vsyncadd [#allocation8], 4294942656 }
  0x79   :  { %20489 = dma.done.wait [#allocation11], 6176  }
  0x7a   :  { %20490 = vsyncadd [#allocation11], 4294961120 }
  0x7b   :  { %20491 = dma.done.wait [#allocation14], 1040  }
  0x7c   :  { %20492 = vsyncadd [#allocation14], 4294966256 }
  0x7d   :  { %20493 = dma.done.wait [#allocation17], 16  }
  0x7e   :  { %20494 = vsyncadd [#allocation17], 4294967280  ;;  %v17473_v0 = vld [vmem:[#allocation4 + $0x2a4] ss:$48 sps:$4 sm:$0xff]   ;;  %v17477_v2 = vld [vmem:[#allocation4 + $0x2a0] ss:$48 sps:$4 sm:$0xff]  }
  0x7f   :  { %v17475_v1 = vld [vmem:[#allocation4 + $0x8a4] ss:$48 sps:$4 sm:$0xff]   ;;  %5680 = vmatprep.subr.bf16.mxu0 %v17473_v0  ;;  %v17478_v3 = vld [vmem:[#allocation4 + $0x8a0] ss:$48 sps:$4 sm:$0xff]   ;;  %v977_v50 = vld [vmem:[%s22199_s1 + $0x8] sm:$0xff] }
  0x80   :  { %5733 = vmatprep.subr.bf16.mxu1 %v17475_v1  ;;  %v17479_v4 = vld [vmem:[#allocation4 + $0x244] ss:$48 sps:$4 sm:$0xff]   ;;  %5681 = vmatpush1.bf16.msra.mxu0 %v17477_v2  ;;  %v17483_v6 = vld [vmem:[#allocation4 + $0x240] ss:$48 sps:$4 sm:$0xff]   ;;  %v981_v51 = vld [vmem:[%s22199_s1 + $0x28] sm:$0xff] }
  0x81   :  { %5734 = vmatpush1.bf16.msra.mxu1 %v17478_v3  ;;  %v17481_v5 = vld [vmem:[#allocation4 + $0x844] ss:$48 sps:$4 sm:$0xff]   ;;  %5682 = vmatprep.subr.bf16.mxu0 %v17479_v4  ;;  %v17484_v7 = vld [vmem:[#allocation4 + $0x840] ss:$48 sps:$4 sm:$0xff]   ;;  %v20637_v54 = vcombine.high %v977_v50, %v981_v51 }
  0x82   :  { %5735 = vmatprep.subr.bf16.mxu1 %v17481_v5  ;;  %v17485_v8 = vld [vmem:[#allocation4 + $0x1e4] ss:$48 sps:$4 sm:$0xff]   ;;  %v17489_v10 = vld [vmem:[#allocation4 + $0x1e0] ss:$48 sps:$4 sm:$0xff]  }
  0x83   :  { %v17487_v9 = vld [vmem:[#allocation4 + $0x7e4] ss:$48 sps:$4 sm:$0xff]   ;;  %v17490_v11 = vld [vmem:[#allocation4 + $0x7e0] ss:$48 sps:$4 sm:$0xff]   ;;  %5765 = vmatprep.mubr.bf16.mxu1 %v20637_v54 }
  0x84   :  { %5683 = vmatpush1.bf16.msra.mxu0 %v17483_v6  ;;  %v17491_v12 = vld [vmem:[#allocation4 + $0x184] ss:$48 sps:$4 sm:$0xff]   ;;  %v17495_v14 = vld [vmem:[#allocation4 + $0x180] ss:$48 sps:$4 sm:$0xff]  }
  0x85   :  { %5736 = vmatpush1.bf16.msra.mxu1 %v17484_v7  ;;  %5684 = vmatprep.subr.bf16.mxu0 %v17485_v8  ;;  %v17493_v13 = vld [vmem:[#allocation4 + $0x784] ss:$48 sps:$4 sm:$0xff]   ;;  %v17496_v15 = vld [vmem:[#allocation4 + $0x780] ss:$48 sps:$4 sm:$0xff]  }
  0x86   :  { %5737 = vmatprep.subr.bf16.mxu1 %v17487_v9  ;;  %v17497_v16 = vld [vmem:[#allocation4 + $0x124] ss:$48 sps:$4 sm:$0xff]   ;;  %v17501_v18 = vld [vmem:[#allocation4 + $0x120] ss:$48 sps:$4 sm:$0xff]   ;;  %v20643_v9 = vcombine.low %v977_v50, %v981_v51  ;;  %v20693_v50 = vld [vmem:[%s22199_s1 + $0x38] sm:$0xff] }
  0x87   :  { %v17499_v17 = vld [vmem:[#allocation4 + $0x724] ss:$48 sps:$4 sm:$0xff]   ;;  %v17502_v19 = vld [vmem:[#allocation4 + $0x720] ss:$48 sps:$4 sm:$0xff]  }
  0x88   :  { %5685 = vmatpush1.bf16.msra.mxu0 %v17489_v10  ;;  %v17503_v20 = vld [vmem:[#allocation4 + $0xc4] ss:$48 sps:$4 sm:$0xff]   ;;  %v17507_v22 = vld [vmem:[#allocation4 + $0xc0] ss:$48 sps:$4 sm:$0xff]  }
  0x89   :  { %5738 = vmatpush1.bf16.msra.mxu1 %v17490_v11  ;;  %5686 = vmatprep.subr.bf16.mxu0 %v17491_v12  ;;  %v17505_v21 = vld [vmem:[#allocation4 + $0x6c4] ss:$48 sps:$4 sm:$0xff]   ;;  %v17508_v23 = vld [vmem:[#allocation4 + $0x6c0] ss:$48 sps:$4 sm:$0xff]  }
  0x8a   :  { %5739 = vmatprep.subr.bf16.mxu1 %v17493_v13  ;;  %v17509_v24 = vld [vmem:[#allocation4 + $0x64] ss:$48 sps:$4 sm:$0xff]   ;;  %v17513_v26 = vld [vmem:[#allocation4 + $0x60] ss:$48 sps:$4 sm:$0xff]  }
  0x8b   :  { %v17511_v25 = vld [vmem:[#allocation4 + $0x664] ss:$48 sps:$4 sm:$0xff]   ;;  %v17514_v27 = vld [vmem:[#allocation4 + $0x660] ss:$48 sps:$4 sm:$0xff]  }
  0x8c   :  { %5687 = vmatpush1.bf16.msra.mxu0 %v17495_v14  ;;  %v17515_v28 = vld [vmem:[#allocation4 + $0x4] ss:$48 sps:$4 sm:$0xff]   ;;  %v17519_v30 = vld [vmem:[#allocation4] ss:$48 sps:$4 sm:$0xff]  }
  0x8d   :  { %5740 = vmatpush1.bf16.msra.mxu1 %v17496_v15  ;;  %5688 = vmatprep.subr.bf16.mxu0 %v17497_v16  ;;  %v17517_v29 = vld [vmem:[#allocation4 + $0x604] ss:$48 sps:$4 sm:$0xff]   ;;  %v17520_v31 = vld [vmem:[#allocation4 + $0x600] ss:$48 sps:$4 sm:$0xff]  }
  0x8e   :  { %5741 = vmatprep.subr.bf16.mxu1 %v17499_v17  ;;  %v17521_v32 = vld [vmem:[#allocation4 + $0x5a4] ss:$48 sps:$4 sm:$0xff]   ;;  %v17525_v34 = vld [vmem:[#allocation4 + $0x5a0] ss:$48 sps:$4 sm:$0xff]  }
  0x8f   :  { %v17523_v33 = vld [vmem:[#allocation4 + $0xba4] ss:$48 sps:$4 sm:$0xff]   ;;  %v17526_v35 = vld [vmem:[#allocation4 + $0xba0] ss:$48 sps:$4 sm:$0xff]  }
  0x90   :  { %5689 = vmatpush1.bf16.msra.mxu0 %v17501_v18  ;;  %v17527_v36 = vld [vmem:[#allocation4 + $0x544] ss:$48 sps:$4 sm:$0xff]   ;;  %v17531_v38 = vld [vmem:[#allocation4 + $0x540] ss:$48 sps:$4 sm:$0xff]  }
  0x91   :  { %5742 = vmatpush1.bf16.msra.mxu1 %v17502_v19  ;;  %5690 = vmatprep.subr.bf16.mxu0 %v17503_v20  ;;  %v17529_v37 = vld [vmem:[#allocation4 + $0xb44] ss:$48 sps:$4 sm:$0xff]   ;;  %v17532_v39 = vld [vmem:[#allocation4 + $0xb40] ss:$48 sps:$4 sm:$0xff]  }
  0x92   :  { %5743 = vmatprep.subr.bf16.mxu1 %v17505_v21  ;;  %v17533_v40 = vld [vmem:[#allocation4 + $0x4e4] ss:$48 sps:$4 sm:$0xff]   ;;  %v17537_v42 = vld [vmem:[#allocation4 + $0x4e0] ss:$48 sps:$4 sm:$0xff]  }
  0x93   :  { %v17535_v41 = vld [vmem:[#allocation4 + $0xae4] ss:$48 sps:$4 sm:$0xff]   ;;  %v17538_v43 = vld [vmem:[#allocation4 + $0xae0] ss:$48 sps:$4 sm:$0xff]  }
  0x94   :  { %5691 = vmatpush1.bf16.msra.mxu0 %v17507_v22  ;;  %v17539_v44 = vld [vmem:[#allocation4 + $0x484] ss:$48 sps:$4 sm:$0xff]   ;;  %v17543_v46 = vld [vmem:[#allocation4 + $0x480] ss:$48 sps:$4 sm:$0xff]  }
  0x95   :  { %5744 = vmatpush1.bf16.msra.mxu1 %v17508_v23  ;;  %5692 = vmatprep.subr.bf16.mxu0 %v17509_v24  ;;  %v17541_v45 = vld [vmem:[#allocation4 + $0xa84] ss:$48 sps:$4 sm:$0xff]   ;;  %v17544_v47 = vld [vmem:[#allocation4 + $0xa80] ss:$48 sps:$4 sm:$0xff]  }
  0x96   :  { %5745 = vmatprep.subr.bf16.mxu1 %v17511_v25  ;;  %v976_v48 = vld [vmem:[%s22199_s1] sm:$0xff] }
  0x97   :  { %v980_v49 = vld [vmem:[%s22199_s1 + $0x20] sm:$0xff] }
  0x98   :  { %5693 = vmatpush1.bf16.msra.mxu0 %v17513_v26  ;;  %v17545_v52 = vld [vmem:[#allocation4 + $0x424] ss:$48 sps:$4 sm:$0xff]   ;;  %v20635_v53 = vcombine.high %v976_v48, %v980_v49  ;;  %v17549_v56 = vld [vmem:[#allocation4 + $0x420] ss:$48 sps:$4 sm:$0xff]   ;;  %v20641_v8 = vcombine.low %v976_v48, %v980_v49  ;;  %v20684_v48 = vld [vmem:[%s22199_s1 + $0x18] sm:$0xff] }
  0x99   :  { %5746 = vmatpush1.bf16.msra.mxu1 %v17514_v27  ;;  %5694 = vmatprep.subr.bf16.mxu0 %v17515_v28  ;;  %v17547_v55 = vld [vmem:[#allocation4 + $0xa24] ss:$48 sps:$4 sm:$0xff]   ;;  %v17550_v57 = vld [vmem:[#allocation4 + $0xa20] ss:$48 sps:$4 sm:$0xff]   ;;  %v20697_v51 = vcombine.high %v20684_v48, %v20693_v50 }
  0x9a   :  { %5747 = vmatprep.subr.bf16.mxu1 %v17517_v29  ;;  %5712 = vmatprep.mubr.bf16.mxu0 %v20635_v53  ;;  %v17551_v58 = vld [vmem:[#allocation4 + $0x3c4] ss:$48 sps:$4 sm:$0xff]   ;;  %v17555_v60 = vld [vmem:[#allocation4 + $0x3c0] ss:$48 sps:$4 sm:$0xff]  }
  0x9b   :  { %v17553_v59 = vld [vmem:[#allocation4 + $0x9c4] ss:$48 sps:$4 sm:$0xff]   ;;  %v17556_v61 = vld [vmem:[#allocation4 + $0x9c0] ss:$48 sps:$4 sm:$0xff]  }
  0x9c   :  { %5695 = vmatpush1.bf16.msra.mxu0 %v17519_v30  ;;  %v17557_v62 = vld [vmem:[#allocation4 + $0x364] ss:$48 sps:$4 sm:$0xff]   ;;  %v17561_v0 = vld [vmem:[#allocation4 + $0x360] ss:$48 sps:$4 sm:$0xff]   ;;  %v985_v30 = vld [vmem:[%s22199_s1 + $0x48] sm:$0xff] }
  0x9d   :  { %5748 = vmatpush1.bf16.msra.mxu1 %v17520_v31  ;;  %5696 = vmatprep.subr.bf16.mxu0 %v17521_v32  ;;  %v17559_v63 = vld [vmem:[#allocation4 + $0x964] ss:$48 sps:$4 sm:$0xff]   ;;  %v17562_v1 = vld [vmem:[#allocation4 + $0x960] ss:$48 sps:$4 sm:$0xff]   ;;  %v989_v31 = vld [vmem:[%s22199_s1 + $0x68] sm:$0xff] }
  0x9e   :  { %5749 = vmatprep.subr.bf16.mxu1 %v17523_v33  ;;  %v17563_v2 = vld [vmem:[#allocation4 + $0x304] ss:$48 sps:$4 sm:$0xff]   ;;  %v17567_v4 = vld [vmem:[#allocation4 + $0x300] ss:$48 sps:$4 sm:$0xff]  }
  0x9f   :  { %v17565_v3 = vld [vmem:[#allocation4 + $0x904] ss:$48 sps:$4 sm:$0xff]   ;;  %v17568_v5 = vld [vmem:[#allocation4 + $0x900] ss:$48 sps:$4 sm:$0xff]  }
  0xa0   :  { %5697 = vmatpush2.bf16.msra.mxu0 %v17525_v34  ;;  %v17571_v6 = vld [vmem:[#allocation4 + $0xea4] ss:$48 sps:$4 sm:$0xff]   ;;  %v17569_v10 = vld [vmem:[#allocation4 + $0xea0] ss:$48 sps:$4 sm:$0xff]   ;;  %v20661_v34 = vcombine.high %v985_v30, %v989_v31 }
  0xa1   :  { %5750 = vmatpush2.bf16.msra.mxu1 %v17526_v35  ;;  %5698 = vmatprep.subr.bf16.mxu0 %v17527_v36  ;;  %v17574_v7 = vld [vmem:[#allocation4 + $0x14a4] ss:$48 sps:$4 sm:$0xff]   ;;  %v17572_v11 = vld [vmem:[#allocation4 + $0x14a0] ss:$48 sps:$4 sm:$0xff]  }
  0xa2   :  { %5751 = vmatprep.subr.bf16.mxu1 %v17529_v37  ;;  %v17577_v12 = vld [vmem:[#allocation4 + $0xe44] ss:$48 sps:$4 sm:$0xff]   ;;  %v17575_v14 = vld [vmem:[#allocation4 + $0xe40] ss:$48 sps:$4 sm:$0xff]   ;;  %v20665_v37 = vcombine.low %v985_v30, %v989_v31 }
  0xa3   :  { %v17580_v13 = vld [vmem:[#allocation4 + $0x1444] ss:$48 sps:$4 sm:$0xff]   ;;  %v17578_v15 = vld [vmem:[#allocation4 + $0x1440] ss:$48 sps:$4 sm:$0xff]  }
  0xa4   :  { %5699 = vmatpush2.bf16.msra.mxu0 %v17531_v38  ;;  %v17583_v16 = vld [vmem:[#allocation4 + $0xde4] ss:$48 sps:$4 sm:$0xff]   ;;  %v17581_v18 = vld [vmem:[#allocation4 + $0xde0] ss:$48 sps:$4 sm:$0xff]  }
  0xa5   :  { %5752 = vmatpush2.bf16.msra.mxu1 %v17532_v39  ;;  %5700 = vmatprep.subr.bf16.mxu0 %v17533_v40  ;;  %v17586_v17 = vld [vmem:[#allocation4 + $0x13e4] ss:$48 sps:$4 sm:$0xff]   ;;  %v17584_v19 = vld [vmem:[#allocation4 + $0x13e0] ss:$48 sps:$4 sm:$0xff]  }
  0xa6   :  { %5753 = vmatprep.subr.bf16.mxu1 %v17535_v41  ;;  %v17589_v20 = vld [vmem:[#allocation4 + $0xd84] ss:$48 sps:$4 sm:$0xff]   ;;  %v17587_v22 = vld [vmem:[#allocation4 + $0xd80] ss:$48 sps:$4 sm:$0xff]  }
  0xa7   :  { %v17592_v21 = vld [vmem:[#allocation4 + $0x1384] ss:$48 sps:$4 sm:$0xff]   ;;  %v17590_v23 = vld [vmem:[#allocation4 + $0x1380] ss:$48 sps:$4 sm:$0xff]  }
  0xa8   :  { %5701 = vmatpush2.bf16.msra.mxu0 %v17537_v42  ;;  %v17595_v24 = vld [vmem:[#allocation4 + $0xd24] ss:$48 sps:$4 sm:$0xff]   ;;  %v17593_v26 = vld [vmem:[#allocation4 + $0xd20] ss:$48 sps:$4 sm:$0xff]  }
  0xa9   :  { %5754 = vmatpush2.bf16.msra.mxu1 %v17538_v43  ;;  %5702 = vmatprep.subr.bf16.mxu0 %v17539_v44  ;;  %v17598_v25 = vld [vmem:[#allocation4 + $0x1324] ss:$48 sps:$4 sm:$0xff]   ;;  %v17596_v27 = vld [vmem:[#allocation4 + $0x1320] ss:$48 sps:$4 sm:$0xff]  }
  0xaa   :  { %5755 = vmatprep.subr.bf16.mxu1 %v17541_v45  ;;  %v984_v28 = vld [vmem:[%s22199_s1 + $0x40] sm:$0xff]  ;;  %v986_v30 = vld [vmem:[%s22199_s1 + $0x50] sm:$0xff] }
  0xab   :  { %v988_v29 = vld [vmem:[%s22199_s1 + $0x60] sm:$0xff]  ;;  %v990_v31 = vld [vmem:[%s22199_s1 + $0x70] sm:$0xff] }
  0xac   :  { %5703 = vmatpush2.bf16.msra.mxu0 %v17543_v46  ;;  %v17601_v32 = vld [vmem:[#allocation4 + $0xcc4] ss:$48 sps:$4 sm:$0xff]   ;;  %v20659_v33 = vcombine.high %v984_v28, %v988_v29  ;;  %v20663_v35 = vcombine.low %v984_v28, %v988_v29  ;;  %v17599_v38 = vld [vmem:[#allocation4 + $0xcc0] ss:$48 sps:$4 sm:$0xff]   ;;  %v17665_v28 = vld [vmem:[#allocation4 + $0x2a8] ss:$48 sps:$4 sm:$0xff]  }
  0xad   :  { %5756 = vmatpush2.bf16.msra.mxu1 %v17544_v47  ;;  %5704 = vmatprep.subr.bf16.mxu0 %v17545_v52  ;;  %v17604_v36 = vld [vmem:[#allocation4 + $0x12c4] ss:$48 sps:$4 sm:$0xff]   ;;  %v17602_v39 = vld [vmem:[#allocation4 + $0x12c0] ss:$48 sps:$4 sm:$0xff]   ;;  %v17668_v29 = vld [vmem:[#allocation4 + $0x8a8] ss:$48 sps:$4 sm:$0xff]  }
  0xae   :  { %5757 = vmatprep.subr.bf16.mxu1 %v17547_v55  ;;  %v17607_v40 = vld [vmem:[#allocation4 + $0xc64] ss:$48 sps:$4 sm:$0xff]   ;;  %v17605_v42 = vld [vmem:[#allocation4 + $0xc60] ss:$48 sps:$4 sm:$0xff]  }
  0xaf   :  { %v17610_v41 = vld [vmem:[#allocation4 + $0x1264] ss:$48 sps:$4 sm:$0xff]   ;;  %v17608_v43 = vld [vmem:[#allocation4 + $0x1260] ss:$48 sps:$4 sm:$0xff]  }
  0xb0   :  { %5705 = vmatpush2.bf16.msra.mxu0 %v17549_v56  ;;  %v17613_v44 = vld [vmem:[#allocation4 + $0xc04] ss:$48 sps:$4 sm:$0xff]   ;;  %v17611_v52 = vld [vmem:[#allocation4 + $0xc00] ss:$48 sps:$4 sm:$0xff]  }
  0xb1   :  { %5758 = vmatpush2.bf16.msra.mxu1 %v17550_v57  ;;  %5706 = vmatprep.subr.bf16.mxu0 %v17551_v58  ;;  %v17616_v45 = vld [vmem:[#allocation4 + $0x1204] ss:$48 sps:$4 sm:$0xff]   ;;  %v17614_v55 = vld [vmem:[#allocation4 + $0x1200] ss:$48 sps:$4 sm:$0xff]  }
  0xb2   :  { %5759 = vmatprep.subr.bf16.mxu1 %v17553_v59  ;;  %v20674_v46 = vld [vmem:[%s22199_s1 + $0x10] sm:$0xff] }
  0xb3   :  { %v20679_v47 = vld [vmem:[%s22199_s1 + $0x30] sm:$0xff] }
  0xb4   :  { %5707 = vmatpush2.bf16.msra.mxu0 %v17555_v60  ;;  %v20688_v49 = vcombine.high %v20674_v46, %v20679_v47  ;;  %v17619_v56 = vld [vmem:[#allocation4 + $0x11a4] ss:$48 sps:$4 sm:$0xff]   ;;  %v17617_v58 = vld [vmem:[#allocation4 + $0x11a0] ss:$48 sps:$4 sm:$0xff]  }
  0xb5   :  { %5760 = vmatpush2.bf16.msra.mxu1 %v17556_v61  ;;  %5708 = vmatprep.subr.bf16.mxu0 %v17557_v62  ;;  %v17622_v57 = vld [vmem:[#allocation4 + $0x17a4] ss:$48 sps:$4 sm:$0xff]   ;;  %v17620_v59 = vld [vmem:[#allocation4 + $0x17a0] ss:$48 sps:$4 sm:$0xff]  }
  0xb6   :  { %5761 = vmatprep.subr.bf16.mxu1 %v17559_v63  ;;  %v17625_v60 = vld [vmem:[#allocation4 + $0x1144] ss:$48 sps:$4 sm:$0xff]   ;;  %v17623_v62 = vld [vmem:[#allocation4 + $0x1140] ss:$48 sps:$4 sm:$0xff]  }
  0xb7   :  { %v17628_v61 = vld [vmem:[#allocation4 + $0x1744] ss:$48 sps:$4 sm:$0xff]   ;;  %v17626_v63 = vld [vmem:[#allocation4 + $0x1740] ss:$48 sps:$4 sm:$0xff]  }
  0xb8   :  { %5709 = vmatpush2.bf16.msra.mxu0 %v17561_v0  ;;  %v17631_v0 = vld [vmem:[#allocation4 + $0x10e4] ss:$48 sps:$4 sm:$0xff]  }
  0xb9   :  { %5762 = vmatpush2.bf16.msra.mxu1 %v17562_v1  ;;  %5710 = vmatprep.subr.bf16.mxu0 %v17563_v2  ;;  %v17634_v1 = vld [vmem:[#allocation4 + $0x16e4] ss:$48 sps:$4 sm:$0xff]   ;;  %v17629_v2 = vld [vmem:[#allocation4 + $0x10e0] ss:$48 sps:$4 sm:$0xff]  }
  0xba   :  { %5763 = vmatprep.subr.bf16.mxu1 %v17565_v3  ;;  %v17632_v3 = vld [vmem:[#allocation4 + $0x16e0] ss:$48 sps:$4 sm:$0xff]  }
  0xbc   :  { %5711 = vmatpush2.bf16.msra.mxu0 %v17567_v4  ;;  %v17637_v4 = vld [vmem:[#allocation4 + $0x1084] ss:$48 sps:$4 sm:$0xff]  }
  0xbd   :  { %5764 = vmatpush2.bf16.msra.mxu1 %v17568_v5  ;;  %5786 = vmatprep.subr.bf16.mxu0 %v17571_v6  ;;  %v17640_v5 = vld [vmem:[#allocation4 + $0x1684] ss:$48 sps:$4 sm:$0xff]   ;;  %v17635_v6 = vld [vmem:[#allocation4 + $0x1080] ss:$48 sps:$4 sm:$0xff]  }
  0xbe   :  { %5839 = vmatprep.subr.bf16.mxu1 %v17574_v7  ;;  %v17638_v7 = vld [vmem:[#allocation4 + $0x1680] ss:$48 sps:$4 sm:$0xff]  }
  0xbf   :  { %5713 = vmatmul.mubr.bf16.vlgmr.msra.gmra.mxu0 %v20641_v8 }
  0xc0   :  { %5766 = vmatmul.mubr.bf16.vlgmr.msra.gmra.mxu1 %v20643_v9  ;;  %5787 = vmatpush1.bf16.msra.mxu0 %v17569_v10  ;;  %v17643_v10 = vld [vmem:[#allocation4 + $0x1024] ss:$48 sps:$4 sm:$0xff]  }
  0xc1   :  { %5840 = vmatpush1.bf16.msra.mxu1 %v17572_v11  ;;  %5788 = vmatprep.subr.bf16.mxu0 %v17577_v12  ;;  %v17646_v11 = vld [vmem:[#allocation4 + $0x1624] ss:$48 sps:$4 sm:$0xff]   ;;  %v17641_v12 = vld [vmem:[#allocation4 + $0x1020] ss:$48 sps:$4 sm:$0xff]  }
  0xc2   :  { %5841 = vmatprep.subr.bf16.mxu1 %v17580_v13  ;;  %5722 = vmatprep.mubr.bf16.mxu0 %v20659_v33  ;;  %v17644_v13 = vld [vmem:[#allocation4 + $0x1620] ss:$48 sps:$4 sm:$0xff]  }
  0xc3   :  { %5775 = vmatprep.mubr.bf16.mxu1 %v20661_v34 }
  0xc4   :  { %5789 = vmatpush1.bf16.msra.mxu0 %v17575_v14  ;;  %v17649_v14 = vld [vmem:[#allocation4 + $0xfc4] ss:$48 sps:$4 sm:$0xff]  }
  0xc5   :  { %5842 = vmatpush1.bf16.msra.mxu1 %v17578_v15  ;;  %5790 = vmatprep.subr.bf16.mxu0 %v17583_v16  ;;  %v17652_v15 = vld [vmem:[#allocation4 + $0x15c4] ss:$48 sps:$4 sm:$0xff]   ;;  %v17647_v16 = vld [vmem:[#allocation4 + $0xfc0] ss:$48 sps:$4 sm:$0xff]  }
  0xc6   :  { %5843 = vmatprep.subr.bf16.mxu1 %v17586_v17  ;;  %v17650_v17 = vld [vmem:[#allocation4 + $0x15c0] ss:$48 sps:$4 sm:$0xff]  }
  0xc7   :  { %5723 = vmatmul.mubr.bf16.gmra.mxu0 %v20663_v35 }
  0xc8   :  { %5791 = vmatpush1.bf16.msra.mxu0 %v17581_v18  ;;  %5776 = vmatmul.mubr.bf16.gmra.mxu1 %v20665_v37  ;;  %v17655_v18 = vld [vmem:[#allocation4 + $0xf64] ss:$48 sps:$4 sm:$0xff]  }
  0xc9   :  { %5844 = vmatpush1.bf16.msra.mxu1 %v17584_v19  ;;  %5792 = vmatprep.subr.bf16.mxu0 %v17589_v20  ;;  %v17658_v19 = vld [vmem:[#allocation4 + $0x1564] ss:$48 sps:$4 sm:$0xff]   ;;  %v17653_v20 = vld [vmem:[#allocation4 + $0xf60] ss:$48 sps:$4 sm:$0xff]  }
  0xca   :  { %5845 = vmatprep.subr.bf16.mxu1 %v17592_v21  ;;  %5818 = vmatprep.mubr.bf16.mxu0 %v20688_v49  ;;  %v17656_v21 = vld [vmem:[#allocation4 + $0x1560] ss:$48 sps:$4 sm:$0xff]  }
  0xcb   :  { %5871 = vmatprep.mubr.bf16.mxu1 %v20697_v51 }
  0xcc   :  { %5793 = vmatpush1.bf16.msra.mxu0 %v17587_v22  ;;  %v17661_v22 = vld [vmem:[#allocation4 + $0xf04] ss:$48 sps:$4 sm:$0xff]  }
  0xcd   :  { %5846 = vmatpush1.bf16.msra.mxu1 %v17590_v23  ;;  %5794 = vmatprep.subr.bf16.mxu0 %v17595_v24  ;;  %v17664_v23 = vld [vmem:[#allocation4 + $0x1504] ss:$48 sps:$4 sm:$0xff]   ;;  %v17659_v24 = vld [vmem:[#allocation4 + $0xf00] ss:$48 sps:$4 sm:$0xff]  }
  0xce   :  { %5847 = vmatprep.subr.bf16.mxu1 %v17598_v25  ;;  %v17662_v25 = vld [vmem:[#allocation4 + $0x1500] ss:$48 sps:$4 sm:$0xff]  }
  0xd0   :  { %5795 = vmatpush1.bf16.msra.mxu0 %v17593_v26  ;;  %v17667_v26 = vld [vmem:[#allocation4 + $0x2ac] ss:$48 sps:$4 sm:$0xff]  }
  0xd1   :  { %5848 = vmatpush1.bf16.msra.mxu1 %v17596_v27  ;;  %5796 = vmatprep.subr.bf16.mxu0 %v17601_v32  ;;  %v17670_v27 = vld [vmem:[#allocation4 + $0x8ac] ss:$48 sps:$4 sm:$0xff]   ;;  %v20709_v32 = vcombine.low %v20674_v46, %v20679_v47 }
  0xd2   :  { %5849 = vmatprep.subr.bf16.mxu1 %v17604_v36  ;;  %v20713_v36 = vcombine.low %v20684_v48, %v20693_v50  ;;  %v17679_v46 = vld [vmem:[#allocation4 + $0x1ec] ss:$48 sps:$4 sm:$0xff]   ;;  %v20729_v48 = vcombine.low %v986_v30, %v990_v31  ;;  %v17677_v50 = vld [vmem:[#allocation4 + $0x1e8] ss:$48 sps:$4 sm:$0xff]  }
  0xd3   :  { %v17682_v47 = vld [vmem:[#allocation4 + $0x7ec] ss:$48 sps:$4 sm:$0xff]  }
  0xd4   :  { %5797 = vmatpush1.bf16.msra.mxu0 %v17599_v38  ;;  %v987_v38 = vld [vmem:[%s22199_s1 + $0x58] sm:$0xff] }
  0xd5   :  { %5850 = vmatpush1.bf16.msra.mxu1 %v17602_v39  ;;  %5798 = vmatprep.subr.bf16.mxu0 %v17607_v40  ;;  %v991_v39 = vld [vmem:[%s22199_s1 + $0x78] sm:$0xff] }
  0xd6   :  { %5851 = vmatprep.subr.bf16.mxu1 %v17610_v41  ;;  %v17673_v40 = vld [vmem:[#allocation4 + $0x24c] ss:$48 sps:$4 sm:$0xff]  }
  0xd7   :  { %v17676_v41 = vld [vmem:[#allocation4 + $0x84c] ss:$48 sps:$4 sm:$0xff]  }
  0xd8   :  { %5799 = vmatpush1.bf16.msra.mxu0 %v17605_v42  ;;  %v20721_v42 = vcombine.high %v986_v30, %v990_v31  ;;  %v17739_v30 = vld [vmem:[#allocation4 + $0x42c] ss:$48 sps:$4 sm:$0xff]  }
  0xd9   :  { %5852 = vmatpush1.bf16.msra.mxu1 %v17608_v43  ;;  %5800 = vmatprep.subr.bf16.mxu0 %v17613_v44  ;;  %v20723_v43 = vcombine.high %v987_v38, %v991_v39  ;;  %v17671_v44 = vld [vmem:[#allocation4 + $0x248] ss:$48 sps:$4 sm:$0xff]   ;;  %v17742_v31 = vld [vmem:[#allocation4 + $0xa2c] ss:$48 sps:$4 sm:$0xff]  }
  0xda   :  { %5853 = vmatprep.subr.bf16.mxu1 %v17616_v45  ;;  %v17674_v45 = vld [vmem:[#allocation4 + $0x848] ss:$48 sps:$4 sm:$0xff]  }
  0xdc   :  { %5801 = vmatpush1.bf16.msra.mxu0 %v17611_v52  ;;  %v17680_v52 = vld [vmem:[#allocation4 + $0x7e8] ss:$48 sps:$4 sm:$0xff]  }
  0xdd   :  { %5854 = vmatpush1.bf16.msra.mxu1 %v17614_v55  ;;  %5802 = vmatprep.subr.bf16.mxu0 %v17619_v56  ;;  %v20731_v55 = vcombine.low %v987_v38, %v991_v39  ;;  %v17685_v56 = vld [vmem:[#allocation4 + $0x18c] ss:$48 sps:$4 sm:$0xff]   ;;  %v17737_v38 = vld [vmem:[#allocation4 + $0x428] ss:$48 sps:$4 sm:$0xff]  }
  0xde   :  { %5855 = vmatprep.subr.bf16.mxu1 %v17622_v57  ;;  %v17688_v57 = vld [vmem:[#allocation4 + $0x78c] ss:$48 sps:$4 sm:$0xff]   ;;  %v17740_v39 = vld [vmem:[#allocation4 + $0xa28] ss:$48 sps:$4 sm:$0xff]  }
  0xe0   :  { %5803 = vmatpush2.bf16.msra.mxu0 %v17617_v58  ;;  %v17683_v58 = vld [vmem:[#allocation4 + $0x188] ss:$48 sps:$4 sm:$0xff]  }
  0xe1   :  { %5856 = vmatpush2.bf16.msra.mxu1 %v17620_v59  ;;  %5804 = vmatprep.subr.bf16.mxu0 %v17625_v60  ;;  %v17686_v59 = vld [vmem:[#allocation4 + $0x788] ss:$48 sps:$4 sm:$0xff]   ;;  %v17691_v60 = vld [vmem:[#allocation4 + $0x12c] ss:$48 sps:$4 sm:$0xff]  }
  0xe2   :  { %5857 = vmatprep.subr.bf16.mxu1 %v17628_v61  ;;  %v17694_v61 = vld [vmem:[#allocation4 + $0x72c] ss:$48 sps:$4 sm:$0xff]  }
  0xe4   :  { %5805 = vmatpush2.bf16.msra.mxu0 %v17623_v62  ;;  %v17689_v62 = vld [vmem:[#allocation4 + $0x128] ss:$48 sps:$4 sm:$0xff]  }
  0xe5   :  { %5858 = vmatpush2.bf16.msra.mxu1 %v17626_v63  ;;  %5806 = vmatprep.subr.bf16.mxu0 %v17631_v0  ;;  %v17692_v63 = vld [vmem:[#allocation4 + $0x728] ss:$48 sps:$4 sm:$0xff]   ;;  %v17697_v0 = vld [vmem:[#allocation4 + $0xcc] ss:$48 sps:$4 sm:$0xff]  }
  0xe6   :  { %5859 = vmatprep.subr.bf16.mxu1 %v17634_v1  ;;  %v17700_v1 = vld [vmem:[#allocation4 + $0x6cc] ss:$48 sps:$4 sm:$0xff]  }
  0xe8   :  { %5807 = vmatpush2.bf16.msra.mxu0 %v17629_v2  ;;  %v17695_v2 = vld [vmem:[#allocation4 + $0xc8] ss:$48 sps:$4 sm:$0xff]  }
  0xe9   :  { %5860 = vmatpush2.bf16.msra.mxu1 %v17632_v3  ;;  %5808 = vmatprep.subr.bf16.mxu0 %v17637_v4  ;;  %v17698_v3 = vld [vmem:[#allocation4 + $0x6c8] ss:$48 sps:$4 sm:$0xff]   ;;  %v17703_v4 = vld [vmem:[#allocation4 + $0x6c] ss:$48 sps:$4 sm:$0xff]  }
  0xea   :  { %5861 = vmatprep.subr.bf16.mxu1 %v17640_v5  ;;  %v17706_v5 = vld [vmem:[#allocation4 + $0x66c] ss:$48 sps:$4 sm:$0xff]  }
  0xec   :  { %5809 = vmatpush2.bf16.msra.mxu0 %v17635_v6  ;;  %v17701_v6 = vld [vmem:[#allocation4 + $0x68] ss:$48 sps:$4 sm:$0xff]  }
  0xed   :  { %5862 = vmatpush2.bf16.msra.mxu1 %v17638_v7  ;;  %5810 = vmatprep.subr.bf16.mxu0 %v17643_v10  ;;  %v17704_v7 = vld [vmem:[#allocation4 + $0x668] ss:$48 sps:$4 sm:$0xff]   ;;  %v17709_v10 = vld [vmem:[#allocation4 + $0xc] ss:$48 sps:$4 sm:$0xff]  }
  0xee   :  { %5863 = vmatprep.subr.bf16.mxu1 %v17646_v11  ;;  %v17712_v11 = vld [vmem:[#allocation4 + $0x60c] ss:$48 sps:$4 sm:$0xff]  }
  0xf0   :  { %5811 = vmatpush2.bf16.msra.mxu0 %v17641_v12  ;;  %v17707_v12 = vld [vmem:[#allocation4 + $0x8] ss:$48 sps:$4 sm:$0xff]  }
  0xf1   :  { %5864 = vmatpush2.bf16.msra.mxu1 %v17644_v13  ;;  %5812 = vmatprep.subr.bf16.mxu0 %v17649_v14  ;;  %v17710_v13 = vld [vmem:[#allocation4 + $0x608] ss:$48 sps:$4 sm:$0xff]   ;;  %v17715_v14 = vld [vmem:[#allocation4 + $0x5ac] ss:$48 sps:$4 sm:$0xff]  }
  0xf2   :  { %5865 = vmatprep.subr.bf16.mxu1 %v17652_v15  ;;  %v17718_v15 = vld [vmem:[#allocation4 + $0xbac] ss:$48 sps:$4 sm:$0xff]  }
  0xf4   :  { %5813 = vmatpush2.bf16.msra.mxu0 %v17647_v16  ;;  %v17713_v16 = vld [vmem:[#allocation4 + $0x5a8] ss:$48 sps:$4 sm:$0xff]  }
  0xf5   :  { %5866 = vmatpush2.bf16.msra.mxu1 %v17650_v17  ;;  %5814 = vmatprep.subr.bf16.mxu0 %v17655_v18  ;;  %v17716_v17 = vld [vmem:[#allocation4 + $0xba8] ss:$48 sps:$4 sm:$0xff]   ;;  %v17721_v18 = vld [vmem:[#allocation4 + $0x54c] ss:$48 sps:$4 sm:$0xff]  }
  0xf6   :  { %5867 = vmatprep.subr.bf16.mxu1 %v17658_v19  ;;  %v17724_v19 = vld [vmem:[#allocation4 + $0xb4c] ss:$48 sps:$4 sm:$0xff]  }
  0xf8   :  { %5815 = vmatpush2.bf16.msra.mxu0 %v17653_v20  ;;  %v17719_v20 = vld [vmem:[#allocation4 + $0x548] ss:$48 sps:$4 sm:$0xff]  }
  0xf9   :  { %5868 = vmatpush2.bf16.msra.mxu1 %v17656_v21  ;;  %5816 = vmatprep.subr.bf16.mxu0 %v17661_v22  ;;  %v17722_v21 = vld [vmem:[#allocation4 + $0xb48] ss:$48 sps:$4 sm:$0xff]   ;;  %v17727_v22 = vld [vmem:[#allocation4 + $0x4ec] ss:$48 sps:$4 sm:$0xff]  }
  0xfa   :  { %5869 = vmatprep.subr.bf16.mxu1 %v17664_v23  ;;  %v17730_v23 = vld [vmem:[#allocation4 + $0xaec] ss:$48 sps:$4 sm:$0xff]  }
  0xfc   :  { %5817 = vmatpush2.bf16.msra.mxu0 %v17659_v24  ;;  %v17725_v24 = vld [vmem:[#allocation4 + $0x4e8] ss:$48 sps:$4 sm:$0xff]  }
  0xfd   :  { %5870 = vmatpush2.bf16.msra.mxu1 %v17662_v25  ;;  %5892 = vmatprep.subr.bf16.mxu0 %v17667_v26  ;;  %v17728_v25 = vld [vmem:[#allocation4 + $0xae8] ss:$48 sps:$4 sm:$0xff]   ;;  %v17733_v26 = vld [vmem:[#allocation4 + $0x48c] ss:$48 sps:$4 sm:$0xff]  }
  0xfe   :  { %5945 = vmatprep.subr.bf16.mxu1 %v17670_v27  ;;  %v17736_v27 = vld [vmem:[#allocation4 + $0xa8c] ss:$48 sps:$4 sm:$0xff]  }
  0xff   :  { %5819 = vmatmul.mubr.bf16.vlgmr.msra.gmra.mxu0 %v20709_v32 }
 0x100   :  { %5872 = vmatmul.mubr.bf16.vlgmr.msra.gmra.mxu1 %v20713_v36  ;;  %5893 = vmatpush1.bf16.msra.mxu0 %v17665_v28  ;;  %v17731_v28 = vld [vmem:[#allocation4 + $0x488] ss:$48 sps:$4 sm:$0xff]  }
 0x101   :  { %5946 = vmatpush1.bf16.msra.mxu1 %v17668_v29  ;;  %5894 = vmatprep.subr.bf16.mxu0 %v17673_v40  ;;  %v17734_v29 = vld [vmem:[#allocation4 + $0xa88] ss:$48 sps:$4 sm:$0xff]   ;;  %v17745_v40 = vld [vmem:[#allocation4 + $0x3cc] ss:$48 sps:$4 sm:$0xff]  }
 0x102   :  { %5947 = vmatprep.subr.bf16.mxu1 %v17676_v41  ;;  %5828 = vmatprep.mubr.bf16.mxu0 %v20721_v42  ;;  %v17748_v41 = vld [vmem:[#allocation4 + $0x9cc] ss:$48 sps:$4 sm:$0xff]  }
 0x103   :  { %5881 = vmatprep.mubr.bf16.mxu1 %v20723_v43 }
 0x104   :  { %5895 = vmatpush1.bf16.msra.mxu0 %v17671_v44  ;;  %v17743_v44 = vld [vmem:[#allocation4 + $0x3c8] ss:$48 sps:$4 sm:$0xff]  }
 0x105   :  { %5948 = vmatpush1.bf16.msra.mxu1 %v17674_v45  ;;  %5896 = vmatprep.subr.bf16.mxu0 %v17679_v46  ;;  %v17746_v45 = vld [vmem:[#allocation4 + $0x9c8] ss:$48 sps:$4 sm:$0xff]   ;;  %v17751_v46 = vld [vmem:[#allocation4 + $0x36c] ss:$48 sps:$4 sm:$0xff]  }
 0x106   :  { %5949 = vmatprep.subr.bf16.mxu1 %v17682_v47  ;;  %v17754_v47 = vld [vmem:[#allocation4 + $0x96c] ss:$48 sps:$4 sm:$0xff]  }
 0x107   :  { %5829 = vmatmul.mubr.bf16.gmra.mxu0 %v20729_v48 }
 0x108   :  { %5882 = vmatmul.mubr.bf16.gmra.mxu1 %v20731_v55  ;;  %5897 = vmatpush1.bf16.msra.mxu0 %v17677_v50  ;;  %v17749_v50 = vld [vmem:[#allocation4 + $0x368] ss:$48 sps:$4 sm:$0xff]  }
 0x109   :  { %5950 = vmatpush1.bf16.msra.mxu1 %v17680_v52  ;;  %5898 = vmatprep.subr.bf16.mxu0 %v17685_v56  ;;  %v17752_v52 = vld [vmem:[#allocation4 + $0x968] ss:$48 sps:$4 sm:$0xff]   ;;  %v17757_v56 = vld [vmem:[#allocation4 + $0x30c] ss:$48 sps:$4 sm:$0xff]  }
 0x10a   :  { %5951 = vmatprep.subr.bf16.mxu1 %v17688_v57  ;;  %5924 = vmatprep.mubr.bf16.mxu0 %v20635_v53  ;;  %v17760_v57 = vld [vmem:[#allocation4 + $0x90c] ss:$48 sps:$4 sm:$0xff]  }
 0x10b   :  { %5977 = vmatprep.mubr.bf16.mxu1 %v20637_v54 }
 0x10c   :  { %5899 = vmatpush1.bf16.msra.mxu0 %v17683_v58  ;;  %v17755_v58 = vld [vmem:[#allocation4 + $0x308] ss:$48 sps:$4 sm:$0xff]  }
 0x10d   :  { %5952 = vmatpush1.bf16.msra.mxu1 %v17686_v59  ;;  %5900 = vmatprep.subr.bf16.mxu0 %v17691_v60  ;;  %v17758_v59 = vld [vmem:[#allocation4 + $0x908] ss:$48 sps:$4 sm:$0xff]   ;;  %v17763_v60 = vld [vmem:[#allocation4 + $0xeac] ss:$48 sps:$4 sm:$0xff]  }
 0x10e   :  { %5953 = vmatprep.subr.bf16.mxu1 %v17694_v61  ;;  %v17766_v61 = vld [vmem:[#allocation4 + $0x14ac] ss:$48 sps:$4 sm:$0xff]  }
 0x110   :  { %5901 = vmatpush1.bf16.msra.mxu0 %v17689_v62  ;;  %v17761_v62 = vld [vmem:[#allocation4 + $0xea8] ss:$48 sps:$4 sm:$0xff]  }
 0x111   :  { %5954 = vmatpush1.bf16.msra.mxu1 %v17692_v63  ;;  %5902 = vmatprep.subr.bf16.mxu0 %v17697_v0  ;;  %v17764_v63 = vld [vmem:[#allocation4 + $0x14a8] ss:$48 sps:$4 sm:$0xff]   ;;  %v17769_v0 = vld [vmem:[#allocation4 + $0xe4c] ss:$48 sps:$4 sm:$0xff]  }
 0x112   :  { %5955 = vmatprep.subr.bf16.mxu1 %v17700_v1  ;;  %v17772_v1 = vld [vmem:[#allocation4 + $0x144c] ss:$48 sps:$4 sm:$0xff]  }
 0x114   :  { %5903 = vmatpush1.bf16.msra.mxu0 %v17695_v2  ;;  %v17767_v2 = vld [vmem:[#allocation4 + $0xe48] ss:$48 sps:$4 sm:$0xff]  }
 0x115   :  { %5956 = vmatpush1.bf16.msra.mxu1 %v17698_v3  ;;  %5904 = vmatprep.subr.bf16.mxu0 %v17703_v4  ;;  %v17770_v3 = vld [vmem:[#allocation4 + $0x1448] ss:$48 sps:$4 sm:$0xff]   ;;  %v17775_v4 = vld [vmem:[#allocation4 + $0xdec] ss:$48 sps:$4 sm:$0xff]  }
 0x116   :  { %5957 = vmatprep.subr.bf16.mxu1 %v17706_v5  ;;  %v17778_v5 = vld [vmem:[#allocation4 + $0x13ec] ss:$48 sps:$4 sm:$0xff]  }
 0x118   :  { %5905 = vmatpush1.bf16.msra.mxu0 %v17701_v6  ;;  %v17773_v6 = vld [vmem:[#allocation4 + $0xde8] ss:$48 sps:$4 sm:$0xff]  }
 0x119   :  { %5958 = vmatpush1.bf16.msra.mxu1 %v17704_v7  ;;  %5906 = vmatprep.subr.bf16.mxu0 %v17709_v10  ;;  %v17776_v7 = vld [vmem:[#allocation4 + $0x13e8] ss:$48 sps:$4 sm:$0xff]   ;;  %v17781_v10 = vld [vmem:[#allocation4 + $0xd8c] ss:$48 sps:$4 sm:$0xff]  }
 0x11a   :  { %5959 = vmatprep.subr.bf16.mxu1 %v17712_v11  ;;  %v17784_v11 = vld [vmem:[#allocation4 + $0x138c] ss:$48 sps:$4 sm:$0xff]  }
 0x11c   :  { %5907 = vmatpush1.bf16.msra.mxu0 %v17707_v12  ;;  %v17779_v12 = vld [vmem:[#allocation4 + $0xd88] ss:$48 sps:$4 sm:$0xff]  }
 0x11d   :  { %5960 = vmatpush1.bf16.msra.mxu1 %v17710_v13  ;;  %5908 = vmatprep.subr.bf16.mxu0 %v17715_v14  ;;  %v17782_v13 = vld [vmem:[#allocation4 + $0x1388] ss:$48 sps:$4 sm:$0xff]   ;;  %v17787_v14 = vld [vmem:[#allocation4 + $0xd2c] ss:$48 sps:$4 sm:$0xff]  }
 0x11e   :  { %5961 = vmatprep.subr.bf16.mxu1 %v17718_v15  ;;  %v17790_v15 = vld [vmem:[#allocation4 + $0x132c] ss:$48 sps:$4 sm:$0xff]  }
 0x120   :  { %5909 = vmatpush2.bf16.msra.mxu0 %v17713_v16  ;;  %v17785_v16 = vld [vmem:[#allocation4 + $0xd28] ss:$48 sps:$4 sm:$0xff]  }
 0x121   :  { %5962 = vmatpush2.bf16.msra.mxu1 %v17716_v17  ;;  %5910 = vmatprep.subr.bf16.mxu0 %v17721_v18  ;;  %v17788_v17 = vld [vmem:[#allocation4 + $0x1328] ss:$48 sps:$4 sm:$0xff]   ;;  %v17793_v18 = vld [vmem:[#allocation4 + $0xccc] ss:$48 sps:$4 sm:$0xff]  }
 0x122   :  { %5963 = vmatprep.subr.bf16.mxu1 %v17724_v19  ;;  %v17796_v19 = vld [vmem:[#allocation4 + $0x12cc] ss:$48 sps:$4 sm:$0xff]  }
 0x124   :  { %5911 = vmatpush2.bf16.msra.mxu0 %v17719_v20  ;;  %v17791_v20 = vld [vmem:[#allocation4 + $0xcc8] ss:$48 sps:$4 sm:$0xff]  }
 0x125   :  { %5964 = vmatpush2.bf16.msra.mxu1 %v17722_v21  ;;  %5912 = vmatprep.subr.bf16.mxu0 %v17727_v22  ;;  %v17794_v21 = vld [vmem:[#allocation4 + $0x12c8] ss:$48 sps:$4 sm:$0xff]   ;;  %v17799_v22 = vld [vmem:[#allocation4 + $0xc6c] ss:$48 sps:$4 sm:$0xff]  }
 0x126   :  { %5965 = vmatprep.subr.bf16.mxu1 %v17730_v23  ;;  %v17802_v23 = vld [vmem:[#allocation4 + $0x126c] ss:$48 sps:$4 sm:$0xff]  }
 0x128   :  { %5913 = vmatpush2.bf16.msra.mxu0 %v17725_v24  ;;  %v17797_v24 = vld [vmem:[#allocation4 + $0xc68] ss:$48 sps:$4 sm:$0xff]  }
 0x129   :  { %5966 = vmatpush2.bf16.msra.mxu1 %v17728_v25  ;;  %5914 = vmatprep.subr.bf16.mxu0 %v17733_v26  ;;  %v17800_v25 = vld [vmem:[#allocation4 + $0x1268] ss:$48 sps:$4 sm:$0xff]   ;;  %v17805_v26 = vld [vmem:[#allocation4 + $0xc0c] ss:$48 sps:$4 sm:$0xff]  }
 0x12a   :  { %5967 = vmatprep.subr.bf16.mxu1 %v17736_v27  ;;  %v17808_v27 = vld [vmem:[#allocation4 + $0x120c] ss:$48 sps:$4 sm:$0xff]  }
 0x12c   :  { %5915 = vmatpush2.bf16.msra.mxu0 %v17731_v28  ;;  %v17803_v28 = vld [vmem:[#allocation4 + $0xc08] ss:$48 sps:$4 sm:$0xff]  }
 0x12d   :  { %5968 = vmatpush2.bf16.msra.mxu1 %v17734_v29  ;;  %5916 = vmatprep.subr.bf16.mxu0 %v17739_v30  ;;  %v17806_v29 = vld [vmem:[#allocation4 + $0x1208] ss:$48 sps:$4 sm:$0xff]   ;;  %v17811_v30 = vld [vmem:[#allocation4 + $0x11ac] ss:$48 sps:$4 sm:$0xff]  }
 0x12e   :  { %5969 = vmatprep.subr.bf16.mxu1 %v17742_v31  ;;  %v17814_v31 = vld [vmem:[#allocation4 + $0x17ac] ss:$48 sps:$4 sm:$0xff]  }
 0x130   :  { %5917 = vmatpush2.bf16.msra.mxu0 %v17737_v38  ;;  %v17809_v38 = vld [vmem:[#allocation4 + $0x11a8] ss:$48 sps:$4 sm:$0xff]  }
 0x131   :  { %5970 = vmatpush2.bf16.msra.mxu1 %v17740_v39  ;;  %5918 = vmatprep.subr.bf16.mxu0 %v17745_v40  ;;  %v17812_v39 = vld [vmem:[#allocation4 + $0x17a8] ss:$48 sps:$4 sm:$0xff]   ;;  %v17817_v40 = vld [vmem:[#allocation4 + $0x114c] ss:$48 sps:$4 sm:$0xff]  }
 0x132   :  { %5971 = vmatprep.subr.bf16.mxu1 %v17748_v41  ;;  %v17820_v41 = vld [vmem:[#allocation4 + $0x174c] ss:$48 sps:$4 sm:$0xff]  }
 0x134   :  { %5919 = vmatpush2.bf16.msra.mxu0 %v17743_v44  ;;  %v17815_v44 = vld [vmem:[#allocation4 + $0x1148] ss:$48 sps:$4 sm:$0xff]  }
 0x135   :  { %5972 = vmatpush2.bf16.msra.mxu1 %v17746_v45  ;;  %5920 = vmatprep.subr.bf16.mxu0 %v17751_v46  ;;  %v17818_v45 = vld [vmem:[#allocation4 + $0x1748] ss:$48 sps:$4 sm:$0xff]   ;;  %v17823_v46 = vld [vmem:[#allocation4 + $0x10ec] ss:$48 sps:$4 sm:$0xff]  }
 0x136   :  { %5973 = vmatprep.subr.bf16.mxu1 %v17754_v47  ;;  %v17826_v47 = vld [vmem:[#allocation4 + $0x16ec] ss:$48 sps:$4 sm:$0xff]  }
 0x138   :  { %5921 = vmatpush2.bf16.msra.mxu0 %v17749_v50  ;;  %v17821_v50 = vld [vmem:[#allocation4 + $0x10e8] ss:$48 sps:$4 sm:$0xff]  }
 0x139   :  { %5974 = vmatpush2.bf16.msra.mxu1 %v17752_v52  ;;  %5922 = vmatprep.subr.bf16.mxu0 %v17757_v56  ;;  %v17824_v52 = vld [vmem:[#allocation4 + $0x16e8] ss:$48 sps:$4 sm:$0xff]   ;;  %v17829_v56 = vld [vmem:[#allocation4 + $0x108c] ss:$48 sps:$4 sm:$0xff]  }
 0x13a   :  { %5975 = vmatprep.subr.bf16.mxu1 %v17760_v57  ;;  %v17832_v57 = vld [vmem:[#allocation4 + $0x168c] ss:$48 sps:$4 sm:$0xff]  }
 0x13c   :  { %5923 = vmatpush2.bf16.msra.mxu0 %v17755_v58  ;;  %v17827_v58 = vld [vmem:[#allocation4 + $0x1088] ss:$48 sps:$4 sm:$0xff]  }
 0x13d   :  { %5976 = vmatpush2.bf16.msra.mxu1 %v17758_v59  ;;  %5998 = vmatprep.subr.bf16.mxu0 %v17763_v60  ;;  %v17830_v59 = vld [vmem:[#allocation4 + $0x1688] ss:$48 sps:$4 sm:$0xff]   ;;  %v17835_v60 = vld [vmem:[#allocation4 + $0x102c] ss:$48 sps:$4 sm:$0xff]  }
 0x13e   :  { %6051 = vmatprep.subr.bf16.mxu1 %v17766_v61  ;;  %v17838_v61 = vld [vmem:[#allocation4 + $0x162c] ss:$48 sps:$4 sm:$0xff]  }
 0x13f   :  { %5925 = vmatmul.mubr.bf16.vlgmr.msra.gmra.mxu0 %v20641_v8 }
 0x140   :  { %5978 = vmatmul.mubr.bf16.vlgmr.msra.gmra.mxu1 %v20643_v9  ;;  %5999 = vmatpush1.bf16.msra.mxu0 %v17761_v62  ;;  %v17833_v62 = vld [vmem:[#allocation4 + $0x1028] ss:$48 sps:$4 sm:$0xff]  }
 0x141   :  { %6052 = vmatpush1.bf16.msra.mxu1 %v17764_v63  ;;  %6000 = vmatprep.subr.bf16.mxu0 %v17769_v0  ;;  %v17836_v63 = vld [vmem:[#allocation4 + $0x1628] ss:$48 sps:$4 sm:$0xff]   ;;  %v17841_v0 = vld [vmem:[#allocation4 + $0xfcc] ss:$48 sps:$4 sm:$0xff]  }
 0x142   :  { %6053 = vmatprep.subr.bf16.mxu1 %v17772_v1  ;;  %5934 = vmatprep.mubr.bf16.mxu0 %v20659_v33  ;;  %v17844_v1 = vld [vmem:[#allocation4 + $0x15cc] ss:$48 sps:$4 sm:$0xff]  }
 0x143   :  { %5987 = vmatprep.mubr.bf16.mxu1 %v20661_v34 }
 0x144   :  { %6001 = vmatpush1.bf16.msra.mxu0 %v17767_v2  ;;  %v17839_v2 = vld [vmem:[#allocation4 + $0xfc8] ss:$48 sps:$4 sm:$0xff]  }
 0x145   :  { %6054 = vmatpush1.bf16.msra.mxu1 %v17770_v3  ;;  %6002 = vmatprep.subr.bf16.mxu0 %v17775_v4  ;;  %v17842_v3 = vld [vmem:[#allocation4 + $0x15c8] ss:$48 sps:$4 sm:$0xff]   ;;  %v17847_v4 = vld [vmem:[#allocation4 + $0xf6c] ss:$48 sps:$4 sm:$0xff]  }
 0x146   :  { %6055 = vmatprep.subr.bf16.mxu1 %v17778_v5  ;;  %v17850_v5 = vld [vmem:[#allocation4 + $0x156c] ss:$48 sps:$4 sm:$0xff]  }
 0x147   :  { %5935 = vmatmul.mubr.bf16.gmra.mxu0 %v20663_v35 }
 0x148   :  { %5988 = vmatmul.mubr.bf16.gmra.mxu1 %v20665_v37  ;;  %6003 = vmatpush1.bf16.msra.mxu0 %v17773_v6  ;;  %v17845_v6 = vld [vmem:[#allocation4 + $0xf68] ss:$48 sps:$4 sm:$0xff]  }
 0x149   :  { %6056 = vmatpush1.bf16.msra.mxu1 %v17776_v7  ;;  %6004 = vmatprep.subr.bf16.mxu0 %v17781_v10  ;;  %v17848_v7 = vld [vmem:[#allocation4 + $0x1568] ss:$48 sps:$4 sm:$0xff]   ;;  %v17853_v10 = vld [vmem:[#allocation4 + $0xf0c] ss:$48 sps:$4 sm:$0xff]  }
 0x14a   :  { %6057 = vmatprep.subr.bf16.mxu1 %v17784_v11  ;;  %6030 = vmatprep.mubr.bf16.mxu0 %v20688_v49  ;;  %v17856_v11 = vld [vmem:[#allocation4 + $0x150c] ss:$48 sps:$4 sm:$0xff]  }
 0x14b   :  { %6083 = vmatprep.mubr.bf16.mxu1 %v20697_v51 }
 0x14c   :  { %6005 = vmatpush1.bf16.msra.mxu0 %v17779_v12  ;;  %v17851_v12 = vld [vmem:[#allocation4 + $0xf08] ss:$48 sps:$4 sm:$0xff]  }
 0x14d   :  { %6058 = vmatpush1.bf16.msra.mxu1 %v17782_v13  ;;  %6006 = vmatprep.subr.bf16.mxu0 %v17787_v14  ;;  %v17854_v13 = vld [vmem:[#allocation4 + $0x1508] ss:$48 sps:$4 sm:$0xff]   ;;  %v17859_v14 = vld [vmem:[#allocation4 + $0x2b4] ss:$48 sps:$4 sm:$0xff]  }
 0x14e   :  { %6059 = vmatprep.subr.bf16.mxu1 %v17790_v15  ;;  %v17862_v15 = vld [vmem:[#allocation4 + $0x8b4] ss:$48 sps:$4 sm:$0xff]  }
 0x150   :  { %6007 = vmatpush1.bf16.msra.mxu0 %v17785_v16  ;;  %v17857_v16 = vld [vmem:[#allocation4 + $0x2b0] ss:$48 sps:$4 sm:$0xff]  }
 0x151   :  { %6060 = vmatpush1.bf16.msra.mxu1 %v17788_v17  ;;  %6008 = vmatprep.subr.bf16.mxu0 %v17793_v18  ;;  %v17860_v17 = vld [vmem:[#allocation4 + $0x8b0] ss:$48 sps:$4 sm:$0xff]   ;;  %v17865_v18 = vld [vmem:[#allocation4 + $0x254] ss:$48 sps:$4 sm:$0xff]  }
 0x152   :  { %6061 = vmatprep.subr.bf16.mxu1 %v17796_v19  ;;  %v17868_v19 = vld [vmem:[#allocation4 + $0x854] ss:$48 sps:$4 sm:$0xff]  }
 0x154   :  { %6009 = vmatpush1.bf16.msra.mxu0 %v17791_v20 }
 0x155   :  { %6062 = vmatpush1.bf16.msra.mxu1 %v17794_v21  ;;  %6010 = vmatprep.subr.bf16.mxu0 %v17799_v22  ;;  %v17863_v22 = vld [vmem:[#allocation4 + $0x250] ss:$48 sps:$4 sm:$0xff]  }
 0x156   :  { %6063 = vmatprep.subr.bf16.mxu1 %v17802_v23  ;;  %v17866_v23 = vld [vmem:[#allocation4 + $0x850] ss:$48 sps:$4 sm:$0xff]  }
 0x158   :  { %6011 = vmatpush1.bf16.msra.mxu0 %v17797_v24 }
 0x159   :  { %6064 = vmatpush1.bf16.msra.mxu1 %v17800_v25  ;;  %6012 = vmatprep.subr.bf16.mxu0 %v17805_v26  ;;  %v17871_v25 = vld [vmem:[#allocation4 + $0x1f4] ss:$48 sps:$4 sm:$0xff]  }
 0x15a   :  { %6065 = vmatprep.subr.bf16.mxu1 %v17808_v27 }
 0x15c   :  { %6013 = vmatpush1.bf16.msra.mxu0 %v17803_v28  ;;  %v17874_v28 = vld [vmem:[#allocation4 + $0x7f4] ss:$48 sps:$4 sm:$0xff]  }
 0x15d   :  { %6066 = vmatpush1.bf16.msra.mxu1 %v17806_v29  ;;  %6014 = vmatprep.subr.bf16.mxu0 %v17811_v30 }
 0x15e   :  { %6067 = vmatprep.subr.bf16.mxu1 %v17814_v31 }
 0x160   :  { %6015 = vmatpush2.bf16.msra.mxu0 %v17809_v38  ;;  %v17869_v38 = vld [vmem:[#allocation4 + $0x1f0] ss:$48 sps:$4 sm:$0xff]  }
 0x161   :  { %6068 = vmatpush2.bf16.msra.mxu1 %v17812_v39  ;;  %6016 = vmatprep.subr.bf16.mxu0 %v17817_v40  ;;  %v17872_v39 = vld [vmem:[#allocation4 + $0x7f0] ss:$48 sps:$4 sm:$0xff]  }
 0x162   :  { %6069 = vmatprep.subr.bf16.mxu1 %v17820_v41  ;;  %v17877_v41 = vld [vmem:[#allocation4 + $0x194] ss:$48 sps:$4 sm:$0xff]  }
 0x164   :  { %6017 = vmatpush2.bf16.msra.mxu0 %v17815_v44  ;;  %v17880_v44 = vld [vmem:[#allocation4 + $0x794] ss:$48 sps:$4 sm:$0xff]  }
 0x165   :  { %6070 = vmatpush2.bf16.msra.mxu1 %v17818_v45  ;;  %6018 = vmatprep.subr.bf16.mxu0 %v17823_v46  ;;  %v17875_v45 = vld [vmem:[#allocation4 + $0x190] ss:$48 sps:$4 sm:$0xff]  }
 0x166   :  { %6071 = vmatprep.subr.bf16.mxu1 %v17826_v47  ;;  %v17878_v46 = vld [vmem:[#allocation4 + $0x790] ss:$48 sps:$4 sm:$0xff]   ;;  %v17883_v47 = vld [vmem:[#allocation4 + $0x134] ss:$48 sps:$4 sm:$0xff]  }
 0x168   :  { %6019 = vmatpush2.bf16.msra.mxu0 %v17821_v50  ;;  %v17886_v50 = vld [vmem:[#allocation4 + $0x734] ss:$48 sps:$4 sm:$0xff]  }
 0x169   :  { %6072 = vmatpush2.bf16.msra.mxu1 %v17824_v52  ;;  %6020 = vmatprep.subr.bf16.mxu0 %v17829_v56  ;;  %v17881_v52 = vld [vmem:[#allocation4 + $0x130] ss:$48 sps:$4 sm:$0xff]  }
 0x16a   :  { %6073 = vmatprep.subr.bf16.mxu1 %v17832_v57  ;;  %v17884_v56 = vld [vmem:[#allocation4 + $0x730] ss:$48 sps:$4 sm:$0xff]   ;;  %v17889_v57 = vld [vmem:[#allocation4 + $0xd4] ss:$48 sps:$4 sm:$0xff]  }
 0x16c   :  { %6021 = vmatpush2.bf16.msra.mxu0 %v17827_v58 }
 0x16d   :  { %6074 = vmatpush2.bf16.msra.mxu1 %v17830_v59  ;;  %6022 = vmatprep.subr.bf16.mxu0 %v17835_v60  ;;  %v17892_v60 = vld [vmem:[#allocation4 + $0x6d4] ss:$48 sps:$4 sm:$0xff]  }
 0x16e   :  { %6075 = vmatprep.subr.bf16.mxu1 %v17838_v61 }
 0x170   :  { %6023 = vmatpush2.bf16.msra.mxu0 %v17833_v62 }
 0x171   :  { %6076 = vmatpush2.bf16.msra.mxu1 %v17836_v63  ;;  %6024 = vmatprep.subr.bf16.mxu0 %v17841_v0  ;;  %v17887_v63 = vld [vmem:[#allocation4 + $0xd0] ss:$48 sps:$4 sm:$0xff]  }
 0x172   :  { %6077 = vmatprep.subr.bf16.mxu1 %v17844_v1  ;;  %v17890_v0 = vld [vmem:[#allocation4 + $0x6d0] ss:$48 sps:$4 sm:$0xff]  }
 0x174   :  { %6025 = vmatpush2.bf16.msra.mxu0 %v17839_v2  ;;  %v17895_v2 = vld [vmem:[#allocation4 + $0x74] ss:$48 sps:$4 sm:$0xff]  }
 0x175   :  { %6078 = vmatpush2.bf16.msra.mxu1 %v17842_v3  ;;  %6026 = vmatprep.subr.bf16.mxu0 %v17847_v4  ;;  %v17898_v3 = vld [vmem:[#allocation4 + $0x674] ss:$48 sps:$4 sm:$0xff]  }
 0x176   :  { %6079 = vmatprep.subr.bf16.mxu1 %v17850_v5 }
 0x178   :  { %6027 = vmatpush2.bf16.msra.mxu0 %v17845_v6 }
 0x179   :  { %6080 = vmatpush2.bf16.msra.mxu1 %v17848_v7  ;;  %6028 = vmatprep.subr.bf16.mxu0 %v17853_v10 }
 0x17a   :  { %6081 = vmatprep.subr.bf16.mxu1 %v17856_v11  ;;  %v17893_v11 = vld [vmem:[#allocation4 + $0x70] ss:$48 sps:$4 sm:$0xff]  }
 0x17c   :  { %6029 = vmatpush2.bf16.msra.mxu0 %v17851_v12  ;;  %v17896_v12 = vld [vmem:[#allocation4 + $0x670] ss:$48 sps:$4 sm:$0xff]  }
 0x17d   :  { %6082 = vmatpush2.bf16.msra.mxu1 %v17854_v13  ;;  %6104 = vmatprep.subr.bf16.mxu0 %v17859_v14  ;;  %v17901_v14 = vld [vmem:[#allocation4 + $0x14] ss:$48 sps:$4 sm:$0xff]  }
 0x17e   :  { %6157 = vmatprep.subr.bf16.mxu1 %v17862_v15  ;;  %v17904_v15 = vld [vmem:[#allocation4 + $0x614] ss:$48 sps:$4 sm:$0xff]  }
 0x17f   :  { %v5714_v20 = vpop.f32.mrf.mxu0  ;;  %6031 = vmatmul.mubr.bf16.vlgmr.msra.gmra.mxu0 %v20709_v32 }
 0x180   :  { %v5767_v21 = vpop.f32.mrf.mxu1  ;;  %6084 = vmatmul.mubr.bf16.vlgmr.msra.gmra.mxu1 %v20713_v36  ;;  %6105 = vmatpush1.bf16.msra.mxu0 %v17857_v16  ;;  %v17899_v16 = vld [vmem:[#allocation4 + $0x10] ss:$48 sps:$4 sm:$0xff]  }
 0x181   :  { %v20747_v24 = vadd.f32 %v5767_v21, %v5714_v20  ;;  %6158 = vmatpush1.bf16.msra.mxu1 %v17860_v17  ;;  %v5716_v26 = vpop.f32.mrf.mxu0  ;;  %6106 = vmatprep.subr.bf16.mxu0 %v17865_v18  ;;  %v17902_v17 = vld [vmem:[#allocation4 + $0x610] ss:$48 sps:$4 sm:$0xff]   ;;  %v17907_v18 = vld [vmem:[#allocation4 + $0x5b4] ss:$48 sps:$4 sm:$0xff]  }
 0x182   :  { %v5769_v27 = vpop.f32.mrf.mxu1  ;;  %6159 = vmatprep.subr.bf16.mxu1 %v17868_v19  ;;  %6040 = vmatprep.mubr.bf16.mxu0 %v20721_v42  ;;  %v17910_v19 = vld [vmem:[#allocation4 + $0xbb4] ss:$48 sps:$4 sm:$0xff]   ;;  %v17905_v20 = vld [vmem:[#allocation4 + $0x5b0] ss:$48 sps:$4 sm:$0xff]  }
 0x183   :  { %v20749_v29 = vadd.f32 %v5769_v27, %v5716_v26  ;;  %6093 = vmatprep.mubr.bf16.mxu1 %v20723_v43  ;;  %v5718_v30 = vpop.f32.mrf.mxu0  ;;  %v17908_v21 = vld [vmem:[#allocation4 + $0xbb0] ss:$48 sps:$4 sm:$0xff]   ;;  %v17919_v27 = vld [vmem:[#allocation4 + $0x4f4] ss:$48 sps:$4 sm:$0xff]  }
 0x184   :  { %v5771_v31 = vpop.f32.mrf.mxu1  ;;  %6107 = vmatpush1.bf16.msra.mxu0 %v17863_v22  ;;  %v17913_v22 = vld [vmem:[#allocation4 + $0x554] ss:$48 sps:$4 sm:$0xff]   ;;  %v17914_v26 = vld [vmem:[#allocation4 + $0xb50] ss:$48 sps:$4 sm:$0xff]  }
 0x185   :  { %v20753_v40 = vadd.f32 %v5771_v31, %v5718_v30  ;;  %6160 = vmatpush1.bf16.msra.mxu1 %v17866_v23  ;;  %6108 = vmatprep.subr.bf16.mxu0 %v17871_v25  ;;  %v20759_v58 = vpop.f32.mrf.mxu0  ;;  %v17916_v23 = vld [vmem:[#allocation4 + $0xb54] ss:$48 sps:$4 sm:$0xff]   ;;  %v17911_v25 = vld [vmem:[#allocation4 + $0x550] ss:$48 sps:$4 sm:$0xff]  }
 0x186   :  { %6161 = vmatprep.subr.bf16.mxu1 %v17874_v28  ;;  %22212 = vst [vmem:[#allocation24_spill] sm:$0xff] %v20759_v58  ;;  %v20761_v59 = vpop.f32.mrf.mxu1  ;;  %v17922_v28 = vld [vmem:[#allocation4 + $0xaf4] ss:$48 sps:$4 sm:$0xff]   ;;  %v17917_v30 = vld [vmem:[#allocation4 + $0x4f0] ss:$48 sps:$4 sm:$0xff]  }
 0x187   :  { %6041 = vmatmul.mubr.bf16.gmra.mxu0 %v20729_v48  ;;  %22213 = vst [vmem:[#allocation25_spill] sm:$0xff] %v20761_v59  ;;  %v5724_v61 = vpop.f32.mrf.mxu0  ;;  %v17920_v31 = vld [vmem:[#allocation4 + $0xaf0] ss:$48 sps:$4 sm:$0xff]  }
 0x188   :  { %6094 = vmatmul.mubr.bf16.gmra.mxu1 %v20731_v55  ;;  %6109 = vmatpush1.bf16.msra.mxu0 %v17869_v38  ;;  %v5777_v62 = vpop.f32.mrf.mxu1  ;;  %v17925_v38 = vld [vmem:[#allocation4 + $0x494] ss:$48 sps:$4 sm:$0xff]  }
 0x189   :  { %6162 = vmatpush1.bf16.msra.mxu1 %v17872_v39  ;;  %6110 = vmatprep.subr.bf16.mxu0 %v17877_v41  ;;  %v20763_v1 = vadd.f32 %v5777_v62, %v5724_v61  ;;  %v5726_v4 = vpop.f32.mrf.mxu0  ;;  %v17928_v39 = vld [vmem:[#allocation4 + $0xa94] ss:$48 sps:$4 sm:$0xff]   ;;  %v17923_v41 = vld [vmem:[#allocation4 + $0x490] ss:$48 sps:$4 sm:$0xff]  }
 0x18a   :  { %6163 = vmatprep.subr.bf16.mxu1 %v17880_v44  ;;  %6136 = vmatprep.mubr.bf16.mxu0 %v20635_v53  ;;  %v5779_v5 = vpop.f32.mrf.mxu1  ;;  %v17926_v44 = vld [vmem:[#allocation4 + $0xa90] ss:$48 sps:$4 sm:$0xff]   ;;  %v17943_v61 = vld [vmem:[#allocation4 + $0x374] ss:$48 sps:$4 sm:$0xff]  }
 0x18b   :  { %6189 = vmatprep.mubr.bf16.mxu1 %v20637_v54  ;;  %v20765_v6 = vadd.f32 %v5779_v5, %v5726_v4  ;;  %v5728_v7 = vpop.f32.mrf.mxu0  ;;  %v17946_v62 = vld [vmem:[#allocation4 + $0x974] ss:$48 sps:$4 sm:$0xff]   ;;  %v17947_v4 = vld [vmem:[#allocation4 + $0x310] ss:$48 sps:$4 sm:$0xff]  }
 0x18c   :  { %6111 = vmatpush1.bf16.msra.mxu0 %v17875_v45  ;;  %v5781_v10 = vpop.f32.mrf.mxu1  ;;  %v17931_v45 = vld [vmem:[#allocation4 + $0x434] ss:$48 sps:$4 sm:$0xff]   ;;  %v17950_v5 = vld [vmem:[#allocation4 + $0x910] ss:$48 sps:$4 sm:$0xff]  }
 0x18d   :  { %6164 = vmatpush1.bf16.msra.mxu1 %v17878_v46  ;;  %6112 = vmatprep.subr.bf16.mxu0 %v17883_v47  ;;  %v20767_v13 = vadd.f32 %v5781_v10, %v5728_v7  ;;  %v17934_v46 = vld [vmem:[#allocation4 + $0xa34] ss:$48 sps:$4 sm:$0xff]   ;;  %v17929_v47 = vld [vmem:[#allocation4 + $0x430] ss:$48 sps:$4 sm:$0xff]  }
 0x18e   :  { %6165 = vmatprep.subr.bf16.mxu1 %v17886_v50  ;;  %v17932_v50 = vld [vmem:[#allocation4 + $0xa30] ss:$48 sps:$4 sm:$0xff]   ;;  %v17955_v7 = vld [vmem:[#allocation4 + $0xeb4] ss:$48 sps:$4 sm:$0xff]  }
 0x18f   :  { %v17958_v10 = vld [vmem:[#allocation4 + $0x14b4] ss:$48 sps:$4 sm:$0xff]  }
 0x190   :  { %6113 = vmatpush1.bf16.msra.mxu0 %v17881_v52  ;;  %v17937_v52 = vld [vmem:[#allocation4 + $0x3d4] ss:$48 sps:$4 sm:$0xff]  }
 0x191   :  { %6166 = vmatpush1.bf16.msra.mxu1 %v17884_v56  ;;  %6114 = vmatprep.subr.bf16.mxu0 %v17889_v57  ;;  %v17940_v56 = vld [vmem:[#allocation4 + $0x9d4] ss:$48 sps:$4 sm:$0xff]   ;;  %v17935_v57 = vld [vmem:[#allocation4 + $0x3d0] ss:$48 sps:$4 sm:$0xff]  }
 0x192   :  { %6167 = vmatprep.subr.bf16.mxu1 %v17892_v60  ;;  %v17938_v60 = vld [vmem:[#allocation4 + $0x9d0] ss:$48 sps:$4 sm:$0xff]  }
 0x194   :  { %6115 = vmatpush1.bf16.msra.mxu0 %v17887_v63  ;;  %v17941_v63 = vld [vmem:[#allocation4 + $0x370] ss:$48 sps:$4 sm:$0xff]  }
 0x195   :  { %6168 = vmatpush1.bf16.msra.mxu1 %v17890_v0  ;;  %6116 = vmatprep.subr.bf16.mxu0 %v17895_v2  ;;  %v17944_v0 = vld [vmem:[#allocation4 + $0x970] ss:$48 sps:$4 sm:$0xff]   ;;  %v17949_v2 = vld [vmem:[#allocation4 + $0x314] ss:$48 sps:$4 sm:$0xff]  }
 0x196   :  { %6169 = vmatprep.subr.bf16.mxu1 %v17898_v3  ;;  %v17952_v3 = vld [vmem:[#allocation4 + $0x914] ss:$48 sps:$4 sm:$0xff]  }
 0x198   :  { %6117 = vmatpush1.bf16.msra.mxu0 %v17893_v11  ;;  %v17953_v11 = vld [vmem:[#allocation4 + $0xeb0] ss:$48 sps:$4 sm:$0xff]  }
 0x199   :  { %6170 = vmatpush1.bf16.msra.mxu1 %v17896_v12  ;;  %6118 = vmatprep.subr.bf16.mxu0 %v17901_v14  ;;  %v17956_v12 = vld [vmem:[#allocation4 + $0x14b0] ss:$48 sps:$4 sm:$0xff]   ;;  %v20769_v14 = vpop.f32.mrf.mxu0 }
 0x19a   :  { %6171 = vmatprep.subr.bf16.mxu1 %v17904_v15  ;;  %22214 = vst [vmem:[#allocation26_spill] sm:$0xff] %v20769_v14  ;;  %v20771_v15 = vpop.f32.mrf.mxu1  ;;  %v18666_v14 = vld [vmem:[#allocation2 + $0x664] ss:$48 sps:$4 sm:$0xff]  }
 0x19b   :  { %22215 = vst [vmem:[#allocation27_spill] sm:$0xff] %v20771_v15 }
 0x19c   :  { %6119 = vmatpush1.bf16.msra.mxu0 %v17899_v16  ;;  %v17961_v16 = vld [vmem:[#allocation4 + $0xe54] ss:$48 sps:$4 sm:$0xff]  }
 0x19d   :  { %6172 = vmatpush1.bf16.msra.mxu1 %v17902_v17  ;;  %6120 = vmatprep.subr.bf16.mxu0 %v17907_v18  ;;  %v17964_v17 = vld [vmem:[#allocation4 + $0x1454] ss:$48 sps:$4 sm:$0xff]   ;;  %v17959_v18 = vld [vmem:[#allocation4 + $0xe50] ss:$48 sps:$4 sm:$0xff]  }
 0x19e   :  { %6173 = vmatprep.subr.bf16.mxu1 %v17910_v19  ;;  %v17962_v19 = vld [vmem:[#allocation4 + $0x1450] ss:$48 sps:$4 sm:$0xff]  }
 0x1a0   :  { %6121 = vmatpush2.bf16.msra.mxu0 %v17905_v20 }
 0x1a1   :  { %6174 = vmatpush2.bf16.msra.mxu1 %v17908_v21  ;;  %6122 = vmatprep.subr.bf16.mxu0 %v17913_v22 }
 0x1a2   :  { %6175 = vmatprep.subr.bf16.mxu1 %v17916_v23 }
 0x1a4   :  { %6123 = vmatpush2.bf16.msra.mxu0 %v17911_v25 }
 0x1a5   :  { %6176 = vmatpush2.bf16.msra.mxu1 %v17914_v26  ;;  %6124 = vmatprep.subr.bf16.mxu0 %v17919_v27  ;;  %v17967_v26 = vld [vmem:[#allocation4 + $0xdf4] ss:$48 sps:$4 sm:$0xff]  }
 0x1a6   :  { %6177 = vmatprep.subr.bf16.mxu1 %v17922_v28  ;;  %v17970_v27 = vld [vmem:[#allocation4 + $0x13f4] ss:$48 sps:$4 sm:$0xff]  }
 0x1a8   :  { %6125 = vmatpush2.bf16.msra.mxu0 %v17917_v30 }
 0x1a9   :  { %6178 = vmatpush2.bf16.msra.mxu1 %v17920_v31  ;;  %6126 = vmatprep.subr.bf16.mxu0 %v17925_v38  ;;  %v17965_v31 = vld [vmem:[#allocation4 + $0xdf0] ss:$48 sps:$4 sm:$0xff]  }
 0x1aa   :  { %6179 = vmatprep.subr.bf16.mxu1 %v17928_v39  ;;  %v17968_v38 = vld [vmem:[#allocation4 + $0x13f0] ss:$48 sps:$4 sm:$0xff]  }
 0x1ac   :  { %6127 = vmatpush2.bf16.msra.mxu0 %v17923_v41 }
 0x1ad   :  { %6180 = vmatpush2.bf16.msra.mxu1 %v17926_v44  ;;  %6128 = vmatprep.subr.bf16.mxu0 %v17931_v45 }
 0x1ae   :  { %6181 = vmatprep.subr.bf16.mxu1 %v17934_v46 }
 0x1b0   :  { %6129 = vmatpush2.bf16.msra.mxu0 %v17929_v47  ;;  %v17976_v47 = vld [vmem:[#allocation4 + $0x1394] ss:$48 sps:$4 sm:$0xff]  }
 0x1b1   :  { %6182 = vmatpush2.bf16.msra.mxu1 %v17932_v50  ;;  %6130 = vmatprep.subr.bf16.mxu0 %v17937_v52  ;;  %v17971_v52 = vld [vmem:[#allocation4 + $0xd90] ss:$48 sps:$4 sm:$0xff]  }
 0x1b2   :  { %6183 = vmatprep.subr.bf16.mxu1 %v17940_v56  ;;  %v17974_v56 = vld [vmem:[#allocation4 + $0x1390] ss:$48 sps:$4 sm:$0xff]  }
 0x1b4   :  { %6131 = vmatpush2.bf16.msra.mxu0 %v17935_v57 }
 0x1b5   :  { %6184 = vmatpush2.bf16.msra.mxu1 %v17938_v60  ;;  %6132 = vmatprep.subr.bf16.mxu0 %v17943_v61 }
 0x1b6   :  { %6185 = vmatprep.subr.bf16.mxu1 %v17946_v62 }
 0x1b8   :  { %6133 = vmatpush2.bf16.msra.mxu0 %v17941_v63  ;;  %v17979_v63 = vld [vmem:[#allocation4 + $0xd34] ss:$48 sps:$4 sm:$0xff]  }
 0x1b9   :  { %6186 = vmatpush2.bf16.msra.mxu1 %v17944_v0  ;;  %6134 = vmatprep.subr.bf16.mxu0 %v17949_v2  ;;  %v17982_v0 = vld [vmem:[#allocation4 + $0x1334] ss:$48 sps:$4 sm:$0xff]  }
 0x1ba   :  { %6187 = vmatprep.subr.bf16.mxu1 %v17952_v3 }
 0x1bc   :  { %6135 = vmatpush2.bf16.msra.mxu0 %v17947_v4  ;;  %v17977_v4 = vld [vmem:[#allocation4 + $0xd30] ss:$48 sps:$4 sm:$0xff]  }
 0x1bd   :  { %6188 = vmatpush2.bf16.msra.mxu1 %v17950_v5  ;;  %6210 = vmatprep.subr.bf16.mxu0 %v17955_v7  ;;  %v17980_v5 = vld [vmem:[#allocation4 + $0x1330] ss:$48 sps:$4 sm:$0xff]  }
 0x1be   :  { %6263 = vmatprep.subr.bf16.mxu1 %v17958_v10 }
 0x1bf   :  { %v5820_v20 = vpop.f32.mrf.mxu0  ;;  %6137 = vmatmul.mubr.bf16.vlgmr.msra.gmra.mxu0 %v20641_v8 }
 0x1c0   :  { %v5873_v21 = vpop.f32.mrf.mxu1  ;;  %6190 = vmatmul.mubr.bf16.vlgmr.msra.gmra.mxu1 %v20643_v9  ;;  %v5821_v22 = vadd.f32 %v5820_v20, %v20747_v24  ;;  %6211 = vmatpush1.bf16.msra.mxu0 %v17953_v11  ;;  %v17994_v20 = vld [vmem:[#allocation4 + $0x1274] ss:$48 sps:$4 sm:$0xff]  }
 0x1c1   :  { %6264 = vmatpush1.bf16.msra.mxu1 %v17956_v12  ;;  %v5822_v23 = vpop.f32.mrf.mxu0  ;;  %6212 = vmatprep.subr.bf16.mxu0 %v17961_v16  ;;  %v17985_v12 = vld [vmem:[#allocation4 + $0xcd4] ss:$48 sps:$4 sm:$0xff]  }
 0x1c2   :  { %v5875_v25 = vpop.f32.mrf.mxu1  ;;  %6265 = vmatprep.subr.bf16.mxu1 %v17964_v17  ;;  %v20776_v28 = vadd.f32 %v5873_v21, %v5821_v22  ;;  %v5823_v30 = vadd.f32 %v5822_v23, %v20749_v29  ;;  %6146 = vmatprep.mubr.bf16.mxu0 %v20659_v33  ;;  %v17973_v29 = vld [vmem:[#allocation4 + $0xd94] ss:$48 sps:$4 sm:$0xff]   ;;  %v17983_v17 = vld [vmem:[#allocation4 + $0xcd0] ss:$48 sps:$4 sm:$0xff]  }
 0x1c3   :  { %6199 = vmatprep.mubr.bf16.mxu1 %v20661_v34  ;;  %v5824_v39 = vpop.f32.mrf.mxu0  ;;  %v17992_v21 = vld [vmem:[#allocation4 + $0x1270] ss:$48 sps:$4 sm:$0xff]   ;;  %v17997_v22 = vld [vmem:[#allocation4 + $0xc14] ss:$48 sps:$4 sm:$0xff]  }
 0x1c4   :  { %v5877_v24 = vpop.f32.mrf.mxu1  ;;  %v20781_v41 = vadd.f32 %v5875_v25, %v5823_v30  ;;  %v5825_v44 = vadd.f32 %v5824_v39, %v20753_v40  ;;  %6213 = vmatpush1.bf16.msra.mxu0 %v17959_v18  ;;  %v17986_v18 = vld [vmem:[#allocation4 + $0x12d0] ss:$48 sps:$4 sm:$0xff]   ;;  %v18000_v23 = vld [vmem:[#allocation4 + $0x1214] ss:$48 sps:$4 sm:$0xff]  }
 0x1c5   :  { %6266 = vmatpush1.bf16.msra.mxu1 %v17962_v19  ;;  %v20784_v45 = vpop.f32.mrf.mxu0  ;;  %6214 = vmatprep.subr.bf16.mxu0 %v17967_v26  ;;  %v17991_v19 = vld [vmem:[#allocation4 + $0xc74] ss:$48 sps:$4 sm:$0xff]   ;;  %v17995_v25 = vld [vmem:[#allocation4 + $0xc10] ss:$48 sps:$4 sm:$0xff]  }
 0x1c6   :  { %22216 = vst [vmem:[#allocation28_spill] sm:$0xff] %v20784_v45  ;;  %v20786_v46 = vpop.f32.mrf.mxu1  ;;  %6267 = vmatprep.subr.bf16.mxu1 %v17970_v27  ;;  %v20788_v50 = vadd.f32 %v5877_v24, %v5825_v44  ;;  %v17998_v26 = vld [vmem:[#allocation4 + $0x1210] ss:$48 sps:$4 sm:$0xff]   ;;  %v18003_v27 = vld [vmem:[#allocation4 + $0x11b4] ss:$48 sps:$4 sm:$0xff]  }
 0x1c7   :  { %22217 = vst [vmem:[#allocation29_spill] sm:$0xff] %v20786_v46  ;;  %v5830_v57 = vpop.f32.mrf.mxu0  ;;  %6147 = vmatmul.mubr.bf16.gmra.mxu0 %v20663_v35  ;;  %v18006_v30 = vld [vmem:[#allocation4 + $0x17b4] ss:$48 sps:$4 sm:$0xff]   ;;  %v18007_v44 = vld [vmem:[#allocation4 + $0x1150] ss:$48 sps:$4 sm:$0xff]  }
 0x1c8   :  { %v5883_v60 = vpop.f32.mrf.mxu1  ;;  %6200 = vmatmul.mubr.bf16.gmra.mxu1 %v20665_v37  ;;  %v5831_v40 = vadd.f32 %v5830_v57, %v20763_v1  ;;  %6215 = vmatpush1.bf16.msra.mxu0 %v17965_v31  ;;  %v18001_v31 = vld [vmem:[#allocation4 + $0x11b0] ss:$48 sps:$4 sm:$0xff]   ;;  %v18009_v39 = vld [vmem:[#allocation4 + $0x1154] ss:$48 sps:$4 sm:$0xff]  }
 0x1c9   :  { %6268 = vmatpush1.bf16.msra.mxu1 %v17968_v38  ;;  %v5832_v61 = vpop.f32.mrf.mxu0  ;;  %6216 = vmatprep.subr.bf16.mxu0 %v17973_v29  ;;  %v18004_v38 = vld [vmem:[#allocation4 + $0x17b0] ss:$48 sps:$4 sm:$0xff]   ;;  %v18012_v24 = vld [vmem:[#allocation4 + $0x1754] ss:$48 sps:$4 sm:$0xff]  }
 0x1ca   :  { %v5885_v62 = vpop.f32.mrf.mxu1  ;;  %6269 = vmatprep.subr.bf16.mxu1 %v17976_v47  ;;  %v5833_v2 = vadd.f32 %v5832_v61, %v20765_v6  ;;  %v20794_v3 = vadd.f32 %v5883_v60, %v5831_v40  ;;  %6242 = vmatprep.mubr.bf16.mxu0 %v20688_v49  ;;  %v17988_v6 = vld [vmem:[#allocation4 + $0x12d4] ss:$48 sps:$4 sm:$0xff]   ;;  %v18010_v29 = vld [vmem:[#allocation4 + $0x1750] ss:$48 sps:$4 sm:$0xff]  }
 0x1cb   :  { %6295 = vmatprep.mubr.bf16.mxu1 %v20697_v51  ;;  %v5834_v7 = vpop.f32.mrf.mxu0  ;;  %v18015_v47 = vld [vmem:[#allocation4 + $0x10f4] ss:$48 sps:$4 sm:$0xff]   ;;  %v18016_v57 = vld [vmem:[#allocation4 + $0x16f0] ss:$48 sps:$4 sm:$0xff]  }
 0x1cc   :  { %v5887_v1 = vpop.f32.mrf.mxu1  ;;  %v5835_v10 = vadd.f32 %v5834_v7, %v20767_v13  ;;  %v20799_v11 = vadd.f32 %v5885_v62, %v5833_v2  ;;  %6217 = vmatpush1.bf16.msra.mxu0 %v17971_v52  ;;  %v17989_v13 = vld [vmem:[#allocation4 + $0xc70] ss:$48 sps:$4 sm:$0xff]   ;;  %v18018_v52 = vld [vmem:[#allocation4 + $0x16f4] ss:$48 sps:$4 sm:$0xff]  }
 0x1cd   :  { %6270 = vmatpush1.bf16.msra.mxu1 %v17974_v56  ;;  %6218 = vmatprep.subr.bf16.mxu0 %v17979_v63  ;;  %v18013_v56 = vld [vmem:[#allocation4 + $0x10f0] ss:$48 sps:$4 sm:$0xff]   ;;  %v18021_v60 = vld [vmem:[#allocation4 + $0x1094] ss:$48 sps:$4 sm:$0xff]  }
 0x1ce   :  { %6271 = vmatprep.subr.bf16.mxu1 %v17982_v0  ;;  %v20801_v16 = vadd.f32 %v5887_v1, %v5835_v10  ;;  %v18024_v40 = vld [vmem:[#allocation4 + $0x1694] ss:$48 sps:$4 sm:$0xff]   ;;  %v18019_v61 = vld [vmem:[#allocation4 + $0x1090] ss:$48 sps:$4 sm:$0xff]  }
 0x1cf   :  { %v18022_v62 = vld [vmem:[#allocation4 + $0x1690] ss:$48 sps:$4 sm:$0xff]   ;;  %v18027_v63 = vld [vmem:[#allocation4 + $0x1034] ss:$48 sps:$4 sm:$0xff]  }
 0x1d0   :  { %6219 = vmatpush1.bf16.msra.mxu0 %v17977_v4  ;;  %v18030_v0 = vld [vmem:[#allocation4 + $0x1634] ss:$48 sps:$4 sm:$0xff]   ;;  %v18025_v2 = vld [vmem:[#allocation4 + $0x1030] ss:$48 sps:$4 sm:$0xff]  }
 0x1d1   :  { %6272 = vmatpush1.bf16.msra.mxu1 %v17980_v5  ;;  %6220 = vmatprep.subr.bf16.mxu0 %v17985_v12  ;;  %v18028_v4 = vld [vmem:[#allocation4 + $0x1630] ss:$48 sps:$4 sm:$0xff]   ;;  %v18033_v5 = vld [vmem:[#allocation4 + $0xfd4] ss:$48 sps:$4 sm:$0xff]  }
 0x1d2   :  { %6273 = vmatprep.subr.bf16.mxu1 %v17988_v6  ;;  %v18036_v7 = vld [vmem:[#allocation4 + $0x15d4] ss:$48 sps:$4 sm:$0xff]   ;;  %v18031_v1 = vld [vmem:[#allocation4 + $0xfd0] ss:$48 sps:$4 sm:$0xff]  }
 0x1d3   :  { %v18034_v10 = vld [vmem:[#allocation4 + $0x15d0] ss:$48 sps:$4 sm:$0xff]   ;;  %v18039_v12 = vld [vmem:[#allocation4 + $0xf74] ss:$48 sps:$4 sm:$0xff]  }
 0x1d4   :  { %6221 = vmatpush1.bf16.msra.mxu0 %v17983_v17  ;;  %v18042_v6 = vld [vmem:[#allocation4 + $0x1574] ss:$48 sps:$4 sm:$0xff]   ;;  %v18037_v17 = vld [vmem:[#allocation4 + $0xf70] ss:$48 sps:$4 sm:$0xff]  }
 0x1d5   :  { %6274 = vmatpush1.bf16.msra.mxu1 %v17986_v18  ;;  %6222 = vmatprep.subr.bf16.mxu0 %v17991_v19  ;;  %v18040_v18 = vld [vmem:[#allocation4 + $0x1570] ss:$48 sps:$4 sm:$0xff]   ;;  %v18045_v19 = vld [vmem:[#allocation4 + $0xf14] ss:$48 sps:$4 sm:$0xff]  }
 0x1d6   :  { %6275 = vmatprep.subr.bf16.mxu1 %v17994_v20  ;;  %v18048_v20 = vld [vmem:[#allocation4 + $0x1514] ss:$48 sps:$4 sm:$0xff]  }
 0x1d8   :  { %6223 = vmatpush1.bf16.msra.mxu0 %v17989_v13  ;;  %v18043_v13 = vld [vmem:[#allocation4 + $0xf10] ss:$48 sps:$4 sm:$0xff]  }
 0x1d9   :  { %6276 = vmatpush1.bf16.msra.mxu1 %v17992_v21  ;;  %6224 = vmatprep.subr.bf16.mxu0 %v17997_v22  ;;  %v18046_v21 = vld [vmem:[#allocation4 + $0x1510] ss:$48 sps:$4 sm:$0xff]   ;;  %v18051_v22 = vld [vmem:[#allocation4 + $0x2bc] ss:$48 sps:$4 sm:$0xff]  }
 0x1da   :  { %6277 = vmatprep.subr.bf16.mxu1 %v18000_v23  ;;  %v18054_v23 = vld [vmem:[#allocation4 + $0x8bc] ss:$48 sps:$4 sm:$0xff]  }
 0x1dc   :  { %6225 = vmatpush1.bf16.msra.mxu0 %v17995_v25  ;;  %v18049_v25 = vld [vmem:[#allocation4 + $0x2b8] ss:$48 sps:$4 sm:$0xff]  }
 0x1dd   :  { %6278 = vmatpush1.bf16.msra.mxu1 %v17998_v26  ;;  %6226 = vmatprep.subr.bf16.mxu0 %v18003_v27  ;;  %v18052_v26 = vld [vmem:[#allocation4 + $0x8b8] ss:$48 sps:$4 sm:$0xff]   ;;  %v20803_v27 = vpop.f32.mrf.mxu0 }
 0x1de   :  { %6279 = vmatprep.subr.bf16.mxu1 %v18006_v30  ;;  %22218 = vst [vmem:[#allocation30_spill] sm:$0xff] %v20803_v27  ;;  %v20805_v30 = vpop.f32.mrf.mxu1 }
 0x1df   :  { %22219 = vst [vmem:[#allocation31_spill] sm:$0xff] %v20805_v30  ;;  %v18349_v30 = vld [vmem:[#allocation4 + $0xe00] ss:$48 sps:$4 sm:$0xff]  }
 0x1e0   :  { %6227 = vmatpush2.bf16.msra.mxu0 %v18001_v31  ;;  %v18057_v31 = vld [vmem:[#allocation4 + $0x25c] ss:$48 sps:$4 sm:$0xff]  }
 0x1e1   :  { %6280 = vmatpush2.bf16.msra.mxu1 %v18004_v38  ;;  %6228 = vmatprep.subr.bf16.mxu0 %v18009_v39  ;;  %v18060_v38 = vld [vmem:[#allocation4 + $0x85c] ss:$48 sps:$4 sm:$0xff]   ;;  %v18055_v39 = vld [vmem:[#allocation4 + $0x258] ss:$48 sps:$4 sm:$0xff]  }
 0x1e2   :  { %6281 = vmatprep.subr.bf16.mxu1 %v18012_v24  ;;  %v18058_v24 = vld [vmem:[#allocation4 + $0x858] ss:$48 sps:$4 sm:$0xff]  }
 0x1e4   :  { %6229 = vmatpush2.bf16.msra.mxu0 %v18007_v44 }
 0x1e5   :  { %6282 = vmatpush2.bf16.msra.mxu1 %v18010_v29  ;;  %6230 = vmatprep.subr.bf16.mxu0 %v18015_v47 }
 0x1e6   :  { %6283 = vmatprep.subr.bf16.mxu1 %v18018_v52 }
 0x1e8   :  { %6231 = vmatpush2.bf16.msra.mxu0 %v18013_v56 }
 0x1e9   :  { %6284 = vmatpush2.bf16.msra.mxu1 %v18016_v57  ;;  %6232 = vmatprep.subr.bf16.mxu0 %v18021_v60  ;;  %v18063_v57 = vld [vmem:[#allocation4 + $0x1fc] ss:$48 sps:$4 sm:$0xff]  }
 0x1ea   :  { %6285 = vmatprep.subr.bf16.mxu1 %v18024_v40  ;;  %v18066_v60 = vld [vmem:[#allocation4 + $0x7fc] ss:$48 sps:$4 sm:$0xff]  }
 0x1ec   :  { %6233 = vmatpush2.bf16.msra.mxu0 %v18019_v61  ;;  %v18061_v61 = vld [vmem:[#allocation4 + $0x1f8] ss:$48 sps:$4 sm:$0xff]  }
 0x1ed   :  { %6286 = vmatpush2.bf16.msra.mxu1 %v18022_v62  ;;  %6234 = vmatprep.subr.bf16.mxu0 %v18027_v63  ;;  %v18064_v62 = vld [vmem:[#allocation4 + $0x7f8] ss:$48 sps:$4 sm:$0xff]  }
 0x1ee   :  { %6287 = vmatprep.subr.bf16.mxu1 %v18030_v0 }
 0x1f0   :  { %6235 = vmatpush2.bf16.msra.mxu0 %v18025_v2 }
 0x1f1   :  { %6288 = vmatpush2.bf16.msra.mxu1 %v18028_v4  ;;  %6236 = vmatprep.subr.bf16.mxu0 %v18033_v5 }
 0x1f2   :  { %6289 = vmatprep.subr.bf16.mxu1 %v18036_v7  ;;  %v18069_v7 = vld [vmem:[#allocation4 + $0x19c] ss:$48 sps:$4 sm:$0xff]  }
 0x1f4   :  { %6237 = vmatpush2.bf16.msra.mxu0 %v18031_v1  ;;  %v18072_v1 = vld [vmem:[#allocation4 + $0x79c] ss:$48 sps:$4 sm:$0xff]  }
 0x1f5   :  { %6290 = vmatpush2.bf16.msra.mxu1 %v18034_v10  ;;  %6238 = vmatprep.subr.bf16.mxu0 %v18039_v12 }
 0x1f6   :  { %6291 = vmatprep.subr.bf16.mxu1 %v18042_v6  ;;  %v18067_v6 = vld [vmem:[#allocation4 + $0x198] ss:$48 sps:$4 sm:$0xff]  }
 0x1f8   :  { %6239 = vmatpush2.bf16.msra.mxu0 %v18037_v17  ;;  %v18070_v17 = vld [vmem:[#allocation4 + $0x798] ss:$48 sps:$4 sm:$0xff]  }
 0x1f9   :  { %6292 = vmatpush2.bf16.msra.mxu1 %v18040_v18  ;;  %6240 = vmatprep.subr.bf16.mxu0 %v18045_v19  ;;  %v18075_v19 = vld [vmem:[#allocation4 + $0x13c] ss:$48 sps:$4 sm:$0xff]  }
 0x1fa   :  { %6293 = vmatprep.subr.bf16.mxu1 %v18048_v20  ;;  %v18078_v20 = vld [vmem:[#allocation4 + $0x73c] ss:$48 sps:$4 sm:$0xff]  }
 0x1fc   :  { %6241 = vmatpush2.bf16.msra.mxu0 %v18043_v13 }
 0x1fd   :  { %6294 = vmatpush2.bf16.msra.mxu1 %v18046_v21  ;;  %6316 = vmatprep.subr.bf16.mxu0 %v18051_v22 }
 0x1fe   :  { %6369 = vmatprep.subr.bf16.mxu1 %v18054_v23 }
 0x1ff   :  { %v5926_v44 = vpop.f32.mrf.mxu0  ;;  %6243 = vmatmul.mubr.bf16.vlgmr.msra.gmra.mxu0 %v20709_v32 }
 0x200   :  { %v5979_v29 = vpop.f32.mrf.mxu1  ;;  %6296 = vmatmul.mubr.bf16.vlgmr.msra.gmra.mxu1 %v20713_v36  ;;  %6317 = vmatpush1.bf16.msra.mxu0 %v18049_v25 }
 0x201   :  { %v20809_v47 = vadd.f32 %v5979_v29, %v5926_v44  ;;  %6370 = vmatpush1.bf16.msra.mxu1 %v18052_v26  ;;  %v5928_v52 = vpop.f32.mrf.mxu0  ;;  %6318 = vmatprep.subr.bf16.mxu0 %v18057_v31  ;;  %v18073_v26 = vld [vmem:[#allocation4 + $0x138] ss:$48 sps:$4 sm:$0xff]  }
 0x202   :  { %v5981_v56 = vpop.f32.mrf.mxu1  ;;  %6371 = vmatprep.subr.bf16.mxu1 %v18060_v38  ;;  %6252 = vmatprep.mubr.bf16.mxu0 %v20721_v42  ;;  %v18076_v31 = vld [vmem:[#allocation4 + $0x738] ss:$48 sps:$4 sm:$0xff]  }
 0x203   :  { %v20811_v40 = vadd.f32 %v5981_v56, %v5928_v52  ;;  %6305 = vmatprep.mubr.bf16.mxu1 %v20723_v43  ;;  %v5930_v63 = vpop.f32.mrf.mxu0  ;;  %v18079_v44 = vld [vmem:[#allocation4 + $0xd8] ss:$48 sps:$4 sm:$0xff]   ;;  %v18087_v52 = vld [vmem:[#allocation4 + $0x7c] ss:$48 sps:$4 sm:$0xff]  }
 0x204   :  { %v5983_v0 = vpop.f32.mrf.mxu1  ;;  %6319 = vmatpush1.bf16.msra.mxu0 %v18055_v39  ;;  %v18081_v39 = vld [vmem:[#allocation4 + $0xdc] ss:$48 sps:$4 sm:$0xff]   ;;  %v18082_v29 = vld [vmem:[#allocation4 + $0x6d8] ss:$48 sps:$4 sm:$0xff]  }
 0x205   :  { %v20815_v2 = vadd.f32 %v5983_v0, %v5930_v63  ;;  %6372 = vmatpush1.bf16.msra.mxu1 %v18058_v24  ;;  %v20817_v4 = vpop.f32.mrf.mxu0  ;;  %6320 = vmatprep.subr.bf16.mxu0 %v18063_v57  ;;  %v18084_v24 = vld [vmem:[#allocation4 + $0x6dc] ss:$48 sps:$4 sm:$0xff]   ;;  %v18085_v57 = vld [vmem:[#allocation4 + $0x78] ss:$48 sps:$4 sm:$0xff]  }
 0x206   :  { %22220 = vst [vmem:[#allocation32_spill] sm:$0xff] %v20817_v4  ;;  %v20819_v5 = vpop.f32.mrf.mxu1  ;;  %6373 = vmatprep.subr.bf16.mxu1 %v18066_v60  ;;  %v18090_v56 = vld [vmem:[#allocation4 + $0x67c] ss:$48 sps:$4 sm:$0xff]   ;;  %v18088_v60 = vld [vmem:[#allocation4 + $0x678] ss:$48 sps:$4 sm:$0xff]  }
 0x207   :  { %22221 = vst [vmem:[#allocation33_spill] sm:$0xff] %v20819_v5  ;;  %6253 = vmatmul.mubr.bf16.gmra.mxu0 %v20729_v48  ;;  %v5936_v10 = vpop.f32.mrf.mxu0  ;;  %v18091_v63 = vld [vmem:[#allocation4 + $0x18] ss:$48 sps:$4 sm:$0xff]  }
 0x208   :  { %6306 = vmatmul.mubr.bf16.gmra.mxu1 %v20731_v55  ;;  %v5989_v12 = vpop.f32.mrf.mxu1  ;;  %6321 = vmatpush1.bf16.msra.mxu0 %v18061_v61  ;;  %v18093_v61 = vld [vmem:[#allocation4 + $0x1c] ss:$48 sps:$4 sm:$0xff]   ;;  %v18094_v0 = vld [vmem:[#allocation4 + $0x618] ss:$48 sps:$4 sm:$0xff]  }
 0x209   :  { %6374 = vmatpush1.bf16.msra.mxu1 %v18064_v62  ;;  %v20823_v18 = vadd.f32 %v5989_v12, %v5936_v10  ;;  %6322 = vmatprep.subr.bf16.mxu0 %v18069_v7  ;;  %v5938_v13 = vpop.f32.mrf.mxu0  ;;  %v18096_v62 = vld [vmem:[#allocation4 + $0x61c] ss:$48 sps:$4 sm:$0xff]   ;;  %v18097_v10 = vld [vmem:[#allocation4 + $0x5b8] ss:$48 sps:$4 sm:$0xff]  }
 0x20a   :  { %6375 = vmatprep.subr.bf16.mxu1 %v18072_v1  ;;  %v5991_v21 = vpop.f32.mrf.mxu1  ;;  %6348 = vmatprep.mubr.bf16.mxu0 %v20635_v53  ;;  %v18099_v7 = vld [vmem:[#allocation4 + $0x5bc] ss:$48 sps:$4 sm:$0xff]   ;;  %v18100_v12 = vld [vmem:[#allocation4 + $0xbb8] ss:$48 sps:$4 sm:$0xff]  }
 0x20b   :  { %v20825_v22 = vadd.f32 %v5991_v21, %v5938_v13  ;;  %6401 = vmatprep.mubr.bf16.mxu1 %v20637_v54  ;;  %v5940_v23 = vpop.f32.mrf.mxu0  ;;  %v18102_v1 = vld [vmem:[#allocation4 + $0xbbc] ss:$48 sps:$4 sm:$0xff]  }
 0x20c   :  { %v5993_v25 = vpop.f32.mrf.mxu1  ;;  %6323 = vmatpush1.bf16.msra.mxu0 %v18067_v6  ;;  %v18105_v6 = vld [vmem:[#allocation4 + $0x55c] ss:$48 sps:$4 sm:$0xff]  }
 0x20d   :  { %6376 = vmatpush1.bf16.msra.mxu1 %v18070_v17  ;;  %v20829_v38 = vadd.f32 %v5993_v25, %v5940_v23  ;;  %6324 = vmatprep.subr.bf16.mxu0 %v18075_v19  ;;  %v18108_v17 = vld [vmem:[#allocation4 + $0xb5c] ss:$48 sps:$4 sm:$0xff]   ;;  %v18103_v19 = vld [vmem:[#allocation4 + $0x558] ss:$48 sps:$4 sm:$0xff]  }
 0x20e   :  { %6377 = vmatprep.subr.bf16.mxu1 %v18078_v20  ;;  %v18106_v20 = vld [vmem:[#allocation4 + $0xb58] ss:$48 sps:$4 sm:$0xff]   ;;  %v18111_v13 = vld [vmem:[#allocation4 + $0x4fc] ss:$48 sps:$4 sm:$0xff]  }
 0x20f   :  { %v18114_v21 = vld [vmem:[#allocation4 + $0xafc] ss:$48 sps:$4 sm:$0xff]   ;;  %v18109_v23 = vld [vmem:[#allocation4 + $0x4f8] ss:$48 sps:$4 sm:$0xff]  }
 0x210   :  { %6325 = vmatpush1.bf16.msra.mxu0 %v18073_v26  ;;  %v18112_v25 = vld [vmem:[#allocation4 + $0xaf8] ss:$48 sps:$4 sm:$0xff]   ;;  %v18117_v26 = vld [vmem:[#allocation4 + $0x49c] ss:$48 sps:$4 sm:$0xff]  }
 0x211   :  { %6378 = vmatpush1.bf16.msra.mxu1 %v18076_v31  ;;  %6326 = vmatprep.subr.bf16.mxu0 %v18081_v39  ;;  %v18120_v31 = vld [vmem:[#allocation4 + $0xa9c] ss:$48 sps:$4 sm:$0xff]   ;;  %v18115_v39 = vld [vmem:[#allocation4 + $0x498] ss:$48 sps:$4 sm:$0xff]  }
 0x212   :  { %6379 = vmatprep.subr.bf16.mxu1 %v18084_v24  ;;  %v18118_v24 = vld [vmem:[#allocation4 + $0xa98] ss:$48 sps:$4 sm:$0xff]  }
 0x214   :  { %6327 = vmatpush1.bf16.msra.mxu0 %v18079_v44  ;;  %v18123_v44 = vld [vmem:[#allocation4 + $0x43c] ss:$48 sps:$4 sm:$0xff]  }
 0x215   :  { %6380 = vmatpush1.bf16.msra.mxu1 %v18082_v29  ;;  %6328 = vmatprep.subr.bf16.mxu0 %v18087_v52  ;;  %v18126_v29 = vld [vmem:[#allocation4 + $0xa3c] ss:$48 sps:$4 sm:$0xff]   ;;  %v18121_v52 = vld [vmem:[#allocation4 + $0x438] ss:$48 sps:$4 sm:$0xff]  }
 0x216   :  { %6381 = vmatprep.subr.bf16.mxu1 %v18090_v56  ;;  %v18124_v56 = vld [vmem:[#allocation4 + $0xa38] ss:$48 sps:$4 sm:$0xff]  }
 0x218   :  { %6329 = vmatpush1.bf16.msra.mxu0 %v18085_v57  ;;  %v18129_v57 = vld [vmem:[#allocation4 + $0x3dc] ss:$48 sps:$4 sm:$0xff]  }
 0x219   :  { %6382 = vmatpush1.bf16.msra.mxu1 %v18088_v60  ;;  %6330 = vmatprep.subr.bf16.mxu0 %v18093_v61  ;;  %v18132_v60 = vld [vmem:[#allocation4 + $0x9dc] ss:$48 sps:$4 sm:$0xff]   ;;  %v18127_v61 = vld [vmem:[#allocation4 + $0x3d8] ss:$48 sps:$4 sm:$0xff]  }
 0x21a   :  { %6383 = vmatprep.subr.bf16.mxu1 %v18096_v62  ;;  %v18130_v62 = vld [vmem:[#allocation4 + $0x9d8] ss:$48 sps:$4 sm:$0xff]  }
 0x21c   :  { %6331 = vmatpush1.bf16.msra.mxu0 %v18091_v63  ;;  %v18135_v63 = vld [vmem:[#allocation4 + $0x37c] ss:$48 sps:$4 sm:$0xff]  }
 0x21d   :  { %6384 = vmatpush1.bf16.msra.mxu1 %v18094_v0  ;;  %6332 = vmatprep.subr.bf16.mxu0 %v18099_v7  ;;  %v18138_v0 = vld [vmem:[#allocation4 + $0x97c] ss:$48 sps:$4 sm:$0xff]   ;;  %v18133_v7 = vld [vmem:[#allocation4 + $0x378] ss:$48 sps:$4 sm:$0xff]  }
 0x21e   :  { %6385 = vmatprep.subr.bf16.mxu1 %v18102_v1  ;;  %v18136_v1 = vld [vmem:[#allocation4 + $0x978] ss:$48 sps:$4 sm:$0xff]  }
 0x220   :  { %6333 = vmatpush2.bf16.msra.mxu0 %v18097_v10  ;;  %v18141_v10 = vld [vmem:[#allocation4 + $0x31c] ss:$48 sps:$4 sm:$0xff]  }
 0x221   :  { %6386 = vmatpush2.bf16.msra.mxu1 %v18100_v12  ;;  %6334 = vmatprep.subr.bf16.mxu0 %v18105_v6  ;;  %v18144_v12 = vld [vmem:[#allocation4 + $0x91c] ss:$48 sps:$4 sm:$0xff]   ;;  %v18139_v6 = vld [vmem:[#allocation4 + $0x318] ss:$48 sps:$4 sm:$0xff]  }
 0x222   :  { %6387 = vmatprep.subr.bf16.mxu1 %v18108_v17  ;;  %v18142_v17 = vld [vmem:[#allocation4 + $0x918] ss:$48 sps:$4 sm:$0xff]  }
 0x224   :  { %6335 = vmatpush2.bf16.msra.mxu0 %v18103_v19  ;;  %v18147_v19 = vld [vmem:[#allocation4 + $0xebc] ss:$48 sps:$4 sm:$0xff]  }
 0x225   :  { %6388 = vmatpush2.bf16.msra.mxu1 %v18106_v20  ;;  %6336 = vmatprep.subr.bf16.mxu0 %v18111_v13  ;;  %v18150_v20 = vld [vmem:[#allocation4 + $0x14bc] ss:$48 sps:$4 sm:$0xff]   ;;  %v18145_v13 = vld [vmem:[#allocation4 + $0xeb8] ss:$48 sps:$4 sm:$0xff]  }
 0x226   :  { %6389 = vmatprep.subr.bf16.mxu1 %v18114_v21  ;;  %v18148_v21 = vld [vmem:[#allocation4 + $0x14b8] ss:$48 sps:$4 sm:$0xff]  }
 0x228   :  { %6337 = vmatpush2.bf16.msra.mxu0 %v18109_v23  ;;  %v20831_v23 = vpop.f32.mrf.mxu0 }
 0x229   :  { %6390 = vmatpush2.bf16.msra.mxu1 %v18112_v25  ;;  %6338 = vmatprep.subr.bf16.mxu0 %v18117_v26  ;;  %22222 = vst [vmem:[#allocation34_spill] sm:$0xff] %v20831_v23  ;;  %v20833_v25 = vpop.f32.mrf.mxu1  ;;  %v18153_v26 = vld [vmem:[#allocation4 + $0xe5c] ss:$48 sps:$4 sm:$0xff]   ;;  %v18541_v23 = vld [vmem:[#allocation4 + $0xe08] ss:$48 sps:$4 sm:$0xff]  }
 0x22a   :  { %6391 = vmatprep.subr.bf16.mxu1 %v18120_v31  ;;  %22223 = vst [vmem:[#allocation35_spill] sm:$0xff] %v20833_v25  ;;  %v18156_v31 = vld [vmem:[#allocation4 + $0x145c] ss:$48 sps:$4 sm:$0xff]  }
 0x22c   :  { %6339 = vmatpush2.bf16.msra.mxu0 %v18115_v39  ;;  %v18151_v39 = vld [vmem:[#allocation4 + $0xe58] ss:$48 sps:$4 sm:$0xff]  }
 0x22d   :  { %6392 = vmatpush2.bf16.msra.mxu1 %v18118_v24  ;;  %6340 = vmatprep.subr.bf16.mxu0 %v18123_v44  ;;  %v18154_v24 = vld [vmem:[#allocation4 + $0x1458] ss:$48 sps:$4 sm:$0xff]  }
 0x22e   :  { %6393 = vmatprep.subr.bf16.mxu1 %v18126_v29 }
 0x230   :  { %6341 = vmatpush2.bf16.msra.mxu0 %v18121_v52 }
 0x231   :  { %6394 = vmatpush2.bf16.msra.mxu1 %v18124_v56  ;;  %6342 = vmatprep.subr.bf16.mxu0 %v18129_v57 }
 0x232   :  { %6395 = vmatprep.subr.bf16.mxu1 %v18132_v60  ;;  %v18159_v60 = vld [vmem:[#allocation4 + $0xdfc] ss:$48 sps:$4 sm:$0xff]  }
 0x234   :  { %6343 = vmatpush2.bf16.msra.mxu0 %v18127_v61  ;;  %v18162_v61 = vld [vmem:[#allocation4 + $0x13fc] ss:$48 sps:$4 sm:$0xff]  }
 0x235   :  { %6396 = vmatpush2.bf16.msra.mxu1 %v18130_v62  ;;  %6344 = vmatprep.subr.bf16.mxu0 %v18135_v63 }
 0x236   :  { %6397 = vmatprep.subr.bf16.mxu1 %v18138_v0  ;;  %v18157_v0 = vld [vmem:[#allocation4 + $0xdf8] ss:$48 sps:$4 sm:$0xff]  }
 0x238   :  { %6345 = vmatpush2.bf16.msra.mxu0 %v18133_v7  ;;  %v18160_v7 = vld [vmem:[#allocation4 + $0x13f8] ss:$48 sps:$4 sm:$0xff]  }
 0x239   :  { %6398 = vmatpush2.bf16.msra.mxu1 %v18136_v1  ;;  %6346 = vmatprep.subr.bf16.mxu0 %v18141_v10 }
 0x23a   :  { %6399 = vmatprep.subr.bf16.mxu1 %v18144_v12 }
 0x23c   :  { %6347 = vmatpush2.bf16.msra.mxu0 %v18139_v6 }
 0x23d   :  { %6400 = vmatpush2.bf16.msra.mxu1 %v18142_v17  ;;  %6422 = vmatprep.subr.bf16.mxu0 %v18147_v19  ;;  %v18168_v19 = vld [vmem:[#allocation4 + $0x139c] ss:$48 sps:$4 sm:$0xff]  }
 0x23e   :  { %6475 = vmatprep.subr.bf16.mxu1 %v18150_v20 }
 0x23f   :  { %v6032_v44 = vpop.f32.mrf.mxu0  ;;  %6349 = vmatmul.mubr.bf16.vlgmr.msra.gmra.mxu0 %v20641_v8 }
 0x240   :  { %v6085_v29 = vpop.f32.mrf.mxu1  ;;  %6402 = vmatmul.mubr.bf16.vlgmr.msra.gmra.mxu1 %v20643_v9  ;;  %v6033_v52 = vadd.f32 %v6032_v44, %v20809_v47  ;;  %6423 = vmatpush1.bf16.msra.mxu0 %v18145_v13  ;;  %v18163_v13 = vld [vmem:[#allocation4 + $0xd98] ss:$48 sps:$4 sm:$0xff]   ;;  %v18171_v44 = vld [vmem:[#allocation4 + $0xd3c] ss:$48 sps:$4 sm:$0xff]  }
 0x241   :  { %6476 = vmatpush1.bf16.msra.mxu1 %v18148_v21  ;;  %v6034_v56 = vpop.f32.mrf.mxu0  ;;  %6424 = vmatprep.subr.bf16.mxu0 %v18153_v26  ;;  %v18166_v21 = vld [vmem:[#allocation4 + $0x1398] ss:$48 sps:$4 sm:$0xff]  }
 0x242   :  { %v6087_v57 = vpop.f32.mrf.mxu1  ;;  %6477 = vmatprep.subr.bf16.mxu1 %v18156_v31  ;;  %v20838_v62 = vadd.f32 %v6085_v29, %v6033_v52  ;;  %v6035_v63 = vadd.f32 %v6034_v56, %v20811_v40  ;;  %6358 = vmatprep.mubr.bf16.mxu0 %v20659_v33  ;;  %v18165_v40 = vld [vmem:[#allocation4 + $0xd9c] ss:$48 sps:$4 sm:$0xff]  }
 0x243   :  { %6411 = vmatprep.mubr.bf16.mxu1 %v20661_v34  ;;  %v6036_v1 = vpop.f32.mrf.mxu0  ;;  %v18174_v29 = vld [vmem:[#allocation4 + $0x133c] ss:$48 sps:$4 sm:$0xff]  }
 0x244   :  { %v6089_v47 = vpop.f32.mrf.mxu1  ;;  %v20843_v10 = vadd.f32 %v6087_v57, %v6035_v63  ;;  %v6037_v12 = vadd.f32 %v6036_v1, %v20815_v2  ;;  %6425 = vmatpush1.bf16.msra.mxu0 %v18151_v39  ;;  %v18169_v57 = vld [vmem:[#allocation4 + $0xd38] ss:$48 sps:$4 sm:$0xff]  }
 0x245   :  { %6478 = vmatpush1.bf16.msra.mxu1 %v18154_v24  ;;  %v20846_v6 = vpop.f32.mrf.mxu0  ;;  %6426 = vmatprep.subr.bf16.mxu0 %v18159_v60  ;;  %v18172_v60 = vld [vmem:[#allocation4 + $0x1338] ss:$48 sps:$4 sm:$0xff]  }
 0x246   :  { %22224 = vst [vmem:[#allocation36_spill] sm:$0xff] %v20846_v6  ;;  %v20848_v17 = vpop.f32.mrf.mxu1  ;;  %6479 = vmatprep.subr.bf16.mxu1 %v18162_v61  ;;  %v20850_v20 = vadd.f32 %v6089_v47, %v6037_v12  ;;  %v18175_v47 = vld [vmem:[#allocation4 + $0xcd8] ss:$48 sps:$4 sm:$0xff]   ;;  %v18352_v6 = vld [vmem:[#allocation4 + $0x1400] ss:$48 sps:$4 sm:$0xff]  }
 0x247   :  { %22225 = vst [vmem:[#allocation37_spill] sm:$0xff] %v20848_v17  ;;  %v6042_v26 = vpop.f32.mrf.mxu0  ;;  %6359 = vmatmul.mubr.bf16.gmra.mxu0 %v20663_v35  ;;  %v18178_v12 = vld [vmem:[#allocation4 + $0x12d8] ss:$48 sps:$4 sm:$0xff]  }
 0x248   :  { %v6095_v31 = vpop.f32.mrf.mxu1  ;;  %6412 = vmatmul.mubr.bf16.gmra.mxu1 %v20665_v37  ;;  %v6043_v2 = vadd.f32 %v6042_v26, %v20823_v18  ;;  %6427 = vmatpush1.bf16.msra.mxu0 %v18157_v0  ;;  %v18184_v26 = vld [vmem:[#allocation4 + $0x1278] ss:$48 sps:$4 sm:$0xff]  }
 0x249   :  { %6480 = vmatpush1.bf16.msra.mxu1 %v18160_v7  ;;  %v6044_v39 = vpop.f32.mrf.mxu0  ;;  %6428 = vmatprep.subr.bf16.mxu0 %v18165_v40  ;;  %v18177_v7 = vld [vmem:[#allocation4 + $0xcdc] ss:$48 sps:$4 sm:$0xff]  }
 0x24a   :  { %v6097_v24 = vpop.f32.mrf.mxu1  ;;  %6481 = vmatprep.subr.bf16.mxu1 %v18168_v19  ;;  %v6045_v52 = vadd.f32 %v6044_v39, %v20825_v22  ;;  %v20856_v56 = vadd.f32 %v6095_v31, %v6043_v2  ;;  %6454 = vmatprep.mubr.bf16.mxu0 %v20688_v49  ;;  %v18180_v22 = vld [vmem:[#allocation4 + $0x12dc] ss:$48 sps:$4 sm:$0xff]   ;;  %v18187_v31 = vld [vmem:[#allocation4 + $0xc18] ss:$48 sps:$4 sm:$0xff]  }
 0x24b   :  { %6507 = vmatprep.mubr.bf16.mxu1 %v20697_v51  ;;  %v6046_v61 = vpop.f32.mrf.mxu0  ;;  %v18183_v40 = vld [vmem:[#allocation4 + $0xc7c] ss:$48 sps:$4 sm:$0xff]   ;;  %v18190_v2 = vld [vmem:[#allocation4 + $0x1218] ss:$48 sps:$4 sm:$0xff]  }
 0x24c   :  { %v6099_v18 = vpop.f32.mrf.mxu1  ;;  %v6047_v63 = vadd.f32 %v6046_v61, %v20829_v38  ;;  %v20861_v0 = vadd.f32 %v6097_v24, %v6045_v52  ;;  %6429 = vmatpush1.bf16.msra.mxu0 %v18163_v13  ;;  %v18186_v19 = vld [vmem:[#allocation4 + $0x127c] ss:$48 sps:$4 sm:$0xff]   ;;  %v18181_v38 = vld [vmem:[#allocation4 + $0xc78] ss:$48 sps:$4 sm:$0xff]  }
 0x24d   :  { %6482 = vmatpush1.bf16.msra.mxu1 %v18166_v21  ;;  %6430 = vmatprep.subr.bf16.mxu0 %v18171_v44  ;;  %v18189_v13 = vld [vmem:[#allocation4 + $0xc1c] ss:$48 sps:$4 sm:$0xff]   ;;  %v18193_v44 = vld [vmem:[#allocation4 + $0x11b8] ss:$48 sps:$4 sm:$0xff]  }
 0x24e   :  { %6483 = vmatprep.subr.bf16.mxu1 %v18174_v29  ;;  %v20863_v1 = vadd.f32 %v6099_v18, %v6047_v63  ;;  %v18192_v21 = vld [vmem:[#allocation4 + $0x121c] ss:$48 sps:$4 sm:$0xff]   ;;  %v18196_v29 = vld [vmem:[#allocation4 + $0x17b8] ss:$48 sps:$4 sm:$0xff]  }
 0x24f   :  { %v18195_v39 = vld [vmem:[#allocation4 + $0x11bc] ss:$48 sps:$4 sm:$0xff]   ;;  %v18202_v61 = vld [vmem:[#allocation4 + $0x1758] ss:$48 sps:$4 sm:$0xff]  }
 0x250   :  { %6431 = vmatpush1.bf16.msra.mxu0 %v18169_v57  ;;  %v18198_v24 = vld [vmem:[#allocation4 + $0x17bc] ss:$48 sps:$4 sm:$0xff]  }
 0x251   :  { %6484 = vmatpush1.bf16.msra.mxu1 %v18172_v60  ;;  %6432 = vmatprep.subr.bf16.mxu0 %v18177_v7  ;;  %v18201_v52 = vld [vmem:[#allocation4 + $0x115c] ss:$48 sps:$4 sm:$0xff]   ;;  %v18199_v60 = vld [vmem:[#allocation4 + $0x1158] ss:$48 sps:$4 sm:$0xff]  }
 0x252   :  { %6485 = vmatprep.subr.bf16.mxu1 %v18180_v22  ;;  %v18204_v57 = vld [vmem:[#allocation4 + $0x175c] ss:$48 sps:$4 sm:$0xff]   ;;  %v18205_v7 = vld [vmem:[#allocation4 + $0x10f8] ss:$48 sps:$4 sm:$0xff]  }
 0x253   :  { %v18207_v18 = vld [vmem:[#allocation4 + $0x10fc] ss:$48 sps:$4 sm:$0xff]   ;;  %v18208_v22 = vld [vmem:[#allocation4 + $0x16f8] ss:$48 sps:$4 sm:$0xff]  }
 0x254   :  { %6433 = vmatpush1.bf16.msra.mxu0 %v18175_v47  ;;  %v18210_v63 = vld [vmem:[#allocation4 + $0x16fc] ss:$48 sps:$4 sm:$0xff]  }
 0x255   :  { %6486 = vmatpush1.bf16.msra.mxu1 %v18178_v12  ;;  %6434 = vmatprep.subr.bf16.mxu0 %v18183_v40  ;;  %v18213_v47 = vld [vmem:[#allocation4 + $0x109c] ss:$48 sps:$4 sm:$0xff]   ;;  %v18211_v40 = vld [vmem:[#allocation4 + $0x1098] ss:$48 sps:$4 sm:$0xff]  }
 0x256   :  { %6487 = vmatprep.subr.bf16.mxu1 %v18186_v19  ;;  %v18216_v12 = vld [vmem:[#allocation4 + $0x169c] ss:$48 sps:$4 sm:$0xff]   ;;  %v18214_v19 = vld [vmem:[#allocation4 + $0x1698] ss:$48 sps:$4 sm:$0xff]  }
 0x258   :  { %6435 = vmatpush1.bf16.msra.mxu0 %v18181_v38  ;;  %v18219_v38 = vld [vmem:[#allocation4 + $0x103c] ss:$48 sps:$4 sm:$0xff]  }
 0x259   :  { %6488 = vmatpush1.bf16.msra.mxu1 %v18184_v26  ;;  %6436 = vmatprep.subr.bf16.mxu0 %v18189_v13  ;;  %v18222_v26 = vld [vmem:[#allocation4 + $0x163c] ss:$48 sps:$4 sm:$0xff]   ;;  %v18217_v13 = vld [vmem:[#allocation4 + $0x1038] ss:$48 sps:$4 sm:$0xff]  }
 0x25a   :  { %6489 = vmatprep.subr.bf16.mxu1 %v18192_v21  ;;  %v18220_v21 = vld [vmem:[#allocation4 + $0x1638] ss:$48 sps:$4 sm:$0xff]  }
 0x25c   :  { %6437 = vmatpush1.bf16.msra.mxu0 %v18187_v31  ;;  %v18225_v31 = vld [vmem:[#allocation4 + $0xfdc] ss:$48 sps:$4 sm:$0xff]  }
 0x25d   :  { %6490 = vmatpush1.bf16.msra.mxu1 %v18190_v2  ;;  %6438 = vmatprep.subr.bf16.mxu0 %v18195_v39  ;;  %v18228_v2 = vld [vmem:[#allocation4 + $0x15dc] ss:$48 sps:$4 sm:$0xff]   ;;  %v18223_v39 = vld [vmem:[#allocation4 + $0xfd8] ss:$48 sps:$4 sm:$0xff]  }
 0x25e   :  { %6491 = vmatprep.subr.bf16.mxu1 %v18198_v24  ;;  %v18226_v24 = vld [vmem:[#allocation4 + $0x15d8] ss:$48 sps:$4 sm:$0xff]  }
 0x260   :  { %6439 = vmatpush2.bf16.msra.mxu0 %v18193_v44  ;;  %v18231_v44 = vld [vmem:[#allocation4 + $0xf7c] ss:$48 sps:$4 sm:$0xff]  }
 0x261   :  { %6492 = vmatpush2.bf16.msra.mxu1 %v18196_v29  ;;  %6440 = vmatprep.subr.bf16.mxu0 %v18201_v52  ;;  %v18234_v29 = vld [vmem:[#allocation4 + $0x157c] ss:$48 sps:$4 sm:$0xff]   ;;  %v18229_v52 = vld [vmem:[#allocation4 + $0xf78] ss:$48 sps:$4 sm:$0xff]  }
 0x262   :  { %6493 = vmatprep.subr.bf16.mxu1 %v18204_v57  ;;  %v18232_v57 = vld [vmem:[#allocation4 + $0x1578] ss:$48 sps:$4 sm:$0xff]  }
 0x264   :  { %6441 = vmatpush2.bf16.msra.mxu0 %v18199_v60  ;;  %v18237_v60 = vld [vmem:[#allocation4 + $0xf1c] ss:$48 sps:$4 sm:$0xff]  }
 0x265   :  { %6494 = vmatpush2.bf16.msra.mxu1 %v18202_v61  ;;  %6442 = vmatprep.subr.bf16.mxu0 %v18207_v18  ;;  %v18240_v61 = vld [vmem:[#allocation4 + $0x151c] ss:$48 sps:$4 sm:$0xff]   ;;  %v18235_v18 = vld [vmem:[#allocation4 + $0xf18] ss:$48 sps:$4 sm:$0xff]  }
 0x266   :  { %6495 = vmatprep.subr.bf16.mxu1 %v18210_v63  ;;  %v18238_v63 = vld [vmem:[#allocation4 + $0x1518] ss:$48 sps:$4 sm:$0xff]  }
 0x268   :  { %6443 = vmatpush2.bf16.msra.mxu0 %v18205_v7  ;;  %v18243_v7 = vld [vmem:[#allocation4 + $0x2c4] ss:$48 sps:$4 sm:$0xff]  }
 0x269   :  { %6496 = vmatpush2.bf16.msra.mxu1 %v18208_v22  ;;  %6444 = vmatprep.subr.bf16.mxu0 %v18213_v47  ;;  %v18246_v22 = vld [vmem:[#allocation4 + $0x8c4] ss:$48 sps:$4 sm:$0xff]   ;;  %v18241_v47 = vld [vmem:[#allocation4 + $0x2c0] ss:$48 sps:$4 sm:$0xff]  }
 0x26a   :  { %6497 = vmatprep.subr.bf16.mxu1 %v18216_v12  ;;  %v18244_v12 = vld [vmem:[#allocation4 + $0x8c0] ss:$48 sps:$4 sm:$0xff]  }
 0x26c   :  { %6445 = vmatpush2.bf16.msra.mxu0 %v18211_v40  ;;  %v20865_v40 = vpop.f32.mrf.mxu0 }
 0x26d   :  { %6498 = vmatpush2.bf16.msra.mxu1 %v18214_v19  ;;  %6446 = vmatprep.subr.bf16.mxu0 %v18219_v38  ;;  %22226 = vst [vmem:[#allocation38_spill] sm:$0xff] %v20865_v40  ;;  %v20867_v19 = vpop.f32.mrf.mxu1  ;;  %v18249_v38 = vld [vmem:[#allocation4 + $0x264] ss:$48 sps:$4 sm:$0xff]  }
 0x26e   :  { %6499 = vmatprep.subr.bf16.mxu1 %v18222_v26  ;;  %22227 = vst [vmem:[#allocation39_spill] sm:$0xff] %v20867_v19  ;;  %v18252_v26 = vld [vmem:[#allocation4 + $0x864] ss:$48 sps:$4 sm:$0xff]  }
 0x270   :  { %6447 = vmatpush2.bf16.msra.mxu0 %v18217_v13  ;;  %v18247_v13 = vld [vmem:[#allocation4 + $0x260] ss:$48 sps:$4 sm:$0xff]  }
 0x271   :  { %6500 = vmatpush2.bf16.msra.mxu1 %v18220_v21  ;;  %6448 = vmatprep.subr.bf16.mxu0 %v18225_v31  ;;  %v18250_v21 = vld [vmem:[#allocation4 + $0x860] ss:$48 sps:$4 sm:$0xff]  }
 0x272   :  { %6501 = vmatprep.subr.bf16.mxu1 %v18228_v2 }
 0x274   :  { %6449 = vmatpush2.bf16.msra.mxu0 %v18223_v39 }
 0x275   :  { %6502 = vmatpush2.bf16.msra.mxu1 %v18226_v24  ;;  %6450 = vmatprep.subr.bf16.mxu0 %v18231_v44 }
 0x276   :  { %6503 = vmatprep.subr.bf16.mxu1 %v18234_v29  ;;  %v18255_v29 = vld [vmem:[#allocation4 + $0x204] ss:$48 sps:$4 sm:$0xff]  }
 0x278   :  { %6451 = vmatpush2.bf16.msra.mxu0 %v18229_v52  ;;  %v18258_v52 = vld [vmem:[#allocation4 + $0x804] ss:$48 sps:$4 sm:$0xff]  }
 0x279   :  { %6504 = vmatpush2.bf16.msra.mxu1 %v18232_v57  ;;  %6452 = vmatprep.subr.bf16.mxu0 %v18237_v60  ;;  %v18253_v60 = vld [vmem:[#allocation4 + $0x200] ss:$48 sps:$4 sm:$0xff]  }
 0x27a   :  { %6505 = vmatprep.subr.bf16.mxu1 %v18240_v61  ;;  %v18256_v61 = vld [vmem:[#allocation4 + $0x800] ss:$48 sps:$4 sm:$0xff]  }
 0x27c   :  { %6453 = vmatpush2.bf16.msra.mxu0 %v18235_v18 }
 0x27d   :  { %6506 = vmatpush2.bf16.msra.mxu1 %v18238_v63  ;;  %6528 = vmatprep.subr.bf16.mxu0 %v18243_v7 }
 0x27e   :  { %6581 = vmatprep.subr.bf16.mxu1 %v18246_v22 }
 0x27f   :  { %v6138_v31 = vpop.f32.mrf.mxu0  ;;  %6455 = vmatmul.mubr.bf16.vlgmr.msra.gmra.mxu0 %v20709_v32 }
 0x280   :  { %v6191_v2 = vpop.f32.mrf.mxu1  ;;  %6508 = vmatmul.mubr.bf16.vlgmr.msra.gmra.mxu1 %v20713_v36  ;;  %6529 = vmatpush1.bf16.msra.mxu0 %v18241_v47 }
 0x281   :  { %v20871_v39 = vadd.f32 %v6191_v2, %v6138_v31  ;;  %6582 = vmatpush1.bf16.msra.mxu1 %v18244_v12  ;;  %v6140_v24 = vpop.f32.mrf.mxu0  ;;  %6530 = vmatprep.subr.bf16.mxu0 %v18249_v38  ;;  %v18261_v12 = vld [vmem:[#allocation4 + $0x1a4] ss:$48 sps:$4 sm:$0xff]   ;;  %v18259_v2 = vld [vmem:[#allocation4 + $0x1a0] ss:$48 sps:$4 sm:$0xff]  }
 0x282   :  { %v6193_v44 = vpop.f32.mrf.mxu1  ;;  %6583 = vmatprep.subr.bf16.mxu1 %v18252_v26  ;;  %6464 = vmatprep.mubr.bf16.mxu0 %v20721_v42  ;;  %v18264_v38 = vld [vmem:[#allocation4 + $0x7a4] ss:$48 sps:$4 sm:$0xff]  }
 0x283   :  { %v20873_v57 = vadd.f32 %v6193_v44, %v6140_v24  ;;  %6517 = vmatprep.mubr.bf16.mxu1 %v20723_v43  ;;  %v6142_v18 = vpop.f32.mrf.mxu0  ;;  %v18262_v24 = vld [vmem:[#allocation4 + $0x7a0] ss:$48 sps:$4 sm:$0xff]   ;;  %v18270_v44 = vld [vmem:[#allocation4 + $0x744] ss:$48 sps:$4 sm:$0xff]  }
 0x284   :  { %v6195_v63 = vpop.f32.mrf.mxu1  ;;  %6531 = vmatpush1.bf16.msra.mxu0 %v18247_v13 }
 0x285   :  { %v20877_v7 = vadd.f32 %v6195_v63, %v6142_v18  ;;  %6584 = vmatpush1.bf16.msra.mxu1 %v18250_v21  ;;  %v20879_v22 = vpop.f32.mrf.mxu0  ;;  %6532 = vmatprep.subr.bf16.mxu0 %v18255_v29  ;;  %v18267_v21 = vld [vmem:[#allocation4 + $0x144] ss:$48 sps:$4 sm:$0xff]  }
 0x286   :  { %22228 = vst [vmem:[#allocation40_spill] sm:$0xff] %v20879_v22  ;;  %v20881_v47 = vpop.f32.mrf.mxu1  ;;  %6585 = vmatprep.subr.bf16.mxu1 %v18258_v52  ;;  %v18282_v22 = vld [vmem:[#allocation4 + $0x684] ss:$48 sps:$4 sm:$0xff]  }
 0x287   :  { %22229 = vst [vmem:[#allocation41_spill] sm:$0xff] %v20881_v47  ;;  %6465 = vmatmul.mubr.bf16.gmra.mxu0 %v20729_v48  ;;  %v6148_v26 = vpop.f32.mrf.mxu0 }
 0x288   :  { %6518 = vmatmul.mubr.bf16.gmra.mxu1 %v20731_v55  ;;  %v6201_v31 = vpop.f32.mrf.mxu1  ;;  %6533 = vmatpush1.bf16.msra.mxu0 %v18253_v60  ;;  %v18265_v60 = vld [vmem:[#allocation4 + $0x140] ss:$48 sps:$4 sm:$0xff]  }
 0x289   :  { %6586 = vmatpush1.bf16.msra.mxu1 %v18256_v61  ;;  %v20885_v13 = vadd.f32 %v6201_v31, %v6148_v26  ;;  %6534 = vmatprep.subr.bf16.mxu0 %v18261_v12  ;;  %v6150_v29 = vpop.f32.mrf.mxu0  ;;  %v18268_v61 = vld [vmem:[#allocation4 + $0x740] ss:$48 sps:$4 sm:$0xff]   ;;  %v18273_v12 = vld [vmem:[#allocation4 + $0xe4] ss:$48 sps:$4 sm:$0xff]  }
 0x28a   :  { %6587 = vmatprep.subr.bf16.mxu1 %v18264_v38  ;;  %v6203_v52 = vpop.f32.mrf.mxu1  ;;  %6560 = vmatprep.mubr.bf16.mxu0 %v20635_v53  ;;  %v18276_v38 = vld [vmem:[#allocation4 + $0x6e4] ss:$48 sps:$4 sm:$0xff]   ;;  %v18271_v31 = vld [vmem:[#allocation4 + $0xe0] ss:$48 sps:$4 sm:$0xff]  }
 0x28b   :  { %v20887_v18 = vadd.f32 %v6203_v52, %v6150_v29  ;;  %6613 = vmatprep.mubr.bf16.mxu1 %v20637_v54  ;;  %v6152_v63 = vpop.f32.mrf.mxu0  ;;  %v18274_v29 = vld [vmem:[#allocation4 + $0x6e0] ss:$48 sps:$4 sm:$0xff]   ;;  %v18279_v52 = vld [vmem:[#allocation4 + $0x84] ss:$48 sps:$4 sm:$0xff]  }
 0x28c   :  { %v6205_v47 = vpop.f32.mrf.mxu1  ;;  %6535 = vmatpush1.bf16.msra.mxu0 %v18259_v2  ;;  %v18277_v2 = vld [vmem:[#allocation4 + $0x80] ss:$48 sps:$4 sm:$0xff]  }
 0x28d   :  { %6588 = vmatpush1.bf16.msra.mxu1 %v18262_v24  ;;  %v20891_v26 = vadd.f32 %v6205_v47, %v6152_v63  ;;  %6536 = vmatprep.subr.bf16.mxu0 %v18267_v21  ;;  %v18280_v24 = vld [vmem:[#allocation4 + $0x680] ss:$48 sps:$4 sm:$0xff]   ;;  %v18285_v47 = vld [vmem:[#allocation4 + $0x24] ss:$48 sps:$4 sm:$0xff]  }
 0x28e   :  { %6589 = vmatprep.subr.bf16.mxu1 %v18270_v44  ;;  %v18288_v63 = vld [vmem:[#allocation4 + $0x624] ss:$48 sps:$4 sm:$0xff]   ;;  %v18283_v21 = vld [vmem:[#allocation4 + $0x20] ss:$48 sps:$4 sm:$0xff]  }
 0x28f   :  { %v18286_v44 = vld [vmem:[#allocation4 + $0x620] ss:$48 sps:$4 sm:$0xff]  }
 0x290   :  { %6537 = vmatpush1.bf16.msra.mxu0 %v18265_v60  ;;  %v18291_v60 = vld [vmem:[#allocation4 + $0x5c4] ss:$48 sps:$4 sm:$0xff]  }
 0x291   :  { %6590 = vmatpush1.bf16.msra.mxu1 %v18268_v61  ;;  %6538 = vmatprep.subr.bf16.mxu0 %v18273_v12  ;;  %v18294_v61 = vld [vmem:[#allocation4 + $0xbc4] ss:$48 sps:$4 sm:$0xff]   ;;  %v18289_v12 = vld [vmem:[#allocation4 + $0x5c0] ss:$48 sps:$4 sm:$0xff]  }
 0x292   :  { %6591 = vmatprep.subr.bf16.mxu1 %v18276_v38  ;;  %v18292_v38 = vld [vmem:[#allocation4 + $0xbc0] ss:$48 sps:$4 sm:$0xff]  }
 0x294   :  { %6539 = vmatpush1.bf16.msra.mxu0 %v18271_v31  ;;  %v18297_v31 = vld [vmem:[#allocation4 + $0x564] ss:$48 sps:$4 sm:$0xff]  }
 0x295   :  { %6592 = vmatpush1.bf16.msra.mxu1 %v18274_v29  ;;  %6540 = vmatprep.subr.bf16.mxu0 %v18279_v52  ;;  %v18300_v29 = vld [vmem:[#allocation4 + $0xb64] ss:$48 sps:$4 sm:$0xff]   ;;  %v18298_v52 = vld [vmem:[#allocation4 + $0xb60] ss:$48 sps:$4 sm:$0xff]  }
 0x296   :  { %6593 = vmatprep.subr.bf16.mxu1 %v18282_v22  ;;  %v18295_v22 = vld [vmem:[#allocation4 + $0x560] ss:$48 sps:$4 sm:$0xff]  }
 0x298   :  { %6541 = vmatpush1.bf16.msra.mxu0 %v18277_v2  ;;  %v18303_v2 = vld [vmem:[#allocation4 + $0x504] ss:$48 sps:$4 sm:$0xff]  }
 0x299   :  { %6594 = vmatpush1.bf16.msra.mxu1 %v18280_v24  ;;  %6542 = vmatprep.subr.bf16.mxu0 %v18285_v47  ;;  %v18306_v24 = vld [vmem:[#allocation4 + $0xb04] ss:$48 sps:$4 sm:$0xff]   ;;  %v18301_v47 = vld [vmem:[#allocation4 + $0x500] ss:$48 sps:$4 sm:$0xff]  }
 0x29a   :  { %6595 = vmatprep.subr.bf16.mxu1 %v18288_v63  ;;  %v18304_v63 = vld [vmem:[#allocation4 + $0xb00] ss:$48 sps:$4 sm:$0xff]  }
 0x29c   :  { %6543 = vmatpush1.bf16.msra.mxu0 %v18283_v21  ;;  %v18309_v21 = vld [vmem:[#allocation4 + $0x4a4] ss:$48 sps:$4 sm:$0xff]  }
 0x29d   :  { %6596 = vmatpush1.bf16.msra.mxu1 %v18286_v44  ;;  %6544 = vmatprep.subr.bf16.mxu0 %v18291_v60  ;;  %v18312_v44 = vld [vmem:[#allocation4 + $0xaa4] ss:$48 sps:$4 sm:$0xff]   ;;  %v18307_v60 = vld [vmem:[#allocation4 + $0x4a0] ss:$48 sps:$4 sm:$0xff]  }
 0x29e   :  { %6597 = vmatprep.subr.bf16.mxu1 %v18294_v61  ;;  %v18310_v61 = vld [vmem:[#allocation4 + $0xaa0] ss:$48 sps:$4 sm:$0xff]  }
 0x2a0   :  { %6545 = vmatpush2.bf16.msra.mxu0 %v18289_v12  ;;  %v18315_v12 = vld [vmem:[#allocation4 + $0x444] ss:$48 sps:$4 sm:$0xff]  }
 0x2a1   :  { %6598 = vmatpush2.bf16.msra.mxu1 %v18292_v38  ;;  %6546 = vmatprep.subr.bf16.mxu0 %v18297_v31  ;;  %v18318_v38 = vld [vmem:[#allocation4 + $0xa44] ss:$48 sps:$4 sm:$0xff]   ;;  %v18313_v31 = vld [vmem:[#allocation4 + $0x440] ss:$48 sps:$4 sm:$0xff]  }
 0x2a2   :  { %6599 = vmatprep.subr.bf16.mxu1 %v18300_v29  ;;  %v18316_v29 = vld [vmem:[#allocation4 + $0xa40] ss:$48 sps:$4 sm:$0xff]  }
 0x2a4   :  { %6547 = vmatpush2.bf16.msra.mxu0 %v18295_v22  ;;  %v18321_v22 = vld [vmem:[#allocation4 + $0x3e4] ss:$48 sps:$4 sm:$0xff]  }
 0x2a5   :  { %6600 = vmatpush2.bf16.msra.mxu1 %v18298_v52  ;;  %6548 = vmatprep.subr.bf16.mxu0 %v18303_v2  ;;  %v18324_v52 = vld [vmem:[#allocation4 + $0x9e4] ss:$48 sps:$4 sm:$0xff]   ;;  %v18319_v2 = vld [vmem:[#allocation4 + $0x3e0] ss:$48 sps:$4 sm:$0xff]  }
 0x2a6   :  { %6601 = vmatprep.subr.bf16.mxu1 %v18306_v24  ;;  %v18322_v24 = vld [vmem:[#allocation4 + $0x9e0] ss:$48 sps:$4 sm:$0xff]  }
 0x2a8   :  { %6549 = vmatpush2.bf16.msra.mxu0 %v18301_v47  ;;  %v18327_v47 = vld [vmem:[#allocation4 + $0x384] ss:$48 sps:$4 sm:$0xff]  }
 0x2a9   :  { %6602 = vmatpush2.bf16.msra.mxu1 %v18304_v63  ;;  %6550 = vmatprep.subr.bf16.mxu0 %v18309_v21  ;;  %v18330_v63 = vld [vmem:[#allocation4 + $0x984] ss:$48 sps:$4 sm:$0xff]   ;;  %v18325_v21 = vld [vmem:[#allocation4 + $0x380] ss:$48 sps:$4 sm:$0xff]  }
 0x2aa   :  { %6603 = vmatprep.subr.bf16.mxu1 %v18312_v44  ;;  %v18328_v44 = vld [vmem:[#allocation4 + $0x980] ss:$48 sps:$4 sm:$0xff]  }
 0x2ac   :  { %6551 = vmatpush2.bf16.msra.mxu0 %v18307_v60  ;;  %v18333_v60 = vld [vmem:[#allocation4 + $0x324] ss:$48 sps:$4 sm:$0xff]  }
 0x2ad   :  { %6604 = vmatpush2.bf16.msra.mxu1 %v18310_v61  ;;  %6552 = vmatprep.subr.bf16.mxu0 %v18315_v12  ;;  %v18336_v61 = vld [vmem:[#allocation4 + $0x924] ss:$48 sps:$4 sm:$0xff]   ;;  %v18331_v12 = vld [vmem:[#allocation4 + $0x320] ss:$48 sps:$4 sm:$0xff]  }
 0x2ae   :  { %6605 = vmatprep.subr.bf16.mxu1 %v18318_v38  ;;  %v18334_v38 = vld [vmem:[#allocation4 + $0x920] ss:$48 sps:$4 sm:$0xff]  }
 0x2b0   :  { %6553 = vmatpush2.bf16.msra.mxu0 %v18313_v31  ;;  %v18339_v31 = vld [vmem:[#allocation4 + $0xec4] ss:$48 sps:$4 sm:$0xff]  }
 0x2b1   :  { %6606 = vmatpush2.bf16.msra.mxu1 %v18316_v29  ;;  %6554 = vmatprep.subr.bf16.mxu0 %v18321_v22  ;;  %v18342_v29 = vld [vmem:[#allocation4 + $0x14c4] ss:$48 sps:$4 sm:$0xff]   ;;  %v18337_v22 = vld [vmem:[#allocation4 + $0xec0] ss:$48 sps:$4 sm:$0xff]  }
 0x2b2   :  { %6607 = vmatprep.subr.bf16.mxu1 %v18324_v52  ;;  %v18340_v52 = vld [vmem:[#allocation4 + $0x14c0] ss:$48 sps:$4 sm:$0xff]  }
 0x2b4   :  { %6555 = vmatpush2.bf16.msra.mxu0 %v18319_v2  ;;  %v20893_v2 = vpop.f32.mrf.mxu0 }
 0x2b5   :  { %6608 = vmatpush2.bf16.msra.mxu1 %v18322_v24  ;;  %6556 = vmatprep.subr.bf16.mxu0 %v18327_v47  ;;  %v20895_v24 = vpop.f32.mrf.mxu1  ;;  %v18345_v47 = vld [vmem:[#allocation4 + $0xe64] ss:$48 sps:$4 sm:$0xff]  }
 0x2b6   :  { %6609 = vmatprep.subr.bf16.mxu1 %v18330_v63  ;;  %v18348_v63 = vld [vmem:[#allocation4 + $0x1464] ss:$48 sps:$4 sm:$0xff]  }
 0x2b8   :  { %6557 = vmatpush2.bf16.msra.mxu0 %v18325_v21  ;;  %v18343_v21 = vld [vmem:[#allocation4 + $0xe60] ss:$48 sps:$4 sm:$0xff]  }
 0x2b9   :  { %6610 = vmatpush2.bf16.msra.mxu1 %v18328_v44  ;;  %6558 = vmatprep.subr.bf16.mxu0 %v18333_v60  ;;  %v18346_v44 = vld [vmem:[#allocation4 + $0x1460] ss:$48 sps:$4 sm:$0xff]  }
 0x2ba   :  { %6611 = vmatprep.subr.bf16.mxu1 %v18336_v61 }
 0x2bc   :  { %6559 = vmatpush2.bf16.msra.mxu0 %v18331_v12 }
 0x2bd   :  { %6612 = vmatpush2.bf16.msra.mxu1 %v18334_v38  ;;  %6634 = vmatprep.subr.bf16.mxu0 %v18339_v31  ;;  %v18351_v38 = vld [vmem:[#allocation4 + $0xe04] ss:$48 sps:$4 sm:$0xff]  }
 0x2be   :  { %6687 = vmatprep.subr.bf16.mxu1 %v18342_v29  ;;  %v18354_v31 = vld [vmem:[#allocation4 + $0x1404] ss:$48 sps:$4 sm:$0xff]  }
 0x2bf   :  { %v6244_v17 = vpop.f32.mrf.mxu0  ;;  %6561 = vmatmul.mubr.bf16.vlgmr.msra.gmra.mxu0 %v20641_v8 }
 0x2c0   :  { %v6297_v46 = vpop.f32.mrf.mxu1  ;;  %6614 = vmatmul.mubr.bf16.vlgmr.msra.gmra.mxu1 %v20643_v9  ;;  %v6245_v60 = vadd.f32 %v6244_v17, %v20871_v39  ;;  %6635 = vmatpush1.bf16.msra.mxu0 %v18337_v22 }
 0x2c1   :  { %6688 = vmatpush1.bf16.msra.mxu1 %v18340_v52  ;;  %v6246_v61 = vpop.f32.mrf.mxu0  ;;  %6636 = vmatprep.subr.bf16.mxu0 %v18345_v47  ;;  %v18360_v47 = vld [vmem:[#allocation4 + $0x13a4] ss:$48 sps:$4 sm:$0xff]  }
 0x2c2   :  { %v6299_v12 = vpop.f32.mrf.mxu1  ;;  %6689 = vmatprep.subr.bf16.mxu1 %v18348_v63  ;;  %v20900_v29 = vadd.f32 %v6297_v46, %v6245_v60  ;;  %v6247_v19 = vadd.f32 %v6246_v61, %v20873_v57  ;;  %6570 = vmatprep.mubr.bf16.mxu0 %v20659_v33  ;;  %v18357_v57 = vld [vmem:[#allocation4 + $0xda4] ss:$48 sps:$4 sm:$0xff]   ;;  %v18355_v60 = vld [vmem:[#allocation4 + $0xda0] ss:$48 sps:$4 sm:$0xff]  }
 0x2c3   :  { %6623 = vmatprep.mubr.bf16.mxu1 %v20661_v34  ;;  %v6248_v45 = vpop.f32.mrf.mxu0  ;;  %v18358_v61 = vld [vmem:[#allocation4 + $0x13a0] ss:$48 sps:$4 sm:$0xff]  }
 0x2c4   :  { %v6301_v17 = vpop.f32.mrf.mxu1  ;;  %v20905_v39 = vadd.f32 %v6299_v12, %v6247_v19  ;;  %v6249_v22 = vadd.f32 %v6248_v45, %v20877_v7  ;;  %6637 = vmatpush1.bf16.msra.mxu0 %v18343_v21  ;;  %v18363_v21 = vld [vmem:[#allocation4 + $0xd44] ss:$48 sps:$4 sm:$0xff]  }
 0x2c5   :  { %6690 = vmatpush1.bf16.msra.mxu1 %v18346_v44  ;;  %v20908_v52 = vpop.f32.mrf.mxu0  ;;  %6638 = vmatprep.subr.bf16.mxu0 %v18351_v38  ;;  %v18366_v44 = vld [vmem:[#allocation4 + $0x1344] ss:$48 sps:$4 sm:$0xff]  }
 0x2c6   :  { %22230 = vst [vmem:[#allocation42_spill] sm:$0xff] %v20908_v52  ;;  %v20910_v46 = vpop.f32.mrf.mxu1  ;;  %6691 = vmatprep.subr.bf16.mxu1 %v18354_v31  ;;  %v20912_v63 = vadd.f32 %v6301_v17, %v6249_v22  ;;  %v18361_v31 = vld [vmem:[#allocation4 + $0xd40] ss:$48 sps:$4 sm:$0xff]  }
 0x2c7   :  { %22231 = vst [vmem:[#allocation43_spill] sm:$0xff] %v20910_v46  ;;  %v6254_v5 = vpop.f32.mrf.mxu0  ;;  %6571 = vmatmul.mubr.bf16.gmra.mxu0 %v20663_v35  ;;  %v18364_v17 = vld [vmem:[#allocation4 + $0x1340] ss:$48 sps:$4 sm:$0xff]  }
 0x2c8   :  { %v6307_v4 = vpop.f32.mrf.mxu1  ;;  %6624 = vmatmul.mubr.bf16.gmra.mxu1 %v20665_v37  ;;  %v6255_v45 = vadd.f32 %v6254_v5, %v20885_v13  ;;  %6639 = vmatpush1.bf16.msra.mxu0 %v18349_v30  ;;  %v18369_v13 = vld [vmem:[#allocation4 + $0xce4] ss:$48 sps:$4 sm:$0xff]  }
 0x2c9   :  { %6692 = vmatpush1.bf16.msra.mxu1 %v18352_v6  ;;  %v6256_v19 = vpop.f32.mrf.mxu0  ;;  %6640 = vmatprep.subr.bf16.mxu0 %v18357_v57  ;;  %v18367_v57 = vld [vmem:[#allocation4 + $0xce0] ss:$48 sps:$4 sm:$0xff]  }
 0x2ca   :  { %v6309_v7 = vpop.f32.mrf.mxu1  ;;  %6693 = vmatprep.subr.bf16.mxu1 %v18360_v47  ;;  %v6257_v12 = vadd.f32 %v6256_v19, %v20887_v18  ;;  %v20918_v38 = vadd.f32 %v6307_v4, %v6255_v45  ;;  %6666 = vmatprep.mubr.bf16.mxu0 %v20688_v49  ;;  %v18372_v18 = vld [vmem:[#allocation4 + $0x12e4] ss:$48 sps:$4 sm:$0xff]   ;;  %v18370_v47 = vld [vmem:[#allocation4 + $0x12e0] ss:$48 sps:$4 sm:$0xff]  }
 0x2cb   :  { %6719 = vmatprep.mubr.bf16.mxu1 %v20697_v51  ;;  %v6258_v22 = vpop.f32.mrf.mxu0  ;;  %v18375_v45 = vld [vmem:[#allocation4 + $0xc84] ss:$48 sps:$4 sm:$0xff]  }
 0x2cc   :  { %v6311_v5 = vpop.f32.mrf.mxu1  ;;  %v6259_v30 = vadd.f32 %v6258_v22, %v20891_v26  ;;  %v20923_v6 = vadd.f32 %v6309_v7, %v6257_v12  ;;  %6641 = vmatpush1.bf16.msra.mxu0 %v18355_v60  ;;  %v18378_v19 = vld [vmem:[#allocation4 + $0x1284] ss:$48 sps:$4 sm:$0xff]   ;;  %v18373_v26 = vld [vmem:[#allocation4 + $0xc80] ss:$48 sps:$4 sm:$0xff]  }
 0x2cd   :  { %6694 = vmatpush1.bf16.msra.mxu1 %v18358_v61  ;;  %6642 = vmatprep.subr.bf16.mxu0 %v18363_v21  ;;  %v18376_v7 = vld [vmem:[#allocation4 + $0x1280] ss:$48 sps:$4 sm:$0xff]   ;;  %v18381_v60 = vld [vmem:[#allocation4 + $0xc24] ss:$48 sps:$4 sm:$0xff]  }
 0x2ce   :  { %6695 = vmatprep.subr.bf16.mxu1 %v18366_v44  ;;  %v20925_v4 = vadd.f32 %v6311_v5, %v6259_v30  ;;  %v18384_v61 = vld [vmem:[#allocation4 + $0x1224] ss:$48 sps:$4 sm:$0xff]   ;;  %v18379_v21 = vld [vmem:[#allocation4 + $0xc20] ss:$48 sps:$4 sm:$0xff]  }
 0x2cf   :  { %v18382_v44 = vld [vmem:[#allocation4 + $0x1220] ss:$48 sps:$4 sm:$0xff]   ;;  %v18387_v12 = vld [vmem:[#allocation4 + $0x11c4] ss:$48 sps:$4 sm:$0xff]  }
 0x2d0   :  { %6643 = vmatpush1.bf16.msra.mxu0 %v18361_v31  ;;  %v18390_v31 = vld [vmem:[#allocation4 + $0x17c4] ss:$48 sps:$4 sm:$0xff]   ;;  %v18388_v22 = vld [vmem:[#allocation4 + $0x17c0] ss:$48 sps:$4 sm:$0xff]  }
 0x2d1   :  { %6696 = vmatpush1.bf16.msra.mxu1 %v18364_v17  ;;  %6644 = vmatprep.subr.bf16.mxu0 %v18369_v13  ;;  %v18385_v17 = vld [vmem:[#allocation4 + $0x11c0] ss:$48 sps:$4 sm:$0xff]   ;;  %v18393_v5 = vld [vmem:[#allocation4 + $0x1164] ss:$48 sps:$4 sm:$0xff]  }
 0x2d2   :  { %6697 = vmatprep.subr.bf16.mxu1 %v18372_v18  ;;  %v18396_v30 = vld [vmem:[#allocation4 + $0x1764] ss:$48 sps:$4 sm:$0xff]   ;;  %v18391_v13 = vld [vmem:[#allocation4 + $0x1160] ss:$48 sps:$4 sm:$0xff]  }
 0x2d3   :  { %v18394_v18 = vld [vmem:[#allocation4 + $0x1760] ss:$48 sps:$4 sm:$0xff]  }
 0x2d4   :  { %6645 = vmatpush1.bf16.msra.mxu0 %v18367_v57  ;;  %v18399_v57 = vld [vmem:[#allocation4 + $0x1104] ss:$48 sps:$4 sm:$0xff]  }
 0x2d5   :  { %6698 = vmatpush1.bf16.msra.mxu1 %v18370_v47  ;;  %6646 = vmatprep.subr.bf16.mxu0 %v18375_v45  ;;  %v18402_v47 = vld [vmem:[#allocation4 + $0x1704] ss:$48 sps:$4 sm:$0xff]   ;;  %v18397_v45 = vld [vmem:[#allocation4 + $0x1100] ss:$48 sps:$4 sm:$0xff]  }
 0x2d6   :  { %6699 = vmatprep.subr.bf16.mxu1 %v18378_v19  ;;  %v18400_v19 = vld [vmem:[#allocation4 + $0x1700] ss:$48 sps:$4 sm:$0xff]  }
 0x2d8   :  { %6647 = vmatpush1.bf16.msra.mxu0 %v18373_v26  ;;  %v18405_v26 = vld [vmem:[#allocation4 + $0x10a4] ss:$48 sps:$4 sm:$0xff]  }
 0x2d9   :  { %6700 = vmatpush1.bf16.msra.mxu1 %v18376_v7  ;;  %6648 = vmatprep.subr.bf16.mxu0 %v18381_v60  ;;  %v18408_v7 = vld [vmem:[#allocation4 + $0x16a4] ss:$48 sps:$4 sm:$0xff]   ;;  %v18403_v60 = vld [vmem:[#allocation4 + $0x10a0] ss:$48 sps:$4 sm:$0xff]  }
 0x2da   :  { %6701 = vmatprep.subr.bf16.mxu1 %v18384_v61  ;;  %v18406_v61 = vld [vmem:[#allocation4 + $0x16a0] ss:$48 sps:$4 sm:$0xff]  }
 0x2dc   :  { %6649 = vmatpush1.bf16.msra.mxu0 %v18379_v21  ;;  %v18411_v21 = vld [vmem:[#allocation4 + $0x1044] ss:$48 sps:$4 sm:$0xff]  }
 0x2dd   :  { %6702 = vmatpush1.bf16.msra.mxu1 %v18382_v44  ;;  %6650 = vmatprep.subr.bf16.mxu0 %v18387_v12  ;;  %v18414_v44 = vld [vmem:[#allocation4 + $0x1644] ss:$48 sps:$4 sm:$0xff]   ;;  %v18409_v12 = vld [vmem:[#allocation4 + $0x1040] ss:$48 sps:$4 sm:$0xff]  }
 0x2de   :  { %6703 = vmatprep.subr.bf16.mxu1 %v18390_v31  ;;  %v18412_v31 = vld [vmem:[#allocation4 + $0x1640] ss:$48 sps:$4 sm:$0xff]  }
 0x2e0   :  { %6651 = vmatpush2.bf16.msra.mxu0 %v18385_v17  ;;  %v18417_v17 = vld [vmem:[#allocation4 + $0xfe4] ss:$48 sps:$4 sm:$0xff]  }
 0x2e1   :  { %6704 = vmatpush2.bf16.msra.mxu1 %v18388_v22  ;;  %6652 = vmatprep.subr.bf16.mxu0 %v18393_v5  ;;  %v18420_v22 = vld [vmem:[#allocation4 + $0x15e4] ss:$48 sps:$4 sm:$0xff]   ;;  %v18415_v5 = vld [vmem:[#allocation4 + $0xfe0] ss:$48 sps:$4 sm:$0xff]  }
 0x2e2   :  { %6705 = vmatprep.subr.bf16.mxu1 %v18396_v30  ;;  %v18418_v30 = vld [vmem:[#allocation4 + $0x15e0] ss:$48 sps:$4 sm:$0xff]  }
 0x2e4   :  { %6653 = vmatpush2.bf16.msra.mxu0 %v18391_v13  ;;  %v18423_v13 = vld [vmem:[#allocation4 + $0xf84] ss:$48 sps:$4 sm:$0xff]  }
 0x2e5   :  { %6706 = vmatpush2.bf16.msra.mxu1 %v18394_v18  ;;  %6654 = vmatprep.subr.bf16.mxu0 %v18399_v57  ;;  %v18426_v18 = vld [vmem:[#allocation4 + $0x1584] ss:$48 sps:$4 sm:$0xff]   ;;  %v18421_v57 = vld [vmem:[#allocation4 + $0xf80] ss:$48 sps:$4 sm:$0xff]  }
 0x2e6   :  { %6707 = vmatprep.subr.bf16.mxu1 %v18402_v47  ;;  %v18424_v47 = vld [vmem:[#allocation4 + $0x1580] ss:$48 sps:$4 sm:$0xff]  }
 0x2e8   :  { %6655 = vmatpush2.bf16.msra.mxu0 %v18397_v45  ;;  %v18429_v45 = vld [vmem:[#allocation4 + $0xf24] ss:$48 sps:$4 sm:$0xff]  }
 0x2e9   :  { %6708 = vmatpush2.bf16.msra.mxu1 %v18400_v19  ;;  %6656 = vmatprep.subr.bf16.mxu0 %v18405_v26  ;;  %v18432_v19 = vld [vmem:[#allocation4 + $0x1524] ss:$48 sps:$4 sm:$0xff]   ;;  %v18427_v26 = vld [vmem:[#allocation4 + $0xf20] ss:$48 sps:$4 sm:$0xff]  }
 0x2ea   :  { %6709 = vmatprep.subr.bf16.mxu1 %v18408_v7  ;;  %v18430_v7 = vld [vmem:[#allocation4 + $0x1520] ss:$48 sps:$4 sm:$0xff]  }
 0x2ec   :  { %6657 = vmatpush2.bf16.msra.mxu0 %v18403_v60  ;;  %v18435_v60 = vld [vmem:[#allocation4 + $0x2cc] ss:$48 sps:$4 sm:$0xff]  }
 0x2ed   :  { %6710 = vmatpush2.bf16.msra.mxu1 %v18406_v61  ;;  %6658 = vmatprep.subr.bf16.mxu0 %v18411_v21  ;;  %v18438_v61 = vld [vmem:[#allocation4 + $0x8cc] ss:$48 sps:$4 sm:$0xff]   ;;  %v18433_v21 = vld [vmem:[#allocation4 + $0x2c8] ss:$48 sps:$4 sm:$0xff]  }
 0x2ee   :  { %6711 = vmatprep.subr.bf16.mxu1 %v18414_v44  ;;  %v18436_v44 = vld [vmem:[#allocation4 + $0x8c8] ss:$48 sps:$4 sm:$0xff]  }
 0x2f0   :  { %6659 = vmatpush2.bf16.msra.mxu0 %v18409_v12  ;;  %v20927_v12 = vpop.f32.mrf.mxu0 }
 0x2f1   :  { %6712 = vmatpush2.bf16.msra.mxu1 %v18412_v31  ;;  %6660 = vmatprep.subr.bf16.mxu0 %v18417_v17  ;;  %v20929_v31 = vpop.f32.mrf.mxu1  ;;  %v18441_v17 = vld [vmem:[#allocation4 + $0x26c] ss:$48 sps:$4 sm:$0xff]  }
 0x2f2   :  { %6713 = vmatprep.subr.bf16.mxu1 %v18420_v22  ;;  %v18444_v22 = vld [vmem:[#allocation4 + $0x86c] ss:$48 sps:$4 sm:$0xff]  }
 0x2f4   :  { %6661 = vmatpush2.bf16.msra.mxu0 %v18415_v5  ;;  %v18439_v5 = vld [vmem:[#allocation4 + $0x268] ss:$48 sps:$4 sm:$0xff]  }
 0x2f5   :  { %6714 = vmatpush2.bf16.msra.mxu1 %v18418_v30  ;;  %6662 = vmatprep.subr.bf16.mxu0 %v18423_v13  ;;  %v18442_v30 = vld [vmem:[#allocation4 + $0x868] ss:$48 sps:$4 sm:$0xff]  }
 0x2f6   :  { %6715 = vmatprep.subr.bf16.mxu1 %v18426_v18 }
 0x2f8   :  { %6663 = vmatpush2.bf16.msra.mxu0 %v18421_v57 }
 0x2f9   :  { %6716 = vmatpush2.bf16.msra.mxu1 %v18424_v47  ;;  %6664 = vmatprep.subr.bf16.mxu0 %v18429_v45 }
 0x2fa   :  { %6717 = vmatprep.subr.bf16.mxu1 %v18432_v19  ;;  %v18447_v19 = vld [vmem:[#allocation4 + $0x20c] ss:$48 sps:$4 sm:$0xff]  }
 0x2fc   :  { %6665 = vmatpush2.bf16.msra.mxu0 %v18427_v26  ;;  %v18450_v26 = vld [vmem:[#allocation4 + $0x80c] ss:$48 sps:$4 sm:$0xff]  }
 0x2fd   :  { %6718 = vmatpush2.bf16.msra.mxu1 %v18430_v7  ;;  %6740 = vmatprep.subr.bf16.mxu0 %v18435_v60  ;;  %v18445_v60 = vld [vmem:[#allocation4 + $0x208] ss:$48 sps:$4 sm:$0xff]  }
 0x2fe   :  { %6793 = vmatprep.subr.bf16.mxu1 %v18438_v61  ;;  %v18448_v61 = vld [vmem:[#allocation4 + $0x808] ss:$48 sps:$4 sm:$0xff]  }
 0x2ff   :  { %v6350_v13 = vpop.f32.mrf.mxu0  ;;  %6667 = vmatmul.mubr.bf16.vlgmr.msra.gmra.mxu0 %v20709_v32 }
 0x300   :  { %v6403_v18 = vpop.f32.mrf.mxu1  ;;  %6720 = vmatmul.mubr.bf16.vlgmr.msra.gmra.mxu1 %v20713_v36  ;;  %6741 = vmatpush1.bf16.msra.mxu0 %v18433_v21 }
 0x301   :  { %v20933_v57 = vadd.f32 %v6403_v18, %v6350_v13  ;;  %6794 = vmatpush1.bf16.msra.mxu1 %v18436_v44  ;;  %v6352_v47 = vpop.f32.mrf.mxu0  ;;  %6742 = vmatprep.subr.bf16.mxu0 %v18441_v17  ;;  %v18453_v17 = vld [vmem:[#allocation4 + $0x1ac] ss:$48 sps:$4 sm:$0xff]  }
 0x302   :  { %v6405_v45 = vpop.f32.mrf.mxu1  ;;  %6795 = vmatprep.subr.bf16.mxu1 %v18444_v22  ;;  %6676 = vmatprep.mubr.bf16.mxu0 %v20721_v42  ;;  %v18456_v22 = vld [vmem:[#allocation4 + $0x7ac] ss:$48 sps:$4 sm:$0xff]  }
 0x303   :  { %v20935_v7 = vadd.f32 %v6405_v45, %v6352_v47  ;;  %6729 = vmatprep.mubr.bf16.mxu1 %v20723_v43  ;;  %v6354_v46 = vpop.f32.mrf.mxu0  ;;  %v18462_v45 = vld [vmem:[#allocation4 + $0x74c] ss:$48 sps:$4 sm:$0xff]  }
 0x304   :  { %v6407_v52 = vpop.f32.mrf.mxu1  ;;  %6743 = vmatpush1.bf16.msra.mxu0 %v18439_v5 }
 0x305   :  { %v20939_v13 = vadd.f32 %v6407_v52, %v6354_v46  ;;  %6796 = vmatpush1.bf16.msra.mxu1 %v18442_v30  ;;  %v20941_v21 = vpop.f32.mrf.mxu0  ;;  %6744 = vmatprep.subr.bf16.mxu0 %v18447_v19  ;;  %v18451_v52 = vld [vmem:[#allocation4 + $0x1a8] ss:$48 sps:$4 sm:$0xff]   ;;  %v18459_v30 = vld [vmem:[#allocation4 + $0x14c] ss:$48 sps:$4 sm:$0xff]  }
 0x306   :  { %v20943_v44 = vpop.f32.mrf.mxu1  ;;  %6797 = vmatprep.subr.bf16.mxu1 %v18450_v26  ;;  %v18454_v46 = vld [vmem:[#allocation4 + $0x7a8] ss:$48 sps:$4 sm:$0xff]  }
 0x307   :  { %6677 = vmatmul.mubr.bf16.gmra.mxu0 %v20729_v48  ;;  %v6360_v18 = vpop.f32.mrf.mxu0 }
 0x308   :  { %6730 = vmatmul.mubr.bf16.gmra.mxu1 %v20731_v55  ;;  %v6413_v47 = vpop.f32.mrf.mxu1  ;;  %6745 = vmatpush1.bf16.msra.mxu0 %v18445_v60  ;;  %v18457_v60 = vld [vmem:[#allocation4 + $0x148] ss:$48 sps:$4 sm:$0xff]  }
 0x309   :  { %6798 = vmatpush1.bf16.msra.mxu1 %v18448_v61  ;;  %v20947_v5 = vadd.f32 %v6413_v47, %v6360_v18  ;;  %6746 = vmatprep.subr.bf16.mxu0 %v18453_v17  ;;  %v6362_v19 = vpop.f32.mrf.mxu0  ;;  %v18460_v61 = vld [vmem:[#allocation4 + $0x748] ss:$48 sps:$4 sm:$0xff]   ;;  %v18465_v17 = vld [vmem:[#allocation4 + $0xec] ss:$48 sps:$4 sm:$0xff]  }
 0x30a   :  { %6799 = vmatprep.subr.bf16.mxu1 %v18456_v22  ;;  %v6415_v26 = vpop.f32.mrf.mxu1  ;;  %6772 = vmatprep.mubr.bf16.mxu0 %v20635_v53  ;;  %v18468_v22 = vld [vmem:[#allocation4 + $0x6ec] ss:$48 sps:$4 sm:$0xff]   ;;  %v18463_v47 = vld [vmem:[#allocation4 + $0xe8] ss:$48 sps:$4 sm:$0xff]  }
 0x30b   :  { %v20949_v40 = vadd.f32 %v6415_v26, %v6362_v19  ;;  %6825 = vmatprep.mubr.bf16.mxu1 %v20637_v54  ;;  %v6364_v27 = vpop.f32.mrf.mxu0  ;;  %v18466_v19 = vld [vmem:[#allocation4 + $0x6e8] ss:$48 sps:$4 sm:$0xff]   ;;  %v18471_v53 = vld [vmem:[#allocation4 + $0x8c] ss:$48 sps:$4 sm:$0xff]  }
 0x30c   :  { %v6417_v59 = vpop.f32.mrf.mxu1  ;;  %6747 = vmatpush1.bf16.msra.mxu0 %v18451_v52  ;;  %v18474_v54 = vld [vmem:[#allocation4 + $0x68c] ss:$48 sps:$4 sm:$0xff]   ;;  %v18469_v52 = vld [vmem:[#allocation4 + $0x88] ss:$48 sps:$4 sm:$0xff]  }
 0x30d   :  { %6800 = vmatpush1.bf16.msra.mxu1 %v18454_v46  ;;  %v20953_v18 = vadd.f32 %v6417_v59, %v6364_v27  ;;  %6748 = vmatprep.subr.bf16.mxu0 %v18459_v30  ;;  %v18472_v46 = vld [vmem:[#allocation4 + $0x688] ss:$48 sps:$4 sm:$0xff]   ;;  %v18477_v59 = vld [vmem:[#allocation4 + $0x2c] ss:$48 sps:$4 sm:$0xff]  }
 0x30e   :  { %6801 = vmatprep.subr.bf16.mxu1 %v18462_v45  ;;  %v18480_v27 = vld [vmem:[#allocation4 + $0x62c] ss:$48 sps:$4 sm:$0xff]   ;;  %v18475_v30 = vld [vmem:[#allocation4 + $0x28] ss:$48 sps:$4 sm:$0xff]  }
 0x30f   :  { %v18478_v45 = vld [vmem:[#allocation4 + $0x628] ss:$48 sps:$4 sm:$0xff]   ;;  %v18483_v26 = vld [vmem:[#allocation4 + $0x5cc] ss:$48 sps:$4 sm:$0xff]  }
 0x310   :  { %6749 = vmatpush1.bf16.msra.mxu0 %v18457_v60  ;;  %v18486_v60 = vld [vmem:[#allocation4 + $0xbcc] ss:$48 sps:$4 sm:$0xff]  }
 0x311   :  { %6802 = vmatpush1.bf16.msra.mxu1 %v18460_v61  ;;  %6750 = vmatprep.subr.bf16.mxu0 %v18465_v17  ;;  %v18481_v61 = vld [vmem:[#allocation4 + $0x5c8] ss:$48 sps:$4 sm:$0xff]  }
 0x312   :  { %6803 = vmatprep.subr.bf16.mxu1 %v18468_v22  ;;  %v18484_v17 = vld [vmem:[#allocation4 + $0xbc8] ss:$48 sps:$4 sm:$0xff]   ;;  %v18489_v22 = vld [vmem:[#allocation4 + $0x56c] ss:$48 sps:$4 sm:$0xff]  }
 0x314   :  { %6751 = vmatpush1.bf16.msra.mxu0 %v18463_v47  ;;  %v18492_v47 = vld [vmem:[#allocation4 + $0xb6c] ss:$48 sps:$4 sm:$0xff]  }
 0x315   :  { %6804 = vmatpush1.bf16.msra.mxu1 %v18466_v19  ;;  %6752 = vmatprep.subr.bf16.mxu0 %v18471_v53  ;;  %v18487_v19 = vld [vmem:[#allocation4 + $0x568] ss:$48 sps:$4 sm:$0xff]  }
 0x316   :  { %6805 = vmatprep.subr.bf16.mxu1 %v18474_v54  ;;  %v18490_v53 = vld [vmem:[#allocation4 + $0xb68] ss:$48 sps:$4 sm:$0xff]   ;;  %v18495_v54 = vld [vmem:[#allocation4 + $0x50c] ss:$48 sps:$4 sm:$0xff]  }
 0x318   :  { %6753 = vmatpush1.bf16.msra.mxu0 %v18469_v52  ;;  %v18498_v52 = vld [vmem:[#allocation4 + $0xb0c] ss:$48 sps:$4 sm:$0xff]  }
 0x319   :  { %6806 = vmatpush1.bf16.msra.mxu1 %v18472_v46  ;;  %6754 = vmatprep.subr.bf16.mxu0 %v18477_v59  ;;  %v18493_v46 = vld [vmem:[#allocation4 + $0x508] ss:$48 sps:$4 sm:$0xff]  }
 0x31a   :  { %6807 = vmatprep.subr.bf16.mxu1 %v18480_v27  ;;  %v18496_v59 = vld [vmem:[#allocation4 + $0xb08] ss:$48 sps:$4 sm:$0xff]   ;;  %v18501_v27 = vld [vmem:[#allocation4 + $0x4ac] ss:$48 sps:$4 sm:$0xff]  }
 0x31c   :  { %6755 = vmatpush1.bf16.msra.mxu0 %v18475_v30  ;;  %v18504_v30 = vld [vmem:[#allocation4 + $0xaac] ss:$48 sps:$4 sm:$0xff]  }
 0x31d   :  { %6808 = vmatpush1.bf16.msra.mxu1 %v18478_v45  ;;  %6756 = vmatprep.subr.bf16.mxu0 %v18483_v26  ;;  %v18499_v45 = vld [vmem:[#allocation4 + $0x4a8] ss:$48 sps:$4 sm:$0xff]  }
 0x31e   :  { %6809 = vmatprep.subr.bf16.mxu1 %v18486_v60  ;;  %v18502_v26 = vld [vmem:[#allocation4 + $0xaa8] ss:$48 sps:$4 sm:$0xff]   ;;  %v18507_v60 = vld [vmem:[#allocation4 + $0x44c] ss:$48 sps:$4 sm:$0xff]  }
 0x320   :  { %6757 = vmatpush2.bf16.msra.mxu0 %v18481_v61  ;;  %v18510_v61 = vld [vmem:[#allocation4 + $0xa4c] ss:$48 sps:$4 sm:$0xff]  }
 0x321   :  { %6810 = vmatpush2.bf16.msra.mxu1 %v18484_v17  ;;  %6758 = vmatprep.subr.bf16.mxu0 %v18489_v22  ;;  %v18505_v17 = vld [vmem:[#allocation4 + $0x448] ss:$48 sps:$4 sm:$0xff]  }
 0x322   :  { %6811 = vmatprep.subr.bf16.mxu1 %v18492_v47  ;;  %v18508_v22 = vld [vmem:[#allocation4 + $0xa48] ss:$48 sps:$4 sm:$0xff]   ;;  %v18513_v47 = vld [vmem:[#allocation4 + $0x3ec] ss:$48 sps:$4 sm:$0xff]  }
 0x324   :  { %6759 = vmatpush2.bf16.msra.mxu0 %v18487_v19  ;;  %v18516_v19 = vld [vmem:[#allocation4 + $0x9ec] ss:$48 sps:$4 sm:$0xff]  }
 0x325   :  { %6812 = vmatpush2.bf16.msra.mxu1 %v18490_v53  ;;  %6760 = vmatprep.subr.bf16.mxu0 %v18495_v54  ;;  %v18511_v53 = vld [vmem:[#allocation4 + $0x3e8] ss:$48 sps:$4 sm:$0xff]  }
 0x326   :  { %6813 = vmatprep.subr.bf16.mxu1 %v18498_v52  ;;  %v18514_v54 = vld [vmem:[#allocation4 + $0x9e8] ss:$48 sps:$4 sm:$0xff]   ;;  %v18519_v52 = vld [vmem:[#allocation4 + $0x38c] ss:$48 sps:$4 sm:$0xff]  }
 0x328   :  { %6761 = vmatpush2.bf16.msra.mxu0 %v18493_v46  ;;  %v18522_v46 = vld [vmem:[#allocation4 + $0x98c] ss:$48 sps:$4 sm:$0xff]  }
 0x329   :  { %6814 = vmatpush2.bf16.msra.mxu1 %v18496_v59  ;;  %6762 = vmatprep.subr.bf16.mxu0 %v18501_v27  ;;  %v18517_v59 = vld [vmem:[#allocation4 + $0x388] ss:$48 sps:$4 sm:$0xff]  }
 0x32a   :  { %6815 = vmatprep.subr.bf16.mxu1 %v18504_v30  ;;  %v18520_v27 = vld [vmem:[#allocation4 + $0x988] ss:$48 sps:$4 sm:$0xff]   ;;  %v18525_v30 = vld [vmem:[#allocation4 + $0x32c] ss:$48 sps:$4 sm:$0xff]  }
 0x32c   :  { %6763 = vmatpush2.bf16.msra.mxu0 %v18499_v45  ;;  %v18528_v45 = vld [vmem:[#allocation4 + $0x92c] ss:$48 sps:$4 sm:$0xff]  }
 0x32d   :  { %6816 = vmatpush2.bf16.msra.mxu1 %v18502_v26  ;;  %6764 = vmatprep.subr.bf16.mxu0 %v18507_v60  ;;  %v18523_v26 = vld [vmem:[#allocation4 + $0x328] ss:$48 sps:$4 sm:$0xff]  }
 0x32e   :  { %6817 = vmatprep.subr.bf16.mxu1 %v18510_v61  ;;  %v18526_v60 = vld [vmem:[#allocation4 + $0x928] ss:$48 sps:$4 sm:$0xff]   ;;  %v18531_v61 = vld [vmem:[#allocation4 + $0xecc] ss:$48 sps:$4 sm:$0xff]  }
 0x330   :  { %6765 = vmatpush2.bf16.msra.mxu0 %v18505_v17  ;;  %v18534_v17 = vld [vmem:[#allocation4 + $0x14cc] ss:$48 sps:$4 sm:$0xff]  }
 0x331   :  { %6818 = vmatpush2.bf16.msra.mxu1 %v18508_v22  ;;  %6766 = vmatprep.subr.bf16.mxu0 %v18513_v47  ;;  %v18529_v22 = vld [vmem:[#allocation4 + $0xec8] ss:$48 sps:$4 sm:$0xff]  }
 0x332   :  { %6819 = vmatprep.subr.bf16.mxu1 %v18516_v19  ;;  %v18532_v47 = vld [vmem:[#allocation4 + $0x14c8] ss:$48 sps:$4 sm:$0xff]   ;;  %v20955_v19 = vpop.f32.mrf.mxu0 }
 0x333   :  { %22232 = vst [vmem:[#allocation44_spill] sm:$0xff] %v20955_v19  ;;  %v18741_v19 = vld [vmem:[#allocation2 + $0xd84] ss:$48 sps:$4 sm:$0xff]  }
 0x334   :  { %6767 = vmatpush2.bf16.msra.mxu0 %v18511_v53  ;;  %v20957_v53 = vpop.f32.mrf.mxu1 }
 0x335   :  { %6820 = vmatpush2.bf16.msra.mxu1 %v18514_v54  ;;  %6768 = vmatprep.subr.bf16.mxu0 %v18519_v52  ;;  %22233 = vst [vmem:[#allocation45_spill] sm:$0xff] %v20957_v53  ;;  %v18537_v54 = vld [vmem:[#allocation4 + $0xe6c] ss:$48 sps:$4 sm:$0xff]  }
 0x336   :  { %6821 = vmatprep.subr.bf16.mxu1 %v18522_v46  ;;  %v18540_v52 = vld [vmem:[#allocation4 + $0x146c] ss:$48 sps:$4 sm:$0xff]   ;;  %v18535_v46 = vld [vmem:[#allocation4 + $0xe68] ss:$48 sps:$4 sm:$0xff]  }
 0x338   :  { %6769 = vmatpush2.bf16.msra.mxu0 %v18517_v59  ;;  %v18538_v59 = vld [vmem:[#allocation4 + $0x1468] ss:$48 sps:$4 sm:$0xff]  }
 0x339   :  { %6822 = vmatpush2.bf16.msra.mxu1 %v18520_v27  ;;  %6770 = vmatprep.subr.bf16.mxu0 %v18525_v30 }
 0x33a   :  { %6823 = vmatprep.subr.bf16.mxu1 %v18528_v45 }
 0x33c   :  { %6771 = vmatpush2.bf16.msra.mxu0 %v18523_v26 }
 0x33d   :  { %6824 = vmatpush2.bf16.msra.mxu1 %v18526_v60  ;;  %6846 = vmatprep.subr.bf16.mxu0 %v18531_v61  ;;  %v18543_v60 = vld [vmem:[#allocation4 + $0xe0c] ss:$48 sps:$4 sm:$0xff]  }
 0x33e   :  { %6899 = vmatprep.subr.bf16.mxu1 %v18534_v17  ;;  %v18546_v61 = vld [vmem:[#allocation4 + $0x140c] ss:$48 sps:$4 sm:$0xff]  }
 0x33f   :  { %v6456_v27 = vpop.f32.mrf.mxu0  ;;  %6773 = vmatmul.mubr.bf16.vlgmr.msra.gmra.mxu0 %v20641_v8 }
 0x340   :  { %v6509_v58 = vpop.f32.mrf.mxu1  ;;  %6826 = vmatmul.mubr.bf16.vlgmr.msra.gmra.mxu1 %v20643_v9  ;;  %v6457_v30 = vadd.f32 %v6456_v27, %v20933_v57  ;;  %6847 = vmatpush1.bf16.msra.mxu0 %v18529_v22  ;;  %v18544_v57 = vld [vmem:[#allocation4 + $0x1408] ss:$48 sps:$4 sm:$0xff]  }
 0x341   :  { %6900 = vmatpush1.bf16.msra.mxu1 %v18532_v47  ;;  %v6458_v45 = vpop.f32.mrf.mxu0  ;;  %6848 = vmatprep.subr.bf16.mxu0 %v18537_v54  ;;  %v18550_v27 = vld [vmem:[#allocation4 + $0x13a8] ss:$48 sps:$4 sm:$0xff]  }
 0x342   :  { %v6511_v26 = vpop.f32.mrf.mxu1  ;;  %6901 = vmatprep.subr.bf16.mxu1 %v18540_v52  ;;  %v20962_v17 = vadd.f32 %v6509_v58, %v6457_v30  ;;  %v6459_v25 = vadd.f32 %v6458_v45, %v20935_v7  ;;  %6782 = vmatprep.mubr.bf16.mxu0 %v20659_v33  ;;  %v18549_v7 = vld [vmem:[#allocation4 + $0xdac] ss:$48 sps:$4 sm:$0xff]  }
 0x343   :  { %6835 = vmatprep.mubr.bf16.mxu1 %v20661_v34  ;;  %v6460_v8 = vpop.f32.mrf.mxu0  ;;  %v18552_v33 = vld [vmem:[#allocation4 + $0x13ac] ss:$48 sps:$4 sm:$0xff]   ;;  %v18547_v34 = vld [vmem:[#allocation4 + $0xda8] ss:$48 sps:$4 sm:$0xff]  }
 0x344   :  { %22234 = vst [vmem:[#allocation46_spill] sm:$0xff] %v20962_v17  ;;  %v6513_v9 = vpop.f32.mrf.mxu1  ;;  %v20967_v22 = vadd.f32 %v6511_v26, %v6459_v25  ;;  %v6461_v47 = vadd.f32 %v6460_v8, %v20939_v13  ;;  %6849 = vmatpush1.bf16.msra.mxu0 %v18535_v46  ;;  %v18558_v26 = vld [vmem:[#allocation4 + $0x134c] ss:$48 sps:$4 sm:$0xff]   ;;  %v18553_v8 = vld [vmem:[#allocation4 + $0xd48] ss:$48 sps:$4 sm:$0xff]  }
 0x345   :  { %6902 = vmatpush1.bf16.msra.mxu1 %v18538_v59  ;;  %v20970_v54 = vpop.f32.mrf.mxu0  ;;  %6850 = vmatprep.subr.bf16.mxu0 %v18543_v60  ;;  %v18555_v59 = vld [vmem:[#allocation4 + $0xd4c] ss:$48 sps:$4 sm:$0xff]   ;;  %v18928_v17 = vld [vmem:[#allocation2 + $0x13e8] ss:$48 sps:$4 sm:$0xff]  }
 0x346   :  { %22235 = vst [vmem:[#allocation47_spill] sm:$0xff] %v20967_v22  ;;  %22236 = vst [vmem:[#allocation48_spill] sm:$0xff] %v20970_v54  ;;  %v20972_v58 = vpop.f32.mrf.mxu1  ;;  %6903 = vmatprep.subr.bf16.mxu1 %v18546_v61  ;;  %v20974_v52 = vadd.f32 %v6513_v9, %v6461_v47  ;;  %v18556_v9 = vld [vmem:[#allocation4 + $0x1348] ss:$48 sps:$4 sm:$0xff]  }
 0x347   :  { %22237 = vst [vmem:[#allocation49_spill] sm:$0xff] %v20972_v58  ;;  %v6466_v30 = vpop.f32.mrf.mxu0  ;;  %6783 = vmatmul.mubr.bf16.gmra.mxu0 %v20663_v35  ;;  %v18856_v22 = vld [vmem:[#allocation2 + $0x668] ss:$48 sps:$4 sm:$0xff]  }
 0x348   :  { %22238 = vst [vmem:[#allocation50_spill] sm:$0xff] %v20974_v52  ;;  %v6519_v45 = vpop.f32.mrf.mxu1  ;;  %6836 = vmatmul.mubr.bf16.gmra.mxu1 %v20665_v37  ;;  %v6467_v25 = vadd.f32 %v6466_v30, %v20947_v5  ;;  %6851 = vmatpush1.bf16.msra.mxu0 %v18541_v23  ;;  %v18568_v30 = vld [vmem:[#allocation4 + $0x1288] ss:$48 sps:$4 sm:$0xff]   ;;  %v18744_v52 = vld [vmem:[#allocation2 + $0x1384] ss:$48 sps:$4 sm:$0xff]  }
 0x349   :  { %6904 = vmatpush1.bf16.msra.mxu1 %v18544_v57  ;;  %v6468_v13 = vpop.f32.mrf.mxu0  ;;  %6852 = vmatprep.subr.bf16.mxu0 %v18549_v7  ;;  %v18561_v57 = vld [vmem:[#allocation4 + $0xcec] ss:$48 sps:$4 sm:$0xff]   ;;  %v18559_v7 = vld [vmem:[#allocation4 + $0xce8] ss:$48 sps:$4 sm:$0xff]  }
 0x34a   :  { %v6521_v46 = vpop.f32.mrf.mxu1  ;;  %6905 = vmatprep.subr.bf16.mxu1 %v18552_v33  ;;  %v6469_v60 = vadd.f32 %v6468_v13, %v20949_v40  ;;  %v20980_v61 = vadd.f32 %v6519_v45, %v6467_v25  ;;  %6878 = vmatprep.mubr.bf16.mxu0 %v20688_v49  ;;  %v18564_v40 = vld [vmem:[#allocation4 + $0x12ec] ss:$48 sps:$4 sm:$0xff]   ;;  %v18562_v49 = vld [vmem:[#allocation4 + $0x12e8] ss:$48 sps:$4 sm:$0xff]  }
 0x34b   :  { %6931 = vmatprep.mubr.bf16.mxu1 %v20697_v51  ;;  %v6470_v35 = vpop.f32.mrf.mxu0  ;;  %v18567_v51 = vld [vmem:[#allocation4 + $0xc8c] ss:$48 sps:$4 sm:$0xff]   ;;  %v18571_v45 = vld [vmem:[#allocation4 + $0xc28] ss:$48 sps:$4 sm:$0xff]  }
 0x34c   :  { %22239 = vst [vmem:[#allocation51_spill] sm:$0xff] %v20980_v61  ;;  %v6523_v37 = vpop.f32.mrf.mxu1  ;;  %v6471_v23 = vadd.f32 %v6470_v35, %v20953_v18  ;;  %v20985_v5 = vadd.f32 %v6521_v46, %v6469_v60  ;;  %6853 = vmatpush1.bf16.msra.mxu0 %v18547_v34  ;;  %v18570_v33 = vld [vmem:[#allocation4 + $0x128c] ss:$48 sps:$4 sm:$0xff]   ;;  %v18565_v18 = vld [vmem:[#allocation4 + $0xc88] ss:$48 sps:$4 sm:$0xff]  }
 0x34d   :  { %6906 = vmatpush1.bf16.msra.mxu1 %v18550_v27  ;;  %6854 = vmatprep.subr.bf16.mxu0 %v18555_v59  ;;  %v18573_v34 = vld [vmem:[#allocation4 + $0xc2c] ss:$48 sps:$4 sm:$0xff]   ;;  %v18574_v25 = vld [vmem:[#allocation4 + $0x1228] ss:$48 sps:$4 sm:$0xff]  }
 0x34e   :  { %22240 = vst [vmem:[#allocation52_spill] sm:$0xff] %v20985_v5  ;;  %6907 = vmatprep.subr.bf16.mxu1 %v18558_v26  ;;  %v20987_v47 = vadd.f32 %v6523_v37, %v6471_v23  ;;  %v18576_v27 = vld [vmem:[#allocation4 + $0x122c] ss:$48 sps:$4 sm:$0xff]   ;;  %v18577_v59 = vld [vmem:[#allocation4 + $0x11c8] ss:$48 sps:$4 sm:$0xff]  }
 0x34f   :  { %v18579_v13 = vld [vmem:[#allocation4 + $0x11cc] ss:$48 sps:$4 sm:$0xff]   ;;  %v18580_v26 = vld [vmem:[#allocation4 + $0x17c8] ss:$48 sps:$4 sm:$0xff]  }
 0x350   :  { %22241 = vst [vmem:[#allocation53_spill] sm:$0xff] %v20987_v47  ;;  %6855 = vmatpush1.bf16.msra.mxu0 %v18553_v8  ;;  %v18582_v46 = vld [vmem:[#allocation4 + $0x17cc] ss:$48 sps:$4 sm:$0xff]   ;;  %v18586_v35 = vld [vmem:[#allocation4 + $0x1768] ss:$48 sps:$4 sm:$0xff]  }
 0x351   :  { %6908 = vmatpush1.bf16.msra.mxu1 %v18556_v9  ;;  %6856 = vmatprep.subr.bf16.mxu0 %v18561_v57  ;;  %v18585_v60 = vld [vmem:[#allocation4 + $0x116c] ss:$48 sps:$4 sm:$0xff]   ;;  %v18583_v9 = vld [vmem:[#allocation4 + $0x1168] ss:$48 sps:$4 sm:$0xff]   ;;  %v18727_v47 = vld [vmem:[#allocation2 + $0xe40] ss:$48 sps:$4 sm:$0xff]  }
 0x352   :  { %6909 = vmatprep.subr.bf16.mxu1 %v18564_v40  ;;  %v18588_v8 = vld [vmem:[#allocation4 + $0x176c] ss:$48 sps:$4 sm:$0xff]   ;;  %v18589_v57 = vld [vmem:[#allocation4 + $0x1108] ss:$48 sps:$4 sm:$0xff]  }
 0x353   :  { %v18591_v37 = vld [vmem:[#allocation4 + $0x110c] ss:$48 sps:$4 sm:$0xff]   ;;  %v18592_v40 = vld [vmem:[#allocation4 + $0x1708] ss:$48 sps:$4 sm:$0xff]  }
 0x354   :  { %6857 = vmatpush1.bf16.msra.mxu0 %v18559_v7  ;;  %v18594_v23 = vld [vmem:[#allocation4 + $0x170c] ss:$48 sps:$4 sm:$0xff]  }
 0x355   :  { %6910 = vmatpush1.bf16.msra.mxu1 %v18562_v49  ;;  %6858 = vmatprep.subr.bf16.mxu0 %v18567_v51  ;;  %v18597_v7 = vld [vmem:[#allocation4 + $0x10ac] ss:$48 sps:$4 sm:$0xff]   ;;  %v18595_v51 = vld [vmem:[#allocation4 + $0x10a8] ss:$48 sps:$4 sm:$0xff]  }
 0x356   :  { %6911 = vmatprep.subr.bf16.mxu1 %v18570_v33  ;;  %v18600_v49 = vld [vmem:[#allocation4 + $0x16ac] ss:$48 sps:$4 sm:$0xff]   ;;  %v18598_v33 = vld [vmem:[#allocation4 + $0x16a8] ss:$48 sps:$4 sm:$0xff]  }
 0x358   :  { %6859 = vmatpush1.bf16.msra.mxu0 %v18565_v18  ;;  %v18603_v18 = vld [vmem:[#allocation4 + $0x104c] ss:$48 sps:$4 sm:$0xff]  }
 0x359   :  { %6912 = vmatpush1.bf16.msra.mxu1 %v18568_v30  ;;  %6860 = vmatprep.subr.bf16.mxu0 %v18573_v34  ;;  %v18606_v30 = vld [vmem:[#allocation4 + $0x164c] ss:$48 sps:$4 sm:$0xff]   ;;  %v18601_v34 = vld [vmem:[#allocation4 + $0x1048] ss:$48 sps:$4 sm:$0xff]  }
 0x35a   :  { %6913 = vmatprep.subr.bf16.mxu1 %v18576_v27  ;;  %v18604_v27 = vld [vmem:[#allocation4 + $0x1648] ss:$48 sps:$4 sm:$0xff]  }
 0x35c   :  { %6861 = vmatpush1.bf16.msra.mxu0 %v18571_v45  ;;  %v18609_v45 = vld [vmem:[#allocation4 + $0xfec] ss:$48 sps:$4 sm:$0xff]  }
 0x35d   :  { %6914 = vmatpush1.bf16.msra.mxu1 %v18574_v25  ;;  %6862 = vmatprep.subr.bf16.mxu0 %v18579_v13  ;;  %v18612_v25 = vld [vmem:[#allocation4 + $0x15ec] ss:$48 sps:$4 sm:$0xff]   ;;  %v18607_v13 = vld [vmem:[#allocation4 + $0xfe8] ss:$48 sps:$4 sm:$0xff]  }
 0x35e   :  { %6915 = vmatprep.subr.bf16.mxu1 %v18582_v46  ;;  %v18610_v46 = vld [vmem:[#allocation4 + $0x15e8] ss:$48 sps:$4 sm:$0xff]  }
 0x360   :  { %6863 = vmatpush2.bf16.msra.mxu0 %v18577_v59  ;;  %v18615_v59 = vld [vmem:[#allocation4 + $0xf8c] ss:$48 sps:$4 sm:$0xff]  }
 0x361   :  { %6916 = vmatpush2.bf16.msra.mxu1 %v18580_v26  ;;  %6864 = vmatprep.subr.bf16.mxu0 %v18585_v60  ;;  %v18618_v26 = vld [vmem:[#allocation4 + $0x158c] ss:$48 sps:$4 sm:$0xff]   ;;  %v18613_v60 = vld [vmem:[#allocation4 + $0xf88] ss:$48 sps:$4 sm:$0xff]  }
 0x362   :  { %6917 = vmatprep.subr.bf16.mxu1 %v18588_v8  ;;  %v18616_v8 = vld [vmem:[#allocation4 + $0x1588] ss:$48 sps:$4 sm:$0xff]  }
 0x364   :  { %6865 = vmatpush2.bf16.msra.mxu0 %v18583_v9  ;;  %v18621_v9 = vld [vmem:[#allocation4 + $0xf2c] ss:$48 sps:$4 sm:$0xff]  }
 0x365   :  { %6918 = vmatpush2.bf16.msra.mxu1 %v18586_v35  ;;  %6866 = vmatprep.subr.bf16.mxu0 %v18591_v37  ;;  %v18624_v35 = vld [vmem:[#allocation4 + $0x152c] ss:$48 sps:$4 sm:$0xff]   ;;  %v18619_v37 = vld [vmem:[#allocation4 + $0xf28] ss:$48 sps:$4 sm:$0xff]  }
 0x366   :  { %6919 = vmatprep.subr.bf16.mxu1 %v18594_v23  ;;  %v18622_v23 = vld [vmem:[#allocation4 + $0x1528] ss:$48 sps:$4 sm:$0xff]  }
 0x368   :  { %6867 = vmatpush2.bf16.msra.mxu0 %v18589_v57  ;;  %v18627_v57 = vld [vmem:[#allocation2 + $0x2a4] ss:$48 sps:$4 sm:$0xff]  }
 0x369   :  { %6920 = vmatpush2.bf16.msra.mxu1 %v18592_v40  ;;  %6868 = vmatprep.subr.bf16.mxu0 %v18597_v7  ;;  %v18630_v40 = vld [vmem:[#allocation2 + $0x8a4] ss:$48 sps:$4 sm:$0xff]   ;;  %v18625_v7 = vld [vmem:[#allocation2 + $0x2a0] ss:$48 sps:$4 sm:$0xff]  }
 0x36a   :  { %6921 = vmatprep.subr.bf16.mxu1 %v18600_v49  ;;  %v18628_v49 = vld [vmem:[#allocation2 + $0x8a0] ss:$48 sps:$4 sm:$0xff]  }
 0x36c   :  { %6869 = vmatpush2.bf16.msra.mxu0 %v18595_v51  ;;  %v20989_v51 = vpop.f32.mrf.mxu0 }
 0x36d   :  { %6922 = vmatpush2.bf16.msra.mxu1 %v18598_v33  ;;  %6870 = vmatprep.subr.bf16.mxu0 %v18603_v18  ;;  %22242 = vst [vmem:[#allocation54_spill] sm:$0xff] %v20989_v51  ;;  %v20991_v33 = vpop.f32.mrf.mxu1  ;;  %v18633_v18 = vld [vmem:[#allocation2 + $0x244] ss:$48 sps:$4 sm:$0xff]  }
 0x36e   :  { %6923 = vmatprep.subr.bf16.mxu1 %v18606_v30  ;;  %22243 = vst [vmem:[#allocation55_spill] sm:$0xff] %v20991_v33  ;;  %v18636_v30 = vld [vmem:[#allocation2 + $0x844] ss:$48 sps:$4 sm:$0xff]   ;;  %v18730_v33 = vld [vmem:[#allocation2 + $0x1440] ss:$48 sps:$4 sm:$0xff]  }
 0x370   :  { %6871 = vmatpush2.bf16.msra.mxu0 %v18601_v34  ;;  %v18631_v34 = vld [vmem:[#allocation2 + $0x240] ss:$48 sps:$4 sm:$0xff]  }
 0x371   :  { %6924 = vmatpush2.bf16.msra.mxu1 %v18604_v27  ;;  %6872 = vmatprep.subr.bf16.mxu0 %v18609_v45  ;;  %v18634_v27 = vld [vmem:[#allocation2 + $0x840] ss:$48 sps:$4 sm:$0xff]  }
 0x372   :  { %6925 = vmatprep.subr.bf16.mxu1 %v18612_v25 }
 0x374   :  { %6873 = vmatpush2.bf16.msra.mxu0 %v18607_v13 }
 0x375   :  { %6926 = vmatpush2.bf16.msra.mxu1 %v18610_v46  ;;  %6874 = vmatprep.subr.bf16.mxu0 %v18615_v59 }
 0x376   :  { %6927 = vmatprep.subr.bf16.mxu1 %v18618_v26  ;;  %v18639_v26 = vld [vmem:[#allocation2 + $0x1e4] ss:$48 sps:$4 sm:$0xff]  }
 0x378   :  { %6875 = vmatpush2.bf16.msra.mxu0 %v18613_v60  ;;  %v18642_v60 = vld [vmem:[#allocation2 + $0x7e4] ss:$48 sps:$4 sm:$0xff]  }
 0x379   :  { %6928 = vmatpush2.bf16.msra.mxu1 %v18616_v8  ;;  %6876 = vmatprep.subr.bf16.mxu0 %v18621_v9  ;;  %v18637_v9 = vld [vmem:[#allocation2 + $0x1e0] ss:$48 sps:$4 sm:$0xff]  }
 0x37a   :  { %6929 = vmatprep.subr.bf16.mxu1 %v18624_v35  ;;  %v18640_v35 = vld [vmem:[#allocation2 + $0x7e0] ss:$48 sps:$4 sm:$0xff]  }
 0x37c   :  { %6877 = vmatpush2.bf16.msra.mxu0 %v18619_v37 }
 0x37d   :  { %6930 = vmatpush2.bf16.msra.mxu1 %v18622_v23  ;;  %10872 = vmatprep.subr.bf16.mxu0 %v18627_v57 }
 0x37e   :  { %10925 = vmatprep.subr.bf16.mxu1 %v18630_v40 }
 0x37f   :  { %v6562_v45 = vpop.f32.mrf.mxu0  ;;  %6879 = vmatmul.mubr.bf16.vlgmr.msra.gmra.mxu0 %v20709_v32  ;;  %v21004_v32 = vld [vmem:[%s22198_s0] sm:$0xff] }
 0x380   :  { %v6615_v25 = vpop.f32.mrf.mxu1  ;;  %6932 = vmatmul.mubr.bf16.vlgmr.msra.gmra.mxu1 %v20713_v36  ;;  %10873 = vmatpush1.bf16.msra.mxu0 %v18625_v7  ;;  %v21009_v36 = vld [vmem:[%s22198_s0 + $0x20] sm:$0xff] }
 0x381   :  { %v20995_v13 = vadd.f32 %v6615_v25, %v6562_v45  ;;  %10926 = vmatpush1.bf16.msra.mxu1 %v18628_v49  ;;  %v6564_v46 = vpop.f32.mrf.mxu0  ;;  %10874 = vmatprep.subr.bf16.mxu0 %v18633_v18  ;;  %v18645_v49 = vld [vmem:[#allocation2 + $0x184] ss:$48 sps:$4 sm:$0xff]   ;;  %v18643_v25 = vld [vmem:[#allocation2 + $0x180] ss:$48 sps:$4 sm:$0xff]  }
 0x382   :  { %v6617_v59 = vpop.f32.mrf.mxu1  ;;  %10927 = vmatprep.subr.bf16.mxu1 %v18636_v30  ;;  %6888 = vmatprep.mubr.bf16.mxu0 %v20721_v42  ;;  %v21014_v42 = vld [vmem:[%s22198_s0 + $0x8] sm:$0xff]  ;;  %v18648_v18 = vld [vmem:[#allocation2 + $0x784] ss:$48 sps:$4 sm:$0xff]   ;;  %v21029_v30 = vcombine.high %v21004_v32, %v21009_v36 }
 0x383   :  { %v20997_v8 = vadd.f32 %v6617_v59, %v6564_v46  ;;  %6941 = vmatprep.mubr.bf16.mxu1 %v20723_v43  ;;  %v6566_v37 = vpop.f32.mrf.mxu0  ;;  %v21019_v43 = vld [vmem:[%s22198_s0 + $0x28] sm:$0xff]  ;;  %v18646_v46 = vld [vmem:[#allocation2 + $0x780] ss:$48 sps:$4 sm:$0xff]  }
 0x384   :  { %v6619_v23 = vpop.f32.mrf.mxu1  ;;  %10875 = vmatpush1.bf16.msra.mxu0 %v18631_v34  ;;  %v21033_v45 = vcombine.high %v21014_v42, %v21019_v43 }
 0x385   :  { %v21021_v57 = vadd.f32 %v6619_v23, %v6566_v37  ;;  %10928 = vmatpush1.bf16.msra.mxu1 %v18634_v27  ;;  %v21023_v40 = vpop.f32.mrf.mxu0  ;;  %10876 = vmatprep.subr.bf16.mxu0 %v18639_v26  ;;  %v18651_v26 = vld [vmem:[#allocation2 + $0x124] ss:$48 sps:$4 sm:$0xff]  }
 0x386   :  { %22244 = vst [vmem:[#allocation56_spill] sm:$0xff] %v21023_v40  ;;  %v21025_v7 = vpop.f32.mrf.mxu1  ;;  %10929 = vmatprep.subr.bf16.mxu1 %v18642_v60  ;;  %v18654_v60 = vld [vmem:[#allocation2 + $0x724] ss:$48 sps:$4 sm:$0xff]  }
 0x387   :  { %22245 = vst [vmem:[#allocation57_spill] sm:$0xff] %v21025_v7  ;;  %6889 = vmatmul.mubr.bf16.gmra.mxu0 %v20729_v48  ;;  %v6572_v34 = vpop.f32.mrf.mxu0  ;;  %v18729_v7 = vld [vmem:[#allocation2 + $0xe44] ss:$48 sps:$4 sm:$0xff]  }
 0x388   :  { %6942 = vmatmul.mubr.bf16.gmra.mxu1 %v20731_v55  ;;  %v6625_v27 = vpop.f32.mrf.mxu1  ;;  %10877 = vmatpush1.bf16.msra.mxu0 %v18637_v9  ;;  %v18649_v9 = vld [vmem:[#allocation2 + $0x120] ss:$48 sps:$4 sm:$0xff]   ;;  %v18732_v40 = vld [vmem:[#allocation2 + $0x1444] ss:$48 sps:$4 sm:$0xff]  }
 0x389   :  { %10930 = vmatpush1.bf16.msra.mxu1 %v18640_v35  ;;  %v21037_v59 = vadd.f32 %v6625_v27, %v6572_v34  ;;  %10878 = vmatprep.subr.bf16.mxu0 %v18645_v49  ;;  %v6574_v37 = vpop.f32.mrf.mxu0  ;;  %v18652_v35 = vld [vmem:[#allocation2 + $0x720] ss:$48 sps:$4 sm:$0xff]   ;;  %v18657_v49 = vld [vmem:[#allocation2 + $0xc4] ss:$48 sps:$4 sm:$0xff]  }
 0x38a   :  { %10931 = vmatprep.subr.bf16.mxu1 %v18648_v18  ;;  %v6627_v23 = vpop.f32.mrf.mxu1  ;;  %10904 = vmatprep.mubr.bf16.mxu0 %v21029_v30  ;;  %v18660_v18 = vld [vmem:[#allocation2 + $0x6c4] ss:$48 sps:$4 sm:$0xff]   ;;  %v18655_v27 = vld [vmem:[#allocation2 + $0xc0] ss:$48 sps:$4 sm:$0xff]  }
 0x38b   :  { %v21039_v15 = vadd.f32 %v6627_v23, %v6574_v37  ;;  %10957 = vmatprep.mubr.bf16.mxu1 %v21033_v45  ;;  %v6576_v48 = vpop.f32.mrf.mxu0  ;;  %v18658_v37 = vld [vmem:[#allocation2 + $0x6c0] ss:$48 sps:$4 sm:$0xff]   ;;  %v18663_v23 = vld [vmem:[#allocation2 + $0x64] ss:$48 sps:$4 sm:$0xff]  }
 0x38c   :  { %v6629_v55 = vpop.f32.mrf.mxu1  ;;  %10879 = vmatpush1.bf16.msra.mxu0 %v18643_v25  ;;  %v18661_v25 = vld [vmem:[#allocation2 + $0x60] ss:$48 sps:$4 sm:$0xff]  }
 0x38d   :  { %10932 = vmatpush1.bf16.msra.mxu1 %v18646_v46  ;;  %v21043_v34 = vadd.f32 %v6629_v55, %v6576_v48  ;;  %10880 = vmatprep.subr.bf16.mxu0 %v18651_v26  ;;  %v18664_v46 = vld [vmem:[#allocation2 + $0x660] ss:$48 sps:$4 sm:$0xff]   ;;  %v18669_v48 = vld [vmem:[#allocation2 + $0x4] ss:$48 sps:$4 sm:$0xff]  }
 0x38e   :  { %10933 = vmatprep.subr.bf16.mxu1 %v18654_v60  ;;  %v18672_v55 = vld [vmem:[#allocation2 + $0x604] ss:$48 sps:$4 sm:$0xff]   ;;  %v18667_v26 = vld [vmem:[#allocation2] ss:$48 sps:$4 sm:$0xff]  }
 0x38f   :  { %v18670_v60 = vld [vmem:[#allocation2 + $0x600] ss:$48 sps:$4 sm:$0xff]  }
 0x390   :  { %10881 = vmatpush1.bf16.msra.mxu0 %v18649_v9  ;;  %v18675_v9 = vld [vmem:[#allocation2 + $0x5a4] ss:$48 sps:$4 sm:$0xff]  }
 0x391   :  { %10934 = vmatpush1.bf16.msra.mxu1 %v18652_v35  ;;  %10882 = vmatprep.subr.bf16.mxu0 %v18657_v49  ;;  %v18678_v35 = vld [vmem:[#allocation2 + $0xba4] ss:$48 sps:$4 sm:$0xff]   ;;  %v18673_v49 = vld [vmem:[#allocation2 + $0x5a0] ss:$48 sps:$4 sm:$0xff]  }
 0x392   :  { %10935 = vmatprep.subr.bf16.mxu1 %v18660_v18  ;;  %v18676_v18 = vld [vmem:[#allocation2 + $0xba0] ss:$48 sps:$4 sm:$0xff]  }
 0x394   :  { %10883 = vmatpush1.bf16.msra.mxu0 %v18655_v27  ;;  %v18681_v27 = vld [vmem:[#allocation2 + $0x544] ss:$48 sps:$4 sm:$0xff]  }
 0x395   :  { %10936 = vmatpush1.bf16.msra.mxu1 %v18658_v37  ;;  %10884 = vmatprep.subr.bf16.mxu0 %v18663_v23  ;;  %v18684_v37 = vld [vmem:[#allocation2 + $0xb44] ss:$48 sps:$4 sm:$0xff]   ;;  %v18682_v23 = vld [vmem:[#allocation2 + $0xb40] ss:$48 sps:$4 sm:$0xff]  }
 0x396   :  { %10937 = vmatprep.subr.bf16.mxu1 %v18666_v14  ;;  %v18679_v14 = vld [vmem:[#allocation2 + $0x540] ss:$48 sps:$4 sm:$0xff]  }
 0x398   :  { %10885 = vmatpush1.bf16.msra.mxu0 %v18661_v25  ;;  %v18687_v25 = vld [vmem:[#allocation2 + $0x4e4] ss:$48 sps:$4 sm:$0xff]  }
 0x399   :  { %10938 = vmatpush1.bf16.msra.mxu1 %v18664_v46  ;;  %10886 = vmatprep.subr.bf16.mxu0 %v18669_v48  ;;  %v18690_v46 = vld [vmem:[#allocation2 + $0xae4] ss:$48 sps:$4 sm:$0xff]   ;;  %v18685_v48 = vld [vmem:[#allocation2 + $0x4e0] ss:$48 sps:$4 sm:$0xff]  }
 0x39a   :  { %10939 = vmatprep.subr.bf16.mxu1 %v18672_v55  ;;  %v18688_v55 = vld [vmem:[#allocation2 + $0xae0] ss:$48 sps:$4 sm:$0xff]  }
 0x39c   :  { %10887 = vmatpush1.bf16.msra.mxu0 %v18667_v26  ;;  %v18693_v26 = vld [vmem:[#allocation2 + $0x484] ss:$48 sps:$4 sm:$0xff]  }
 0x39d   :  { %10940 = vmatpush1.bf16.msra.mxu1 %v18670_v60  ;;  %10888 = vmatprep.subr.bf16.mxu0 %v18675_v9  ;;  %v18696_v60 = vld [vmem:[#allocation2 + $0xa84] ss:$48 sps:$4 sm:$0xff]   ;;  %v18691_v9 = vld [vmem:[#allocation2 + $0x480] ss:$48 sps:$4 sm:$0xff]  }
 0x39e   :  { %10941 = vmatprep.subr.bf16.mxu1 %v18678_v35  ;;  %v18694_v35 = vld [vmem:[#allocation2 + $0xa80] ss:$48 sps:$4 sm:$0xff]  }
 0x3a0   :  { %10889 = vmatpush2.bf16.msra.mxu0 %v18673_v49  ;;  %v18699_v49 = vld [vmem:[#allocation2 + $0x424] ss:$48 sps:$4 sm:$0xff]  }
 0x3a1   :  { %10942 = vmatpush2.bf16.msra.mxu1 %v18676_v18  ;;  %10890 = vmatprep.subr.bf16.mxu0 %v18681_v27  ;;  %v18702_v18 = vld [vmem:[#allocation2 + $0xa24] ss:$48 sps:$4 sm:$0xff]   ;;  %v18697_v27 = vld [vmem:[#allocation2 + $0x420] ss:$48 sps:$4 sm:$0xff]  }
 0x3a2   :  { %10943 = vmatprep.subr.bf16.mxu1 %v18684_v37  ;;  %v18700_v37 = vld [vmem:[#allocation2 + $0xa20] ss:$48 sps:$4 sm:$0xff]  }
 0x3a4   :  { %10891 = vmatpush2.bf16.msra.mxu0 %v18679_v14  ;;  %v18705_v14 = vld [vmem:[#allocation2 + $0x3c4] ss:$48 sps:$4 sm:$0xff]  }
 0x3a5   :  { %10944 = vmatpush2.bf16.msra.mxu1 %v18682_v23  ;;  %10892 = vmatprep.subr.bf16.mxu0 %v18687_v25  ;;  %v18708_v23 = vld [vmem:[#allocation2 + $0x9c4] ss:$48 sps:$4 sm:$0xff]   ;;  %v18703_v25 = vld [vmem:[#allocation2 + $0x3c0] ss:$48 sps:$4 sm:$0xff]  }
 0x3a6   :  { %10945 = vmatprep.subr.bf16.mxu1 %v18690_v46  ;;  %v18706_v46 = vld [vmem:[#allocation2 + $0x9c0] ss:$48 sps:$4 sm:$0xff]  }
 0x3a8   :  { %10893 = vmatpush2.bf16.msra.mxu0 %v18685_v48  ;;  %v18711_v48 = vld [vmem:[#allocation2 + $0x364] ss:$48 sps:$4 sm:$0xff]  }
 0x3a9   :  { %10946 = vmatpush2.bf16.msra.mxu1 %v18688_v55  ;;  %10894 = vmatprep.subr.bf16.mxu0 %v18693_v26  ;;  %v18714_v55 = vld [vmem:[#allocation2 + $0x964] ss:$48 sps:$4 sm:$0xff]   ;;  %v18709_v26 = vld [vmem:[#allocation2 + $0x360] ss:$48 sps:$4 sm:$0xff]  }
 0x3aa   :  { %10947 = vmatprep.subr.bf16.mxu1 %v18696_v60  ;;  %v18712_v60 = vld [vmem:[#allocation2 + $0x960] ss:$48 sps:$4 sm:$0xff]  }
 0x3ac   :  { %10895 = vmatpush2.bf16.msra.mxu0 %v18691_v9  ;;  %v18717_v9 = vld [vmem:[#allocation2 + $0x304] ss:$48 sps:$4 sm:$0xff]  }
 0x3ad   :  { %10948 = vmatpush2.bf16.msra.mxu1 %v18694_v35  ;;  %10896 = vmatprep.subr.bf16.mxu0 %v18699_v49  ;;  %v18720_v35 = vld [vmem:[#allocation2 + $0x904] ss:$48 sps:$4 sm:$0xff]   ;;  %v18715_v49 = vld [vmem:[#allocation2 + $0x300] ss:$48 sps:$4 sm:$0xff]  }
 0x3ae   :  { %10949 = vmatprep.subr.bf16.mxu1 %v18702_v18  ;;  %v18718_v18 = vld [vmem:[#allocation2 + $0x900] ss:$48 sps:$4 sm:$0xff]  }
 0x3b0   :  { %10897 = vmatpush2.bf16.msra.mxu0 %v18697_v27  ;;  %v18723_v27 = vld [vmem:[#allocation2 + $0xea4] ss:$48 sps:$4 sm:$0xff]  }
 0x3b1   :  { %10950 = vmatpush2.bf16.msra.mxu1 %v18700_v37  ;;  %10898 = vmatprep.subr.bf16.mxu0 %v18705_v14  ;;  %v18726_v37 = vld [vmem:[#allocation2 + $0x14a4] ss:$48 sps:$4 sm:$0xff]  }
 0x3b2   :  { %10951 = vmatprep.subr.bf16.mxu1 %v18708_v23  ;;  %v200_v14 = vld [vmem:[%s22198_s0 + $0x40] sm:$0xff] }
 0x3b3   :  { %v204_v23 = vld [vmem:[%s22198_s0 + $0x60] sm:$0xff] }
 0x3b4   :  { %10899 = vmatpush2.bf16.msra.mxu0 %v18703_v25  ;;  %v201_v25 = vld [vmem:[%s22198_s0 + $0x48] sm:$0xff]  ;;  %v21069_v5 = vcombine.high %v200_v14, %v204_v23 }
 0x3b5   :  { %10952 = vmatpush2.bf16.msra.mxu1 %v18706_v46  ;;  %10900 = vmatprep.subr.bf16.mxu0 %v18711_v48  ;;  %v205_v46 = vld [vmem:[%s22198_s0 + $0x68] sm:$0xff]  ;;  %v18721_v48 = vld [vmem:[#allocation2 + $0xea0] ss:$48 sps:$4 sm:$0xff]  }
 0x3b6   :  { %10953 = vmatprep.subr.bf16.mxu1 %v18714_v55  ;;  %v18724_v55 = vld [vmem:[#allocation2 + $0x14a0] ss:$48 sps:$4 sm:$0xff]  }
 0x3b8   :  { %10901 = vmatpush2.bf16.msra.mxu0 %v18709_v26  ;;  %v21059_v26 = vcombine.low %v21004_v32, %v21009_v36  ;;  %v21071_v32 = vcombine.high %v201_v25, %v205_v46 }
 0x3b9   :  { %10954 = vmatpush2.bf16.msra.mxu1 %v18712_v60  ;;  %10902 = vmatprep.subr.bf16.mxu0 %v18717_v9  ;;  %v21063_v60 = vcombine.low %v21014_v42, %v21019_v43  ;;  %v21065_v9 = vpop.f32.mrf.mxu0  ;;  %v18735_v42 = vld [vmem:[#allocation2 + $0xde4] ss:$48 sps:$4 sm:$0xff]  }
 0x3ba   :  { %10955 = vmatprep.subr.bf16.mxu1 %v18720_v35  ;;  %22246 = vst [vmem:[#allocation58_spill] sm:$0xff] %v21065_v9  ;;  %v21067_v35 = vpop.f32.mrf.mxu1  ;;  %v18738_v43 = vld [vmem:[#allocation2 + $0x13e4] ss:$48 sps:$4 sm:$0xff]  }
 0x3bb   :  { %22247 = vst [vmem:[#allocation59_spill] sm:$0xff] %v21067_v35  ;;  %v21084_v35 = vld [vmem:[%s22198_s0 + $0x30] sm:$0xff] }
 0x3bc   :  { %10903 = vmatpush2.bf16.msra.mxu0 %v18715_v49 }
 0x3bd   :  { %10956 = vmatpush2.bf16.msra.mxu1 %v18718_v18  ;;  %10978 = vmatprep.subr.bf16.mxu0 %v18723_v27 }
 0x3be   :  { %11031 = vmatprep.subr.bf16.mxu1 %v18726_v37  ;;  %v21079_v37 = vld [vmem:[%s22198_s0 + $0x10] sm:$0xff] }
 0x3bf   :  { %v6668_v36 = vpop.f32.mrf.mxu0  ;;  %10905 = vmatmul.mubr.bf16.vlgmr.msra.gmra.mxu0 %v21059_v26 }
 0x3c0   :  { %v6721_v61 = vpop.f32.mrf.mxu1  ;;  %10958 = vmatmul.mubr.bf16.vlgmr.msra.gmra.mxu1 %v21063_v60  ;;  %v6669_v49 = vadd.f32 %v6668_v36, %v20995_v13  ;;  %10979 = vmatpush1.bf16.msra.mxu0 %v18721_v48  ;;  %v18733_v48 = vld [vmem:[#allocation2 + $0xde0] ss:$48 sps:$4 sm:$0xff]  }
 0x3c1   :  { %11032 = vmatpush1.bf16.msra.mxu1 %v18724_v55  ;;  %v6670_v18 = vpop.f32.mrf.mxu0  ;;  %10980 = vmatprep.subr.bf16.mxu0 %v18729_v7  ;;  %v18736_v55 = vld [vmem:[#allocation2 + $0x13e0] ss:$48 sps:$4 sm:$0xff]   ;;  %v21099_v7 = vld [vmem:[%s22198_s0 + $0x38] sm:$0xff] }
 0x3c2   :  { %v6723_v27 = vpop.f32.mrf.mxu1  ;;  %11033 = vmatprep.subr.bf16.mxu1 %v18732_v40  ;;  %v21086_v9 = vadd.f32 %v6721_v61, %v6669_v49  ;;  %v6671_v13 = vadd.f32 %v6670_v18, %v20997_v8  ;;  %10914 = vmatprep.mubr.bf16.mxu0 %v21069_v5  ;;  %v21094_v40 = vld [vmem:[%s22198_s0 + $0x18] sm:$0xff]  ;;  %v21101_v49 = vcombine.low %v200_v14, %v204_v23  ;;  %v18739_v14 = vld [vmem:[#allocation2 + $0xd80] ss:$48 sps:$4 sm:$0xff]  }
 0x3c3   :  { %10967 = vmatprep.mubr.bf16.mxu1 %v21071_v32  ;;  %v6672_v61 = vpop.f32.mrf.mxu0  ;;  %v21103_v8 = vcombine.low %v201_v25, %v205_v46  ;;  %v18742_v23 = vld [vmem:[#allocation2 + $0x1380] ss:$48 sps:$4 sm:$0xff]   ;;  %v21116_v25 = vcombine.high %v21079_v37, %v21084_v35 }
 0x3c4   :  { %22248 = vst [vmem:[#allocation60_spill] sm:$0xff] %v21086_v9  ;;  %v6725_v36 = vpop.f32.mrf.mxu1  ;;  %v21105_v18 = vadd.f32 %v6723_v27, %v6671_v13  ;;  %v6673_v9 = vadd.f32 %v6672_v61, %v21021_v57  ;;  %10981 = vmatpush1.bf16.msra.mxu0 %v18727_v47  ;;  %v21120_v47 = vcombine.high %v21094_v40, %v21099_v7  ;;  %v18750_v27 = vld [vmem:[#allocation2 + $0x1324] ss:$48 sps:$4 sm:$0xff]  }
 0x3c5   :  { %11034 = vmatpush1.bf16.msra.mxu1 %v18730_v33  ;;  %v21108_v51 = vpop.f32.mrf.mxu0  ;;  %10982 = vmatprep.subr.bf16.mxu0 %v18735_v42 }
 0x3c6   :  { %22249 = vst [vmem:[#allocation61_spill] sm:$0xff] %v21105_v18  ;;  %22250 = vst [vmem:[#allocation62_spill] sm:$0xff] %v21108_v51  ;;  %v21110_v53 = vpop.f32.mrf.mxu1  ;;  %11035 = vmatprep.subr.bf16.mxu1 %v18738_v43  ;;  %v21112_v58 = vadd.f32 %v6725_v36, %v6673_v9  ;;  %v18747_v43 = vld [vmem:[#allocation2 + $0xd24] ss:$48 sps:$4 sm:$0xff]   ;;  %v18745_v36 = vld [vmem:[#allocation2 + $0xd20] ss:$48 sps:$4 sm:$0xff]  }
 0x3c7   :  { %22251 = vst [vmem:[#allocation63_spill] sm:$0xff] %v21110_v53  ;;  %v6678_v33 = vpop.f32.mrf.mxu0  ;;  %10915 = vmatmul.mubr.bf16.gmra.mxu0 %v21101_v49  ;;  %v18838_v51 = vld [vmem:[#allocation2 + $0x788] ss:$48 sps:$4 sm:$0xff]  }
 0x3c8   :  { %22252 = vst [vmem:[#allocation64_spill] sm:$0xff] %v21112_v58  ;;  %v6731_v57 = vpop.f32.mrf.mxu1  ;;  %10968 = vmatmul.mubr.bf16.gmra.mxu1 %v21103_v8  ;;  %v6679_v46 = vadd.f32 %v6678_v33, %v21037_v59  ;;  %10983 = vmatpush1.bf16.msra.mxu0 %v18733_v48  ;;  %v18748_v58 = vld [vmem:[#allocation2 + $0x1320] ss:$48 sps:$4 sm:$0xff]  }
 0x3c9   :  { %11036 = vmatpush1.bf16.msra.mxu1 %v18736_v55  ;;  %v6680_v9 = vpop.f32.mrf.mxu0  ;;  %10984 = vmatprep.subr.bf16.mxu0 %v18741_v19  ;;  %v18753_v19 = vld [vmem:[#allocation2 + $0xcc4] ss:$48 sps:$4 sm:$0xff]   ;;  %v18751_v33 = vld [vmem:[#allocation2 + $0xcc0] ss:$48 sps:$4 sm:$0xff]  }
 0x3ca   :  { %v6733_v42 = vpop.f32.mrf.mxu1  ;;  %11037 = vmatprep.subr.bf16.mxu1 %v18744_v52  ;;  %v6681_v13 = vadd.f32 %v6680_v9, %v21039_v15  ;;  %v21126_v61 = vadd.f32 %v6731_v57, %v6679_v46  ;;  %11010 = vmatprep.mubr.bf16.mxu0 %v21116_v25  ;;  %v18756_v15 = vld [vmem:[#allocation2 + $0x12c4] ss:$48 sps:$4 sm:$0xff]   ;;  %v18754_v57 = vld [vmem:[#allocation2 + $0x12c0] ss:$48 sps:$4 sm:$0xff]  }
 0x3cb   :  { %11063 = vmatprep.mubr.bf16.mxu1 %v21120_v47  ;;  %v6682_v53 = vpop.f32.mrf.mxu0  ;;  %v18759_v46 = vld [vmem:[#allocation2 + $0xc64] ss:$48 sps:$4 sm:$0xff]  }
 0x3cc   :  { %22253 = vst [vmem:[#allocation65_spill] sm:$0xff] %v21126_v61  ;;  %v6735_v59 = vpop.f32.mrf.mxu1  ;;  %v6683_v48 = vadd.f32 %v6682_v53, %v21043_v34  ;;  %v21131_v55 = vadd.f32 %v6733_v42, %v6681_v13  ;;  %10985 = vmatpush1.bf16.msra.mxu0 %v18739_v14  ;;  %v18762_v9 = vld [vmem:[#allocation2 + $0x1264] ss:$48 sps:$4 sm:$0xff]   ;;  %v18757_v53 = vld [vmem:[#allocation2 + $0xc60] ss:$48 sps:$4 sm:$0xff]  }
 0x3cd   :  { %11038 = vmatpush1.bf16.msra.mxu1 %v18742_v23  ;;  %10986 = vmatprep.subr.bf16.mxu0 %v18747_v43  ;;  %v18760_v34 = vld [vmem:[#allocation2 + $0x1260] ss:$48 sps:$4 sm:$0xff]   ;;  %v18765_v14 = vld [vmem:[#allocation2 + $0xc04] ss:$48 sps:$4 sm:$0xff]   ;;  %v18832_v61 = vld [vmem:[#allocation2 + $0x7e8] ss:$48 sps:$4 sm:$0xff]  }
 0x3ce   :  { %22254 = vst [vmem:[#allocation66_spill] sm:$0xff] %v21131_v55  ;;  %11039 = vmatprep.subr.bf16.mxu1 %v18750_v27  ;;  %v21133_v52 = vadd.f32 %v6735_v59, %v6683_v48  ;;  %v18768_v23 = vld [vmem:[#allocation2 + $0x1204] ss:$48 sps:$4 sm:$0xff]   ;;  %v18763_v42 = vld [vmem:[#allocation2 + $0xc00] ss:$48 sps:$4 sm:$0xff]  }
 0x3cf   :  { %v18766_v43 = vld [vmem:[#allocation2 + $0x1200] ss:$48 sps:$4 sm:$0xff]   ;;  %v18774_v27 = vld [vmem:[#allocation2 + $0x17a4] ss:$48 sps:$4 sm:$0xff]  }
 0x3d0   :  { %22255 = vst [vmem:[#allocation67_spill] sm:$0xff] %v21133_v52  ;;  %10987 = vmatpush1.bf16.msra.mxu0 %v18745_v36  ;;  %v18769_v13 = vld [vmem:[#allocation2 + $0x11a0] ss:$48 sps:$4 sm:$0xff]   ;;  %v18777_v59 = vld [vmem:[#allocation2 + $0x1144] ss:$48 sps:$4 sm:$0xff]  }
 0x3d1   :  { %11040 = vmatpush1.bf16.msra.mxu1 %v18748_v58  ;;  %10988 = vmatprep.subr.bf16.mxu0 %v18753_v19  ;;  %v18771_v58 = vld [vmem:[#allocation2 + $0x11a4] ss:$48 sps:$4 sm:$0xff]   ;;  %v18772_v36 = vld [vmem:[#allocation2 + $0x17a0] ss:$48 sps:$4 sm:$0xff]  }
 0x3d2   :  { %11041 = vmatprep.subr.bf16.mxu1 %v18756_v15  ;;  %v18780_v48 = vld [vmem:[#allocation2 + $0x1744] ss:$48 sps:$4 sm:$0xff]   ;;  %v18775_v19 = vld [vmem:[#allocation2 + $0x1140] ss:$48 sps:$4 sm:$0xff]  }
 0x3d3   :  { %v18778_v15 = vld [vmem:[#allocation2 + $0x1740] ss:$48 sps:$4 sm:$0xff]  }
 0x3d4   :  { %10989 = vmatpush1.bf16.msra.mxu0 %v18751_v33  ;;  %v18783_v33 = vld [vmem:[#allocation2 + $0x10e4] ss:$48 sps:$4 sm:$0xff]  }
 0x3d5   :  { %11042 = vmatpush1.bf16.msra.mxu1 %v18754_v57  ;;  %10990 = vmatprep.subr.bf16.mxu0 %v18759_v46  ;;  %v18786_v57 = vld [vmem:[#allocation2 + $0x16e4] ss:$48 sps:$4 sm:$0xff]   ;;  %v18781_v46 = vld [vmem:[#allocation2 + $0x10e0] ss:$48 sps:$4 sm:$0xff]  }
 0x3d6   :  { %11043 = vmatprep.subr.bf16.mxu1 %v18762_v9  ;;  %v18784_v9 = vld [vmem:[#allocation2 + $0x16e0] ss:$48 sps:$4 sm:$0xff]  }
 0x3d8   :  { %10991 = vmatpush1.bf16.msra.mxu0 %v18757_v53  ;;  %v18789_v53 = vld [vmem:[#allocation2 + $0x1084] ss:$48 sps:$4 sm:$0xff]  }
 0x3d9   :  { %11044 = vmatpush1.bf16.msra.mxu1 %v18760_v34  ;;  %10992 = vmatprep.subr.bf16.mxu0 %v18765_v14  ;;  %v18792_v34 = vld [vmem:[#allocation2 + $0x1684] ss:$48 sps:$4 sm:$0xff]   ;;  %v18787_v14 = vld [vmem:[#allocation2 + $0x1080] ss:$48 sps:$4 sm:$0xff]  }
 0x3da   :  { %11045 = vmatprep.subr.bf16.mxu1 %v18768_v23  ;;  %v18790_v23 = vld [vmem:[#allocation2 + $0x1680] ss:$48 sps:$4 sm:$0xff]  }
 0x3dc   :  { %10993 = vmatpush1.bf16.msra.mxu0 %v18763_v42  ;;  %v18795_v42 = vld [vmem:[#allocation2 + $0x1024] ss:$48 sps:$4 sm:$0xff]  }
 0x3dd   :  { %11046 = vmatpush1.bf16.msra.mxu1 %v18766_v43  ;;  %10994 = vmatprep.subr.bf16.mxu0 %v18771_v58  ;;  %v18798_v43 = vld [vmem:[#allocation2 + $0x1624] ss:$48 sps:$4 sm:$0xff]   ;;  %v18793_v58 = vld [vmem:[#allocation2 + $0x1020] ss:$48 sps:$4 sm:$0xff]  }
 0x3de   :  { %11047 = vmatprep.subr.bf16.mxu1 %v18774_v27  ;;  %v18796_v27 = vld [vmem:[#allocation2 + $0x1620] ss:$48 sps:$4 sm:$0xff]  }
 0x3e0   :  { %10995 = vmatpush2.bf16.msra.mxu0 %v18769_v13  ;;  %v18801_v13 = vld [vmem:[#allocation2 + $0xfc4] ss:$48 sps:$4 sm:$0xff]  }
 0x3e1   :  { %11048 = vmatpush2.bf16.msra.mxu1 %v18772_v36  ;;  %10996 = vmatprep.subr.bf16.mxu0 %v18777_v59  ;;  %v18804_v36 = vld [vmem:[#allocation2 + $0x15c4] ss:$48 sps:$4 sm:$0xff]   ;;  %v18799_v59 = vld [vmem:[#allocation2 + $0xfc0] ss:$48 sps:$4 sm:$0xff]  }
 0x3e2   :  { %11049 = vmatprep.subr.bf16.mxu1 %v18780_v48  ;;  %v18802_v48 = vld [vmem:[#allocation2 + $0x15c0] ss:$48 sps:$4 sm:$0xff]  }
 0x3e4   :  { %10997 = vmatpush2.bf16.msra.mxu0 %v18775_v19  ;;  %v18807_v19 = vld [vmem:[#allocation2 + $0xf64] ss:$48 sps:$4 sm:$0xff]  }
 0x3e5   :  { %11050 = vmatpush2.bf16.msra.mxu1 %v18778_v15  ;;  %10998 = vmatprep.subr.bf16.mxu0 %v18783_v33  ;;  %v18810_v15 = vld [vmem:[#allocation2 + $0x1564] ss:$48 sps:$4 sm:$0xff]   ;;  %v18805_v33 = vld [vmem:[#allocation2 + $0xf60] ss:$48 sps:$4 sm:$0xff]  }
 0x3e6   :  { %11051 = vmatprep.subr.bf16.mxu1 %v18786_v57  ;;  %v18808_v57 = vld [vmem:[#allocation2 + $0x1560] ss:$48 sps:$4 sm:$0xff]  }
 0x3e8   :  { %10999 = vmatpush2.bf16.msra.mxu0 %v18781_v46  ;;  %v18813_v46 = vld [vmem:[#allocation2 + $0xf04] ss:$48 sps:$4 sm:$0xff]  }
 0x3e9   :  { %11052 = vmatpush2.bf16.msra.mxu1 %v18784_v9  ;;  %11000 = vmatprep.subr.bf16.mxu0 %v18789_v53  ;;  %v18816_v9 = vld [vmem:[#allocation2 + $0x1504] ss:$48 sps:$4 sm:$0xff]   ;;  %v18811_v53 = vld [vmem:[#allocation2 + $0xf00] ss:$48 sps:$4 sm:$0xff]  }
 0x3ea   :  { %11053 = vmatprep.subr.bf16.mxu1 %v18792_v34  ;;  %v18814_v34 = vld [vmem:[#allocation2 + $0x1500] ss:$48 sps:$4 sm:$0xff]  }
 0x3ec   :  { %11001 = vmatpush2.bf16.msra.mxu0 %v18787_v14  ;;  %v18819_v14 = vld [vmem:[#allocation2 + $0x2ac] ss:$48 sps:$4 sm:$0xff]  }
 0x3ed   :  { %11054 = vmatpush2.bf16.msra.mxu1 %v18790_v23  ;;  %11002 = vmatprep.subr.bf16.mxu0 %v18795_v42  ;;  %v18822_v23 = vld [vmem:[#allocation2 + $0x8ac] ss:$48 sps:$4 sm:$0xff]   ;;  %v202_v42 = vld [vmem:[%s22198_s0 + $0x50] sm:$0xff] }
 0x3ee   :  { %11055 = vmatprep.subr.bf16.mxu1 %v18798_v43  ;;  %v206_v43 = vld [vmem:[%s22198_s0 + $0x70] sm:$0xff] }
 0x3ef   :  { %v21159_v52 = vcombine.high %v202_v42, %v206_v43 }
 0x3f0   :  { %11003 = vmatpush2.bf16.msra.mxu0 %v18793_v58  ;;  %v203_v58 = vld [vmem:[%s22198_s0 + $0x58] sm:$0xff] }
 0x3f1   :  { %11056 = vmatpush2.bf16.msra.mxu1 %v18796_v27  ;;  %11004 = vmatprep.subr.bf16.mxu0 %v18801_v13  ;;  %v207_v27 = vld [vmem:[%s22198_s0 + $0x78] sm:$0xff] }
 0x3f2   :  { %11057 = vmatprep.subr.bf16.mxu1 %v18804_v36  ;;  %v18817_v13 = vld [vmem:[#allocation2 + $0x2a8] ss:$48 sps:$4 sm:$0xff]  }
 0x3f3   :  { %v18820_v36 = vld [vmem:[#allocation2 + $0x8a8] ss:$48 sps:$4 sm:$0xff]  }
 0x3f4   :  { %11005 = vmatpush2.bf16.msra.mxu0 %v18799_v59  ;;  %v21149_v59 = vcombine.low %v21079_v37, %v21084_v35  ;;  %v21161_v35 = vcombine.high %v203_v58, %v207_v27 }
 0x3f5   :  { %11058 = vmatpush2.bf16.msra.mxu1 %v18802_v48  ;;  %11006 = vmatprep.subr.bf16.mxu0 %v18807_v19  ;;  %v21153_v48 = vcombine.low %v21094_v40, %v21099_v7  ;;  %v21155_v19 = vpop.f32.mrf.mxu0 }
 0x3f6   :  { %11059 = vmatprep.subr.bf16.mxu1 %v18810_v15  ;;  %22256 = vst [vmem:[#allocation68_spill] sm:$0xff] %v21155_v19  ;;  %v21157_v15 = vpop.f32.mrf.mxu1 }
 0x3f7   :  { %22257 = vst [vmem:[#allocation69_spill] sm:$0xff] %v21157_v15  ;;  %v18829_v15 = vld [vmem:[#allocation2 + $0x1e8] ss:$48 sps:$4 sm:$0xff]  }
 0x3f8   :  { %11007 = vmatpush2.bf16.msra.mxu0 %v18805_v33  ;;  %v18825_v33 = vld [vmem:[#allocation2 + $0x24c] ss:$48 sps:$4 sm:$0xff]  }
 0x3f9   :  { %11060 = vmatpush2.bf16.msra.mxu1 %v18808_v57  ;;  %11008 = vmatprep.subr.bf16.mxu0 %v18813_v46  ;;  %v18828_v57 = vld [vmem:[#allocation2 + $0x84c] ss:$48 sps:$4 sm:$0xff]   ;;  %v18823_v46 = vld [vmem:[#allocation2 + $0x248] ss:$48 sps:$4 sm:$0xff]  }
 0x3fa   :  { %11061 = vmatprep.subr.bf16.mxu1 %v18816_v9  ;;  %v18826_v9 = vld [vmem:[#allocation2 + $0x848] ss:$48 sps:$4 sm:$0xff]  }
 0x3fc   :  { %11009 = vmatpush2.bf16.msra.mxu0 %v18811_v53 }
 0x3fd   :  { %11062 = vmatpush2.bf16.msra.mxu1 %v18814_v34  ;;  %11084 = vmatprep.subr.bf16.mxu0 %v18819_v14  ;;  %v18831_v34 = vld [vmem:[#allocation2 + $0x1ec] ss:$48 sps:$4 sm:$0xff]  }
 0x3fe   :  { %11137 = vmatprep.subr.bf16.mxu1 %v18822_v23  ;;  %v18834_v14 = vld [vmem:[#allocation2 + $0x7ec] ss:$48 sps:$4 sm:$0xff]  }
 0x3ff   :  { %v6774_v37 = vpop.f32.mrf.mxu0  ;;  %11011 = vmatmul.mubr.bf16.vlgmr.msra.gmra.mxu0 %v21149_v59 }
 0x400   :  { %v6827_v55 = vpop.f32.mrf.mxu1  ;;  %11064 = vmatmul.mubr.bf16.vlgmr.msra.gmra.mxu1 %v21153_v48  ;;  %11085 = vmatpush1.bf16.msra.mxu0 %v18817_v13  ;;  %v21173_v13 = vcombine.low %v203_v58, %v207_v27  ;;  %v18843_v58 = vld [vmem:[#allocation2 + $0x12c] ss:$48 sps:$4 sm:$0xff]  }
 0x401   :  { %v21165_v40 = vadd.f32 %v6827_v55, %v6774_v37  ;;  %11138 = vmatpush1.bf16.msra.mxu1 %v18820_v36  ;;  %v6776_v7 = vpop.f32.mrf.mxu0  ;;  %11086 = vmatprep.subr.bf16.mxu0 %v18825_v33  ;;  %v21171_v55 = vcombine.low %v202_v42, %v206_v43  ;;  %v18837_v37 = vld [vmem:[#allocation2 + $0x18c] ss:$48 sps:$4 sm:$0xff]  }
 0x402   :  { %v6829_v53 = vpop.f32.mrf.mxu1  ;;  %11139 = vmatprep.subr.bf16.mxu1 %v18828_v57  ;;  %11020 = vmatprep.mubr.bf16.mxu0 %v21159_v52  ;;  %v18846_v27 = vld [vmem:[#allocation2 + $0x72c] ss:$48 sps:$4 sm:$0xff]  }
 0x403   :  { %v21167_v23 = vadd.f32 %v6829_v53, %v6776_v7  ;;  %11073 = vmatprep.mubr.bf16.mxu1 %v21161_v35  ;;  %v6778_v19 = vpop.f32.mrf.mxu0  ;;  %v18840_v7 = vld [vmem:[#allocation2 + $0x78c] ss:$48 sps:$4 sm:$0xff]   ;;  %v18835_v53 = vld [vmem:[#allocation2 + $0x188] ss:$48 sps:$4 sm:$0xff]  }
 0x404   :  { %v6831_v18 = vpop.f32.mrf.mxu1  ;;  %11087 = vmatpush1.bf16.msra.mxu0 %v18823_v46 }
 0x405   :  { %v21175_v36 = vadd.f32 %v6831_v18, %v6778_v19  ;;  %11140 = vmatpush1.bf16.msra.mxu1 %v18826_v9  ;;  %v21177_v33 = vpop.f32.mrf.mxu0  ;;  %11088 = vmatprep.subr.bf16.mxu0 %v18831_v34  ;;  %v18841_v9 = vld [vmem:[#allocation2 + $0x128] ss:$48 sps:$4 sm:$0xff]  }
 0x406   :  { %22258 = vst [vmem:[#allocation70_spill] sm:$0xff] %v21177_v33  ;;  %v21179_v57 = vpop.f32.mrf.mxu1  ;;  %11141 = vmatprep.subr.bf16.mxu1 %v18834_v14  ;;  %v18844_v34 = vld [vmem:[#allocation2 + $0x728] ss:$48 sps:$4 sm:$0xff]  }
 0x407   :  { %22259 = vst [vmem:[#allocation71_spill] sm:$0xff] %v21179_v57  ;;  %11021 = vmatmul.mubr.bf16.gmra.mxu0 %v21171_v55  ;;  %v6784_v42 = vpop.f32.mrf.mxu0 }
 0x408   :  { %11074 = vmatmul.mubr.bf16.gmra.mxu1 %v21173_v13  ;;  %v6837_v43 = vpop.f32.mrf.mxu1  ;;  %11089 = vmatpush1.bf16.msra.mxu0 %v18829_v15  ;;  %v18849_v15 = vld [vmem:[#allocation2 + $0xcc] ss:$48 sps:$4 sm:$0xff]  }
 0x409   :  { %11142 = vmatpush1.bf16.msra.mxu1 %v18832_v61  ;;  %v21183_v18 = vadd.f32 %v6837_v43, %v6784_v42  ;;  %11090 = vmatprep.subr.bf16.mxu0 %v18837_v37  ;;  %v6786_v19 = vpop.f32.mrf.mxu0  ;;  %v18852_v37 = vld [vmem:[#allocation2 + $0x6cc] ss:$48 sps:$4 sm:$0xff]   ;;  %v18850_v42 = vld [vmem:[#allocation2 + $0x6c8] ss:$48 sps:$4 sm:$0xff]  }
 0x40a   :  { %11143 = vmatprep.subr.bf16.mxu1 %v18840_v7  ;;  %v6839_v46 = vpop.f32.mrf.mxu1  ;;  %11116 = vmatprep.mubr.bf16.mxu0 %v21029_v30  ;;  %v18847_v7 = vld [vmem:[#allocation2 + $0xc8] ss:$48 sps:$4 sm:$0xff]   ;;  %v18855_v43 = vld [vmem:[#allocation2 + $0x6c] ss:$48 sps:$4 sm:$0xff]  }
 0x40b   :  { %v21185_v14 = vadd.f32 %v6839_v46, %v6786_v19  ;;  %11169 = vmatprep.mubr.bf16.mxu1 %v21033_v45  ;;  %v6788_v57 = vpop.f32.mrf.mxu0  ;;  %v18858_v19 = vld [vmem:[#allocation2 + $0x66c] ss:$48 sps:$4 sm:$0xff]   ;;  %v18853_v46 = vld [vmem:[#allocation2 + $0x68] ss:$48 sps:$4 sm:$0xff]  }
 0x40c   :  { %v6841_v33 = vpop.f32.mrf.mxu1  ;;  %11091 = vmatpush1.bf16.msra.mxu0 %v18835_v53  ;;  %v18862_v53 = vld [vmem:[#allocation2 + $0x608] ss:$48 sps:$4 sm:$0xff]  }
 0x40d   :  { %11144 = vmatpush1.bf16.msra.mxu1 %v18838_v51  ;;  %v21189_v61 = vadd.f32 %v6841_v33, %v6788_v57  ;;  %11092 = vmatprep.subr.bf16.mxu0 %v18843_v58  ;;  %v18861_v51 = vld [vmem:[#allocation2 + $0xc] ss:$48 sps:$4 sm:$0xff]   ;;  %v18859_v57 = vld [vmem:[#allocation2 + $0x8] ss:$48 sps:$4 sm:$0xff]  }
 0x40e   :  { %11145 = vmatprep.subr.bf16.mxu1 %v18846_v27  ;;  %v18864_v33 = vld [vmem:[#allocation2 + $0x60c] ss:$48 sps:$4 sm:$0xff]  }
 0x40f   :  { %v18867_v58 = vld [vmem:[#allocation2 + $0x5ac] ss:$48 sps:$4 sm:$0xff]  }
 0x410   :  { %11093 = vmatpush1.bf16.msra.mxu0 %v18841_v9  ;;  %v18870_v27 = vld [vmem:[#allocation2 + $0xbac] ss:$48 sps:$4 sm:$0xff]   ;;  %v18865_v9 = vld [vmem:[#allocation2 + $0x5a8] ss:$48 sps:$4 sm:$0xff]  }
 0x411   :  { %11146 = vmatpush1.bf16.msra.mxu1 %v18844_v34  ;;  %11094 = vmatprep.subr.bf16.mxu0 %v18849_v15  ;;  %v18868_v34 = vld [vmem:[#allocation2 + $0xba8] ss:$48 sps:$4 sm:$0xff]   ;;  %v18873_v15 = vld [vmem:[#allocation2 + $0x54c] ss:$48 sps:$4 sm:$0xff]  }
 0x412   :  { %11147 = vmatprep.subr.bf16.mxu1 %v18852_v37  ;;  %v18876_v37 = vld [vmem:[#allocation2 + $0xb4c] ss:$48 sps:$4 sm:$0xff]  }
 0x414   :  { %11095 = vmatpush1.bf16.msra.mxu0 %v18847_v7  ;;  %v18871_v7 = vld [vmem:[#allocation2 + $0x548] ss:$48 sps:$4 sm:$0xff]  }
 0x415   :  { %11148 = vmatpush1.bf16.msra.mxu1 %v18850_v42  ;;  %11096 = vmatprep.subr.bf16.mxu0 %v18855_v43  ;;  %v18874_v42 = vld [vmem:[#allocation2 + $0xb48] ss:$48 sps:$4 sm:$0xff]   ;;  %v18882_v43 = vld [vmem:[#allocation2 + $0xaec] ss:$48 sps:$4 sm:$0xff]  }
 0x416   :  { %11149 = vmatprep.subr.bf16.mxu1 %v18858_v19  ;;  %v18877_v19 = vld [vmem:[#allocation2 + $0x4e8] ss:$48 sps:$4 sm:$0xff]  }
 0x418   :  { %11097 = vmatpush1.bf16.msra.mxu0 %v18853_v46  ;;  %v18880_v46 = vld [vmem:[#allocation2 + $0xae8] ss:$48 sps:$4 sm:$0xff]  }
 0x419   :  { %11150 = vmatpush1.bf16.msra.mxu1 %v18856_v22  ;;  %11098 = vmatprep.subr.bf16.mxu0 %v18861_v51  ;;  %v18879_v22 = vld [vmem:[#allocation2 + $0x4ec] ss:$48 sps:$4 sm:$0xff]  }
 0x41a   :  { %11151 = vmatprep.subr.bf16.mxu1 %v18864_v33  ;;  %v18885_v51 = vld [vmem:[#allocation2 + $0x48c] ss:$48 sps:$4 sm:$0xff]  }
 0x41b   :  { %v18888_v33 = vld [vmem:[#allocation2 + $0xa8c] ss:$48 sps:$4 sm:$0xff]  }
 0x41c   :  { %11099 = vmatpush1.bf16.msra.mxu0 %v18859_v57  ;;  %v18883_v57 = vld [vmem:[#allocation2 + $0x488] ss:$48 sps:$4 sm:$0xff]  }
 0x41d   :  { %11152 = vmatpush1.bf16.msra.mxu1 %v18862_v53  ;;  %11100 = vmatprep.subr.bf16.mxu0 %v18867_v58  ;;  %v18886_v53 = vld [vmem:[#allocation2 + $0xa88] ss:$48 sps:$4 sm:$0xff]   ;;  %v18891_v58 = vld [vmem:[#allocation2 + $0x42c] ss:$48 sps:$4 sm:$0xff]  }
 0x41e   :  { %11153 = vmatprep.subr.bf16.mxu1 %v18870_v27  ;;  %v18894_v27 = vld [vmem:[#allocation2 + $0xa2c] ss:$48 sps:$4 sm:$0xff]  }
 0x420   :  { %11101 = vmatpush2.bf16.msra.mxu0 %v18865_v9  ;;  %v18889_v9 = vld [vmem:[#allocation2 + $0x428] ss:$48 sps:$4 sm:$0xff]  }
 0x421   :  { %11154 = vmatpush2.bf16.msra.mxu1 %v18868_v34  ;;  %11102 = vmatprep.subr.bf16.mxu0 %v18873_v15  ;;  %v18892_v34 = vld [vmem:[#allocation2 + $0xa28] ss:$48 sps:$4 sm:$0xff]   ;;  %v18897_v15 = vld [vmem:[#allocation2 + $0x3cc] ss:$48 sps:$4 sm:$0xff]  }
 0x422   :  { %11155 = vmatprep.subr.bf16.mxu1 %v18876_v37  ;;  %v18900_v37 = vld [vmem:[#allocation2 + $0x9cc] ss:$48 sps:$4 sm:$0xff]  }
 0x424   :  { %11103 = vmatpush2.bf16.msra.mxu0 %v18871_v7  ;;  %v18895_v7 = vld [vmem:[#allocation2 + $0x3c8] ss:$48 sps:$4 sm:$0xff]  }
 0x425   :  { %11156 = vmatpush2.bf16.msra.mxu1 %v18874_v42  ;;  %11104 = vmatprep.subr.bf16.mxu0 %v18879_v22  ;;  %v18898_v42 = vld [vmem:[#allocation2 + $0x9c8] ss:$48 sps:$4 sm:$0xff]   ;;  %v18903_v22 = vld [vmem:[#allocation2 + $0x36c] ss:$48 sps:$4 sm:$0xff]  }
 0x426   :  { %11157 = vmatprep.subr.bf16.mxu1 %v18882_v43  ;;  %v18906_v43 = vld [vmem:[#allocation2 + $0x96c] ss:$48 sps:$4 sm:$0xff]  }
 0x428   :  { %11105 = vmatpush2.bf16.msra.mxu0 %v18877_v19  ;;  %v18901_v19 = vld [vmem:[#allocation2 + $0x368] ss:$48 sps:$4 sm:$0xff]  }
 0x429   :  { %11158 = vmatpush2.bf16.msra.mxu1 %v18880_v46  ;;  %11106 = vmatprep.subr.bf16.mxu0 %v18885_v51  ;;  %v18904_v46 = vld [vmem:[#allocation2 + $0x968] ss:$48 sps:$4 sm:$0xff]   ;;  %v18909_v51 = vld [vmem:[#allocation2 + $0x30c] ss:$48 sps:$4 sm:$0xff]  }
 0x42a   :  { %11159 = vmatprep.subr.bf16.mxu1 %v18888_v33  ;;  %v18912_v33 = vld [vmem:[#allocation2 + $0x90c] ss:$48 sps:$4 sm:$0xff]  }
 0x42c   :  { %11107 = vmatpush2.bf16.msra.mxu0 %v18883_v57  ;;  %v18907_v57 = vld [vmem:[#allocation2 + $0x308] ss:$48 sps:$4 sm:$0xff]  }
 0x42d   :  { %11160 = vmatpush2.bf16.msra.mxu1 %v18886_v53  ;;  %11108 = vmatprep.subr.bf16.mxu0 %v18891_v58  ;;  %v18910_v53 = vld [vmem:[#allocation2 + $0x908] ss:$48 sps:$4 sm:$0xff]   ;;  %v18915_v58 = vld [vmem:[#allocation2 + $0xeac] ss:$48 sps:$4 sm:$0xff]  }
 0x42e   :  { %11161 = vmatprep.subr.bf16.mxu1 %v18894_v27  ;;  %v18918_v27 = vld [vmem:[#allocation2 + $0x14ac] ss:$48 sps:$4 sm:$0xff]  }
 0x430   :  { %11109 = vmatpush2.bf16.msra.mxu0 %v18889_v9  ;;  %v18913_v9 = vld [vmem:[#allocation2 + $0xea8] ss:$48 sps:$4 sm:$0xff]  }
 0x431   :  { %11162 = vmatpush2.bf16.msra.mxu1 %v18892_v34  ;;  %11110 = vmatprep.subr.bf16.mxu0 %v18897_v15  ;;  %v18916_v34 = vld [vmem:[#allocation2 + $0x14a8] ss:$48 sps:$4 sm:$0xff]   ;;  %v21191_v15 = vpop.f32.mrf.mxu0 }
 0x432   :  { %11163 = vmatprep.subr.bf16.mxu1 %v18900_v37  ;;  %22260 = vst [vmem:[#allocation72_spill] sm:$0xff] %v21191_v15  ;;  %v21193_v37 = vpop.f32.mrf.mxu1  ;;  %v18925_v15 = vld [vmem:[#allocation2 + $0xde8] ss:$48 sps:$4 sm:$0xff]  }
 0x433   :  { %22261 = vst [vmem:[#allocation73_spill] sm:$0xff] %v21193_v37 }
 0x434   :  { %11111 = vmatpush2.bf16.msra.mxu0 %v18895_v7  ;;  %v18921_v7 = vld [vmem:[#allocation2 + $0xe4c] ss:$48 sps:$4 sm:$0xff]  }
 0x435   :  { %11164 = vmatpush2.bf16.msra.mxu1 %v18898_v42  ;;  %11112 = vmatprep.subr.bf16.mxu0 %v18903_v22  ;;  %v18924_v42 = vld [vmem:[#allocation2 + $0x144c] ss:$48 sps:$4 sm:$0xff]   ;;  %v18919_v22 = vld [vmem:[#allocation2 + $0xe48] ss:$48 sps:$4 sm:$0xff]  }
 0x436   :  { %11165 = vmatprep.subr.bf16.mxu1 %v18906_v43  ;;  %v18922_v43 = vld [vmem:[#allocation2 + $0x1448] ss:$48 sps:$4 sm:$0xff]  }
 0x438   :  { %11113 = vmatpush2.bf16.msra.mxu0 %v18901_v19 }
 0x439   :  { %11166 = vmatpush2.bf16.msra.mxu1 %v18904_v46  ;;  %11114 = vmatprep.subr.bf16.mxu0 %v18909_v51 }
 0x43a   :  { %11167 = vmatprep.subr.bf16.mxu1 %v18912_v33 }
 0x43c   :  { %11115 = vmatpush2.bf16.msra.mxu0 %v18907_v57 }
 0x43d   :  { %11168 = vmatpush2.bf16.msra.mxu1 %v18910_v53  ;;  %11190 = vmatprep.subr.bf16.mxu0 %v18915_v58  ;;  %v18927_v53 = vld [vmem:[#allocation2 + $0xdec] ss:$48 sps:$4 sm:$0xff]  }
 0x43e   :  { %11243 = vmatprep.subr.bf16.mxu1 %v18918_v27  ;;  %v18930_v58 = vld [vmem:[#allocation2 + $0x13ec] ss:$48 sps:$4 sm:$0xff]  }
 0x43f   :  { %v6880_v19 = vpop.f32.mrf.mxu0  ;;  %11117 = vmatmul.mubr.bf16.vlgmr.msra.gmra.mxu0 %v21059_v26 }
 0x440   :  { %v6933_v46 = vpop.f32.mrf.mxu1  ;;  %11170 = vmatmul.mubr.bf16.vlgmr.msra.gmra.mxu1 %v21063_v60  ;;  %v6881_v51 = vadd.f32 %v6880_v19, %v21165_v40  ;;  %11191 = vmatpush1.bf16.msra.mxu0 %v18913_v9  ;;  %v18936_v19 = vld [vmem:[#allocation2 + $0x138c] ss:$48 sps:$4 sm:$0xff]  }
 0x441   :  { %11244 = vmatpush1.bf16.msra.mxu1 %v18916_v34  ;;  %v6882_v33 = vpop.f32.mrf.mxu0  ;;  %11192 = vmatprep.subr.bf16.mxu0 %v18921_v7 }
 0x442   :  { %v6935_v57 = vpop.f32.mrf.mxu1  ;;  %11245 = vmatprep.subr.bf16.mxu1 %v18924_v42  ;;  %v21198_v27 = vadd.f32 %v6933_v46, %v6881_v51  ;;  %v6883_v37 = vadd.f32 %v6882_v33, %v21167_v23  ;;  %11126 = vmatprep.mubr.bf16.mxu0 %v21069_v5  ;;  %v18933_v23 = vld [vmem:[#allocation2 + $0xd8c] ss:$48 sps:$4 sm:$0xff]   ;;  %v18931_v51 = vld [vmem:[#allocation2 + $0xd88] ss:$48 sps:$4 sm:$0xff]  }
 0x443   :  { %11179 = vmatprep.mubr.bf16.mxu1 %v21071_v32  ;;  %v6884_v54 = vpop.f32.mrf.mxu0  ;;  %v18934_v33 = vld [vmem:[#allocation2 + $0x1388] ss:$48 sps:$4 sm:$0xff]  }
 0x444   :  { %22262 = vst [vmem:[#allocation74_spill] sm:$0xff] %v21198_v27  ;;  %v6937_v40 = vpop.f32.mrf.mxu1  ;;  %v21203_v9 = vadd.f32 %v6935_v57, %v6883_v37  ;;  %v6885_v34 = vadd.f32 %v6884_v54, %v21175_v36  ;;  %11193 = vmatpush1.bf16.msra.mxu0 %v18919_v22  ;;  %v18942_v57 = vld [vmem:[#allocation2 + $0x132c] ss:$48 sps:$4 sm:$0xff]  }
 0x445   :  { %11246 = vmatpush1.bf16.msra.mxu1 %v18922_v43  ;;  %v21206_v7 = vpop.f32.mrf.mxu0  ;;  %11194 = vmatprep.subr.bf16.mxu0 %v18927_v53  ;;  %v18939_v43 = vld [vmem:[#allocation2 + $0xd2c] ss:$48 sps:$4 sm:$0xff]  }
 0x446   :  { %v21208_v42 = vpop.f32.mrf.mxu1  ;;  %11247 = vmatprep.subr.bf16.mxu1 %v18930_v58  ;;  %v21210_v46 = vadd.f32 %v6937_v40, %v6885_v34  ;;  %v18937_v40 = vld [vmem:[#allocation2 + $0xd28] ss:$48 sps:$4 sm:$0xff]  }
 0x447   :  { %v6890_v27 = vpop.f32.mrf.mxu0  ;;  %11127 = vmatmul.mubr.bf16.gmra.mxu0 %v21101_v49  ;;  %v18940_v34 = vld [vmem:[#allocation2 + $0x1328] ss:$48 sps:$4 sm:$0xff]  }
 0x448   :  { %22263 = vst [vmem:[#allocation75_spill] sm:$0xff] %v21210_v46  ;;  %v6943_v37 = vpop.f32.mrf.mxu1  ;;  %11180 = vmatmul.mubr.bf16.gmra.mxu1 %v21103_v8  ;;  %v6891_v54 = vadd.f32 %v6890_v27, %v21183_v18  ;;  %11195 = vmatpush1.bf16.msra.mxu0 %v18925_v15  ;;  %v18945_v27 = vld [vmem:[#allocation2 + $0xccc] ss:$48 sps:$4 sm:$0xff]  }
 0x449   :  { %11248 = vmatpush1.bf16.msra.mxu1 %v18928_v17  ;;  %v6892_v36 = vpop.f32.mrf.mxu0  ;;  %11196 = vmatprep.subr.bf16.mxu0 %v18933_v23 }
 0x44a   :  { %v6945_v22 = vpop.f32.mrf.mxu1  ;;  %11249 = vmatprep.subr.bf16.mxu1 %v18936_v19  ;;  %v6893_v53 = vadd.f32 %v6892_v36, %v21185_v14  ;;  %v21216_v58 = vadd.f32 %v6943_v37, %v6891_v54  ;;  %11222 = vmatprep.mubr.bf16.mxu0 %v21116_v25  ;;  %v18948_v14 = vld [vmem:[#allocation2 + $0x12cc] ss:$48 sps:$4 sm:$0xff]   ;;  %v18943_v19 = vld [vmem:[#allocation2 + $0xcc8] ss:$48 sps:$4 sm:$0xff]  }
 0x44b   :  { %11275 = vmatprep.mubr.bf16.mxu1 %v21120_v47  ;;  %v6894_v46 = vpop.f32.mrf.mxu0  ;;  %v18946_v37 = vld [vmem:[#allocation2 + $0x12c8] ss:$48 sps:$4 sm:$0xff]   ;;  %v18951_v54 = vld [vmem:[#allocation2 + $0xc6c] ss:$48 sps:$4 sm:$0xff]  }
 0x44c   :  { %22264 = vst [vmem:[#allocation76_spill] sm:$0xff] %v21216_v58  ;;  %v6947_v18 = vpop.f32.mrf.mxu1  ;;  %v6895_v17 = vadd.f32 %v6894_v46, %v21189_v61  ;;  %v21221_v15 = vadd.f32 %v6945_v22, %v6893_v53  ;;  %11197 = vmatpush1.bf16.msra.mxu0 %v18931_v51  ;;  %v18954_v36 = vld [vmem:[#allocation2 + $0x126c] ss:$48 sps:$4 sm:$0xff]   ;;  %v18949_v61 = vld [vmem:[#allocation2 + $0xc68] ss:$48 sps:$4 sm:$0xff]  }
 0x44d   :  { %11250 = vmatpush1.bf16.msra.mxu1 %v18934_v33  ;;  %11198 = vmatprep.subr.bf16.mxu0 %v18939_v43  ;;  %v18952_v46 = vld [vmem:[#allocation2 + $0x1268] ss:$48 sps:$4 sm:$0xff]   ;;  %v18957_v51 = vld [vmem:[#allocation2 + $0xc0c] ss:$48 sps:$4 sm:$0xff]  }
 0x44e   :  { %22265 = vst [vmem:[#allocation77_spill] sm:$0xff] %v21221_v15  ;;  %11251 = vmatprep.subr.bf16.mxu1 %v18942_v57  ;;  %v21223_v23 = vadd.f32 %v6947_v18, %v6895_v17  ;;  %v18960_v33 = vld [vmem:[#allocation2 + $0x120c] ss:$48 sps:$4 sm:$0xff]   ;;  %v18955_v22 = vld [vmem:[#allocation2 + $0xc08] ss:$48 sps:$4 sm:$0xff]  }
 0x44f   :  { %v18958_v43 = vld [vmem:[#allocation2 + $0x1208] ss:$48 sps:$4 sm:$0xff]   ;;  %v18963_v57 = vld [vmem:[#allocation2 + $0x11ac] ss:$48 sps:$4 sm:$0xff]   ;;  %v19024_v15 = vld [vmem:[#allocation2 + $0x7f0] ss:$48 sps:$4 sm:$0xff]  }
 0x450   :  { %11199 = vmatpush1.bf16.msra.mxu0 %v18937_v40  ;;  %v18966_v53 = vld [vmem:[#allocation2 + $0x17ac] ss:$48 sps:$4 sm:$0xff]   ;;  %v18961_v40 = vld [vmem:[#allocation2 + $0x11a8] ss:$48 sps:$4 sm:$0xff]  }
 0x451   :  { %11252 = vmatpush1.bf16.msra.mxu1 %v18940_v34  ;;  %11200 = vmatprep.subr.bf16.mxu0 %v18945_v27  ;;  %v18964_v34 = vld [vmem:[#allocation2 + $0x17a8] ss:$48 sps:$4 sm:$0xff]   ;;  %v18969_v18 = vld [vmem:[#allocation2 + $0x114c] ss:$48 sps:$4 sm:$0xff]  }
 0x452   :  { %11253 = vmatprep.subr.bf16.mxu1 %v18948_v14  ;;  %v18972_v17 = vld [vmem:[#allocation2 + $0x174c] ss:$48 sps:$4 sm:$0xff]   ;;  %v18967_v27 = vld [vmem:[#allocation2 + $0x1148] ss:$48 sps:$4 sm:$0xff]  }
 0x453   :  { %v18970_v14 = vld [vmem:[#allocation2 + $0x1748] ss:$48 sps:$4 sm:$0xff]  }
 0x454   :  { %11201 = vmatpush1.bf16.msra.mxu0 %v18943_v19  ;;  %v18975_v19 = vld [vmem:[#allocation2 + $0x10ec] ss:$48 sps:$4 sm:$0xff]  }
 0x455   :  { %11254 = vmatpush1.bf16.msra.mxu1 %v18946_v37  ;;  %11202 = vmatprep.subr.bf16.mxu0 %v18951_v54  ;;  %v18978_v37 = vld [vmem:[#allocation2 + $0x16ec] ss:$48 sps:$4 sm:$0xff]   ;;  %v18973_v54 = vld [vmem:[#allocation2 + $0x10e8] ss:$48 sps:$4 sm:$0xff]  }
 0x456   :  { %11255 = vmatprep.subr.bf16.mxu1 %v18954_v36  ;;  %v18976_v36 = vld [vmem:[#allocation2 + $0x16e8] ss:$48 sps:$4 sm:$0xff]  }
 0x458   :  { %11203 = vmatpush1.bf16.msra.mxu0 %v18949_v61  ;;  %v18981_v61 = vld [vmem:[#allocation2 + $0x108c] ss:$48 sps:$4 sm:$0xff]  }
 0x459   :  { %11256 = vmatpush1.bf16.msra.mxu1 %v18952_v46  ;;  %11204 = vmatprep.subr.bf16.mxu0 %v18957_v51  ;;  %v18984_v46 = vld [vmem:[#allocation2 + $0x168c] ss:$48 sps:$4 sm:$0xff]   ;;  %v18979_v51 = vld [vmem:[#allocation2 + $0x1088] ss:$48 sps:$4 sm:$0xff]  }
 0x45a   :  { %11257 = vmatprep.subr.bf16.mxu1 %v18960_v33  ;;  %v18982_v33 = vld [vmem:[#allocation2 + $0x1688] ss:$48 sps:$4 sm:$0xff]  }
 0x45c   :  { %11205 = vmatpush1.bf16.msra.mxu0 %v18955_v22  ;;  %v18987_v22 = vld [vmem:[#allocation2 + $0x102c] ss:$48 sps:$4 sm:$0xff]  }
 0x45d   :  { %11258 = vmatpush1.bf16.msra.mxu1 %v18958_v43  ;;  %11206 = vmatprep.subr.bf16.mxu0 %v18963_v57  ;;  %v18990_v43 = vld [vmem:[#allocation2 + $0x162c] ss:$48 sps:$4 sm:$0xff]   ;;  %v18985_v57 = vld [vmem:[#allocation2 + $0x1028] ss:$48 sps:$4 sm:$0xff]  }
 0x45e   :  { %11259 = vmatprep.subr.bf16.mxu1 %v18966_v53  ;;  %v18988_v53 = vld [vmem:[#allocation2 + $0x1628] ss:$48 sps:$4 sm:$0xff]  }
 0x460   :  { %11207 = vmatpush2.bf16.msra.mxu0 %v18961_v40  ;;  %v18993_v40 = vld [vmem:[#allocation2 + $0xfcc] ss:$48 sps:$4 sm:$0xff]  }
 0x461   :  { %11260 = vmatpush2.bf16.msra.mxu1 %v18964_v34  ;;  %11208 = vmatprep.subr.bf16.mxu0 %v18969_v18  ;;  %v18996_v34 = vld [vmem:[#allocation2 + $0x15cc] ss:$48 sps:$4 sm:$0xff]   ;;  %v18991_v18 = vld [vmem:[#allocation2 + $0xfc8] ss:$48 sps:$4 sm:$0xff]  }
 0x462   :  { %11261 = vmatprep.subr.bf16.mxu1 %v18972_v17  ;;  %v18994_v17 = vld [vmem:[#allocation2 + $0x15c8] ss:$48 sps:$4 sm:$0xff]  }
 0x464   :  { %11209 = vmatpush2.bf16.msra.mxu0 %v18967_v27  ;;  %v18999_v27 = vld [vmem:[#allocation2 + $0xf6c] ss:$48 sps:$4 sm:$0xff]  }
 0x465   :  { %11262 = vmatpush2.bf16.msra.mxu1 %v18970_v14  ;;  %11210 = vmatprep.subr.bf16.mxu0 %v18975_v19  ;;  %v19002_v14 = vld [vmem:[#allocation2 + $0x156c] ss:$48 sps:$4 sm:$0xff]   ;;  %v18997_v19 = vld [vmem:[#allocation2 + $0xf68] ss:$48 sps:$4 sm:$0xff]  }
 0x466   :  { %11263 = vmatprep.subr.bf16.mxu1 %v18978_v37  ;;  %v19000_v37 = vld [vmem:[#allocation2 + $0x1568] ss:$48 sps:$4 sm:$0xff]  }
 0x468   :  { %11211 = vmatpush2.bf16.msra.mxu0 %v18973_v54  ;;  %v19005_v54 = vld [vmem:[#allocation2 + $0xf0c] ss:$48 sps:$4 sm:$0xff]  }
 0x469   :  { %11264 = vmatpush2.bf16.msra.mxu1 %v18976_v36  ;;  %11212 = vmatprep.subr.bf16.mxu0 %v18981_v61  ;;  %v19008_v36 = vld [vmem:[#allocation2 + $0x150c] ss:$48 sps:$4 sm:$0xff]   ;;  %v19003_v61 = vld [vmem:[#allocation2 + $0xf08] ss:$48 sps:$4 sm:$0xff]  }
 0x46a   :  { %11265 = vmatprep.subr.bf16.mxu1 %v18984_v46  ;;  %v19006_v46 = vld [vmem:[#allocation2 + $0x1508] ss:$48 sps:$4 sm:$0xff]  }
 0x46c   :  { %11213 = vmatpush2.bf16.msra.mxu0 %v18979_v51  ;;  %v19011_v51 = vld [vmem:[#allocation2 + $0x2b4] ss:$48 sps:$4 sm:$0xff]  }
 0x46d   :  { %11266 = vmatpush2.bf16.msra.mxu1 %v18982_v33  ;;  %11214 = vmatprep.subr.bf16.mxu0 %v18987_v22  ;;  %v19014_v33 = vld [vmem:[#allocation2 + $0x8b4] ss:$48 sps:$4 sm:$0xff]   ;;  %v19009_v22 = vld [vmem:[#allocation2 + $0x2b0] ss:$48 sps:$4 sm:$0xff]  }
 0x46e   :  { %11267 = vmatprep.subr.bf16.mxu1 %v18990_v43  ;;  %v19012_v43 = vld [vmem:[#allocation2 + $0x8b0] ss:$48 sps:$4 sm:$0xff]  }
 0x470   :  { %11215 = vmatpush2.bf16.msra.mxu0 %v18985_v57  ;;  %v21225_v57 = vpop.f32.mrf.mxu0 }
 0x471   :  { %11268 = vmatpush2.bf16.msra.mxu1 %v18988_v53  ;;  %11216 = vmatprep.subr.bf16.mxu0 %v18993_v40  ;;  %22266 = vst [vmem:[#allocation78_spill] sm:$0xff] %v21225_v57  ;;  %v21227_v53 = vpop.f32.mrf.mxu1  ;;  %v19017_v40 = vld [vmem:[#allocation2 + $0x254] ss:$48 sps:$4 sm:$0xff]  }
 0x472   :  { %11269 = vmatprep.subr.bf16.mxu1 %v18996_v34  ;;  %22267 = vst [vmem:[#allocation79_spill] sm:$0xff] %v21227_v53  ;;  %v19020_v34 = vld [vmem:[#allocation2 + $0x854] ss:$48 sps:$4 sm:$0xff]  }
 0x473   :  { %v19047_v53 = vld [vmem:[#allocation2 + $0x74] ss:$48 sps:$4 sm:$0xff]  }
 0x474   :  { %11217 = vmatpush2.bf16.msra.mxu0 %v18991_v18  ;;  %v19015_v18 = vld [vmem:[#allocation2 + $0x250] ss:$48 sps:$4 sm:$0xff]  }
 0x475   :  { %11270 = vmatpush2.bf16.msra.mxu1 %v18994_v17  ;;  %11218 = vmatprep.subr.bf16.mxu0 %v18999_v27  ;;  %v19018_v17 = vld [vmem:[#allocation2 + $0x850] ss:$48 sps:$4 sm:$0xff]  }
 0x476   :  { %11271 = vmatprep.subr.bf16.mxu1 %v19002_v14 }
 0x478   :  { %11219 = vmatpush2.bf16.msra.mxu0 %v18997_v19 }
 0x479   :  { %11272 = vmatpush2.bf16.msra.mxu1 %v19000_v37  ;;  %11220 = vmatprep.subr.bf16.mxu0 %v19005_v54 }
 0x47a   :  { %11273 = vmatprep.subr.bf16.mxu1 %v19008_v36  ;;  %v19023_v36 = vld [vmem:[#allocation2 + $0x1f4] ss:$48 sps:$4 sm:$0xff]  }
 0x47c   :  { %11221 = vmatpush2.bf16.msra.mxu0 %v19003_v61  ;;  %v19026_v61 = vld [vmem:[#allocation2 + $0x7f4] ss:$48 sps:$4 sm:$0xff]  }
 0x47d   :  { %11274 = vmatpush2.bf16.msra.mxu1 %v19006_v46  ;;  %11296 = vmatprep.subr.bf16.mxu0 %v19011_v51 }
 0x47e   :  { %11349 = vmatprep.subr.bf16.mxu1 %v19014_v33  ;;  %v19021_v33 = vld [vmem:[#allocation2 + $0x1f0] ss:$48 sps:$4 sm:$0xff]  }
 0x47f   :  { %v10906_v27 = vpop.f32.mrf.mxu0  ;;  %11223 = vmatmul.mubr.bf16.vlgmr.msra.gmra.mxu0 %v21149_v59 }
 0x480   :  { %v10959_v14 = vpop.f32.mrf.mxu1  ;;  %11276 = vmatmul.mubr.bf16.vlgmr.msra.gmra.mxu1 %v21153_v48  ;;  %v10907_v19 = vadd.f32 %v10906_v27, %v20776_v28  ;;  %11297 = vmatpush1.bf16.msra.mxu0 %v19009_v22  ;;  %v19032_v27 = vld [vmem:[#allocation2 + $0x794] ss:$48 sps:$4 sm:$0xff]  }
 0x481   :  { %11350 = vmatpush1.bf16.msra.mxu1 %v19012_v43  ;;  %v10908_v37 = vpop.f32.mrf.mxu0  ;;  %11298 = vmatprep.subr.bf16.mxu0 %v19017_v40 }
 0x482   :  { %v10961_v54 = vpop.f32.mrf.mxu1  ;;  %11351 = vmatprep.subr.bf16.mxu1 %v19020_v34  ;;  %v21232_v46 = vadd.f32 %v10959_v14, %v10907_v19  ;;  %v10909_v51 = vadd.f32 %v10908_v37, %v20781_v41  ;;  %11232 = vmatprep.mubr.bf16.mxu0 %v21159_v52  ;;  %v19029_v41 = vld [vmem:[#allocation2 + $0x194] ss:$48 sps:$4 sm:$0xff]  }
 0x483   :  { %11285 = vmatprep.mubr.bf16.mxu1 %v21161_v35  ;;  %v10910_v58 = vpop.f32.mrf.mxu0 }
 0x484   :  { %v10963_v28 = vpop.f32.mrf.mxu1  ;;  %v21237_v22 = vadd.f32 %v10961_v54, %v10909_v51  ;;  %v10911_v43 = vadd.f32 %v10910_v58, %v20788_v50  ;;  %11299 = vmatpush1.bf16.msra.mxu0 %v19015_v18  ;;  %v19027_v58 = vld [vmem:[#allocation2 + $0x190] ss:$48 sps:$4 sm:$0xff]  }
 0x485   :  { %11352 = vmatpush1.bf16.msra.mxu1 %v19018_v17  ;;  %v21240_v40 = vpop.f32.mrf.mxu0  ;;  %11300 = vmatprep.subr.bf16.mxu0 %v19023_v36  ;;  %v19030_v18 = vld [vmem:[#allocation2 + $0x790] ss:$48 sps:$4 sm:$0xff]   ;;  %v19035_v36 = vld [vmem:[#allocation2 + $0x134] ss:$48 sps:$4 sm:$0xff]  }
 0x486   :  { %v21242_v34 = vpop.f32.mrf.mxu1  ;;  %11353 = vmatprep.subr.bf16.mxu1 %v19026_v61  ;;  %v21244_v14 = vadd.f32 %v10963_v28, %v10911_v43  ;;  %v19038_v61 = vld [vmem:[#allocation2 + $0x734] ss:$48 sps:$4 sm:$0xff]  }
 0x487   :  { %22268 = vst [vmem:[#allocation80_spill] sm:$0xff] %v21242_v34  ;;  %v10916_v19 = vpop.f32.mrf.mxu0  ;;  %11233 = vmatmul.mubr.bf16.gmra.mxu0 %v21171_v55 }
 0x488   :  { %v10969_v37 = vpop.f32.mrf.mxu1  ;;  %11286 = vmatmul.mubr.bf16.gmra.mxu1 %v21173_v13  ;;  %v10917_v50 = vadd.f32 %v10916_v19, %v20794_v3  ;;  %11301 = vmatpush1.bf16.msra.mxu0 %v19021_v33  ;;  %v19041_v19 = vld [vmem:[#allocation2 + $0xd4] ss:$48 sps:$4 sm:$0xff]  }
 0x489   :  { %11354 = vmatpush1.bf16.msra.mxu1 %v19024_v15  ;;  %v10918_v17 = vpop.f32.mrf.mxu0  ;;  %11302 = vmatprep.subr.bf16.mxu0 %v19029_v41  ;;  %v19033_v41 = vld [vmem:[#allocation2 + $0x130] ss:$48 sps:$4 sm:$0xff]  }
 0x48a   :  { %v10971_v54 = vpop.f32.mrf.mxu1  ;;  %11355 = vmatprep.subr.bf16.mxu1 %v19032_v27  ;;  %v10919_v51 = vadd.f32 %v10918_v17, %v20799_v11  ;;  %v21250_v28 = vadd.f32 %v10969_v37, %v10917_v50  ;;  %11328 = vmatprep.mubr.bf16.mxu0 %v21029_v30  ;;  %v19036_v27 = vld [vmem:[#allocation2 + $0x730] ss:$48 sps:$4 sm:$0xff]   ;;  %v19044_v11 = vld [vmem:[#allocation2 + $0x6d4] ss:$48 sps:$4 sm:$0xff]  }
 0x48b   :  { %11381 = vmatprep.mubr.bf16.mxu1 %v21033_v45  ;;  %v10920_v43 = vpop.f32.mrf.mxu0  ;;  %v19039_v50 = vld [vmem:[#allocation2 + $0xd0] ss:$48 sps:$4 sm:$0xff]  }
 0x48c   :  { %v10973_v3 = vpop.f32.mrf.mxu1  ;;  %v10921_v15 = vadd.f32 %v10920_v43, %v20801_v16  ;;  %v21255_v33 = vadd.f32 %v10971_v54, %v10919_v51  ;;  %11303 = vmatpush1.bf16.msra.mxu0 %v19027_v58  ;;  %v19042_v17 = vld [vmem:[#allocation2 + $0x6d0] ss:$48 sps:$4 sm:$0xff]   ;;  %v19050_v16 = vld [vmem:[#allocation2 + $0x674] ss:$48 sps:$4 sm:$0xff]  }
 0x48d   :  { %11356 = vmatpush1.bf16.msra.mxu1 %v19030_v18  ;;  %11304 = vmatprep.subr.bf16.mxu0 %v19035_v36  ;;  %v19045_v58 = vld [vmem:[#allocation2 + $0x70] ss:$48 sps:$4 sm:$0xff]   ;;  %v19053_v54 = vld [vmem:[#allocation2 + $0x14] ss:$48 sps:$4 sm:$0xff]  }
 0x48e   :  { %11357 = vmatprep.subr.bf16.mxu1 %v19038_v61  ;;  %v21257_v37 = vadd.f32 %v10973_v3, %v10921_v15  ;;  %v19048_v18 = vld [vmem:[#allocation2 + $0x670] ss:$48 sps:$4 sm:$0xff]   ;;  %v19056_v36 = vld [vmem:[#allocation2 + $0x614] ss:$48 sps:$4 sm:$0xff]  }
 0x48f   :  { %v19051_v61 = vld [vmem:[#allocation2 + $0x10] ss:$48 sps:$4 sm:$0xff]   ;;  %v19059_v43 = vld [vmem:[#allocation2 + $0x5b4] ss:$48 sps:$4 sm:$0xff]  }
 0x490   :  { %11305 = vmatpush1.bf16.msra.mxu0 %v19033_v41  ;;  %v19054_v51 = vld [vmem:[#allocation2 + $0x610] ss:$48 sps:$4 sm:$0xff]   ;;  %v19062_v3 = vld [vmem:[#allocation2 + $0xbb4] ss:$48 sps:$4 sm:$0xff]  }
 0x491   :  { %11358 = vmatpush1.bf16.msra.mxu1 %v19036_v27  ;;  %11306 = vmatprep.subr.bf16.mxu0 %v19041_v19  ;;  %v19057_v15 = vld [vmem:[#allocation2 + $0x5b0] ss:$48 sps:$4 sm:$0xff]   ;;  %v19065_v27 = vld [vmem:[#allocation2 + $0x554] ss:$48 sps:$4 sm:$0xff]  }
 0x492   :  { %11359 = vmatprep.subr.bf16.mxu1 %v19044_v11  ;;  %v19060_v41 = vld [vmem:[#allocation2 + $0xbb0] ss:$48 sps:$4 sm:$0xff]   ;;  %v19068_v19 = vld [vmem:[#allocation2 + $0xb54] ss:$48 sps:$4 sm:$0xff]  }
 0x493   :  { %v19066_v11 = vld [vmem:[#allocation2 + $0xb50] ss:$48 sps:$4 sm:$0xff]  }
 0x494   :  { %11307 = vmatpush1.bf16.msra.mxu0 %v19039_v50  ;;  %v19071_v50 = vld [vmem:[#allocation2 + $0x4f4] ss:$48 sps:$4 sm:$0xff]  }
 0x495   :  { %11360 = vmatpush1.bf16.msra.mxu1 %v19042_v17  ;;  %11308 = vmatprep.subr.bf16.mxu0 %v19047_v53  ;;  %v19063_v53 = vld [vmem:[#allocation2 + $0x550] ss:$48 sps:$4 sm:$0xff]   ;;  %v19074_v17 = vld [vmem:[#allocation2 + $0xaf4] ss:$48 sps:$4 sm:$0xff]  }
 0x496   :  { %11361 = vmatprep.subr.bf16.mxu1 %v19050_v16  ;;  %v19069_v16 = vld [vmem:[#allocation2 + $0x4f0] ss:$48 sps:$4 sm:$0xff]  }
 0x498   :  { %11309 = vmatpush1.bf16.msra.mxu0 %v19045_v58  ;;  %v19072_v58 = vld [vmem:[#allocation2 + $0xaf0] ss:$48 sps:$4 sm:$0xff]  }
 0x499   :  { %11362 = vmatpush1.bf16.msra.mxu1 %v19048_v18  ;;  %11310 = vmatprep.subr.bf16.mxu0 %v19053_v54  ;;  %v19077_v18 = vld [vmem:[#allocation2 + $0x494] ss:$48 sps:$4 sm:$0xff]  }
 0x49a   :  { %11363 = vmatprep.subr.bf16.mxu1 %v19056_v36  ;;  %v19080_v54 = vld [vmem:[#allocation2 + $0xa94] ss:$48 sps:$4 sm:$0xff]   ;;  %v19075_v36 = vld [vmem:[#allocation2 + $0x490] ss:$48 sps:$4 sm:$0xff]  }
 0x49c   :  { %11311 = vmatpush1.bf16.msra.mxu0 %v19051_v61  ;;  %v19078_v61 = vld [vmem:[#allocation2 + $0xa90] ss:$48 sps:$4 sm:$0xff]  }
 0x49d   :  { %11364 = vmatpush1.bf16.msra.mxu1 %v19054_v51  ;;  %11312 = vmatprep.subr.bf16.mxu0 %v19059_v43  ;;  %v19083_v51 = vld [vmem:[#allocation2 + $0x434] ss:$48 sps:$4 sm:$0xff]  }
 0x49e   :  { %11365 = vmatprep.subr.bf16.mxu1 %v19062_v3  ;;  %v19086_v43 = vld [vmem:[#allocation2 + $0xa34] ss:$48 sps:$4 sm:$0xff]   ;;  %v19081_v3 = vld [vmem:[#allocation2 + $0x430] ss:$48 sps:$4 sm:$0xff]  }
 0x4a0   :  { %11313 = vmatpush2.bf16.msra.mxu0 %v19057_v15  ;;  %v19084_v15 = vld [vmem:[#allocation2 + $0xa30] ss:$48 sps:$4 sm:$0xff]  }
 0x4a1   :  { %11366 = vmatpush2.bf16.msra.mxu1 %v19060_v41  ;;  %11314 = vmatprep.subr.bf16.mxu0 %v19065_v27  ;;  %v19089_v41 = vld [vmem:[#allocation2 + $0x3d4] ss:$48 sps:$4 sm:$0xff]  }
 0x4a2   :  { %11367 = vmatprep.subr.bf16.mxu1 %v19068_v19  ;;  %v19092_v27 = vld [vmem:[#allocation2 + $0x9d4] ss:$48 sps:$4 sm:$0xff]   ;;  %v19087_v19 = vld [vmem:[#allocation2 + $0x3d0] ss:$48 sps:$4 sm:$0xff]  }
 0x4a4   :  { %11315 = vmatpush2.bf16.msra.mxu0 %v19063_v53  ;;  %v19090_v53 = vld [vmem:[#allocation2 + $0x9d0] ss:$48 sps:$4 sm:$0xff]  }
 0x4a5   :  { %11368 = vmatpush2.bf16.msra.mxu1 %v19066_v11  ;;  %11316 = vmatprep.subr.bf16.mxu0 %v19071_v50  ;;  %v19095_v11 = vld [vmem:[#allocation2 + $0x374] ss:$48 sps:$4 sm:$0xff]  }
 0x4a6   :  { %11369 = vmatprep.subr.bf16.mxu1 %v19074_v17  ;;  %v19098_v50 = vld [vmem:[#allocation2 + $0x974] ss:$48 sps:$4 sm:$0xff]   ;;  %v19093_v17 = vld [vmem:[#allocation2 + $0x370] ss:$48 sps:$4 sm:$0xff]  }
 0x4a8   :  { %11317 = vmatpush2.bf16.msra.mxu0 %v19069_v16  ;;  %v19096_v16 = vld [vmem:[#allocation2 + $0x970] ss:$48 sps:$4 sm:$0xff]  }
 0x4a9   :  { %11370 = vmatpush2.bf16.msra.mxu1 %v19072_v58  ;;  %11318 = vmatprep.subr.bf16.mxu0 %v19077_v18  ;;  %v19101_v58 = vld [vmem:[#allocation2 + $0x314] ss:$48 sps:$4 sm:$0xff]  }
 0x4aa   :  { %11371 = vmatprep.subr.bf16.mxu1 %v19080_v54  ;;  %v19104_v18 = vld [vmem:[#allocation2 + $0x914] ss:$48 sps:$4 sm:$0xff]   ;;  %v19099_v54 = vld [vmem:[#allocation2 + $0x310] ss:$48 sps:$4 sm:$0xff]  }
 0x4ac   :  { %11319 = vmatpush2.bf16.msra.mxu0 %v19075_v36  ;;  %v19102_v36 = vld [vmem:[#allocation2 + $0x910] ss:$48 sps:$4 sm:$0xff]  }
 0x4ad   :  { %11372 = vmatpush2.bf16.msra.mxu1 %v19078_v61  ;;  %11320 = vmatprep.subr.bf16.mxu0 %v19083_v51  ;;  %v19107_v61 = vld [vmem:[#allocation2 + $0xeb4] ss:$48 sps:$4 sm:$0xff]  }
 0x4ae   :  { %11373 = vmatprep.subr.bf16.mxu1 %v19086_v43  ;;  %v19110_v51 = vld [vmem:[#allocation2 + $0x14b4] ss:$48 sps:$4 sm:$0xff]   ;;  %v19105_v43 = vld [vmem:[#allocation2 + $0xeb0] ss:$48 sps:$4 sm:$0xff]  }
 0x4b0   :  { %11321 = vmatpush2.bf16.msra.mxu0 %v19081_v3  ;;  %v19108_v3 = vld [vmem:[#allocation2 + $0x14b0] ss:$48 sps:$4 sm:$0xff]  }
 0x4b1   :  { %11374 = vmatpush2.bf16.msra.mxu1 %v19084_v15  ;;  %11322 = vmatprep.subr.bf16.mxu0 %v19089_v41  ;;  %v21259_v15 = vpop.f32.mrf.mxu0  ;;  %v21261_v41 = vpop.f32.mrf.mxu1 }
 0x4b2   :  { %11375 = vmatprep.subr.bf16.mxu1 %v19092_v27  ;;  %v19113_v27 = vld [vmem:[#allocation2 + $0xe54] ss:$48 sps:$4 sm:$0xff]  }
 0x4b4   :  { %11323 = vmatpush2.bf16.msra.mxu0 %v19087_v19  ;;  %v19116_v19 = vld [vmem:[#allocation2 + $0x1454] ss:$48 sps:$4 sm:$0xff]  }
 0x4b5   :  { %11376 = vmatpush2.bf16.msra.mxu1 %v19090_v53  ;;  %11324 = vmatprep.subr.bf16.mxu0 %v19095_v11 }
 0x4b6   :  { %11377 = vmatprep.subr.bf16.mxu1 %v19098_v50 }
 0x4b8   :  { %11325 = vmatpush2.bf16.msra.mxu0 %v19093_v17  ;;  %v19111_v17 = vld [vmem:[#allocation2 + $0xe50] ss:$48 sps:$4 sm:$0xff]  }
 0x4b9   :  { %11378 = vmatpush2.bf16.msra.mxu1 %v19096_v16  ;;  %11326 = vmatprep.subr.bf16.mxu0 %v19101_v58  ;;  %v19114_v16 = vld [vmem:[#allocation2 + $0x1450] ss:$48 sps:$4 sm:$0xff]  }
 0x4ba   :  { %11379 = vmatprep.subr.bf16.mxu1 %v19104_v18 }
 0x4bc   :  { %11327 = vmatpush2.bf16.msra.mxu0 %v19099_v54  ;;  %v19119_v54 = vld [vmem:[#allocation2 + $0xdf4] ss:$48 sps:$4 sm:$0xff]  }
 0x4bd   :  { %11380 = vmatpush2.bf16.msra.mxu1 %v19102_v36  ;;  %11402 = vmatprep.subr.bf16.mxu0 %v19107_v61  ;;  %v19122_v36 = vld [vmem:[#allocation2 + $0x13f4] ss:$48 sps:$4 sm:$0xff]  }
 0x4be   :  { %11455 = vmatprep.subr.bf16.mxu1 %v19110_v51 }
 0x4bf   :  { %v11012_v53 = vpop.f32.mrf.mxu0  ;;  %11329 = vmatmul.mubr.bf16.vlgmr.msra.gmra.mxu0 %v21059_v26 }
 0x4c0   :  { %v11065_v11 = vpop.f32.mrf.mxu1  ;;  %11382 = vmatmul.mubr.bf16.vlgmr.msra.gmra.mxu1 %v21063_v60  ;;  %v11013_v50 = vadd.f32 %v11012_v53, %v21232_v46  ;;  %11403 = vmatpush1.bf16.msra.mxu0 %v19105_v43 }
 0x4c1   :  { %11456 = vmatpush1.bf16.msra.mxu1 %v19108_v3  ;;  %v11014_v58 = vpop.f32.mrf.mxu0  ;;  %11404 = vmatprep.subr.bf16.mxu0 %v19113_v27  ;;  %v19117_v27 = vld [vmem:[#allocation2 + $0xdf0] ss:$48 sps:$4 sm:$0xff]  }
 0x4c2   :  { %v11067_v18 = vpop.f32.mrf.mxu1  ;;  %11457 = vmatprep.subr.bf16.mxu1 %v19116_v19  ;;  %v21266_v61 = vadd.f32 %v11065_v11, %v11013_v50  ;;  %v11015_v51 = vadd.f32 %v11014_v58, %v21237_v22  ;;  %11338 = vmatprep.mubr.bf16.mxu0 %v21069_v5  ;;  %v19120_v19 = vld [vmem:[#allocation2 + $0x13f0] ss:$48 sps:$4 sm:$0xff]   ;;  %v19125_v22 = vld [vmem:[#allocation2 + $0xd94] ss:$48 sps:$4 sm:$0xff]  }
 0x4c3   :  { %11391 = vmatprep.mubr.bf16.mxu1 %v21071_v32  ;;  %v11016_v57 = vpop.f32.mrf.mxu0  ;;  %v19128_v50 = vld [vmem:[#allocation2 + $0x1394] ss:$48 sps:$4 sm:$0xff]  }
 0x4c4   :  { %v11069_v46 = vpop.f32.mrf.mxu1  ;;  %v21271_v43 = vadd.f32 %v11067_v18, %v11015_v51  ;;  %v11017_v3 = vadd.f32 %v11016_v57, %v21244_v14  ;;  %11405 = vmatpush1.bf16.msra.mxu0 %v19111_v17  ;;  %v19123_v14 = vld [vmem:[#allocation2 + $0xd90] ss:$48 sps:$4 sm:$0xff]  }
 0x4c5   :  { %11458 = vmatpush1.bf16.msra.mxu1 %v19114_v16  ;;  %v21274_v53 = vpop.f32.mrf.mxu0  ;;  %11406 = vmatprep.subr.bf16.mxu0 %v19119_v54  ;;  %v19126_v17 = vld [vmem:[#allocation2 + $0x1390] ss:$48 sps:$4 sm:$0xff]   ;;  %v19131_v54 = vld [vmem:[#allocation2 + $0xd34] ss:$48 sps:$4 sm:$0xff]  }
 0x4c6   :  { %22269 = vst [vmem:[#allocation81_spill] sm:$0xff] %v21271_v43  ;;  %22270 = vst [vmem:[#allocation82_spill] sm:$0xff] %v21274_v53  ;;  %v21276_v11 = vpop.f32.mrf.mxu1  ;;  %11459 = vmatprep.subr.bf16.mxu1 %v19122_v36  ;;  %v21278_v58 = vadd.f32 %v11069_v46, %v11017_v3  ;;  %v19134_v36 = vld [vmem:[#allocation2 + $0x1334] ss:$48 sps:$4 sm:$0xff]  }
 0x4c7   :  { %22271 = vst [vmem:[#allocation83_spill] sm:$0xff] %v21276_v11  ;;  %v11022_v34 = vpop.f32.mrf.mxu0  ;;  %11339 = vmatmul.mubr.bf16.gmra.mxu0 %v21101_v49  ;;  %v19143_v11 = vld [vmem:[#allocation2 + $0xc74] ss:$48 sps:$4 sm:$0xff]  }
 0x4c8   :  { %v11075_v18 = vpop.f32.mrf.mxu1  ;;  %11392 = vmatmul.mubr.bf16.gmra.mxu1 %v21103_v8  ;;  %v11023_v57 = vadd.f32 %v11022_v34, %v21250_v28  ;;  %11407 = vmatpush1.bf16.msra.mxu0 %v19117_v27 }
 0x4c9   :  { %11460 = vmatpush1.bf16.msra.mxu1 %v19120_v19  ;;  %v11024_v16 = vpop.f32.mrf.mxu0  ;;  %11408 = vmatprep.subr.bf16.mxu0 %v19125_v22  ;;  %v19129_v19 = vld [vmem:[#allocation2 + $0xd30] ss:$48 sps:$4 sm:$0xff]  }
 0x4ca   :  { %v11077_v51 = vpop.f32.mrf.mxu1  ;;  %11461 = vmatprep.subr.bf16.mxu1 %v19128_v50  ;;  %v11025_v46 = vadd.f32 %v11024_v16, %v21255_v33  ;;  %v21284_v3 = vadd.f32 %v11075_v18, %v11023_v57  ;;  %11434 = vmatprep.mubr.bf16.mxu0 %v21116_v25  ;;  %v19132_v22 = vld [vmem:[#allocation2 + $0x1330] ss:$48 sps:$4 sm:$0xff]   ;;  %v19137_v50 = vld [vmem:[#allocation2 + $0xcd4] ss:$48 sps:$4 sm:$0xff]  }
 0x4cb   :  { %11487 = vmatprep.mubr.bf16.mxu1 %v21120_v47  ;;  %v11026_v43 = vpop.f32.mrf.mxu0  ;;  %v19140_v33 = vld [vmem:[#allocation2 + $0x12d4] ss:$48 sps:$4 sm:$0xff]   ;;  %v19135_v57 = vld [vmem:[#allocation2 + $0xcd0] ss:$48 sps:$4 sm:$0xff]  }
 0x4cc   :  { %v11079_v34 = vpop.f32.mrf.mxu1  ;;  %v11027_v28 = vadd.f32 %v11026_v43, %v21257_v37  ;;  %v21289_v27 = vadd.f32 %v11077_v51, %v11025_v46  ;;  %11409 = vmatpush1.bf16.msra.mxu0 %v19123_v14  ;;  %v19138_v16 = vld [vmem:[#allocation2 + $0x12d0] ss:$48 sps:$4 sm:$0xff]   ;;  %v19146_v37 = vld [vmem:[#allocation2 + $0x1274] ss:$48 sps:$4 sm:$0xff]  }
 0x4cd   :  { %11462 = vmatpush1.bf16.msra.mxu1 %v19126_v17  ;;  %11410 = vmatprep.subr.bf16.mxu0 %v19131_v54  ;;  %v19141_v43 = vld [vmem:[#allocation2 + $0xc70] ss:$48 sps:$4 sm:$0xff]   ;;  %v19149_v17 = vld [vmem:[#allocation2 + $0xc14] ss:$48 sps:$4 sm:$0xff]  }
 0x4ce   :  { %22272 = vst [vmem:[#allocation84_spill] sm:$0xff] %v21289_v27  ;;  %11463 = vmatprep.subr.bf16.mxu1 %v19134_v36  ;;  %v21291_v18 = vadd.f32 %v11079_v34, %v11027_v28  ;;  %v19144_v14 = vld [vmem:[#allocation2 + $0x1270] ss:$48 sps:$4 sm:$0xff]   ;;  %v19152_v51 = vld [vmem:[#allocation2 + $0x1214] ss:$48 sps:$4 sm:$0xff]  }
 0x4cf   :  { %v19147_v54 = vld [vmem:[#allocation2 + $0xc10] ss:$48 sps:$4 sm:$0xff]   ;;  %v19155_v46 = vld [vmem:[#allocation2 + $0x11b4] ss:$48 sps:$4 sm:$0xff]  }
 0x4d0   :  { %22273 = vst [vmem:[#allocation85_spill] sm:$0xff] %v21291_v18  ;;  %11411 = vmatpush1.bf16.msra.mxu0 %v19129_v19  ;;  %v19150_v36 = vld [vmem:[#allocation2 + $0x1210] ss:$48 sps:$4 sm:$0xff]   ;;  %v19158_v34 = vld [vmem:[#allocation2 + $0x17b4] ss:$48 sps:$4 sm:$0xff]  }
 0x4d1   :  { %11464 = vmatpush1.bf16.msra.mxu1 %v19132_v22  ;;  %11412 = vmatprep.subr.bf16.mxu0 %v19137_v50  ;;  %v19153_v28 = vld [vmem:[#allocation2 + $0x11b0] ss:$48 sps:$4 sm:$0xff]   ;;  %v19161_v22 = vld [vmem:[#allocation2 + $0x1154] ss:$48 sps:$4 sm:$0xff]  }
 0x4d2   :  { %11465 = vmatprep.subr.bf16.mxu1 %v19140_v33  ;;  %v19156_v19 = vld [vmem:[#allocation2 + $0x17b0] ss:$48 sps:$4 sm:$0xff]   ;;  %v19164_v50 = vld [vmem:[#allocation2 + $0x1754] ss:$48 sps:$4 sm:$0xff]  }
 0x4d3   :  { %v19162_v33 = vld [vmem:[#allocation2 + $0x1750] ss:$48 sps:$4 sm:$0xff]  }
 0x4d4   :  { %11413 = vmatpush1.bf16.msra.mxu0 %v19135_v57  ;;  %v19167_v57 = vld [vmem:[#allocation2 + $0x10f4] ss:$48 sps:$4 sm:$0xff]  }
 0x4d5   :  { %11466 = vmatpush1.bf16.msra.mxu1 %v19138_v16  ;;  %11414 = vmatprep.subr.bf16.mxu0 %v19143_v11  ;;  %v19159_v11 = vld [vmem:[#allocation2 + $0x1150] ss:$48 sps:$4 sm:$0xff]   ;;  %v19170_v16 = vld [vmem:[#allocation2 + $0x16f4] ss:$48 sps:$4 sm:$0xff]  }
 0x4d6   :  { %11467 = vmatprep.subr.bf16.mxu1 %v19146_v37  ;;  %v19165_v37 = vld [vmem:[#allocation2 + $0x10f0] ss:$48 sps:$4 sm:$0xff]  }
 0x4d8   :  { %11415 = vmatpush1.bf16.msra.mxu0 %v19141_v43  ;;  %v19168_v43 = vld [vmem:[#allocation2 + $0x16f0] ss:$48 sps:$4 sm:$0xff]  }
 0x4d9   :  { %11468 = vmatpush1.bf16.msra.mxu1 %v19144_v14  ;;  %11416 = vmatprep.subr.bf16.mxu0 %v19149_v17  ;;  %v19173_v14 = vld [vmem:[#allocation2 + $0x1094] ss:$48 sps:$4 sm:$0xff]  }
 0x4da   :  { %11469 = vmatprep.subr.bf16.mxu1 %v19152_v51  ;;  %v19176_v17 = vld [vmem:[#allocation2 + $0x1694] ss:$48 sps:$4 sm:$0xff]   ;;  %v19171_v51 = vld [vmem:[#allocation2 + $0x1090] ss:$48 sps:$4 sm:$0xff]  }
 0x4dc   :  { %11417 = vmatpush1.bf16.msra.mxu0 %v19147_v54  ;;  %v19174_v54 = vld [vmem:[#allocation2 + $0x1690] ss:$48 sps:$4 sm:$0xff]  }
 0x4dd   :  { %11470 = vmatpush1.bf16.msra.mxu1 %v19150_v36  ;;  %11418 = vmatprep.subr.bf16.mxu0 %v19155_v46  ;;  %v19179_v36 = vld [vmem:[#allocation2 + $0x1034] ss:$48 sps:$4 sm:$0xff]  }
 0x4de   :  { %11471 = vmatprep.subr.bf16.mxu1 %v19158_v34  ;;  %v19182_v46 = vld [vmem:[#allocation2 + $0x1634] ss:$48 sps:$4 sm:$0xff]   ;;  %v19177_v34 = vld [vmem:[#allocation2 + $0x1030] ss:$48 sps:$4 sm:$0xff]  }
 0x4e0   :  { %11419 = vmatpush2.bf16.msra.mxu0 %v19153_v28  ;;  %v19180_v28 = vld [vmem:[#allocation2 + $0x1630] ss:$48 sps:$4 sm:$0xff]  }
 0x4e1   :  { %11472 = vmatpush2.bf16.msra.mxu1 %v19156_v19  ;;  %11420 = vmatprep.subr.bf16.mxu0 %v19161_v22  ;;  %v19185_v19 = vld [vmem:[#allocation2 + $0xfd4] ss:$48 sps:$4 sm:$0xff]  }
 0x4e2   :  { %11473 = vmatprep.subr.bf16.mxu1 %v19164_v50  ;;  %v19188_v22 = vld [vmem:[#allocation2 + $0x15d4] ss:$48 sps:$4 sm:$0xff]   ;;  %v19183_v50 = vld [vmem:[#allocation2 + $0xfd0] ss:$48 sps:$4 sm:$0xff]  }
 0x4e4   :  { %11421 = vmatpush2.bf16.msra.mxu0 %v19159_v11  ;;  %v19186_v11 = vld [vmem:[#allocation2 + $0x15d0] ss:$48 sps:$4 sm:$0xff]  }
 0x4e5   :  { %11474 = vmatpush2.bf16.msra.mxu1 %v19162_v33  ;;  %11422 = vmatprep.subr.bf16.mxu0 %v19167_v57  ;;  %v19191_v33 = vld [vmem:[#allocation2 + $0xf74] ss:$48 sps:$4 sm:$0xff]  }
 0x4e6   :  { %11475 = vmatprep.subr.bf16.mxu1 %v19170_v16  ;;  %v19194_v57 = vld [vmem:[#allocation2 + $0x1574] ss:$48 sps:$4 sm:$0xff]   ;;  %v19189_v16 = vld [vmem:[#allocation2 + $0xf70] ss:$48 sps:$4 sm:$0xff]  }
 0x4e8   :  { %11423 = vmatpush2.bf16.msra.mxu0 %v19165_v37  ;;  %v19192_v37 = vld [vmem:[#allocation2 + $0x1570] ss:$48 sps:$4 sm:$0xff]  }
 0x4e9   :  { %11476 = vmatpush2.bf16.msra.mxu1 %v19168_v43  ;;  %11424 = vmatprep.subr.bf16.mxu0 %v19173_v14  ;;  %v19197_v43 = vld [vmem:[#allocation2 + $0xf14] ss:$48 sps:$4 sm:$0xff]  }
 0x4ea   :  { %11477 = vmatprep.subr.bf16.mxu1 %v19176_v17  ;;  %v19200_v14 = vld [vmem:[#allocation2 + $0x1514] ss:$48 sps:$4 sm:$0xff]   ;;  %v19195_v17 = vld [vmem:[#allocation2 + $0xf10] ss:$48 sps:$4 sm:$0xff]  }
 0x4ec   :  { %11425 = vmatpush2.bf16.msra.mxu0 %v19171_v51  ;;  %v19198_v51 = vld [vmem:[#allocation2 + $0x1510] ss:$48 sps:$4 sm:$0xff]  }
 0x4ed   :  { %11478 = vmatpush2.bf16.msra.mxu1 %v19174_v54  ;;  %11426 = vmatprep.subr.bf16.mxu0 %v19179_v36  ;;  %v19203_v54 = vld [vmem:[#allocation2 + $0x2bc] ss:$48 sps:$4 sm:$0xff]  }
 0x4ee   :  { %11479 = vmatprep.subr.bf16.mxu1 %v19182_v46  ;;  %v19206_v36 = vld [vmem:[#allocation2 + $0x8bc] ss:$48 sps:$4 sm:$0xff]   ;;  %v19201_v46 = vld [vmem:[#allocation2 + $0x2b8] ss:$48 sps:$4 sm:$0xff]  }
 0x4f0   :  { %11427 = vmatpush2.bf16.msra.mxu0 %v19177_v34  ;;  %v19204_v34 = vld [vmem:[#allocation2 + $0x8b8] ss:$48 sps:$4 sm:$0xff]  }
 0x4f1   :  { %11480 = vmatpush2.bf16.msra.mxu1 %v19180_v28  ;;  %11428 = vmatprep.subr.bf16.mxu0 %v19185_v19  ;;  %v21293_v28 = vpop.f32.mrf.mxu0  ;;  %v21295_v19 = vpop.f32.mrf.mxu1 }
 0x4f2   :  { %11481 = vmatprep.subr.bf16.mxu1 %v19188_v22  ;;  %22274 = vst [vmem:[#allocation86_spill] sm:$0xff] %v21293_v28  ;;  %22275 = vst [vmem:[#allocation87_spill] sm:$0xff] %v21295_v19  ;;  %v19209_v22 = vld [vmem:[#allocation2 + $0x25c] ss:$48 sps:$4 sm:$0xff]  }
 0x4f4   :  { %11429 = vmatpush2.bf16.msra.mxu0 %v19183_v50  ;;  %v19212_v50 = vld [vmem:[#allocation2 + $0x85c] ss:$48 sps:$4 sm:$0xff]  }
 0x4f5   :  { %11482 = vmatpush2.bf16.msra.mxu1 %v19186_v11  ;;  %11430 = vmatprep.subr.bf16.mxu0 %v19191_v33 }
 0x4f6   :  { %11483 = vmatprep.subr.bf16.mxu1 %v19194_v57 }
 0x4f8   :  { %11431 = vmatpush2.bf16.msra.mxu0 %v19189_v16  ;;  %v19207_v16 = vld [vmem:[#allocation2 + $0x258] ss:$48 sps:$4 sm:$0xff]  }
 0x4f9   :  { %11484 = vmatpush2.bf16.msra.mxu1 %v19192_v37  ;;  %11432 = vmatprep.subr.bf16.mxu0 %v19197_v43  ;;  %v19210_v37 = vld [vmem:[#allocation2 + $0x858] ss:$48 sps:$4 sm:$0xff]  }
 0x4fa   :  { %11485 = vmatprep.subr.bf16.mxu1 %v19200_v14 }
 0x4fc   :  { %11433 = vmatpush2.bf16.msra.mxu0 %v19195_v17  ;;  %v19215_v17 = vld [vmem:[#allocation2 + $0x1fc] ss:$48 sps:$4 sm:$0xff]  }
 0x4fd   :  { %11486 = vmatpush2.bf16.msra.mxu1 %v19198_v51  ;;  %11508 = vmatprep.subr.bf16.mxu0 %v19203_v54  ;;  %v19218_v51 = vld [vmem:[#allocation2 + $0x7fc] ss:$48 sps:$4 sm:$0xff]  }
 0x4fe   :  { %11561 = vmatprep.subr.bf16.mxu1 %v19206_v36 }
 0x4ff   :  { %v11118_v11 = vpop.f32.mrf.mxu0  ;;  %11435 = vmatmul.mubr.bf16.vlgmr.msra.gmra.mxu0 %v21149_v59 }
 0x500   :  { %v11171_v33 = vpop.f32.mrf.mxu1  ;;  %11488 = vmatmul.mubr.bf16.vlgmr.msra.gmra.mxu1 %v21153_v48  ;;  %v11119_v57 = vadd.f32 %v11118_v11, %v20838_v62  ;;  %11509 = vmatpush1.bf16.msra.mxu0 %v19201_v46 }
 0x501   :  { %11562 = vmatpush1.bf16.msra.mxu1 %v19204_v34  ;;  %v11120_v43 = vpop.f32.mrf.mxu0  ;;  %11510 = vmatprep.subr.bf16.mxu0 %v19209_v22  ;;  %v19213_v22 = vld [vmem:[#allocation2 + $0x1f8] ss:$48 sps:$4 sm:$0xff]  }
 0x502   :  { %v11173_v14 = vpop.f32.mrf.mxu1  ;;  %11563 = vmatprep.subr.bf16.mxu1 %v19212_v50  ;;  %v21300_v54 = vadd.f32 %v11171_v33, %v11119_v57  ;;  %v11121_v36 = vadd.f32 %v11120_v43, %v20843_v10  ;;  %11444 = vmatprep.mubr.bf16.mxu0 %v21159_v52  ;;  %v19216_v50 = vld [vmem:[#allocation2 + $0x7f8] ss:$48 sps:$4 sm:$0xff]   ;;  %v19221_v10 = vld [vmem:[#allocation2 + $0x19c] ss:$48 sps:$4 sm:$0xff]  }
 0x503   :  { %11497 = vmatprep.mubr.bf16.mxu1 %v21161_v35  ;;  %v11122_v27 = vpop.f32.mrf.mxu0  ;;  %v19224_v57 = vld [vmem:[#allocation2 + $0x79c] ss:$48 sps:$4 sm:$0xff]  }
 0x504   :  { %v11175_v62 = vpop.f32.mrf.mxu1  ;;  %v21305_v46 = vadd.f32 %v11173_v14, %v11121_v36  ;;  %v11123_v34 = vadd.f32 %v11122_v27, %v20850_v20  ;;  %11511 = vmatpush1.bf16.msra.mxu0 %v19207_v16  ;;  %v19219_v27 = vld [vmem:[#allocation2 + $0x198] ss:$48 sps:$4 sm:$0xff]  }
 0x505   :  { %11564 = vmatpush1.bf16.msra.mxu1 %v19210_v37  ;;  %v21308_v11 = vpop.f32.mrf.mxu0  ;;  %11512 = vmatprep.subr.bf16.mxu0 %v19215_v17  ;;  %v19222_v16 = vld [vmem:[#allocation2 + $0x798] ss:$48 sps:$4 sm:$0xff]   ;;  %v19227_v17 = vld [vmem:[#allocation2 + $0x13c] ss:$48 sps:$4 sm:$0xff]  }
 0x506   :  { %v21310_v33 = vpop.f32.mrf.mxu1  ;;  %11565 = vmatprep.subr.bf16.mxu1 %v19218_v51  ;;  %v21312_v43 = vadd.f32 %v11175_v62, %v11123_v34  ;;  %v19230_v51 = vld [vmem:[#allocation2 + $0x73c] ss:$48 sps:$4 sm:$0xff]  }
 0x507   :  { %22276 = vst [vmem:[#allocation88_spill] sm:$0xff] %v21310_v33  ;;  %v11128_v19 = vpop.f32.mrf.mxu0  ;;  %11445 = vmatmul.mubr.bf16.gmra.mxu0 %v21171_v55  ;;  %v19239_v33 = vld [vmem:[#allocation2 + $0x7c] ss:$48 sps:$4 sm:$0xff]  }
 0x508   :  { %v11181_v14 = vpop.f32.mrf.mxu1  ;;  %11498 = vmatmul.mubr.bf16.gmra.mxu1 %v21173_v13  ;;  %v11129_v20 = vadd.f32 %v11128_v19, %v20856_v56  ;;  %11513 = vmatpush1.bf16.msra.mxu0 %v19213_v22 }
 0x509   :  { %11566 = vmatpush1.bf16.msra.mxu1 %v19216_v50  ;;  %v11130_v37 = vpop.f32.mrf.mxu0  ;;  %11514 = vmatprep.subr.bf16.mxu0 %v19221_v10  ;;  %v19225_v50 = vld [vmem:[#allocation2 + $0x138] ss:$48 sps:$4 sm:$0xff]  }
 0x50a   :  { %v11183_v36 = vpop.f32.mrf.mxu1  ;;  %11567 = vmatprep.subr.bf16.mxu1 %v19224_v57  ;;  %v11131_v62 = vadd.f32 %v11130_v37, %v20861_v0  ;;  %v21318_v34 = vadd.f32 %v11181_v14, %v11129_v20  ;;  %11540 = vmatprep.mubr.bf16.mxu0 %v21029_v30  ;;  %v19228_v10 = vld [vmem:[#allocation2 + $0x738] ss:$48 sps:$4 sm:$0xff]   ;;  %v19233_v57 = vld [vmem:[#allocation2 + $0xdc] ss:$48 sps:$4 sm:$0xff]  }
 0x50b   :  { %11593 = vmatprep.mubr.bf16.mxu1 %v21033_v45  ;;  %v11132_v53 = vpop.f32.mrf.mxu0  ;;  %v19236_v0 = vld [vmem:[#allocation2 + $0x6dc] ss:$48 sps:$4 sm:$0xff]   ;;  %v19231_v20 = vld [vmem:[#allocation2 + $0xd8] ss:$48 sps:$4 sm:$0xff]  }
 0x50c   :  { %v11185_v56 = vpop.f32.mrf.mxu1  ;;  %v11133_v19 = vadd.f32 %v11132_v53, %v20863_v1  ;;  %v21323_v22 = vadd.f32 %v11183_v36, %v11131_v62  ;;  %11515 = vmatpush1.bf16.msra.mxu0 %v19219_v27  ;;  %v19234_v37 = vld [vmem:[#allocation2 + $0x6d8] ss:$48 sps:$4 sm:$0xff]   ;;  %v19242_v1 = vld [vmem:[#allocation2 + $0x67c] ss:$48 sps:$4 sm:$0xff]  }
 0x50d   :  { %11568 = vmatpush1.bf16.msra.mxu1 %v19222_v16  ;;  %11516 = vmatprep.subr.bf16.mxu0 %v19227_v17  ;;  %v19237_v53 = vld [vmem:[#allocation2 + $0x78] ss:$48 sps:$4 sm:$0xff]   ;;  %v19245_v16 = vld [vmem:[#allocation2 + $0x1c] ss:$48 sps:$4 sm:$0xff]  }
 0x50e   :  { %11569 = vmatprep.subr.bf16.mxu1 %v19230_v51  ;;  %v21325_v14 = vadd.f32 %v11185_v56, %v11133_v19  ;;  %v19240_v27 = vld [vmem:[#allocation2 + $0x678] ss:$48 sps:$4 sm:$0xff]   ;;  %v19248_v36 = vld [vmem:[#allocation2 + $0x61c] ss:$48 sps:$4 sm:$0xff]  }
 0x50f   :  { %v19243_v17 = vld [vmem:[#allocation2 + $0x18] ss:$48 sps:$4 sm:$0xff]   ;;  %v19251_v62 = vld [vmem:[#allocation2 + $0x5bc] ss:$48 sps:$4 sm:$0xff]  }
 0x510   :  { %11517 = vmatpush1.bf16.msra.mxu0 %v19225_v50  ;;  %v19246_v51 = vld [vmem:[#allocation2 + $0x618] ss:$48 sps:$4 sm:$0xff]   ;;  %v19254_v56 = vld [vmem:[#allocation2 + $0xbbc] ss:$48 sps:$4 sm:$0xff]  }
 0x511   :  { %11570 = vmatpush1.bf16.msra.mxu1 %v19228_v10  ;;  %11518 = vmatprep.subr.bf16.mxu0 %v19233_v57  ;;  %v19249_v19 = vld [vmem:[#allocation2 + $0x5b8] ss:$48 sps:$4 sm:$0xff]   ;;  %v19257_v10 = vld [vmem:[#allocation2 + $0x55c] ss:$48 sps:$4 sm:$0xff]  }
 0x512   :  { %11571 = vmatprep.subr.bf16.mxu1 %v19236_v0  ;;  %v19252_v50 = vld [vmem:[#allocation2 + $0xbb8] ss:$48 sps:$4 sm:$0xff]   ;;  %v19260_v57 = vld [vmem:[#allocation2 + $0xb5c] ss:$48 sps:$4 sm:$0xff]  }
 0x513   :  { %v19258_v0 = vld [vmem:[#allocation2 + $0xb58] ss:$48 sps:$4 sm:$0xff]  }
 0x514   :  { %11519 = vmatpush1.bf16.msra.mxu0 %v19231_v20  ;;  %v19263_v20 = vld [vmem:[#allocation2 + $0x4fc] ss:$48 sps:$4 sm:$0xff]  }
 0x515   :  { %11572 = vmatpush1.bf16.msra.mxu1 %v19234_v37  ;;  %11520 = vmatprep.subr.bf16.mxu0 %v19239_v33  ;;  %v19255_v33 = vld [vmem:[#allocation2 + $0x558] ss:$48 sps:$4 sm:$0xff]   ;;  %v19266_v37 = vld [vmem:[#allocation2 + $0xafc] ss:$48 sps:$4 sm:$0xff]  }
 0x516   :  { %11573 = vmatprep.subr.bf16.mxu1 %v19242_v1  ;;  %v19261_v1 = vld [vmem:[#allocation2 + $0x4f8] ss:$48 sps:$4 sm:$0xff]  }
 0x518   :  { %11521 = vmatpush1.bf16.msra.mxu0 %v19237_v53  ;;  %v19264_v53 = vld [vmem:[#allocation2 + $0xaf8] ss:$48 sps:$4 sm:$0xff]  }
 0x519   :  { %11574 = vmatpush1.bf16.msra.mxu1 %v19240_v27  ;;  %11522 = vmatprep.subr.bf16.mxu0 %v19245_v16  ;;  %v19269_v27 = vld [vmem:[#allocation2 + $0x49c] ss:$48 sps:$4 sm:$0xff]  }
 0x51a   :  { %11575 = vmatprep.subr.bf16.mxu1 %v19248_v36  ;;  %v19272_v16 = vld [vmem:[#allocation2 + $0xa9c] ss:$48 sps:$4 sm:$0xff]   ;;  %v19267_v36 = vld [vmem:[#allocation2 + $0x498] ss:$48 sps:$4 sm:$0xff]  }
 0x51c   :  { %11523 = vmatpush1.bf16.msra.mxu0 %v19243_v17  ;;  %v19270_v17 = vld [vmem:[#allocation2 + $0xa98] ss:$48 sps:$4 sm:$0xff]  }
 0x51d   :  { %11576 = vmatpush1.bf16.msra.mxu1 %v19246_v51  ;;  %11524 = vmatprep.subr.bf16.mxu0 %v19251_v62  ;;  %v19275_v51 = vld [vmem:[#allocation2 + $0x43c] ss:$48 sps:$4 sm:$0xff]  }
 0x51e   :  { %11577 = vmatprep.subr.bf16.mxu1 %v19254_v56  ;;  %v19278_v62 = vld [vmem:[#allocation2 + $0xa3c] ss:$48 sps:$4 sm:$0xff]   ;;  %v19273_v56 = vld [vmem:[#allocation2 + $0x438] ss:$48 sps:$4 sm:$0xff]  }
 0x520   :  { %11525 = vmatpush2.bf16.msra.mxu0 %v19249_v19  ;;  %v19276_v19 = vld [vmem:[#allocation2 + $0xa38] ss:$48 sps:$4 sm:$0xff]  }
 0x521   :  { %11578 = vmatpush2.bf16.msra.mxu1 %v19252_v50  ;;  %11526 = vmatprep.subr.bf16.mxu0 %v19257_v10  ;;  %v19281_v50 = vld [vmem:[#allocation2 + $0x3dc] ss:$48 sps:$4 sm:$0xff]  }
 0x522   :  { %11579 = vmatprep.subr.bf16.mxu1 %v19260_v57  ;;  %v19284_v10 = vld [vmem:[#allocation2 + $0x9dc] ss:$48 sps:$4 sm:$0xff]   ;;  %v19279_v57 = vld [vmem:[#allocation2 + $0x3d8] ss:$48 sps:$4 sm:$0xff]  }
 0x524   :  { %11527 = vmatpush2.bf16.msra.mxu0 %v19255_v33  ;;  %v19282_v33 = vld [vmem:[#allocation2 + $0x9d8] ss:$48 sps:$4 sm:$0xff]  }
 0x525   :  { %11580 = vmatpush2.bf16.msra.mxu1 %v19258_v0  ;;  %11528 = vmatprep.subr.bf16.mxu0 %v19263_v20  ;;  %v19287_v0 = vld [vmem:[#allocation2 + $0x37c] ss:$48 sps:$4 sm:$0xff]  }
 0x526   :  { %11581 = vmatprep.subr.bf16.mxu1 %v19266_v37  ;;  %v19290_v20 = vld [vmem:[#allocation2 + $0x97c] ss:$48 sps:$4 sm:$0xff]   ;;  %v19285_v37 = vld [vmem:[#allocation2 + $0x378] ss:$48 sps:$4 sm:$0xff]  }
 0x528   :  { %11529 = vmatpush2.bf16.msra.mxu0 %v19261_v1  ;;  %v19288_v1 = vld [vmem:[#allocation2 + $0x978] ss:$48 sps:$4 sm:$0xff]  }
 0x529   :  { %11582 = vmatpush2.bf16.msra.mxu1 %v19264_v53  ;;  %11530 = vmatprep.subr.bf16.mxu0 %v19269_v27  ;;  %v19293_v53 = vld [vmem:[#allocation2 + $0x31c] ss:$48 sps:$4 sm:$0xff]  }
 0x52a   :  { %11583 = vmatprep.subr.bf16.mxu1 %v19272_v16  ;;  %v19296_v27 = vld [vmem:[#allocation2 + $0x91c] ss:$48 sps:$4 sm:$0xff]   ;;  %v19291_v16 = vld [vmem:[#allocation2 + $0x318] ss:$48 sps:$4 sm:$0xff]  }
 0x52c   :  { %11531 = vmatpush2.bf16.msra.mxu0 %v19267_v36  ;;  %v19294_v36 = vld [vmem:[#allocation2 + $0x918] ss:$48 sps:$4 sm:$0xff]  }
 0x52d   :  { %11584 = vmatpush2.bf16.msra.mxu1 %v19270_v17  ;;  %11532 = vmatprep.subr.bf16.mxu0 %v19275_v51  ;;  %v19299_v17 = vld [vmem:[#allocation2 + $0xebc] ss:$48 sps:$4 sm:$0xff]  }
 0x52e   :  { %11585 = vmatprep.subr.bf16.mxu1 %v19278_v62  ;;  %v19302_v51 = vld [vmem:[#allocation2 + $0x14bc] ss:$48 sps:$4 sm:$0xff]   ;;  %v19297_v62 = vld [vmem:[#allocation2 + $0xeb8] ss:$48 sps:$4 sm:$0xff]  }
 0x530   :  { %11533 = vmatpush2.bf16.msra.mxu0 %v19273_v56  ;;  %v19300_v56 = vld [vmem:[#allocation2 + $0x14b8] ss:$48 sps:$4 sm:$0xff]  }
 0x531   :  { %11586 = vmatpush2.bf16.msra.mxu1 %v19276_v19  ;;  %11534 = vmatprep.subr.bf16.mxu0 %v19281_v50  ;;  %v21327_v19 = vpop.f32.mrf.mxu0  ;;  %v21329_v50 = vpop.f32.mrf.mxu1 }
 0x532   :  { %11587 = vmatprep.subr.bf16.mxu1 %v19284_v10  ;;  %v19305_v10 = vld [vmem:[#allocation2 + $0xe5c] ss:$48 sps:$4 sm:$0xff]  }
 0x534   :  { %11535 = vmatpush2.bf16.msra.mxu0 %v19279_v57  ;;  %v19308_v57 = vld [vmem:[#allocation2 + $0x145c] ss:$48 sps:$4 sm:$0xff]  }
 0x535   :  { %11588 = vmatpush2.bf16.msra.mxu1 %v19282_v33  ;;  %11536 = vmatprep.subr.bf16.mxu0 %v19287_v0 }
 0x536   :  { %11589 = vmatprep.subr.bf16.mxu1 %v19290_v20 }
 0x538   :  { %11537 = vmatpush2.bf16.msra.mxu0 %v19285_v37  ;;  %v19303_v37 = vld [vmem:[#allocation2 + $0xe58] ss:$48 sps:$4 sm:$0xff]  }
 0x539   :  { %11590 = vmatpush2.bf16.msra.mxu1 %v19288_v1  ;;  %11538 = vmatprep.subr.bf16.mxu0 %v19293_v53  ;;  %v19306_v1 = vld [vmem:[#allocation2 + $0x1458] ss:$48 sps:$4 sm:$0xff]  }
 0x53a   :  { %11591 = vmatprep.subr.bf16.mxu1 %v19296_v27 }
 0x53c   :  { %11539 = vmatpush2.bf16.msra.mxu0 %v19291_v16  ;;  %v19311_v16 = vld [vmem:[#allocation2 + $0xdfc] ss:$48 sps:$4 sm:$0xff]  }
 0x53d   :  { %11592 = vmatpush2.bf16.msra.mxu1 %v19294_v36  ;;  %11614 = vmatprep.subr.bf16.mxu0 %v19299_v17  ;;  %v19314_v36 = vld [vmem:[#allocation2 + $0x13fc] ss:$48 sps:$4 sm:$0xff]  }
 0x53e   :  { %11667 = vmatprep.subr.bf16.mxu1 %v19302_v51 }
 0x53f   :  { %v11224_v33 = vpop.f32.mrf.mxu0  ;;  %11541 = vmatmul.mubr.bf16.vlgmr.msra.gmra.mxu0 %v21059_v26 }
 0x540   :  { %v11277_v0 = vpop.f32.mrf.mxu1  ;;  %11594 = vmatmul.mubr.bf16.vlgmr.msra.gmra.mxu1 %v21063_v60  ;;  %v11225_v20 = vadd.f32 %v11224_v33, %v21300_v54  ;;  %11615 = vmatpush1.bf16.msra.mxu0 %v19297_v62 }
 0x541   :  { %11668 = vmatpush1.bf16.msra.mxu1 %v19300_v56  ;;  %v11226_v53 = vpop.f32.mrf.mxu0  ;;  %11616 = vmatprep.subr.bf16.mxu0 %v19305_v10  ;;  %v19309_v10 = vld [vmem:[#allocation2 + $0xdf8] ss:$48 sps:$4 sm:$0xff]  }
 0x542   :  { %v11279_v27 = vpop.f32.mrf.mxu1  ;;  %11669 = vmatprep.subr.bf16.mxu1 %v19308_v57  ;;  %v21334_v17 = vadd.f32 %v11277_v0, %v11225_v20  ;;  %v11227_v51 = vadd.f32 %v11226_v53, %v21305_v46  ;;  %11550 = vmatprep.mubr.bf16.mxu0 %v21069_v5  ;;  %v19312_v57 = vld [vmem:[#allocation2 + $0x13f8] ss:$48 sps:$4 sm:$0xff]   ;;  %v19317_v46 = vld [vmem:[#allocation2 + $0xd9c] ss:$48 sps:$4 sm:$0xff]  }
 0x543   :  { %11603 = vmatprep.mubr.bf16.mxu1 %v21071_v32  ;;  %v11228_v18 = vpop.f32.mrf.mxu0  ;;  %v19320_v20 = vld [vmem:[#allocation2 + $0x139c] ss:$48 sps:$4 sm:$0xff]  }
 0x544   :  { %v11281_v54 = vpop.f32.mrf.mxu1  ;;  %v21339_v62 = vadd.f32 %v11279_v27, %v11227_v51  ;;  %v11229_v56 = vadd.f32 %v11228_v18, %v21312_v43  ;;  %11617 = vmatpush1.bf16.msra.mxu0 %v19303_v37  ;;  %v19315_v43 = vld [vmem:[#allocation2 + $0xd98] ss:$48 sps:$4 sm:$0xff]  }
 0x545   :  { %11670 = vmatpush1.bf16.msra.mxu1 %v19306_v1  ;;  %v21342_v33 = vpop.f32.mrf.mxu0  ;;  %11618 = vmatprep.subr.bf16.mxu0 %v19311_v16  ;;  %v19318_v37 = vld [vmem:[#allocation2 + $0x1398] ss:$48 sps:$4 sm:$0xff]   ;;  %v19323_v16 = vld [vmem:[#allocation2 + $0xd3c] ss:$48 sps:$4 sm:$0xff]  }
 0x546   :  { %22277 = vst [vmem:[#allocation89_spill] sm:$0xff] %v21339_v62  ;;  %22278 = vst [vmem:[#allocation90_spill] sm:$0xff] %v21342_v33  ;;  %v21344_v0 = vpop.f32.mrf.mxu1  ;;  %11671 = vmatprep.subr.bf16.mxu1 %v19314_v36  ;;  %v21346_v53 = vadd.f32 %v11281_v54, %v11229_v56  ;;  %v19326_v36 = vld [vmem:[#allocation2 + $0x133c] ss:$48 sps:$4 sm:$0xff]  }
 0x547   :  { %22279 = vst [vmem:[#allocation91_spill] sm:$0xff] %v21344_v0  ;;  %v11234_v28 = vpop.f32.mrf.mxu0  ;;  %11551 = vmatmul.mubr.bf16.gmra.mxu0 %v21101_v49  ;;  %v19335_v0 = vld [vmem:[#allocation2 + $0xc7c] ss:$48 sps:$4 sm:$0xff]  }
 0x548   :  { %v11287_v27 = vpop.f32.mrf.mxu1  ;;  %11604 = vmatmul.mubr.bf16.gmra.mxu1 %v21103_v8  ;;  %v11235_v18 = vadd.f32 %v11234_v28, %v21318_v34  ;;  %11619 = vmatpush1.bf16.msra.mxu0 %v19309_v10 }
 0x549   :  { %11672 = vmatpush1.bf16.msra.mxu1 %v19312_v57  ;;  %v11236_v1 = vpop.f32.mrf.mxu0  ;;  %11620 = vmatprep.subr.bf16.mxu0 %v19317_v46  ;;  %v19321_v57 = vld [vmem:[#allocation2 + $0xd38] ss:$48 sps:$4 sm:$0xff]  }
 0x54a   :  { %v11289_v51 = vpop.f32.mrf.mxu1  ;;  %11673 = vmatprep.subr.bf16.mxu1 %v19320_v20  ;;  %v11237_v54 = vadd.f32 %v11236_v1, %v21323_v22  ;;  %v21352_v56 = vadd.f32 %v11287_v27, %v11235_v18  ;;  %11646 = vmatprep.mubr.bf16.mxu0 %v21116_v25  ;;  %v19324_v46 = vld [vmem:[#allocation2 + $0x1338] ss:$48 sps:$4 sm:$0xff]   ;;  %v19329_v20 = vld [vmem:[#allocation2 + $0xcdc] ss:$48 sps:$4 sm:$0xff]  }
 0x54b   :  { %11699 = vmatprep.mubr.bf16.mxu1 %v21120_v47  ;;  %v11238_v62 = vpop.f32.mrf.mxu0  ;;  %v19332_v22 = vld [vmem:[#allocation2 + $0x12dc] ss:$48 sps:$4 sm:$0xff]   ;;  %v19327_v18 = vld [vmem:[#allocation2 + $0xcd8] ss:$48 sps:$4 sm:$0xff]  }
 0x54c   :  { %v11291_v28 = vpop.f32.mrf.mxu1  ;;  %v11239_v34 = vadd.f32 %v11238_v62, %v21325_v14  ;;  %v21357_v10 = vadd.f32 %v11289_v51, %v11237_v54  ;;  %11621 = vmatpush1.bf16.msra.mxu0 %v19315_v43  ;;  %v19330_v1 = vld [vmem:[#allocation2 + $0x12d8] ss:$48 sps:$4 sm:$0xff]   ;;  %v19338_v14 = vld [vmem:[#allocation2 + $0x127c] ss:$48 sps:$4 sm:$0xff]  }
 0x54d   :  { %11674 = vmatpush1.bf16.msra.mxu1 %v19318_v37  ;;  %11622 = vmatprep.subr.bf16.mxu0 %v19323_v16  ;;  %v19333_v62 = vld [vmem:[#allocation2 + $0xc78] ss:$48 sps:$4 sm:$0xff]   ;;  %v19341_v37 = vld [vmem:[#allocation2 + $0xc1c] ss:$48 sps:$4 sm:$0xff]  }
 0x54e   :  { %22280 = vst [vmem:[#allocation92_spill] sm:$0xff] %v21357_v10  ;;  %11675 = vmatprep.subr.bf16.mxu1 %v19326_v36  ;;  %v21359_v27 = vadd.f32 %v11291_v28, %v11239_v34  ;;  %v19336_v43 = vld [vmem:[#allocation2 + $0x1278] ss:$48 sps:$4 sm:$0xff]   ;;  %v19344_v51 = vld [vmem:[#allocation2 + $0x121c] ss:$48 sps:$4 sm:$0xff]  }
 0x54f   :  { %v19339_v16 = vld [vmem:[#allocation2 + $0xc18] ss:$48 sps:$4 sm:$0xff]   ;;  %v19347_v54 = vld [vmem:[#allocation2 + $0x11bc] ss:$48 sps:$4 sm:$0xff]  }
 0x550   :  { %22281 = vst [vmem:[#allocation93_spill] sm:$0xff] %v21359_v27  ;;  %11623 = vmatpush1.bf16.msra.mxu0 %v19321_v57  ;;  %v19342_v36 = vld [vmem:[#allocation2 + $0x1218] ss:$48 sps:$4 sm:$0xff]   ;;  %v19350_v28 = vld [vmem:[#allocation2 + $0x17bc] ss:$48 sps:$4 sm:$0xff]  }
 0x551   :  { %11676 = vmatpush1.bf16.msra.mxu1 %v19324_v46  ;;  %11624 = vmatprep.subr.bf16.mxu0 %v19329_v20  ;;  %v19345_v34 = vld [vmem:[#allocation2 + $0x11b8] ss:$48 sps:$4 sm:$0xff]   ;;  %v19353_v46 = vld [vmem:[#allocation2 + $0x115c] ss:$48 sps:$4 sm:$0xff]  }
 0x552   :  { %11677 = vmatprep.subr.bf16.mxu1 %v19332_v22  ;;  %v19348_v57 = vld [vmem:[#allocation2 + $0x17b8] ss:$48 sps:$4 sm:$0xff]   ;;  %v19356_v20 = vld [vmem:[#allocation2 + $0x175c] ss:$48 sps:$4 sm:$0xff]  }
 0x553   :  { %v19354_v22 = vld [vmem:[#allocation2 + $0x1758] ss:$48 sps:$4 sm:$0xff]  }
 0x554   :  { %11625 = vmatpush1.bf16.msra.mxu0 %v19327_v18  ;;  %v19359_v18 = vld [vmem:[#allocation2 + $0x10fc] ss:$48 sps:$4 sm:$0xff]  }
 0x555   :  { %11678 = vmatpush1.bf16.msra.mxu1 %v19330_v1  ;;  %11626 = vmatprep.subr.bf16.mxu0 %v19335_v0  ;;  %v19351_v0 = vld [vmem:[#allocation2 + $0x1158] ss:$48 sps:$4 sm:$0xff]   ;;  %v19362_v1 = vld [vmem:[#allocation2 + $0x16fc] ss:$48 sps:$4 sm:$0xff]  }
 0x556   :  { %11679 = vmatprep.subr.bf16.mxu1 %v19338_v14  ;;  %v19357_v14 = vld [vmem:[#allocation2 + $0x10f8] ss:$48 sps:$4 sm:$0xff]  }
 0x558   :  { %11627 = vmatpush1.bf16.msra.mxu0 %v19333_v62  ;;  %v19360_v62 = vld [vmem:[#allocation2 + $0x16f8] ss:$48 sps:$4 sm:$0xff]  }
 0x559   :  { %11680 = vmatpush1.bf16.msra.mxu1 %v19336_v43  ;;  %11628 = vmatprep.subr.bf16.mxu0 %v19341_v37  ;;  %v19365_v43 = vld [vmem:[#allocation2 + $0x109c] ss:$48 sps:$4 sm:$0xff]  }
 0x55a   :  { %11681 = vmatprep.subr.bf16.mxu1 %v19344_v51  ;;  %v19368_v37 = vld [vmem:[#allocation2 + $0x169c] ss:$48 sps:$4 sm:$0xff]   ;;  %v19363_v51 = vld [vmem:[#allocation2 + $0x1098] ss:$48 sps:$4 sm:$0xff]  }
 0x55c   :  { %11629 = vmatpush1.bf16.msra.mxu0 %v19339_v16  ;;  %v19366_v16 = vld [vmem:[#allocation2 + $0x1698] ss:$48 sps:$4 sm:$0xff]  }
 0x55d   :  { %11682 = vmatpush1.bf16.msra.mxu1 %v19342_v36  ;;  %11630 = vmatprep.subr.bf16.mxu0 %v19347_v54  ;;  %v19371_v36 = vld [vmem:[#allocation2 + $0x103c] ss:$48 sps:$4 sm:$0xff]  }
 0x55e   :  { %11683 = vmatprep.subr.bf16.mxu1 %v19350_v28  ;;  %v19374_v54 = vld [vmem:[#allocation2 + $0x163c] ss:$48 sps:$4 sm:$0xff]   ;;  %v19369_v28 = vld [vmem:[#allocation2 + $0x1038] ss:$48 sps:$4 sm:$0xff]  }
 0x560   :  { %11631 = vmatpush2.bf16.msra.mxu0 %v19345_v34  ;;  %v19372_v34 = vld [vmem:[#allocation2 + $0x1638] ss:$48 sps:$4 sm:$0xff]  }
 0x561   :  { %11684 = vmatpush2.bf16.msra.mxu1 %v19348_v57  ;;  %11632 = vmatprep.subr.bf16.mxu0 %v19353_v46  ;;  %v19377_v57 = vld [vmem:[#allocation2 + $0xfdc] ss:$48 sps:$4 sm:$0xff]  }
 0x562   :  { %11685 = vmatprep.subr.bf16.mxu1 %v19356_v20  ;;  %v19380_v46 = vld [vmem:[#allocation2 + $0x15dc] ss:$48 sps:$4 sm:$0xff]   ;;  %v19375_v20 = vld [vmem:[#allocation2 + $0xfd8] ss:$48 sps:$4 sm:$0xff]  }
 0x564   :  { %11633 = vmatpush2.bf16.msra.mxu0 %v19351_v0  ;;  %v19378_v0 = vld [vmem:[#allocation2 + $0x15d8] ss:$48 sps:$4 sm:$0xff]  }
 0x565   :  { %11686 = vmatpush2.bf16.msra.mxu1 %v19354_v22  ;;  %11634 = vmatprep.subr.bf16.mxu0 %v19359_v18  ;;  %v19383_v22 = vld [vmem:[#allocation2 + $0xf7c] ss:$48 sps:$4 sm:$0xff]  }
 0x566   :  { %11687 = vmatprep.subr.bf16.mxu1 %v19362_v1  ;;  %v19386_v18 = vld [vmem:[#allocation2 + $0x157c] ss:$48 sps:$4 sm:$0xff]   ;;  %v19381_v1 = vld [vmem:[#allocation2 + $0xf78] ss:$48 sps:$4 sm:$0xff]  }
 0x568   :  { %11635 = vmatpush2.bf16.msra.mxu0 %v19357_v14  ;;  %v19384_v14 = vld [vmem:[#allocation2 + $0x1578] ss:$48 sps:$4 sm:$0xff]  }
 0x569   :  { %11688 = vmatpush2.bf16.msra.mxu1 %v19360_v62  ;;  %11636 = vmatprep.subr.bf16.mxu0 %v19365_v43  ;;  %v19389_v62 = vld [vmem:[#allocation2 + $0xf1c] ss:$48 sps:$4 sm:$0xff]  }
 0x56a   :  { %11689 = vmatprep.subr.bf16.mxu1 %v19368_v37  ;;  %v19392_v43 = vld [vmem:[#allocation2 + $0x151c] ss:$48 sps:$4 sm:$0xff]   ;;  %v19387_v37 = vld [vmem:[#allocation2 + $0xf18] ss:$48 sps:$4 sm:$0xff]  }
 0x56c   :  { %11637 = vmatpush2.bf16.msra.mxu0 %v19363_v51  ;;  %v19390_v51 = vld [vmem:[#allocation2 + $0x1518] ss:$48 sps:$4 sm:$0xff]  }
 0x56d   :  { %11690 = vmatpush2.bf16.msra.mxu1 %v19366_v16  ;;  %11638 = vmatprep.subr.bf16.mxu0 %v19371_v36  ;;  %v19395_v16 = vld [vmem:[#allocation2 + $0x2c4] ss:$48 sps:$4 sm:$0xff]  }
 0x56e   :  { %11691 = vmatprep.subr.bf16.mxu1 %v19374_v54  ;;  %v19398_v36 = vld [vmem:[#allocation2 + $0x8c4] ss:$48 sps:$4 sm:$0xff]   ;;  %v19393_v54 = vld [vmem:[#allocation2 + $0x2c0] ss:$48 sps:$4 sm:$0xff]  }
 0x570   :  { %11639 = vmatpush2.bf16.msra.mxu0 %v19369_v28  ;;  %v19396_v28 = vld [vmem:[#allocation2 + $0x8c0] ss:$48 sps:$4 sm:$0xff]  }
 0x571   :  { %11692 = vmatpush2.bf16.msra.mxu1 %v19372_v34  ;;  %11640 = vmatprep.subr.bf16.mxu0 %v19377_v57  ;;  %v21361_v34 = vpop.f32.mrf.mxu0  ;;  %v21363_v57 = vpop.f32.mrf.mxu1 }
 0x572   :  { %11693 = vmatprep.subr.bf16.mxu1 %v19380_v46  ;;  %22282 = vst [vmem:[#allocation94_spill] sm:$0xff] %v21363_v57  ;;  %v19401_v46 = vld [vmem:[#allocation2 + $0x264] ss:$48 sps:$4 sm:$0xff]  }
 0x574   :  { %11641 = vmatpush2.bf16.msra.mxu0 %v19375_v20  ;;  %v19404_v20 = vld [vmem:[#allocation2 + $0x864] ss:$48 sps:$4 sm:$0xff]  }
 0x575   :  { %11694 = vmatpush2.bf16.msra.mxu1 %v19378_v0  ;;  %11642 = vmatprep.subr.bf16.mxu0 %v19383_v22 }
 0x576   :  { %11695 = vmatprep.subr.bf16.mxu1 %v19386_v18 }
 0x578   :  { %11643 = vmatpush2.bf16.msra.mxu0 %v19381_v1  ;;  %v19399_v1 = vld [vmem:[#allocation2 + $0x260] ss:$48 sps:$4 sm:$0xff]  }
 0x579   :  { %11696 = vmatpush2.bf16.msra.mxu1 %v19384_v14  ;;  %11644 = vmatprep.subr.bf16.mxu0 %v19389_v62  ;;  %v19402_v14 = vld [vmem:[#allocation2 + $0x860] ss:$48 sps:$4 sm:$0xff]  }
 0x57a   :  { %11697 = vmatprep.subr.bf16.mxu1 %v19392_v43 }
 0x57c   :  { %11645 = vmatpush2.bf16.msra.mxu0 %v19387_v37  ;;  %v19407_v37 = vld [vmem:[#allocation2 + $0x204] ss:$48 sps:$4 sm:$0xff]  }
 0x57d   :  { %11698 = vmatpush2.bf16.msra.mxu1 %v19390_v51  ;;  %11720 = vmatprep.subr.bf16.mxu0 %v19395_v16  ;;  %v19410_v51 = vld [vmem:[#allocation2 + $0x804] ss:$48 sps:$4 sm:$0xff]  }
 0x57e   :  { %11773 = vmatprep.subr.bf16.mxu1 %v19398_v36 }
 0x57f   :  { %v11330_v0 = vpop.f32.mrf.mxu0  ;;  %11647 = vmatmul.mubr.bf16.vlgmr.msra.gmra.mxu0 %v21149_v59 }
 0x580   :  { %v11383_v22 = vpop.f32.mrf.mxu1  ;;  %11700 = vmatmul.mubr.bf16.vlgmr.msra.gmra.mxu1 %v21153_v48  ;;  %v11331_v18 = vadd.f32 %v11330_v0, %v20900_v29  ;;  %11721 = vmatpush1.bf16.msra.mxu0 %v19393_v54 }
 0x581   :  { %11774 = vmatpush1.bf16.msra.mxu1 %v19396_v28  ;;  %v11332_v62 = vpop.f32.mrf.mxu0  ;;  %11722 = vmatprep.subr.bf16.mxu0 %v19401_v46  ;;  %v19405_v46 = vld [vmem:[#allocation2 + $0x200] ss:$48 sps:$4 sm:$0xff]  }
 0x582   :  { %v11385_v43 = vpop.f32.mrf.mxu1  ;;  %11775 = vmatprep.subr.bf16.mxu1 %v19404_v20  ;;  %v21368_v16 = vadd.f32 %v11383_v22, %v11331_v18  ;;  %v11333_v36 = vadd.f32 %v11332_v62, %v20905_v39  ;;  %11656 = vmatprep.mubr.bf16.mxu0 %v21159_v52  ;;  %v19408_v20 = vld [vmem:[#allocation2 + $0x800] ss:$48 sps:$4 sm:$0xff]   ;;  %v19413_v39 = vld [vmem:[#allocation2 + $0x1a4] ss:$48 sps:$4 sm:$0xff]  }
 0x583   :  { %11709 = vmatprep.mubr.bf16.mxu1 %v21161_v35  ;;  %v11334_v10 = vpop.f32.mrf.mxu0  ;;  %v19416_v18 = vld [vmem:[#allocation2 + $0x7a4] ss:$48 sps:$4 sm:$0xff]  }
 0x584   :  { %v11387_v29 = vpop.f32.mrf.mxu1  ;;  %v21373_v54 = vadd.f32 %v11385_v43, %v11333_v36  ;;  %v11335_v28 = vadd.f32 %v11334_v10, %v20912_v63  ;;  %11723 = vmatpush1.bf16.msra.mxu0 %v19399_v1  ;;  %v19411_v10 = vld [vmem:[#allocation2 + $0x1a0] ss:$48 sps:$4 sm:$0xff]  }
 0x585   :  { %11776 = vmatpush1.bf16.msra.mxu1 %v19402_v14  ;;  %v21376_v0 = vpop.f32.mrf.mxu0  ;;  %11724 = vmatprep.subr.bf16.mxu0 %v19407_v37  ;;  %v19414_v1 = vld [vmem:[#allocation2 + $0x7a0] ss:$48 sps:$4 sm:$0xff]   ;;  %v19419_v37 = vld [vmem:[#allocation2 + $0x144] ss:$48 sps:$4 sm:$0xff]  }
 0x586   :  { %22283 = vst [vmem:[#allocation95_spill] sm:$0xff] %v21376_v0  ;;  %v21378_v22 = vpop.f32.mrf.mxu1  ;;  %11777 = vmatprep.subr.bf16.mxu1 %v19410_v51  ;;  %v21380_v62 = vadd.f32 %v11387_v29, %v11335_v28  ;;  %v19422_v51 = vld [vmem:[#allocation2 + $0x744] ss:$48 sps:$4 sm:$0xff]  }
 0x587   :  { %22284 = vst [vmem:[#allocation96_spill] sm:$0xff] %v21378_v22  ;;  %v11340_v57 = vpop.f32.mrf.mxu0  ;;  %11657 = vmatmul.mubr.bf16.gmra.mxu0 %v21171_v55  ;;  %v19431_v0 = vld [vmem:[#allocation2 + $0x84] ss:$48 sps:$4 sm:$0xff]  }
 0x588   :  { %v11393_v43 = vpop.f32.mrf.mxu1  ;;  %11710 = vmatmul.mubr.bf16.gmra.mxu1 %v21173_v13  ;;  %v11341_v63 = vadd.f32 %v11340_v57, %v20918_v38  ;;  %11725 = vmatpush1.bf16.msra.mxu0 %v19405_v46 }
 0x589   :  { %11778 = vmatpush1.bf16.msra.mxu1 %v19408_v20  ;;  %v11342_v14 = vpop.f32.mrf.mxu0  ;;  %11726 = vmatprep.subr.bf16.mxu0 %v19413_v39  ;;  %v19417_v20 = vld [vmem:[#allocation2 + $0x140] ss:$48 sps:$4 sm:$0xff]  }
 0x58a   :  { %v11395_v36 = vpop.f32.mrf.mxu1  ;;  %11779 = vmatprep.subr.bf16.mxu1 %v19416_v18  ;;  %v11343_v29 = vadd.f32 %v11342_v14, %v20923_v6  ;;  %v21386_v28 = vadd.f32 %v11393_v43, %v11341_v63  ;;  %11752 = vmatprep.mubr.bf16.mxu0 %v21029_v30  ;;  %v19420_v39 = vld [vmem:[#allocation2 + $0x740] ss:$48 sps:$4 sm:$0xff]   ;;  %v19425_v18 = vld [vmem:[#allocation2 + $0xe4] ss:$48 sps:$4 sm:$0xff]  }
 0x58b   :  { %11805 = vmatprep.mubr.bf16.mxu1 %v21033_v45  ;;  %v11344_v22 = vpop.f32.mrf.mxu0  ;;  %v19428_v6 = vld [vmem:[#allocation2 + $0x6e4] ss:$48 sps:$4 sm:$0xff]   ;;  %v19423_v63 = vld [vmem:[#allocation2 + $0xe0] ss:$48 sps:$4 sm:$0xff]  }
 0x58c   :  { %v11397_v38 = vpop.f32.mrf.mxu1  ;;  %v11345_v57 = vadd.f32 %v11344_v22, %v20925_v4  ;;  %v21391_v46 = vadd.f32 %v11395_v36, %v11343_v29  ;;  %11727 = vmatpush1.bf16.msra.mxu0 %v19411_v10  ;;  %v19426_v14 = vld [vmem:[#allocation2 + $0x6e0] ss:$48 sps:$4 sm:$0xff]   ;;  %v19434_v4 = vld [vmem:[#allocation2 + $0x684] ss:$48 sps:$4 sm:$0xff]  }
 0x58d   :  { %11780 = vmatpush1.bf16.msra.mxu1 %v19414_v1  ;;  %11728 = vmatprep.subr.bf16.mxu0 %v19419_v37  ;;  %v19429_v22 = vld [vmem:[#allocation2 + $0x80] ss:$48 sps:$4 sm:$0xff]   ;;  %v19437_v1 = vld [vmem:[#allocation2 + $0x24] ss:$48 sps:$4 sm:$0xff]  }
 0x58e   :  { %11781 = vmatprep.subr.bf16.mxu1 %v19422_v51  ;;  %v21393_v43 = vadd.f32 %v11397_v38, %v11345_v57  ;;  %v19432_v10 = vld [vmem:[#allocation2 + $0x680] ss:$48 sps:$4 sm:$0xff]   ;;  %v19440_v36 = vld [vmem:[#allocation2 + $0x624] ss:$48 sps:$4 sm:$0xff]  }
 0x58f   :  { %v19435_v37 = vld [vmem:[#allocation2 + $0x20] ss:$48 sps:$4 sm:$0xff]   ;;  %v19443_v29 = vld [vmem:[#allocation2 + $0x5c4] ss:$48 sps:$4 sm:$0xff]  }
 0x590   :  { %11729 = vmatpush1.bf16.msra.mxu0 %v19417_v20  ;;  %v19438_v51 = vld [vmem:[#allocation2 + $0x620] ss:$48 sps:$4 sm:$0xff]   ;;  %v19446_v38 = vld [vmem:[#allocation2 + $0xbc4] ss:$48 sps:$4 sm:$0xff]  }
 0x591   :  { %11782 = vmatpush1.bf16.msra.mxu1 %v19420_v39  ;;  %11730 = vmatprep.subr.bf16.mxu0 %v19425_v18  ;;  %v19441_v57 = vld [vmem:[#allocation2 + $0x5c0] ss:$48 sps:$4 sm:$0xff]   ;;  %v19449_v39 = vld [vmem:[#allocation2 + $0x564] ss:$48 sps:$4 sm:$0xff]  }
 0x592   :  { %11783 = vmatprep.subr.bf16.mxu1 %v19428_v6  ;;  %v19444_v20 = vld [vmem:[#allocation2 + $0xbc0] ss:$48 sps:$4 sm:$0xff]   ;;  %v19452_v18 = vld [vmem:[#allocation2 + $0xb64] ss:$48 sps:$4 sm:$0xff]  }
 0x593   :  { %v19450_v6 = vld [vmem:[#allocation2 + $0xb60] ss:$48 sps:$4 sm:$0xff]  }
 0x594   :  { %11731 = vmatpush1.bf16.msra.mxu0 %v19423_v63  ;;  %v19455_v63 = vld [vmem:[#allocation2 + $0x504] ss:$48 sps:$4 sm:$0xff]  }
 0x595   :  { %11784 = vmatpush1.bf16.msra.mxu1 %v19426_v14  ;;  %11732 = vmatprep.subr.bf16.mxu0 %v19431_v0  ;;  %v19447_v0 = vld [vmem:[#allocation2 + $0x560] ss:$48 sps:$4 sm:$0xff]   ;;  %v19458_v14 = vld [vmem:[#allocation2 + $0xb04] ss:$48 sps:$4 sm:$0xff]  }
 0x596   :  { %11785 = vmatprep.subr.bf16.mxu1 %v19434_v4  ;;  %v19453_v4 = vld [vmem:[#allocation2 + $0x500] ss:$48 sps:$4 sm:$0xff]  }
 0x598   :  { %11733 = vmatpush1.bf16.msra.mxu0 %v19429_v22  ;;  %v19456_v22 = vld [vmem:[#allocation2 + $0xb00] ss:$48 sps:$4 sm:$0xff]  }
 0x599   :  { %11786 = vmatpush1.bf16.msra.mxu1 %v19432_v10  ;;  %11734 = vmatprep.subr.bf16.mxu0 %v19437_v1  ;;  %v19461_v10 = vld [vmem:[#allocation2 + $0x4a4] ss:$48 sps:$4 sm:$0xff]  }
 0x59a   :  { %11787 = vmatprep.subr.bf16.mxu1 %v19440_v36  ;;  %v19464_v1 = vld [vmem:[#allocation2 + $0xaa4] ss:$48 sps:$4 sm:$0xff]   ;;  %v19459_v36 = vld [vmem:[#allocation2 + $0x4a0] ss:$48 sps:$4 sm:$0xff]  }
 0x59c   :  { %11735 = vmatpush1.bf16.msra.mxu0 %v19435_v37  ;;  %v19462_v37 = vld [vmem:[#allocation2 + $0xaa0] ss:$48 sps:$4 sm:$0xff]  }
 0x59d   :  { %11788 = vmatpush1.bf16.msra.mxu1 %v19438_v51  ;;  %11736 = vmatprep.subr.bf16.mxu0 %v19443_v29  ;;  %v19467_v51 = vld [vmem:[#allocation2 + $0x444] ss:$48 sps:$4 sm:$0xff]  }
 0x59e   :  { %11789 = vmatprep.subr.bf16.mxu1 %v19446_v38  ;;  %v19470_v29 = vld [vmem:[#allocation2 + $0xa44] ss:$48 sps:$4 sm:$0xff]   ;;  %v19465_v38 = vld [vmem:[#allocation2 + $0x440] ss:$48 sps:$4 sm:$0xff]  }
 0x5a0   :  { %11737 = vmatpush2.bf16.msra.mxu0 %v19441_v57  ;;  %v19468_v57 = vld [vmem:[#allocation2 + $0xa40] ss:$48 sps:$4 sm:$0xff]  }
 0x5a1   :  { %11790 = vmatpush2.bf16.msra.mxu1 %v19444_v20  ;;  %11738 = vmatprep.subr.bf16.mxu0 %v19449_v39  ;;  %v19473_v20 = vld [vmem:[#allocation2 + $0x3e4] ss:$48 sps:$4 sm:$0xff]  }
 0x5a2   :  { %11791 = vmatprep.subr.bf16.mxu1 %v19452_v18  ;;  %v19476_v39 = vld [vmem:[#allocation2 + $0x9e4] ss:$48 sps:$4 sm:$0xff]   ;;  %v19471_v18 = vld [vmem:[#allocation2 + $0x3e0] ss:$48 sps:$4 sm:$0xff]  }
 0x5a4   :  { %11739 = vmatpush2.bf16.msra.mxu0 %v19447_v0  ;;  %v19474_v0 = vld [vmem:[#allocation2 + $0x9e0] ss:$48 sps:$4 sm:$0xff]  }
 0x5a5   :  { %11792 = vmatpush2.bf16.msra.mxu1 %v19450_v6  ;;  %11740 = vmatprep.subr.bf16.mxu0 %v19455_v63  ;;  %v19479_v6 = vld [vmem:[#allocation2 + $0x384] ss:$48 sps:$4 sm:$0xff]  }
 0x5a6   :  { %11793 = vmatprep.subr.bf16.mxu1 %v19458_v14  ;;  %v19482_v63 = vld [vmem:[#allocation2 + $0x984] ss:$48 sps:$4 sm:$0xff]   ;;  %v19477_v14 = vld [vmem:[#allocation2 + $0x380] ss:$48 sps:$4 sm:$0xff]  }
 0x5a8   :  { %11741 = vmatpush2.bf16.msra.mxu0 %v19453_v4  ;;  %v19480_v4 = vld [vmem:[#allocation2 + $0x980] ss:$48 sps:$4 sm:$0xff]  }
 0x5a9   :  { %11794 = vmatpush2.bf16.msra.mxu1 %v19456_v22  ;;  %11742 = vmatprep.subr.bf16.mxu0 %v19461_v10  ;;  %v19485_v22 = vld [vmem:[#allocation2 + $0x324] ss:$48 sps:$4 sm:$0xff]  }
 0x5aa   :  { %11795 = vmatprep.subr.bf16.mxu1 %v19464_v1  ;;  %v19488_v10 = vld [vmem:[#allocation2 + $0x924] ss:$48 sps:$4 sm:$0xff]   ;;  %v19483_v1 = vld [vmem:[#allocation2 + $0x320] ss:$48 sps:$4 sm:$0xff]  }
 0x5ac   :  { %11743 = vmatpush2.bf16.msra.mxu0 %v19459_v36  ;;  %v19486_v36 = vld [vmem:[#allocation2 + $0x920] ss:$48 sps:$4 sm:$0xff]  }
 0x5ad   :  { %11796 = vmatpush2.bf16.msra.mxu1 %v19462_v37  ;;  %11744 = vmatprep.subr.bf16.mxu0 %v19467_v51  ;;  %v19491_v37 = vld [vmem:[#allocation2 + $0xec4] ss:$48 sps:$4 sm:$0xff]  }
 0x5ae   :  { %11797 = vmatprep.subr.bf16.mxu1 %v19470_v29  ;;  %v19494_v51 = vld [vmem:[#allocation2 + $0x14c4] ss:$48 sps:$4 sm:$0xff]   ;;  %v19489_v29 = vld [vmem:[#allocation2 + $0xec0] ss:$48 sps:$4 sm:$0xff]  }
 0x5b0   :  { %11745 = vmatpush2.bf16.msra.mxu0 %v19465_v38  ;;  %v19492_v38 = vld [vmem:[#allocation2 + $0x14c0] ss:$48 sps:$4 sm:$0xff]  }
 0x5b1   :  { %11798 = vmatpush2.bf16.msra.mxu1 %v19468_v57  ;;  %11746 = vmatprep.subr.bf16.mxu0 %v19473_v20  ;;  %v11346_v57 = vpop.f32.mrf.mxu0  ;;  %v21395_v20 = vpop.f32.mrf.mxu1 }
 0x5b2   :  { %11799 = vmatprep.subr.bf16.mxu1 %v19476_v39  ;;  %v19497_v39 = vld [vmem:[#allocation2 + $0xe64] ss:$48 sps:$4 sm:$0xff]  }
 0x5b4   :  { %11747 = vmatpush2.bf16.msra.mxu0 %v19471_v18  ;;  %v19500_v18 = vld [vmem:[#allocation2 + $0x1464] ss:$48 sps:$4 sm:$0xff]  }
 0x5b5   :  { %11800 = vmatpush2.bf16.msra.mxu1 %v19474_v0  ;;  %11748 = vmatprep.subr.bf16.mxu0 %v19479_v6 }
 0x5b6   :  { %11801 = vmatprep.subr.bf16.mxu1 %v19482_v63  ;;  %v6208_v63 = vadd.f32 %v20895_v24, %v20893_v2 }
 0x5b8   :  { %11749 = vmatpush2.bf16.msra.mxu0 %v19477_v14 }
 0x5b9   :  { %11802 = vmatpush2.bf16.msra.mxu1 %v19480_v4  ;;  %11750 = vmatprep.subr.bf16.mxu0 %v19485_v22  ;;  %v19495_v4 = vld [vmem:[#allocation2 + $0xe60] ss:$48 sps:$4 sm:$0xff]  }
 0x5ba   :  { %11803 = vmatprep.subr.bf16.mxu1 %v19488_v10  ;;  %v19498_v22 = vld [vmem:[#allocation2 + $0x1460] ss:$48 sps:$4 sm:$0xff]  }
 0x5bc   :  { %11751 = vmatpush2.bf16.msra.mxu0 %v19483_v1 }
 0x5bd   :  { %11804 = vmatpush2.bf16.msra.mxu1 %v19486_v36  ;;  %11826 = vmatprep.subr.bf16.mxu0 %v19491_v37  ;;  %v19503_v36 = vld [vmem:[#allocation2 + $0xe04] ss:$48 sps:$4 sm:$0xff]  }
 0x5be   :  { %11879 = vmatprep.subr.bf16.mxu1 %v19494_v51  ;;  %v19506_v37 = vld [vmem:[#allocation2 + $0x1404] ss:$48 sps:$4 sm:$0xff]   ;;  %v6261_v51 = vadd.f32 %v20927_v12, %v6208_v63 }
 0x5bf   :  { %v11436_v0 = vpop.f32.mrf.mxu0  ;;  %11753 = vmatmul.mubr.bf16.vlgmr.msra.gmra.mxu0 %v21059_v26 }
 0x5c0   :  { %v11489_v6 = vpop.f32.mrf.mxu1  ;;  %11806 = vmatmul.mubr.bf16.vlgmr.msra.gmra.mxu1 %v21063_v60  ;;  %v11437_v14 = vadd.f32 %v11436_v0, %v21368_v16  ;;  %11827 = vmatpush1.bf16.msra.mxu0 %v19489_v29  ;;  %v19512_v0 = vld [vmem:[#allocation2 + $0x13a4] ss:$48 sps:$4 sm:$0xff]  }
 0x5c1   :  { %11880 = vmatpush1.bf16.msra.mxu1 %v19492_v38  ;;  %v11438_v10 = vpop.f32.mrf.mxu0  ;;  %11828 = vmatprep.subr.bf16.mxu0 %v19497_v39  ;;  %v19501_v38 = vld [vmem:[#allocation2 + $0xe00] ss:$48 sps:$4 sm:$0xff]  }
 0x5c2   :  { %v11491_v1 = vpop.f32.mrf.mxu1  ;;  %11881 = vmatprep.subr.bf16.mxu1 %v19500_v18  ;;  %v21403_v33 = vadd.f32 %v11489_v6, %v11437_v14  ;;  %v11439_v27 = vadd.f32 %v11438_v10, %v21373_v54  ;;  %11762 = vmatprep.mubr.bf16.mxu0 %v21069_v5  ;;  %v19504_v39 = vld [vmem:[#allocation2 + $0x1400] ss:$48 sps:$4 sm:$0xff]   ;;  %v19509_v54 = vld [vmem:[#allocation2 + $0xda4] ss:$48 sps:$4 sm:$0xff]   ;;  %v6314_v6 = vadd.f32 %v20929_v31, %v6261_v51 }
 0x5c3   :  { %11815 = vmatprep.mubr.bf16.mxu1 %v21071_v32  ;;  %v11440_v2 = vpop.f32.mrf.mxu0  ;;  %v19510_v10 = vld [vmem:[#allocation2 + $0x13a0] ss:$48 sps:$4 sm:$0xff]   ;;  %v19515_v31 = vld [vmem:[#allocation2 + $0xd44] ss:$48 sps:$4 sm:$0xff]  }
 0x5c4   :  { %v11493_v24 = vpop.f32.mrf.mxu1  ;;  %v21408_v16 = vadd.f32 %v11491_v1, %v11439_v27  ;;  %v11441_v29 = vadd.f32 %v11440_v2, %v21380_v62  ;;  %11829 = vmatpush1.bf16.msra.mxu0 %v19495_v4  ;;  %v11347_v14 = vadd.f32 %v11346_v57, %v6314_v6  ;;  %v19521_v6 = vld [vmem:[#allocation2 + $0xce4] ss:$48 sps:$4 sm:$0xff]  }
 0x5c5   :  { %11882 = vmatpush1.bf16.msra.mxu1 %v19498_v22  ;;  %v21411_v18 = vpop.f32.mrf.mxu0  ;;  %11830 = vmatprep.subr.bf16.mxu0 %v19503_v36  ;;  %v19507_v22 = vld [vmem:[#allocation2 + $0xda0] ss:$48 sps:$4 sm:$0xff]  }
 0x5c6   :  { %v21413_v12 = vpop.f32.mrf.mxu1  ;;  %11883 = vmatprep.subr.bf16.mxu1 %v19506_v37  ;;  %v21416_v63 = vadd.f32 %v11493_v24, %v11441_v29  ;;  %v19518_v37 = vld [vmem:[#allocation2 + $0x1344] ss:$48 sps:$4 sm:$0xff]   ;;  %v11400_v24 = vadd.f32 %v21395_v20, %v11347_v14  ;;  %v19522_v20 = vld [vmem:[#allocation2 + $0x12e0] ss:$48 sps:$4 sm:$0xff]  }
 0x5c7   :  { %v11446_v27 = vpop.f32.mrf.mxu0  ;;  %11763 = vmatmul.mubr.bf16.gmra.mxu0 %v21101_v49  ;;  %v19527_v14 = vld [vmem:[#allocation2 + $0xc84] ss:$48 sps:$4 sm:$0xff]  }
 0x5c8   :  { %v11499_v62 = vpop.f32.mrf.mxu1  ;;  %11816 = vmatmul.mubr.bf16.gmra.mxu1 %v21103_v8  ;;  %v11447_v4 = vadd.f32 %v11446_v27, %v21386_v28  ;;  %11831 = vmatpush1.bf16.msra.mxu0 %v19501_v38  ;;  %v19524_v27 = vld [vmem:[#allocation2 + $0x12e4] ss:$48 sps:$4 sm:$0xff]  }
 0x5c9   :  { %11884 = vmatpush1.bf16.msra.mxu1 %v19504_v39  ;;  %v11448_v1 = vpop.f32.mrf.mxu0  ;;  %11832 = vmatprep.subr.bf16.mxu0 %v19509_v54  ;;  %v19513_v39 = vld [vmem:[#allocation2 + $0xd40] ss:$48 sps:$4 sm:$0xff]  }
 0x5ca   :  { %v11501_v36 = vpop.f32.mrf.mxu1  ;;  %11885 = vmatprep.subr.bf16.mxu1 %v19512_v0  ;;  %v11449_v51 = vadd.f32 %v11448_v1, %v21391_v46  ;;  %v21422_v2 = vadd.f32 %v11499_v62, %v11447_v4  ;;  %11858 = vmatprep.mubr.bf16.mxu0 %v21116_v25  ;;  %v19516_v54 = vld [vmem:[#allocation2 + $0x1340] ss:$48 sps:$4 sm:$0xff]  }
 0x5cb   :  { %11911 = vmatprep.mubr.bf16.mxu1 %v21120_v47  ;;  %v11450_v57 = vpop.f32.mrf.mxu0 }
 0x5cc   :  { %22285 = vst [vmem:[#allocation97_spill] sm:$0xff] %v21422_v2  ;;  %v11503_v28 = vpop.f32.mrf.mxu1  ;;  %v11451_v29 = vadd.f32 %v11450_v57, %v21393_v43  ;;  %v21428_v38 = vadd.f32 %v11501_v36, %v11449_v51  ;;  %11833 = vmatpush1.bf16.msra.mxu0 %v19507_v22  ;;  %v19519_v43 = vld [vmem:[#allocation2 + $0xce0] ss:$48 sps:$4 sm:$0xff]   ;;  %v19530_v22 = vld [vmem:[#allocation2 + $0x1284] ss:$48 sps:$4 sm:$0xff]  }
 0x5cd   :  { %11886 = vmatpush1.bf16.msra.mxu1 %v19510_v10  ;;  %v11452_v0 = vpop.f32.mrf.mxu0  ;;  %11834 = vmatprep.subr.bf16.mxu0 %v19515_v31  ;;  %v19525_v10 = vld [vmem:[#allocation2 + $0xc80] ss:$48 sps:$4 sm:$0xff]   ;;  %v19533_v31 = vld [vmem:[#allocation2 + $0xc24] ss:$48 sps:$4 sm:$0xff]  }
 0x5ce   :  { %22286 = vst [vmem:[#allocation98_spill] sm:$0xff] %v21428_v38  ;;  %v11505_v46 = vpop.f32.mrf.mxu1  ;;  %11887 = vmatprep.subr.bf16.mxu1 %v19518_v37  ;;  %v11453_v62 = vadd.f32 %v11452_v0, %v11400_v24  ;;  %v21430_v4 = vadd.f32 %v11503_v28, %v11451_v29  ;;  %v19528_v36 = vld [vmem:[#allocation2 + $0x1280] ss:$48 sps:$4 sm:$0xff]   ;;  %v19536_v37 = vld [vmem:[#allocation2 + $0x1224] ss:$48 sps:$4 sm:$0xff]  }
 0x5cf   :  { %v19531_v51 = vld [vmem:[#allocation2 + $0xc20] ss:$48 sps:$4 sm:$0xff]   ;;  %v19539_v28 = vld [vmem:[#allocation2 + $0x11c4] ss:$48 sps:$4 sm:$0xff]  }
 0x5d0   :  { %22287 = vst [vmem:[#allocation99_spill] sm:$0xff] %v21430_v4  ;;  %v21432_v1 = vadd.f32 %v11505_v46, %v11453_v62  ;;  %11835 = vmatpush1.bf16.msra.mxu0 %v19513_v39  ;;  %v19534_v57 = vld [vmem:[#allocation2 + $0x1220] ss:$48 sps:$4 sm:$0xff]   ;;  %v19542_v24 = vld [vmem:[#allocation2 + $0x17c4] ss:$48 sps:$4 sm:$0xff]  }
 0x5d1   :  { %11888 = vmatpush1.bf16.msra.mxu1 %v19516_v54  ;;  %11836 = vmatprep.subr.bf16.mxu0 %v19521_v6  ;;  %v19537_v29 = vld [vmem:[#allocation2 + $0x11c0] ss:$48 sps:$4 sm:$0xff]   ;;  %v19545_v54 = vld [vmem:[#allocation2 + $0x1164] ss:$48 sps:$4 sm:$0xff]  }
 0x5d2   :  { %22288 = vst [vmem:[#allocation100_spill] sm:$0xff] %v21432_v1  ;;  %11889 = vmatprep.subr.bf16.mxu1 %v19524_v27  ;;  %v19540_v39 = vld [vmem:[#allocation2 + $0x17c0] ss:$48 sps:$4 sm:$0xff]   ;;  %v19548_v0 = vld [vmem:[#allocation2 + $0x1764] ss:$48 sps:$4 sm:$0xff]  }
 0x5d3   :  { %v19543_v46 = vld [vmem:[#allocation2 + $0x1160] ss:$48 sps:$4 sm:$0xff]   ;;  %v19551_v27 = vld [vmem:[#allocation2 + $0x1104] ss:$48 sps:$4 sm:$0xff]  }
 0x5d4   :  { %11837 = vmatpush1.bf16.msra.mxu0 %v19519_v43  ;;  %v19546_v6 = vld [vmem:[#allocation2 + $0x1760] ss:$48 sps:$4 sm:$0xff]   ;;  %v19554_v62 = vld [vmem:[#allocation2 + $0x1704] ss:$48 sps:$4 sm:$0xff]  }
 0x5d5   :  { %11890 = vmatpush1.bf16.msra.mxu1 %v19522_v20  ;;  %11838 = vmatprep.subr.bf16.mxu0 %v19527_v14  ;;  %v19549_v43 = vld [vmem:[#allocation2 + $0x1100] ss:$48 sps:$4 sm:$0xff]   ;;  %v19557_v14 = vld [vmem:[#allocation2 + $0x10a4] ss:$48 sps:$4 sm:$0xff]  }
 0x5d6   :  { %11891 = vmatprep.subr.bf16.mxu1 %v19530_v22  ;;  %v19552_v20 = vld [vmem:[#allocation2 + $0x1700] ss:$48 sps:$4 sm:$0xff]   ;;  %v19560_v22 = vld [vmem:[#allocation2 + $0x16a4] ss:$48 sps:$4 sm:$0xff]  }
 0x5d7   :  { %v22295_v1 = vld [vmem:[#allocation45_spill] sm:$0xff] }
 0x5d8   :  { %11839 = vmatpush1.bf16.msra.mxu0 %v19525_v10  ;;  %v19555_v10 = vld [vmem:[#allocation2 + $0x10a0] ss:$48 sps:$4 sm:$0xff]  }
 0x5d9   :  { %11892 = vmatpush1.bf16.msra.mxu1 %v19528_v36  ;;  %11840 = vmatprep.subr.bf16.mxu0 %v19533_v31  ;;  %v19558_v36 = vld [vmem:[#allocation2 + $0x16a0] ss:$48 sps:$4 sm:$0xff]   ;;  %v19563_v31 = vld [vmem:[#allocation2 + $0x1044] ss:$48 sps:$4 sm:$0xff]  }
 0x5da   :  { %11893 = vmatprep.subr.bf16.mxu1 %v19536_v37  ;;  %v19566_v37 = vld [vmem:[#allocation2 + $0x1644] ss:$48 sps:$4 sm:$0xff]  }
 0x5dc   :  { %11841 = vmatpush1.bf16.msra.mxu0 %v19531_v51  ;;  %v19561_v51 = vld [vmem:[#allocation2 + $0x1040] ss:$48 sps:$4 sm:$0xff]  }
 0x5dd   :  { %11894 = vmatpush1.bf16.msra.mxu1 %v19534_v57  ;;  %11842 = vmatprep.subr.bf16.mxu0 %v19539_v28  ;;  %v19564_v57 = vld [vmem:[#allocation2 + $0x1640] ss:$48 sps:$4 sm:$0xff]   ;;  %v19569_v28 = vld [vmem:[#allocation2 + $0xfe4] ss:$48 sps:$4 sm:$0xff]  }
 0x5de   :  { %11895 = vmatprep.subr.bf16.mxu1 %v19542_v24  ;;  %v19572_v24 = vld [vmem:[#allocation2 + $0x15e4] ss:$48 sps:$4 sm:$0xff]  }
 0x5e0   :  { %11843 = vmatpush2.bf16.msra.mxu0 %v19537_v29  ;;  %v19567_v29 = vld [vmem:[#allocation2 + $0xfe0] ss:$48 sps:$4 sm:$0xff]  }
 0x5e1   :  { %11896 = vmatpush2.bf16.msra.mxu1 %v19540_v39  ;;  %11844 = vmatprep.subr.bf16.mxu0 %v19545_v54  ;;  %v19570_v39 = vld [vmem:[#allocation2 + $0x15e0] ss:$48 sps:$4 sm:$0xff]   ;;  %v19575_v54 = vld [vmem:[#allocation2 + $0xf84] ss:$48 sps:$4 sm:$0xff]  }
 0x5e2   :  { %11897 = vmatprep.subr.bf16.mxu1 %v19548_v0  ;;  %v19578_v0 = vld [vmem:[#allocation2 + $0x1584] ss:$48 sps:$4 sm:$0xff]  }
 0x5e4   :  { %11845 = vmatpush2.bf16.msra.mxu0 %v19543_v46  ;;  %v19573_v46 = vld [vmem:[#allocation2 + $0xf80] ss:$48 sps:$4 sm:$0xff]  }
 0x5e5   :  { %11898 = vmatpush2.bf16.msra.mxu1 %v19546_v6  ;;  %11846 = vmatprep.subr.bf16.mxu0 %v19551_v27  ;;  %v19576_v6 = vld [vmem:[#allocation2 + $0x1580] ss:$48 sps:$4 sm:$0xff]   ;;  %v19581_v27 = vld [vmem:[#allocation2 + $0xf24] ss:$48 sps:$4 sm:$0xff]  }
 0x5e6   :  { %11899 = vmatprep.subr.bf16.mxu1 %v19554_v62  ;;  %v19584_v62 = vld [vmem:[#allocation2 + $0x1524] ss:$48 sps:$4 sm:$0xff]  }
 0x5e8   :  { %11847 = vmatpush2.bf16.msra.mxu0 %v19549_v43  ;;  %v19579_v43 = vld [vmem:[#allocation2 + $0xf20] ss:$48 sps:$4 sm:$0xff]  }
 0x5e9   :  { %11900 = vmatpush2.bf16.msra.mxu1 %v19552_v20  ;;  %11848 = vmatprep.subr.bf16.mxu0 %v19557_v14  ;;  %v19582_v20 = vld [vmem:[#allocation2 + $0x1520] ss:$48 sps:$4 sm:$0xff]   ;;  %v19587_v14 = vld [vmem:[#allocation2 + $0x2cc] ss:$48 sps:$4 sm:$0xff]  }
 0x5ea   :  { %11901 = vmatprep.subr.bf16.mxu1 %v19560_v22  ;;  %v19590_v22 = vld [vmem:[#allocation2 + $0x8cc] ss:$48 sps:$4 sm:$0xff]  }
 0x5ec   :  { %11849 = vmatpush2.bf16.msra.mxu0 %v19555_v10  ;;  %v19585_v10 = vld [vmem:[#allocation2 + $0x2c8] ss:$48 sps:$4 sm:$0xff]  }
 0x5ed   :  { %11902 = vmatpush2.bf16.msra.mxu1 %v19558_v36  ;;  %11850 = vmatprep.subr.bf16.mxu0 %v19563_v31  ;;  %v19588_v36 = vld [vmem:[#allocation2 + $0x8c8] ss:$48 sps:$4 sm:$0xff]   ;;  %v19593_v31 = vld [vmem:[#allocation2 + $0x26c] ss:$48 sps:$4 sm:$0xff]  }
 0x5ee   :  { %11903 = vmatprep.subr.bf16.mxu1 %v19566_v37  ;;  %v19596_v37 = vld [vmem:[#allocation2 + $0x86c] ss:$48 sps:$4 sm:$0xff]  }
 0x5f0   :  { %11851 = vmatpush2.bf16.msra.mxu0 %v19561_v51  ;;  %v6410_v51 = vadd.f32 %v20943_v44, %v20941_v21  ;;  %v19602_v21 = vld [vmem:[#allocation2 + $0x80c] ss:$48 sps:$4 sm:$0xff]  }
 0x5f1   :  { %11904 = vmatpush2.bf16.msra.mxu1 %v19564_v57  ;;  %11852 = vmatprep.subr.bf16.mxu0 %v19569_v28 }
 0x5f2   :  { %11905 = vmatprep.subr.bf16.mxu1 %v19572_v24  ;;  %v22289_v24 = vld [vmem:[#allocation48_spill] sm:$0xff] }
 0x5f4   :  { %11853 = vmatpush2.bf16.msra.mxu0 %v19567_v29  ;;  %v6463_v29 = vadd.f32 %v22289_v24, %v6410_v51 }
 0x5f5   :  { %11906 = vmatpush2.bf16.msra.mxu1 %v19570_v39  ;;  %11854 = vmatprep.subr.bf16.mxu0 %v19575_v54  ;;  %v22290_v39 = vld [vmem:[#allocation46_spill] sm:$0xff] }
 0x5f6   :  { %11907 = vmatprep.subr.bf16.mxu1 %v19578_v0  ;;  %v19591_v0 = vld [vmem:[#allocation2 + $0x268] ss:$48 sps:$4 sm:$0xff]  }
 0x5f8   :  { %11855 = vmatpush2.bf16.msra.mxu0 %v19573_v46  ;;  %v19594_v46 = vld [vmem:[#allocation2 + $0x868] ss:$48 sps:$4 sm:$0xff]  }
 0x5f9   :  { %11908 = vmatpush2.bf16.msra.mxu1 %v19576_v6  ;;  %11856 = vmatprep.subr.bf16.mxu0 %v19581_v27 }
 0x5fa   :  { %11909 = vmatprep.subr.bf16.mxu1 %v19584_v62  ;;  %v19599_v62 = vld [vmem:[#allocation2 + $0x20c] ss:$48 sps:$4 sm:$0xff]  }
 0x5fc   :  { %11857 = vmatpush2.bf16.msra.mxu0 %v19579_v43  ;;  %v22291_v43 = vld [vmem:[#allocation47_spill] sm:$0xff] }
 0x5fd   :  { %11910 = vmatpush2.bf16.msra.mxu1 %v19582_v20  ;;  %11932 = vmatprep.subr.bf16.mxu0 %v19587_v14 }
 0x5fe   :  { %11985 = vmatprep.subr.bf16.mxu1 %v19590_v22 }
 0x5ff   :  { %v11542_v57 = vpop.f32.mrf.mxu0  ;;  %11859 = vmatmul.mubr.bf16.vlgmr.msra.gmra.mxu0 %v21149_v59 }
 0x600   :  { %v11595_v28 = vpop.f32.mrf.mxu1  ;;  %11912 = vmatmul.mubr.bf16.vlgmr.msra.gmra.mxu1 %v21153_v48  ;;  %v11543_v54 = vadd.f32 %v11542_v57, %v22290_v39  ;;  %11933 = vmatpush1.bf16.msra.mxu0 %v19585_v10  ;;  %v22292_v10 = vld [vmem:[#allocation49_spill] sm:$0xff]  ;;  %v22293_v57 = vld [vmem:[#allocation50_spill] sm:$0xff] }
 0x601   :  { %11986 = vmatpush1.bf16.msra.mxu1 %v19588_v36  ;;  %v11544_v6 = vpop.f32.mrf.mxu0  ;;  %11934 = vmatprep.subr.bf16.mxu0 %v19593_v31  ;;  %v6516_v36 = vadd.f32 %v22292_v10, %v6463_v29  ;;  %v19597_v31 = vld [vmem:[#allocation2 + $0x208] ss:$48 sps:$4 sm:$0xff]  }
 0x602   :  { %v11597_v27 = vpop.f32.mrf.mxu1  ;;  %11987 = vmatprep.subr.bf16.mxu1 %v19596_v37  ;;  %v21440_v44 = vadd.f32 %v11595_v28, %v11543_v54  ;;  %v11545_v20 = vadd.f32 %v11544_v6, %v22291_v43  ;;  %11868 = vmatprep.mubr.bf16.mxu0 %v21159_v52  ;;  %v19600_v37 = vld [vmem:[#allocation2 + $0x808] ss:$48 sps:$4 sm:$0xff]   ;;  %v19605_v54 = vld [vmem:[#allocation2 + $0x1ac] ss:$48 sps:$4 sm:$0xff]  }
 0x603   :  { %11921 = vmatprep.mubr.bf16.mxu1 %v21161_v35  ;;  %v11546_v14 = vpop.f32.mrf.mxu0  ;;  %v19608_v6 = vld [vmem:[#allocation2 + $0x7ac] ss:$48 sps:$4 sm:$0xff]   ;;  %v19603_v10 = vld [vmem:[#allocation2 + $0x1a8] ss:$48 sps:$4 sm:$0xff]  }
 0x604   :  { %v11599_v22 = vpop.f32.mrf.mxu1  ;;  %v21446_v51 = vadd.f32 %v11597_v27, %v11545_v20  ;;  %v11547_v24 = vadd.f32 %v11546_v14, %v22293_v57  ;;  %11935 = vmatpush1.bf16.msra.mxu0 %v19591_v0  ;;  %v22294_v43 = vld [vmem:[#allocation44_spill] sm:$0xff]  ;;  %v22296_v0 = vld [vmem:[#allocation54_spill] sm:$0xff] }
 0x605   :  { %11988 = vmatpush1.bf16.msra.mxu1 %v19594_v46  ;;  %v11548_v28 = vpop.f32.mrf.mxu0  ;;  %11936 = vmatprep.subr.bf16.mxu0 %v19599_v62  ;;  %v6420_v4 = vadd.f32 %v22295_v1, %v22294_v43  ;;  %v22297_v62 = vld [vmem:[#allocation51_spill] sm:$0xff] }
 0x606   :  { %v11601_v39 = vpop.f32.mrf.mxu1  ;;  %11989 = vmatprep.subr.bf16.mxu1 %v19602_v21  ;;  %v21451_v38 = vadd.f32 %v11599_v22, %v11547_v24  ;;  %v11549_v29 = vadd.f32 %v11548_v28, %v6516_v36  ;;  %v19606_v57 = vld [vmem:[#allocation2 + $0x7a8] ss:$48 sps:$4 sm:$0xff]   ;;  %v19611_v36 = vld [vmem:[#allocation2 + $0x14c] ss:$48 sps:$4 sm:$0xff]  }
 0x607   :  { %v11552_v27 = vpop.f32.mrf.mxu0  ;;  %11869 = vmatmul.mubr.bf16.gmra.mxu0 %v21171_v55  ;;  %v6473_v46 = vadd.f32 %v22296_v0, %v6420_v4  ;;  %v19614_v24 = vld [vmem:[#allocation2 + $0x74c] ss:$48 sps:$4 sm:$0xff]  }
 0x608   :  { %v11605_v20 = vpop.f32.mrf.mxu1  ;;  %11922 = vmatmul.mubr.bf16.gmra.mxu1 %v21173_v13  ;;  %v21456_v14 = vadd.f32 %v11601_v39, %v11549_v29  ;;  %v11553_v21 = vadd.f32 %v11552_v27, %v22297_v62  ;;  %11937 = vmatpush1.bf16.msra.mxu0 %v19597_v31  ;;  %v22298_v28 = vld [vmem:[#allocation52_spill] sm:$0xff]  ;;  %v22299_v31 = vld [vmem:[#allocation55_spill] sm:$0xff]  ;;  %v22300_v29 = vld [vmem:[#allocation53_spill] sm:$0xff] }
 0x609   :  { %11990 = vmatpush1.bf16.msra.mxu1 %v19600_v37  ;;  %v11554_v1 = vpop.f32.mrf.mxu0  ;;  %11938 = vmatprep.subr.bf16.mxu0 %v19605_v54  ;;  %v6526_v37 = vadd.f32 %v22299_v31, %v6473_v46  ;;  %v19609_v54 = vld [vmem:[#allocation2 + $0x148] ss:$48 sps:$4 sm:$0xff]  }
 0x60a   :  { %v11607_v22 = vpop.f32.mrf.mxu1  ;;  %11991 = vmatprep.subr.bf16.mxu1 %v19608_v6  ;;  %v11555_v43 = vadd.f32 %v11554_v1, %v22298_v28  ;;  %v21460_v2 = vadd.f32 %v11605_v20, %v11553_v21  ;;  %11964 = vmatprep.mubr.bf16.mxu0 %v21029_v30  ;;  %v19612_v6 = vld [vmem:[#allocation2 + $0x748] ss:$48 sps:$4 sm:$0xff]   ;;  %v19617_v20 = vld [vmem:[#allocation2 + $0xec] ss:$48 sps:$4 sm:$0xff]  }
 0x60b   :  { %12017 = vmatprep.mubr.bf16.mxu1 %v21033_v45  ;;  %v11556_v4 = vpop.f32.mrf.mxu0  ;;  %v19620_v30 = vld [vmem:[#allocation2 + $0x6ec] ss:$48 sps:$4 sm:$0xff]   ;;  %v19615_v46 = vld [vmem:[#allocation2 + $0xe8] ss:$48 sps:$4 sm:$0xff]  }
 0x60c   :  { %v11609_v39 = vpop.f32.mrf.mxu1  ;;  %v11557_v27 = vadd.f32 %v11556_v4, %v22300_v29  ;;  %v21466_v0 = vadd.f32 %v11607_v22, %v11555_v43  ;;  %11939 = vmatpush1.bf16.msra.mxu0 %v19603_v10  ;;  %v19618_v22 = vld [vmem:[#allocation2 + $0x6e8] ss:$48 sps:$4 sm:$0xff]   ;;  %v19623_v10 = vld [vmem:[#allocation2 + $0x8c] ss:$48 sps:$4 sm:$0xff]  }
 0x60d   :  { %11992 = vmatpush1.bf16.msra.mxu1 %v19606_v57  ;;  %v11558_v62 = vpop.f32.mrf.mxu0  ;;  %11940 = vmatprep.subr.bf16.mxu0 %v19611_v36  ;;  %v19626_v57 = vld [vmem:[#allocation2 + $0x68c] ss:$48 sps:$4 sm:$0xff]   ;;  %v19621_v43 = vld [vmem:[#allocation2 + $0x88] ss:$48 sps:$4 sm:$0xff]  }
 0x60e   :  { %v11611_v1 = vpop.f32.mrf.mxu1  ;;  %11993 = vmatprep.subr.bf16.mxu1 %v19614_v24  ;;  %v11559_v21 = vadd.f32 %v11558_v62, %v6526_v37  ;;  %v21468_v45 = vadd.f32 %v11609_v39, %v11557_v27  ;;  %v19624_v36 = vld [vmem:[#allocation2 + $0x688] ss:$48 sps:$4 sm:$0xff]   ;;  %v19629_v24 = vld [vmem:[#allocation2 + $0x2c] ss:$48 sps:$4 sm:$0xff]  }
 0x60f   :  { %v19632_v4 = vld [vmem:[#allocation2 + $0x62c] ss:$48 sps:$4 sm:$0xff]   ;;  %v19627_v39 = vld [vmem:[#allocation2 + $0x28] ss:$48 sps:$4 sm:$0xff]  }
 0x610   :  { %v21470_v28 = vadd.f32 %v11611_v1, %v11559_v21  ;;  %11941 = vmatpush1.bf16.msra.mxu0 %v19609_v54  ;;  %v19630_v31 = vld [vmem:[#allocation2 + $0x628] ss:$48 sps:$4 sm:$0xff]   ;;  %v19635_v37 = vld [vmem:[#allocation2 + $0x5cc] ss:$48 sps:$4 sm:$0xff]  }
 0x611   :  { %11994 = vmatpush1.bf16.msra.mxu1 %v19612_v6  ;;  %11942 = vmatprep.subr.bf16.mxu0 %v19617_v20  ;;  %v19638_v29 = vld [vmem:[#allocation2 + $0xbcc] ss:$48 sps:$4 sm:$0xff]   ;;  %v19633_v27 = vld [vmem:[#allocation2 + $0x5c8] ss:$48 sps:$4 sm:$0xff]  }
 0x612   :  { %11995 = vmatprep.subr.bf16.mxu1 %v19620_v30  ;;  %v19636_v54 = vld [vmem:[#allocation2 + $0xbc8] ss:$48 sps:$4 sm:$0xff]   ;;  %v19641_v6 = vld [vmem:[#allocation2 + $0x56c] ss:$48 sps:$4 sm:$0xff]  }
 0x613   :  { %v19644_v62 = vld [vmem:[#allocation2 + $0xb6c] ss:$48 sps:$4 sm:$0xff]   ;;  %v19639_v1 = vld [vmem:[#allocation2 + $0x568] ss:$48 sps:$4 sm:$0xff]  }
 0x614   :  { %11943 = vmatpush1.bf16.msra.mxu0 %v19615_v46  ;;  %v19642_v20 = vld [vmem:[#allocation2 + $0xb68] ss:$48 sps:$4 sm:$0xff]   ;;  %v19647_v30 = vld [vmem:[#allocation2 + $0x50c] ss:$48 sps:$4 sm:$0xff]  }
 0x615   :  { %11996 = vmatpush1.bf16.msra.mxu1 %v19618_v22  ;;  %11944 = vmatprep.subr.bf16.mxu0 %v19623_v10  ;;  %v19650_v21 = vld [vmem:[#allocation2 + $0xb0c] ss:$48 sps:$4 sm:$0xff]   ;;  %v19645_v46 = vld [vmem:[#allocation2 + $0x508] ss:$48 sps:$4 sm:$0xff]  }
 0x616   :  { %11997 = vmatprep.subr.bf16.mxu1 %v19626_v57  ;;  %v19648_v22 = vld [vmem:[#allocation2 + $0xb08] ss:$48 sps:$4 sm:$0xff]   ;;  %v19653_v10 = vld [vmem:[#allocation2 + $0x4ac] ss:$48 sps:$4 sm:$0xff]  }
 0x617   :  { %v19656_v57 = vld [vmem:[#allocation2 + $0xaac] ss:$48 sps:$4 sm:$0xff]  }
 0x618   :  { %11945 = vmatpush1.bf16.msra.mxu0 %v19621_v43  ;;  %v19651_v43 = vld [vmem:[#allocation2 + $0x4a8] ss:$48 sps:$4 sm:$0xff]  }
 0x619   :  { %11998 = vmatpush1.bf16.msra.mxu1 %v19624_v36  ;;  %11946 = vmatprep.subr.bf16.mxu0 %v19629_v24  ;;  %v19654_v36 = vld [vmem:[#allocation2 + $0xaa8] ss:$48 sps:$4 sm:$0xff]   ;;  %v19659_v24 = vld [vmem:[#allocation2 + $0x44c] ss:$48 sps:$4 sm:$0xff]  }
 0x61a   :  { %11999 = vmatprep.subr.bf16.mxu1 %v19632_v4  ;;  %v19662_v4 = vld [vmem:[#allocation2 + $0xa4c] ss:$48 sps:$4 sm:$0xff]  }
 0x61c   :  { %11947 = vmatpush1.bf16.msra.mxu0 %v19627_v39  ;;  %v19657_v39 = vld [vmem:[#allocation2 + $0x448] ss:$48 sps:$4 sm:$0xff]  }
 0x61d   :  { %12000 = vmatpush1.bf16.msra.mxu1 %v19630_v31  ;;  %11948 = vmatprep.subr.bf16.mxu0 %v19635_v37  ;;  %v19660_v31 = vld [vmem:[#allocation2 + $0xa48] ss:$48 sps:$4 sm:$0xff]   ;;  %v19665_v37 = vld [vmem:[#allocation2 + $0x3ec] ss:$48 sps:$4 sm:$0xff]  }
 0x61e   :  { %12001 = vmatprep.subr.bf16.mxu1 %v19638_v29  ;;  %v19668_v29 = vld [vmem:[#allocation2 + $0x9ec] ss:$48 sps:$4 sm:$0xff]  }
 0x620   :  { %11949 = vmatpush2.bf16.msra.mxu0 %v19633_v27  ;;  %v19663_v27 = vld [vmem:[#allocation2 + $0x3e8] ss:$48 sps:$4 sm:$0xff]  }
 0x621   :  { %12002 = vmatpush2.bf16.msra.mxu1 %v19636_v54  ;;  %11950 = vmatprep.subr.bf16.mxu0 %v19641_v6  ;;  %v19666_v54 = vld [vmem:[#allocation2 + $0x9e8] ss:$48 sps:$4 sm:$0xff]   ;;  %v19671_v6 = vld [vmem:[#allocation2 + $0x38c] ss:$48 sps:$4 sm:$0xff]  }
 0x622   :  { %12003 = vmatprep.subr.bf16.mxu1 %v19644_v62  ;;  %v19674_v62 = vld [vmem:[#allocation2 + $0x98c] ss:$48 sps:$4 sm:$0xff]  }
 0x624   :  { %11951 = vmatpush2.bf16.msra.mxu0 %v19639_v1  ;;  %v19669_v1 = vld [vmem:[#allocation2 + $0x388] ss:$48 sps:$4 sm:$0xff]  }
 0x625   :  { %12004 = vmatpush2.bf16.msra.mxu1 %v19642_v20  ;;  %11952 = vmatprep.subr.bf16.mxu0 %v19647_v30  ;;  %v19672_v20 = vld [vmem:[#allocation2 + $0x988] ss:$48 sps:$4 sm:$0xff]   ;;  %v19677_v30 = vld [vmem:[#allocation2 + $0x32c] ss:$48 sps:$4 sm:$0xff]  }
 0x626   :  { %12005 = vmatprep.subr.bf16.mxu1 %v19650_v21  ;;  %v19680_v21 = vld [vmem:[#allocation2 + $0x92c] ss:$48 sps:$4 sm:$0xff]  }
 0x628   :  { %11953 = vmatpush2.bf16.msra.mxu0 %v19645_v46  ;;  %v19675_v46 = vld [vmem:[#allocation2 + $0x328] ss:$48 sps:$4 sm:$0xff]  }
 0x629   :  { %12006 = vmatpush2.bf16.msra.mxu1 %v19648_v22  ;;  %11954 = vmatprep.subr.bf16.mxu0 %v19653_v10  ;;  %v19678_v22 = vld [vmem:[#allocation2 + $0x928] ss:$48 sps:$4 sm:$0xff]   ;;  %v19683_v10 = vld [vmem:[#allocation2 + $0xecc] ss:$48 sps:$4 sm:$0xff]  }
 0x62a   :  { %12007 = vmatprep.subr.bf16.mxu1 %v19656_v57  ;;  %v19686_v57 = vld [vmem:[#allocation2 + $0x14cc] ss:$48 sps:$4 sm:$0xff]  }
 0x62c   :  { %11955 = vmatpush2.bf16.msra.mxu0 %v19651_v43  ;;  %v19681_v43 = vld [vmem:[#allocation2 + $0xec8] ss:$48 sps:$4 sm:$0xff]  }
 0x62d   :  { %12008 = vmatpush2.bf16.msra.mxu1 %v19654_v36  ;;  %11956 = vmatprep.subr.bf16.mxu0 %v19659_v24  ;;  %v19684_v36 = vld [vmem:[#allocation2 + $0x14c8] ss:$48 sps:$4 sm:$0xff]   ;;  %v19689_v24 = vld [vmem:[#allocation2 + $0xe6c] ss:$48 sps:$4 sm:$0xff]  }
 0x62e   :  { %12009 = vmatprep.subr.bf16.mxu1 %v19662_v4  ;;  %v19692_v4 = vld [vmem:[#allocation2 + $0x146c] ss:$48 sps:$4 sm:$0xff]  }
 0x630   :  { %11957 = vmatpush2.bf16.msra.mxu0 %v19657_v39 }
 0x631   :  { %12010 = vmatpush2.bf16.msra.mxu1 %v19660_v31  ;;  %11958 = vmatprep.subr.bf16.mxu0 %v19665_v37 }
 0x632   :  { %12011 = vmatprep.subr.bf16.mxu1 %v19668_v29  ;;  %v19687_v29 = vld [vmem:[#allocation2 + $0xe68] ss:$48 sps:$4 sm:$0xff]  }
 0x634   :  { %11959 = vmatpush2.bf16.msra.mxu0 %v19663_v27  ;;  %v19690_v27 = vld [vmem:[#allocation2 + $0x1468] ss:$48 sps:$4 sm:$0xff]  }
 0x635   :  { %12012 = vmatpush2.bf16.msra.mxu1 %v19666_v54  ;;  %11960 = vmatprep.subr.bf16.mxu0 %v19671_v6 }
 0x636   :  { %12013 = vmatprep.subr.bf16.mxu1 %v19674_v62  ;;  %v19695_v62 = vld [vmem:[#allocation2 + $0xe0c] ss:$48 sps:$4 sm:$0xff]  }
 0x638   :  { %11961 = vmatpush2.bf16.msra.mxu0 %v19669_v1  ;;  %v19698_v1 = vld [vmem:[#allocation2 + $0x140c] ss:$48 sps:$4 sm:$0xff]  }
 0x639   :  { %12014 = vmatpush2.bf16.msra.mxu1 %v19672_v20  ;;  %11962 = vmatprep.subr.bf16.mxu0 %v19677_v30 }
 0x63a   :  { %12015 = vmatprep.subr.bf16.mxu1 %v19680_v21 }
 0x63c   :  { %11963 = vmatpush2.bf16.msra.mxu0 %v19675_v46  ;;  %v19693_v46 = vld [vmem:[#allocation2 + $0xe08] ss:$48 sps:$4 sm:$0xff]  }
 0x63d   :  { %12016 = vmatpush2.bf16.msra.mxu1 %v19678_v22  ;;  %12038 = vmatprep.subr.bf16.mxu0 %v19683_v10  ;;  %v19696_v22 = vld [vmem:[#allocation2 + $0x1408] ss:$48 sps:$4 sm:$0xff]  }
 0x63e   :  { %12091 = vmatprep.subr.bf16.mxu1 %v19686_v57 }
 0x63f   :  { %v11648_v39 = vpop.f32.mrf.mxu0  ;;  %11965 = vmatmul.mubr.bf16.vlgmr.msra.gmra.mxu0 %v21059_v26 }
 0x640   :  { %v11701_v31 = vpop.f32.mrf.mxu1  ;;  %12018 = vmatmul.mubr.bf16.vlgmr.msra.gmra.mxu1 %v21063_v60  ;;  %v11649_v37 = vadd.f32 %v11648_v39, %v21440_v44  ;;  %12039 = vmatpush1.bf16.msra.mxu0 %v19681_v43  ;;  %v19701_v43 = vld [vmem:[#allocation2 + $0xdac] ss:$48 sps:$4 sm:$0xff]   ;;  %v19699_v39 = vld [vmem:[#allocation2 + $0xda8] ss:$48 sps:$4 sm:$0xff]  }
 0x641   :  { %12092 = vmatpush1.bf16.msra.mxu1 %v19684_v36  ;;  %v11650_v54 = vpop.f32.mrf.mxu0  ;;  %12040 = vmatprep.subr.bf16.mxu0 %v19689_v24 }
 0x642   :  { %v11703_v6 = vpop.f32.mrf.mxu1  ;;  %12093 = vmatprep.subr.bf16.mxu1 %v19692_v4  ;;  %v21475_v20 = vadd.f32 %v11701_v31, %v11649_v37  ;;  %v11651_v30 = vadd.f32 %v11650_v54, %v21446_v51  ;;  %11974 = vmatprep.mubr.bf16.mxu0 %v21069_v5  ;;  %v19704_v51 = vld [vmem:[#allocation2 + $0x13ac] ss:$48 sps:$4 sm:$0xff]   ;;  %v19702_v31 = vld [vmem:[#allocation2 + $0x13a8] ss:$48 sps:$4 sm:$0xff]  }
 0x643   :  { %12027 = vmatprep.mubr.bf16.mxu1 %v21071_v32  ;;  %v11652_v26 = vpop.f32.mrf.mxu0 }
 0x644   :  { %v11705_v60 = vpop.f32.mrf.mxu1  ;;  %v21480_v44 = vadd.f32 %v11703_v6, %v11651_v30  ;;  %v11653_v21 = vadd.f32 %v11652_v26, %v21451_v38  ;;  %12041 = vmatpush1.bf16.msra.mxu0 %v19687_v29  ;;  %v19708_v30 = vld [vmem:[#allocation2 + $0x1348] ss:$48 sps:$4 sm:$0xff]  }
 0x645   :  { %12094 = vmatpush1.bf16.msra.mxu1 %v19690_v27  ;;  %v11654_v10 = vpop.f32.mrf.mxu0  ;;  %12042 = vmatprep.subr.bf16.mxu0 %v19695_v62  ;;  %v19707_v27 = vld [vmem:[#allocation2 + $0xd4c] ss:$48 sps:$4 sm:$0xff]  }
 0x646   :  { %v11707_v57 = vpop.f32.mrf.mxu1  ;;  %12095 = vmatprep.subr.bf16.mxu1 %v19698_v1  ;;  %v21483_v36 = vadd.f32 %v11705_v60, %v11653_v21  ;;  %v11655_v5 = vadd.f32 %v11654_v10, %v21456_v14  ;;  %v19710_v14 = vld [vmem:[#allocation2 + $0x134c] ss:$48 sps:$4 sm:$0xff]   ;;  %v19705_v1 = vld [vmem:[#allocation2 + $0xd48] ss:$48 sps:$4 sm:$0xff]  }
 0x647   :  { %v11658_v32 = vpop.f32.mrf.mxu0  ;;  %11975 = vmatmul.mubr.bf16.gmra.mxu0 %v21101_v49  ;;  %v19716_v21 = vld [vmem:[#allocation2 + $0x12ec] ss:$48 sps:$4 sm:$0xff]  }
 0x648   :  { %v11711_v24 = vpop.f32.mrf.mxu1  ;;  %12028 = vmatmul.mubr.bf16.gmra.mxu1 %v21103_v8  ;;  %v21488_v38 = vadd.f32 %v11707_v57, %v11655_v5  ;;  %v11659_v4 = vadd.f32 %v11658_v32, %v21460_v2  ;;  %12043 = vmatpush1.bf16.msra.mxu0 %v19693_v46  ;;  %v19719_v10 = vld [vmem:[#allocation2 + $0xc8c] ss:$48 sps:$4 sm:$0xff]   ;;  %v19723_v32 = vld [vmem:[#allocation2 + $0xc28] ss:$48 sps:$4 sm:$0xff]  }
 0x649   :  { %12096 = vmatpush1.bf16.msra.mxu1 %v19696_v22  ;;  %v11660_v37 = vpop.f32.mrf.mxu0  ;;  %12044 = vmatprep.subr.bf16.mxu0 %v19701_v43  ;;  %v19714_v22 = vld [vmem:[#allocation2 + $0x12e8] ss:$48 sps:$4 sm:$0xff]   ;;  %v19722_v57 = vld [vmem:[#allocation2 + $0x128c] ss:$48 sps:$4 sm:$0xff]  }
 0x64a   :  { %v11713_v29 = vpop.f32.mrf.mxu1  ;;  %12097 = vmatprep.subr.bf16.mxu1 %v19704_v51  ;;  %v11661_v54 = vadd.f32 %v11660_v37, %v21466_v0  ;;  %v21492_v49 = vadd.f32 %v11711_v24, %v11659_v4  ;;  %12070 = vmatprep.mubr.bf16.mxu0 %v21116_v25  ;;  %v19713_v0 = vld [vmem:[#allocation2 + $0xcec] ss:$48 sps:$4 sm:$0xff]   ;;  %v19717_v43 = vld [vmem:[#allocation2 + $0xc88] ss:$48 sps:$4 sm:$0xff]  }
 0x64b   :  { %12123 = vmatprep.mubr.bf16.mxu1 %v21120_v47  ;;  %v11662_v8 = vpop.f32.mrf.mxu0  ;;  %v19720_v51 = vld [vmem:[#allocation2 + $0x1288] ss:$48 sps:$4 sm:$0xff]   ;;  %v19725_v5 = vld [vmem:[#allocation2 + $0xc2c] ss:$48 sps:$4 sm:$0xff]  }
 0x64c   :  { %v11715_v2 = vpop.f32.mrf.mxu1  ;;  %v11663_v6 = vadd.f32 %v11662_v8, %v21468_v45  ;;  %v21497_v62 = vadd.f32 %v11713_v29, %v11661_v54  ;;  %12045 = vmatpush1.bf16.msra.mxu0 %v19699_v39  ;;  %v19711_v45 = vld [vmem:[#allocation2 + $0xce8] ss:$48 sps:$4 sm:$0xff]   ;;  %v19731_v4 = vld [vmem:[#allocation2 + $0x11cc] ss:$48 sps:$4 sm:$0xff]  }
 0x64d   :  { %12098 = vmatpush1.bf16.msra.mxu1 %v19702_v31  ;;  %v11664_v26 = vpop.f32.mrf.mxu0  ;;  %12046 = vmatprep.subr.bf16.mxu0 %v19707_v27  ;;  %v19726_v24 = vld [vmem:[#allocation2 + $0x1228] ss:$48 sps:$4 sm:$0xff]   ;;  %v19734_v39 = vld [vmem:[#allocation2 + $0x17cc] ss:$48 sps:$4 sm:$0xff]  }
 0x64e   :  { %v11717_v60 = vpop.f32.mrf.mxu1  ;;  %12099 = vmatprep.subr.bf16.mxu1 %v19710_v14  ;;  %v11665_v25 = vadd.f32 %v11664_v26, %v21470_v28  ;;  %v21500_v46 = vadd.f32 %v11715_v2, %v11663_v6  ;;  %v19728_v28 = vld [vmem:[#allocation2 + $0x122c] ss:$48 sps:$4 sm:$0xff]   ;;  %v19729_v31 = vld [vmem:[#allocation2 + $0x11c8] ss:$48 sps:$4 sm:$0xff]  }
 0x64f   :  { %v19732_v37 = vld [vmem:[#allocation2 + $0x17c8] ss:$48 sps:$4 sm:$0xff]   ;;  %v19737_v29 = vld [vmem:[#allocation2 + $0x116c] ss:$48 sps:$4 sm:$0xff]  }
 0x650   :  { %v21502_v47 = vadd.f32 %v11717_v60, %v11665_v25  ;;  %12047 = vmatpush1.bf16.msra.mxu0 %v19705_v1  ;;  %v19740_v27 = vld [vmem:[#allocation2 + $0x176c] ss:$48 sps:$4 sm:$0xff]   ;;  %v19735_v14 = vld [vmem:[#allocation2 + $0x1168] ss:$48 sps:$4 sm:$0xff]  }
 0x651   :  { %12100 = vmatpush1.bf16.msra.mxu1 %v19708_v30  ;;  %12048 = vmatprep.subr.bf16.mxu0 %v19713_v0  ;;  %v19738_v54 = vld [vmem:[#allocation2 + $0x1768] ss:$48 sps:$4 sm:$0xff]   ;;  %v19743_v8 = vld [vmem:[#allocation2 + $0x110c] ss:$48 sps:$4 sm:$0xff]  }
 0x652   :  { %12101 = vmatprep.subr.bf16.mxu1 %v19716_v21  ;;  %v19746_v2 = vld [vmem:[#allocation2 + $0x170c] ss:$48 sps:$4 sm:$0xff]   ;;  %v19741_v6 = vld [vmem:[#allocation2 + $0x1108] ss:$48 sps:$4 sm:$0xff]  }
 0x653   :  { %v19744_v1 = vld [vmem:[#allocation2 + $0x1708] ss:$48 sps:$4 sm:$0xff]   ;;  %v19749_v30 = vld [vmem:[#allocation2 + $0x10ac] ss:$48 sps:$4 sm:$0xff]  }
 0x654   :  { %12049 = vmatpush1.bf16.msra.mxu0 %v19711_v45  ;;  %v19752_v26 = vld [vmem:[#allocation2 + $0x16ac] ss:$48 sps:$4 sm:$0xff]   ;;  %v19747_v60 = vld [vmem:[#allocation2 + $0x10a8] ss:$48 sps:$4 sm:$0xff]  }
 0x655   :  { %12102 = vmatpush1.bf16.msra.mxu1 %v19714_v22  ;;  %12050 = vmatprep.subr.bf16.mxu0 %v19719_v10  ;;  %v19750_v0 = vld [vmem:[#allocation2 + $0x16a8] ss:$48 sps:$4 sm:$0xff]   ;;  %v19755_v21 = vld [vmem:[#allocation2 + $0x104c] ss:$48 sps:$4 sm:$0xff]  }
 0x656   :  { %12103 = vmatprep.subr.bf16.mxu1 %v19722_v57  ;;  %v19758_v25 = vld [vmem:[#allocation2 + $0x164c] ss:$48 sps:$4 sm:$0xff]   ;;  %v19753_v45 = vld [vmem:[#allocation2 + $0x1048] ss:$48 sps:$4 sm:$0xff]  }
 0x657   :  { %v19756_v22 = vld [vmem:[#allocation2 + $0x1648] ss:$48 sps:$4 sm:$0xff]   ;;  %v19761_v10 = vld [vmem:[#allocation2 + $0xfec] ss:$48 sps:$4 sm:$0xff]  }
 0x658   :  { %12051 = vmatpush1.bf16.msra.mxu0 %v19717_v43  ;;  %v19764_v57 = vld [vmem:[#allocation2 + $0x15ec] ss:$48 sps:$4 sm:$0xff]   ;;  %v19759_v43 = vld [vmem:[#allocation2 + $0xfe8] ss:$48 sps:$4 sm:$0xff]  }
 0x659   :  { %12104 = vmatpush1.bf16.msra.mxu1 %v19720_v51  ;;  %12052 = vmatprep.subr.bf16.mxu0 %v19725_v5  ;;  %v19762_v51 = vld [vmem:[#allocation2 + $0x15e8] ss:$48 sps:$4 sm:$0xff]   ;;  %v19767_v5 = vld [vmem:[#allocation2 + $0xf8c] ss:$48 sps:$4 sm:$0xff]  }
 0x65a   :  { %12105 = vmatprep.subr.bf16.mxu1 %v19728_v28  ;;  %v19770_v28 = vld [vmem:[#allocation2 + $0x158c] ss:$48 sps:$4 sm:$0xff]  }
 0x65c   :  { %12053 = vmatpush1.bf16.msra.mxu0 %v19723_v32  ;;  %v19765_v32 = vld [vmem:[#allocation2 + $0xf88] ss:$48 sps:$4 sm:$0xff]  }
 0x65d   :  { %12106 = vmatpush1.bf16.msra.mxu1 %v19726_v24  ;;  %12054 = vmatprep.subr.bf16.mxu0 %v19731_v4  ;;  %v19768_v24 = vld [vmem:[#allocation2 + $0x1588] ss:$48 sps:$4 sm:$0xff]   ;;  %v19773_v4 = vld [vmem:[#allocation2 + $0xf2c] ss:$48 sps:$4 sm:$0xff]  }
 0x65e   :  { %12107 = vmatprep.subr.bf16.mxu1 %v19734_v39  ;;  %v19776_v39 = vld [vmem:[#allocation2 + $0x152c] ss:$48 sps:$4 sm:$0xff]  }
 0x660   :  { %12055 = vmatpush2.bf16.msra.mxu0 %v19729_v31  ;;  %v19771_v31 = vld [vmem:[#allocation2 + $0xf28] ss:$48 sps:$4 sm:$0xff]  }
 0x661   :  { %12108 = vmatpush2.bf16.msra.mxu1 %v19732_v37  ;;  %12056 = vmatprep.subr.bf16.mxu0 %v19737_v29  ;;  %v19774_v37 = vld [vmem:[#allocation2 + $0x1528] ss:$48 sps:$4 sm:$0xff]   ;;  %v19779_v29 = vld [vmem:[#allocation6 + $0x2a4] ss:$48 sps:$4 sm:$0xff]  }
 0x662   :  { %12109 = vmatprep.subr.bf16.mxu1 %v19740_v27  ;;  %v19782_v27 = vld [vmem:[#allocation6 + $0x2ac] ss:$48 sps:$4 sm:$0xff]  }
 0x664   :  { %12057 = vmatpush2.bf16.msra.mxu0 %v19735_v14  ;;  %v19777_v14 = vld [vmem:[#allocation6 + $0x2a0] ss:$48 sps:$4 sm:$0xff]  }
 0x665   :  { %12110 = vmatpush2.bf16.msra.mxu1 %v19738_v54  ;;  %12058 = vmatprep.subr.bf16.mxu0 %v19743_v8  ;;  %v19780_v54 = vld [vmem:[#allocation6 + $0x2a8] ss:$48 sps:$4 sm:$0xff]   ;;  %v19785_v8 = vld [vmem:[#allocation6 + $0x244] ss:$48 sps:$4 sm:$0xff]  }
 0x666   :  { %12111 = vmatprep.subr.bf16.mxu1 %v19746_v2  ;;  %v19788_v2 = vld [vmem:[#allocation6 + $0x24c] ss:$48 sps:$4 sm:$0xff]  }
 0x668   :  { %12059 = vmatpush2.bf16.msra.mxu0 %v19741_v6  ;;  %v22301_v6 = vld [vmem:[#allocation56_spill] sm:$0xff] }
 0x669   :  { %12112 = vmatpush2.bf16.msra.mxu1 %v19744_v1  ;;  %12060 = vmatprep.subr.bf16.mxu0 %v19749_v30  ;;  %v22302_v1 = vld [vmem:[#allocation57_spill] sm:$0xff] }
 0x66a   :  { %12113 = vmatprep.subr.bf16.mxu1 %v19752_v26  ;;  %v6622_v30 = vadd.f32 %v22302_v1, %v22301_v6  ;;  %v22308_v6 = vld [vmem:[#allocation58_spill] sm:$0xff] }
 0x66c   :  { %12061 = vmatpush2.bf16.msra.mxu0 %v19747_v60 }
 0x66d   :  { %12114 = vmatpush2.bf16.msra.mxu1 %v19750_v0  ;;  %12062 = vmatprep.subr.bf16.mxu0 %v19755_v21  ;;  %v22303_v0 = vld [vmem:[#allocation62_spill] sm:$0xff] }
 0x66e   :  { %12115 = vmatprep.subr.bf16.mxu1 %v19758_v25  ;;  %v6675_v21 = vadd.f32 %v22303_v0, %v6622_v30  ;;  %v22304_v25 = vld [vmem:[#allocation60_spill] sm:$0xff] }
 0x670   :  { %12063 = vmatpush2.bf16.msra.mxu0 %v19753_v45 }
 0x671   :  { %12116 = vmatpush2.bf16.msra.mxu1 %v19756_v22  ;;  %12064 = vmatprep.subr.bf16.mxu0 %v19761_v10  ;;  %v19783_v22 = vld [vmem:[#allocation6 + $0x240] ss:$48 sps:$4 sm:$0xff]   ;;  %v19786_v10 = vld [vmem:[#allocation6 + $0x248] ss:$48 sps:$4 sm:$0xff]  }
 0x672   :  { %12117 = vmatprep.subr.bf16.mxu1 %v19764_v57 }
 0x674   :  { %12065 = vmatpush2.bf16.msra.mxu0 %v19759_v43 }
 0x675   :  { %12118 = vmatpush2.bf16.msra.mxu1 %v19762_v51  ;;  %12066 = vmatprep.subr.bf16.mxu0 %v19767_v5  ;;  %v19791_v51 = vld [vmem:[#allocation6 + $0x1e4] ss:$48 sps:$4 sm:$0xff]   ;;  %v19794_v5 = vld [vmem:[#allocation6 + $0x1ec] ss:$48 sps:$4 sm:$0xff]  }
 0x676   :  { %12119 = vmatprep.subr.bf16.mxu1 %v19770_v28 }
 0x678   :  { %12067 = vmatpush2.bf16.msra.mxu0 %v19765_v32  ;;  %v22305_v32 = vld [vmem:[#allocation61_spill] sm:$0xff] }
 0x679   :  { %12120 = vmatpush2.bf16.msra.mxu1 %v19768_v24  ;;  %12068 = vmatprep.subr.bf16.mxu0 %v19773_v4  ;;  %v22306_v4 = vld [vmem:[#allocation63_spill] sm:$0xff] }
 0x67a   :  { %12121 = vmatprep.subr.bf16.mxu1 %v19776_v39  ;;  %v6728_v39 = vadd.f32 %v22306_v4, %v6675_v21  ;;  %v22310_v21 = vld [vmem:[#allocation68_spill] sm:$0xff] }
 0x67c   :  { %12069 = vmatpush2.bf16.msra.mxu0 %v19771_v31 }
 0x67d   :  { %12122 = vmatpush2.bf16.msra.mxu1 %v19774_v37  ;;  %12736 = vmatprep.subr.bf16.mxu0 %v19779_v29  ;;  %v22307_v37 = vld [vmem:[#allocation64_spill] sm:$0xff] }
 0x67e   :  { %12789 = vmatprep.subr.bf16.mxu1 %v19782_v27  ;;  %v19789_v27 = vld [vmem:[#allocation6 + $0x1e0] ss:$48 sps:$4 sm:$0xff]  }
 0x67f   :  { %v11754_v26 = vpop.f32.mrf.mxu0  ;;  %12071 = vmatmul.mubr.bf16.vlgmr.msra.gmra.mxu0 %v21149_v59 }
 0x680   :  { %v11807_v60 = vpop.f32.mrf.mxu1  ;;  %12124 = vmatmul.mubr.bf16.vlgmr.msra.gmra.mxu1 %v21153_v48  ;;  %v11755_v45 = vadd.f32 %v11754_v26, %v22304_v25  ;;  %12737 = vmatpush1.bf16.msra.mxu0 %v19777_v14  ;;  %v19792_v14 = vld [vmem:[#allocation6 + $0x1e8] ss:$48 sps:$4 sm:$0xff]  }
 0x681   :  { %12790 = vmatpush1.bf16.msra.mxu1 %v19780_v54  ;;  %v11756_v57 = vpop.f32.mrf.mxu0  ;;  %12738 = vmatprep.subr.bf16.mxu0 %v19785_v8 }
 0x682   :  { %v11809_v43 = vpop.f32.mrf.mxu1  ;;  %12791 = vmatprep.subr.bf16.mxu1 %v19788_v2  ;;  %v21510_v28 = vadd.f32 %v11807_v60, %v11755_v45  ;;  %v11757_v59 = vadd.f32 %v11756_v57, %v22305_v32  ;;  %12080 = vmatprep.mubr.bf16.mxu0 %v21159_v52  ;;  %v19797_v2 = vld [vmem:[#allocation6 + $0x184] ss:$48 sps:$4 sm:$0xff]   ;;  %v19800_v52 = vld [vmem:[#allocation6 + $0x18c] ss:$48 sps:$4 sm:$0xff]   ;;  %v19795_v57 = vld [vmem:[#allocation6 + $0x180] ss:$48 sps:$4 sm:$0xff]  }
 0x683   :  { %12133 = vmatprep.mubr.bf16.mxu1 %v21161_v35  ;;  %v11758_v48 = vpop.f32.mrf.mxu0  ;;  %v22309_v35 = vld [vmem:[#allocation59_spill] sm:$0xff] }
 0x684   :  { %v11811_v24 = vpop.f32.mrf.mxu1  ;;  %v21516_v31 = vadd.f32 %v11809_v43, %v11757_v59  ;;  %v11759_v29 = vadd.f32 %v11758_v48, %v22307_v37  ;;  %12739 = vmatpush1.bf16.msra.mxu0 %v19783_v22  ;;  %v6632_v1 = vadd.f32 %v22309_v35, %v22308_v6  ;;  %v22311_v22 = vld [vmem:[#allocation65_spill] sm:$0xff]  ;;  %v19806_v59 = vld [vmem:[#allocation6 + $0x12c] ss:$48 sps:$4 sm:$0xff]  }
 0x685   :  { %12792 = vmatpush1.bf16.msra.mxu1 %v19786_v10  ;;  %v11760_v54 = vpop.f32.mrf.mxu0  ;;  %12740 = vmatprep.subr.bf16.mxu0 %v19791_v51  ;;  %v19798_v43 = vld [vmem:[#allocation6 + $0x188] ss:$48 sps:$4 sm:$0xff]   ;;  %v19803_v32 = vld [vmem:[#allocation6 + $0x124] ss:$48 sps:$4 sm:$0xff]  }
 0x686   :  { %v11813_v8 = vpop.f32.mrf.mxu1  ;;  %12793 = vmatprep.subr.bf16.mxu1 %v19794_v5  ;;  %v21521_v30 = vadd.f32 %v11811_v24, %v11759_v29  ;;  %v11761_v26 = vadd.f32 %v11760_v54, %v6728_v39  ;;  %v6685_v25 = vadd.f32 %v22310_v21, %v6632_v1  ;;  %v22313_v37 = vld [vmem:[#allocation69_spill] sm:$0xff]  ;;  %v19812_v1 = vld [vmem:[#allocation6 + $0xcc] ss:$48 sps:$4 sm:$0xff]  }
 0x687   :  { %v11764_v60 = vpop.f32.mrf.mxu0  ;;  %12081 = vmatmul.mubr.bf16.gmra.mxu0 %v21171_v55  ;;  %v22312_v55 = vld [vmem:[#allocation66_spill] sm:$0xff]  ;;  %v19809_v35 = vld [vmem:[#allocation6 + $0xc4] ss:$48 sps:$4 sm:$0xff]  }
 0x688   :  { %v11817_v0 = vpop.f32.mrf.mxu1  ;;  %12134 = vmatmul.mubr.bf16.gmra.mxu1 %v21173_v13  ;;  %v21526_v45 = vadd.f32 %v11813_v8, %v11761_v26  ;;  %v11765_v10 = vadd.f32 %v11764_v60, %v22311_v22  ;;  %12741 = vmatpush1.bf16.msra.mxu0 %v19789_v27  ;;  %v20513_v13 = vmov 0   ;;  %v6738_v29 = vadd.f32 %v22313_v37, %v6685_v25  ;;  %v22314_v27 = vld [vmem:[#allocation67_spill] sm:$0xff] }
 0x689   :  { %12794 = vmatpush1.bf16.msra.mxu1 %v19792_v14  ;;  %v11766_v51 = vpop.f32.mrf.mxu0  ;;  %12742 = vmatprep.subr.bf16.mxu0 %v19797_v2  ;;  %v19801_v8 = vld [vmem:[#allocation6 + $0x120] ss:$48 sps:$4 sm:$0xff]   ;;  %v19804_v2 = vld [vmem:[#allocation6 + $0x128] ss:$48 sps:$4 sm:$0xff]   ;;  %v19815_v22 = vld [vmem:[#allocation6 + $0x64] ss:$48 sps:$4 sm:$0xff]  }
 0x68a   :  { %v11819_v5 = vpop.f32.mrf.mxu1  ;;  %12795 = vmatprep.subr.bf16.mxu1 %v19800_v52  ;;  %v11767_v48 = vadd.f32 %v11766_v51, %v22312_v55  ;;  %v21530_v24 = vadd.f32 %v11817_v0, %v11765_v10  ;;  %12768 = vmatprep.mubr.bf16.mxu0 %v20513_v13  ;;  %v19807_v21 = vld [vmem:[#allocation6 + $0xc0] ss:$48 sps:$4 sm:$0xff]   ;;  %v19810_v25 = vld [vmem:[#allocation6 + $0xc8] ss:$48 sps:$4 sm:$0xff]   ;;  %v19818_v10 = vld [vmem:[#allocation6 + $0x6c] ss:$48 sps:$4 sm:$0xff]  }
 0x68b   :  { %12821 = vmatprep.mubr.bf16.mxu1 %v20513_v13  ;;  %v11768_v4 = vpop.f32.mrf.mxu0  ;;  %v19821_v51 = vld [vmem:[#allocation6 + $0x4] ss:$48 sps:$4 sm:$0xff]   ;;  %v19829_v37 = vld [vmem:[#allocation6 + $0x2b8] ss:$48 sps:$4 sm:$0xff]  }
 0x68c   :  { %v11821_v39 = vpop.f32.mrf.mxu1  ;;  %v11769_v14 = vadd.f32 %v11768_v4, %v22314_v27  ;;  %v21536_v54 = vadd.f32 %v11819_v5, %v11767_v48  ;;  %12743 = vmatpush1.bf16.msra.mxu0 %v19795_v57  ;;  %v19813_v57 = vld [vmem:[#allocation6 + $0x60] ss:$48 sps:$4 sm:$0xff]   ;;  %v19824_v5 = vld [vmem:[#allocation6 + $0xc] ss:$48 sps:$4 sm:$0xff]   ;;  %v19828_v55 = vld [vmem:[#allocation6 + $0x2b4] ss:$48 sps:$4 sm:$0xff]  }
 0x68d   :  { %12796 = vmatpush1.bf16.msra.mxu1 %v19798_v43  ;;  %v11770_v52 = vpop.f32.mrf.mxu0  ;;  %12744 = vmatprep.subr.bf16.mxu0 %v19803_v32  ;;  %v19816_v43 = vld [vmem:[#allocation6 + $0x68] ss:$48 sps:$4 sm:$0xff]   ;;  %v19819_v32 = vld [vmem:[#allocation6] ss:$48 sps:$4 sm:$0xff]   ;;  %v19831_v48 = vld [vmem:[#allocation6 + $0x2bc] ss:$48 sps:$4 sm:$0xff]  }
 0x68e   :  { %v11823_v6 = vpop.f32.mrf.mxu1  ;;  %12797 = vmatprep.subr.bf16.mxu1 %v19806_v59  ;;  %v11771_v26 = vadd.f32 %v11770_v52, %v6738_v29  ;;  %v21538_v60 = vadd.f32 %v11821_v39, %v11769_v14  ;;  %v19822_v59 = vld [vmem:[#allocation6 + $0x8] ss:$48 sps:$4 sm:$0xff]   ;;  %v21545_v4 = vld [vmem:[%s22200_s2] sm:$0xff]   ;;  %v19837_v27 = vld [vmem:[#allocation6 + $0x25c] ss:$48 sps:$4 sm:$0xff]  }
 0x68f   :  { %v19826_v39 = vld [vmem:[#allocation6 + $0x2b0] ss:$48 sps:$4 sm:$0xff]   ;;  %v19834_v29 = vld [vmem:[#allocation6 + $0x254] ss:$48 sps:$4 sm:$0xff]   ;;  %v19844_v52 = vld [vmem:[#allocation6 + $0x1fc] ss:$48 sps:$4 sm:$0xff]  }
 0x690   :  { %v21540_v0 = vadd.f32 %v11823_v6, %v11771_v26  ;;  %12745 = vmatpush1.bf16.msra.mxu0 %v19801_v8  ;;  %v19832_v14 = vld [vmem:[#allocation6 + $0x250] ss:$48 sps:$4 sm:$0xff]   ;;  %v19835_v8 = vld [vmem:[#allocation6 + $0x258] ss:$48 sps:$4 sm:$0xff]   ;;  %v19847_v26 = vld [vmem:[#allocation6 + $0x194] ss:$48 sps:$4 sm:$0xff]  }
 0x691   :  { %12798 = vmatpush1.bf16.msra.mxu1 %v19804_v2  ;;  %12746 = vmatprep.subr.bf16.mxu0 %v19809_v35  ;;  %v19841_v2 = vld [vmem:[#allocation6 + $0x1f4] ss:$48 sps:$4 sm:$0xff]   ;;  %v21554_v6 = vld [vmem:[%s22200_s2 + $0x8] sm:$0xff]   ;;  %v19839_v35 = vld [vmem:[#allocation6 + $0x1f0] ss:$48 sps:$4 sm:$0xff]  }
 0x692   :  { %12799 = vmatprep.subr.bf16.mxu1 %v19812_v1  ;;  %v19842_v1 = vld [vmem:[#allocation6 + $0x1f8] ss:$48 sps:$4 sm:$0xff]  }
 0x694   :  { %12747 = vmatpush1.bf16.msra.mxu0 %v19807_v21  ;;  %v19850_v21 = vld [vmem:[#allocation6 + $0x19c] ss:$48 sps:$4 sm:$0xff]  }
 0x695   :  { %12800 = vmatpush1.bf16.msra.mxu1 %v19810_v25  ;;  %12748 = vmatprep.subr.bf16.mxu0 %v19815_v22  ;;  %v19845_v25 = vld [vmem:[#allocation6 + $0x190] ss:$48 sps:$4 sm:$0xff]   ;;  %v19848_v22 = vld [vmem:[#allocation6 + $0x198] ss:$48 sps:$4 sm:$0xff]  }
 0x696   :  { %12801 = vmatprep.subr.bf16.mxu1 %v19818_v10  ;;  %v19853_v10 = vld [vmem:[#allocation6 + $0x134] ss:$48 sps:$4 sm:$0xff]  }
 0x698   :  { %12749 = vmatpush1.bf16.msra.mxu0 %v19813_v57  ;;  %v19856_v57 = vld [vmem:[#allocation6 + $0x13c] ss:$48 sps:$4 sm:$0xff]  }
 0x699   :  { %12802 = vmatpush1.bf16.msra.mxu1 %v19816_v43  ;;  %12750 = vmatprep.subr.bf16.mxu0 %v19821_v51  ;;  %v19851_v43 = vld [vmem:[#allocation6 + $0x130] ss:$48 sps:$4 sm:$0xff]   ;;  %v19854_v51 = vld [vmem:[#allocation6 + $0x138] ss:$48 sps:$4 sm:$0xff]  }
 0x69a   :  { %12803 = vmatprep.subr.bf16.mxu1 %v19824_v5  ;;  %v19859_v5 = vld [vmem:[#allocation6 + $0xd4] ss:$48 sps:$4 sm:$0xff]  }
 0x69c   :  { %12751 = vmatpush1.bf16.msra.mxu0 %v19819_v32  ;;  %v19862_v32 = vld [vmem:[#allocation6 + $0xdc] ss:$48 sps:$4 sm:$0xff]  }
 0x69d   :  { %12804 = vmatpush1.bf16.msra.mxu1 %v19822_v59  ;;  %12842 = vmatprep.subr.bf16.mxu0 %v19828_v55  ;;  %v19857_v59 = vld [vmem:[#allocation6 + $0xd0] ss:$48 sps:$4 sm:$0xff]   ;;  %v19860_v55 = vld [vmem:[#allocation6 + $0xd8] ss:$48 sps:$4 sm:$0xff]  }
 0x69e   :  { %12895 = vmatprep.subr.bf16.mxu1 %v19831_v48  ;;  %v19865_v48 = vld [vmem:[#allocation6 + $0x74] ss:$48 sps:$4 sm:$0xff]  }
 0x69f   :  { %12769 = vmatmul.mubr.bf16.vlgmr.msra.gmra.mxu0 %v21545_v4 }
 0x6a0   :  { %12822 = vmatmul.mubr.bf16.vlgmr.msra.gmra.mxu1 %v21545_v4  ;;  %12843 = vmatpush1.bf16.msra.mxu0 %v19826_v39  ;;  %v19868_v39 = vld [vmem:[#allocation6 + $0x7c] ss:$48 sps:$4 sm:$0xff]  }
 0x6a1   :  { %12896 = vmatpush1.bf16.msra.mxu1 %v19829_v37  ;;  %12844 = vmatprep.subr.bf16.mxu0 %v19834_v29  ;;  %v19863_v37 = vld [vmem:[#allocation6 + $0x70] ss:$48 sps:$4 sm:$0xff]   ;;  %v19866_v29 = vld [vmem:[#allocation6 + $0x78] ss:$48 sps:$4 sm:$0xff]  }
 0x6a2   :  { %12897 = vmatprep.subr.bf16.mxu1 %v19837_v27  ;;  %12778 = vmatprep.mubr.bf16.mxu0 %v20513_v13  ;;  %v19871_v27 = vld [vmem:[#allocation6 + $0x14] ss:$48 sps:$4 sm:$0xff]  }
 0x6a3   :  { %12831 = vmatprep.mubr.bf16.mxu1 %v20513_v13 }
 0x6a4   :  { %12845 = vmatpush1.bf16.msra.mxu0 %v19832_v14  ;;  %v19874_v14 = vld [vmem:[#allocation6 + $0x1c] ss:$48 sps:$4 sm:$0xff]  }
 0x6a5   :  { %12898 = vmatpush1.bf16.msra.mxu1 %v19835_v8  ;;  %12846 = vmatprep.subr.bf16.mxu0 %v19841_v2  ;;  %v19869_v8 = vld [vmem:[#allocation6 + $0x10] ss:$48 sps:$4 sm:$0xff]   ;;  %v19872_v2 = vld [vmem:[#allocation6 + $0x18] ss:$48 sps:$4 sm:$0xff]  }
 0x6a6   :  { %12899 = vmatprep.subr.bf16.mxu1 %v19844_v52  ;;  %v19877_v52 = vld [vmem:[#allocation6 + $0x2c4] ss:$48 sps:$4 sm:$0xff]  }
 0x6a7   :  { %12779 = vmatmul.mubr.bf16.gmra.mxu0 %v21554_v6 }
 0x6a8   :  { %12832 = vmatmul.mubr.bf16.gmra.mxu1 %v21554_v6  ;;  %12847 = vmatpush1.bf16.msra.mxu0 %v19839_v35  ;;  %v19880_v35 = vld [vmem:[#allocation6 + $0x2cc] ss:$48 sps:$4 sm:$0xff]  }
 0x6a9   :  { %12900 = vmatpush1.bf16.msra.mxu1 %v19842_v1  ;;  %12848 = vmatprep.subr.bf16.mxu0 %v19847_v26  ;;  %v19875_v1 = vld [vmem:[#allocation6 + $0x2c0] ss:$48 sps:$4 sm:$0xff]   ;;  %v19878_v26 = vld [vmem:[#allocation6 + $0x2c8] ss:$48 sps:$4 sm:$0xff]  }
 0x6aa   :  { %12901 = vmatprep.subr.bf16.mxu1 %v19850_v21  ;;  %12874 = vmatprep.mubr.bf16.mxu0 %v20513_v13  ;;  %v19883_v21 = vld [vmem:[#allocation6 + $0x264] ss:$48 sps:$4 sm:$0xff]  }
 0x6ab   :  { %12927 = vmatprep.mubr.bf16.mxu1 %v20513_v13 }
 0x6ac   :  { %12849 = vmatpush1.bf16.msra.mxu0 %v19845_v25  ;;  %v19886_v25 = vld [vmem:[#allocation6 + $0x26c] ss:$48 sps:$4 sm:$0xff]  }
 0x6ad   :  { %12902 = vmatpush1.bf16.msra.mxu1 %v19848_v22  ;;  %12850 = vmatprep.subr.bf16.mxu0 %v19853_v10 }
 0x6ae   :  { %12903 = vmatprep.subr.bf16.mxu1 %v19856_v57 }
 0x6b0   :  { %12851 = vmatpush1.bf16.msra.mxu0 %v19851_v43  ;;  %v19881_v43 = vld [vmem:[#allocation6 + $0x260] ss:$48 sps:$4 sm:$0xff]  }
 0x6b1   :  { %12904 = vmatpush1.bf16.msra.mxu1 %v19854_v51  ;;  %12852 = vmatprep.subr.bf16.mxu0 %v19859_v5  ;;  %v19884_v51 = vld [vmem:[#allocation6 + $0x268] ss:$48 sps:$4 sm:$0xff]  }
 0x6b2   :  { %12905 = vmatprep.subr.bf16.mxu1 %v19862_v32 }
 0x6b4   :  { %12853 = vmatpush1.bf16.msra.mxu0 %v19857_v59  ;;  %v19889_v59 = vld [vmem:[#allocation6 + $0x204] ss:$48 sps:$4 sm:$0xff]  }
 0x6b5   :  { %12906 = vmatpush1.bf16.msra.mxu1 %v19860_v55  ;;  %12854 = vmatprep.subr.bf16.mxu0 %v19865_v48  ;;  %v19892_v55 = vld [vmem:[#allocation6 + $0x20c] ss:$48 sps:$4 sm:$0xff]  }
 0x6b6   :  { %12907 = vmatprep.subr.bf16.mxu1 %v19868_v39 }
 0x6b8   :  { %12855 = vmatpush1.bf16.msra.mxu0 %v19863_v37 }
 0x6b9   :  { %12908 = vmatpush1.bf16.msra.mxu1 %v19866_v29  ;;  %12856 = vmatprep.subr.bf16.mxu0 %v19871_v27 }
 0x6ba   :  { %12909 = vmatprep.subr.bf16.mxu1 %v19874_v14  ;;  %v19887_v14 = vld [vmem:[#allocation6 + $0x200] ss:$48 sps:$4 sm:$0xff]  }
 0x6bc   :  { %12857 = vmatpush1.bf16.msra.mxu0 %v19869_v8  ;;  %v19890_v8 = vld [vmem:[#allocation6 + $0x208] ss:$48 sps:$4 sm:$0xff]  }
 0x6bd   :  { %12910 = vmatpush1.bf16.msra.mxu1 %v19872_v2  ;;  %12948 = vmatprep.subr.bf16.mxu0 %v19877_v52 }
 0x6be   :  { %13001 = vmatprep.subr.bf16.mxu1 %v19880_v35  ;;  %v19895_v35 = vld [vmem:[#allocation6 + $0x1a4] ss:$48 sps:$4 sm:$0xff]  }
 0x6bf   :  { %v11860_v22 = vpop.f32.mrf.mxu0  ;;  %12875 = vmatmul.mubr.bf16.vlgmr.msra.gmra.mxu0 %v21545_v4 }
 0x6c0   :  { %v11913_v10 = vpop.f32.mrf.mxu1  ;;  %12928 = vmatmul.mubr.bf16.vlgmr.msra.gmra.mxu1 %v21545_v4  ;;  %v11861_v57 = vadd.f32 %v11860_v22, %v21510_v28  ;;  %12949 = vmatpush1.bf16.msra.mxu0 %v19875_v1 }
 0x6c1   :  { %13002 = vmatpush1.bf16.msra.mxu1 %v19878_v26  ;;  %v11862_v5 = vpop.f32.mrf.mxu0  ;;  %12950 = vmatprep.subr.bf16.mxu0 %v19883_v21 }
 0x6c2   :  { %v11915_v32 = vpop.f32.mrf.mxu1  ;;  %13003 = vmatprep.subr.bf16.mxu1 %v19886_v25  ;;  %v21563_v48 = vadd.f32 %v11913_v10, %v11861_v57  ;;  %v11863_v39 = vadd.f32 %v11862_v5, %v21516_v31  ;;  %12884 = vmatprep.mubr.bf16.mxu0 %v20513_v13  ;;  %v19898_v31 = vld [vmem:[#allocation6 + $0x1ac] ss:$48 sps:$4 sm:$0xff]   ;;  %v19893_v10 = vld [vmem:[#allocation6 + $0x1a0] ss:$48 sps:$4 sm:$0xff]   ;;  %v19896_v57 = vld [vmem:[#allocation6 + $0x1a8] ss:$48 sps:$4 sm:$0xff]  }
 0x6c3   :  { %12937 = vmatprep.mubr.bf16.mxu1 %v20513_v13  ;;  %v11864_v37 = vpop.f32.mrf.mxu0  ;;  %v19901_v5 = vld [vmem:[#allocation6 + $0x144] ss:$48 sps:$4 sm:$0xff]  }
 0x6c4   :  { %22315 = vst [vmem:[#allocation48_spill] sm:$0xff] %v21563_v48  ;;  %v11917_v28 = vpop.f32.mrf.mxu1  ;;  %v21568_v29 = vadd.f32 %v11915_v32, %v11863_v39  ;;  %v11865_v27 = vadd.f32 %v11864_v37, %v21521_v30  ;;  %12951 = vmatpush1.bf16.msra.mxu0 %v19881_v43  ;;  %v22355_v48 = vld [vmem:[#allocation33_spill] sm:$0xff] }
 0x6c5   :  { %13004 = vmatpush1.bf16.msra.mxu1 %v19884_v51  ;;  %v11866_v2 = vpop.f32.mrf.mxu0  ;;  %12952 = vmatprep.subr.bf16.mxu0 %v19889_v59 }
 0x6c6   :  { %22316 = vst [vmem:[#allocation46_spill] sm:$0xff] %v21568_v29  ;;  %v11919_v52 = vpop.f32.mrf.mxu1  ;;  %13005 = vmatprep.subr.bf16.mxu1 %v19892_v55  ;;  %v21571_v1 = vadd.f32 %v11917_v28, %v11865_v27  ;;  %v11867_v26 = vadd.f32 %v11866_v2, %v21526_v45  ;;  %v19904_v45 = vld [vmem:[#allocation6 + $0x14c] ss:$48 sps:$4 sm:$0xff]   ;;  %v19899_v28 = vld [vmem:[#allocation6 + $0x140] ss:$48 sps:$4 sm:$0xff]  }
 0x6c7   :  { %v11870_v21 = vpop.f32.mrf.mxu0  ;;  %12885 = vmatmul.mubr.bf16.gmra.mxu0 %v21554_v6  ;;  %v19902_v27 = vld [vmem:[#allocation6 + $0x148] ss:$48 sps:$4 sm:$0xff]   ;;  %v19910_v2 = vld [vmem:[#allocation6 + $0xec] ss:$48 sps:$4 sm:$0xff]  }
 0x6c8   :  { %22317 = vst [vmem:[#allocation47_spill] sm:$0xff] %v21571_v1  ;;  %12938 = vmatmul.mubr.bf16.gmra.mxu1 %v21554_v6  ;;  %v11923_v30 = vpop.f32.mrf.mxu1  ;;  %v21576_v25 = vadd.f32 %v11919_v52, %v11867_v26  ;;  %v11871_v22 = vadd.f32 %v11870_v21, %v21530_v24  ;;  %12953 = vmatpush1.bf16.msra.mxu0 %v19887_v14  ;;  %v19908_v26 = vld [vmem:[#allocation6 + $0xe8] ss:$48 sps:$4 sm:$0xff]   ;;  %v19913_v21 = vld [vmem:[#allocation6 + $0x84] ss:$48 sps:$4 sm:$0xff]  }
 0x6c9   :  { %13006 = vmatpush1.bf16.msra.mxu1 %v19890_v8  ;;  %v11872_v43 = vpop.f32.mrf.mxu0  ;;  %12954 = vmatprep.subr.bf16.mxu0 %v19895_v35  ;;  %v22350_v1 = vld [vmem:[#allocation24_spill] sm:$0xff]  ;;  %v22352_v29 = vld [vmem:[#allocation30_spill] sm:$0xff] }
 0x6ca   :  { %22318 = vst [vmem:[#allocation49_spill] sm:$0xff] %v21576_v25  ;;  %v11925_v51 = vpop.f32.mrf.mxu1  ;;  %13007 = vmatprep.subr.bf16.mxu1 %v19898_v31  ;;  %v11873_v32 = vadd.f32 %v11872_v43, %v21536_v54  ;;  %v21580_v59 = vadd.f32 %v11923_v30, %v11871_v22  ;;  %12980 = vmatprep.mubr.bf16.mxu0 %v20513_v13  ;;  %v19907_v54 = vld [vmem:[#allocation6 + $0xe4] ss:$48 sps:$4 sm:$0xff]   ;;  %v19916_v30 = vld [vmem:[#allocation6 + $0x8c] ss:$48 sps:$4 sm:$0xff]  }
 0x6cb   :  { %13033 = vmatprep.mubr.bf16.mxu1 %v20513_v13  ;;  %v11874_v55 = vpop.f32.mrf.mxu0  ;;  %v19911_v22 = vld [vmem:[#allocation6 + $0x80] ss:$48 sps:$4 sm:$0xff]  }
 0x6cc   :  { %22319 = vst [vmem:[#allocation50_spill] sm:$0xff] %v21580_v59  ;;  %v11927_v24 = vpop.f32.mrf.mxu1  ;;  %v11875_v39 = vadd.f32 %v11874_v55, %v21538_v60  ;;  %v21585_v37 = vadd.f32 %v11925_v51, %v11873_v32  ;;  %12955 = vmatpush1.bf16.msra.mxu0 %v19893_v10  ;;  %v19905_v60 = vld [vmem:[#allocation6 + $0xe0] ss:$48 sps:$4 sm:$0xff]   ;;  %v19914_v10 = vld [vmem:[#allocation6 + $0x88] ss:$48 sps:$4 sm:$0xff]  }
 0x6cd   :  { %13008 = vmatpush1.bf16.msra.mxu1 %v19896_v57  ;;  %v11876_v14 = vpop.f32.mrf.mxu0  ;;  %12956 = vmatprep.subr.bf16.mxu0 %v19901_v5  ;;  %v19919_v57 = vld [vmem:[#allocation6 + $0x24] ss:$48 sps:$4 sm:$0xff]   ;;  %v19917_v43 = vld [vmem:[#allocation6 + $0x20] ss:$48 sps:$4 sm:$0xff]   ;;  %v19920_v51 = vld [vmem:[#allocation6 + $0x28] ss:$48 sps:$4 sm:$0xff]  }
 0x6ce   :  { %22320 = vst [vmem:[#allocation44_spill] sm:$0xff] %v21585_v37  ;;  %v11929_v8 = vpop.f32.mrf.mxu1  ;;  %13009 = vmatprep.subr.bf16.mxu1 %v19904_v45  ;;  %v11877_v52 = vadd.f32 %v11876_v14, %v21540_v0  ;;  %v21588_v35 = vadd.f32 %v11927_v24, %v11875_v39  ;;  %v19922_v0 = vld [vmem:[#allocation6 + $0x2c] ss:$48 sps:$4 sm:$0xff]   ;;  %v19925_v45 = vld [vmem:[#allocation9 + $0x154] ss:$24 sps:$4 sm:$0xff]  }
 0x6cf   :  { %v19923_v5 = vld [vmem:[#allocation9 + $0x150] ss:$24 sps:$4 sm:$0xff]   ;;  %v19928_v55 = vld [vmem:[#allocation9 + $0x454] ss:$24 sps:$4 sm:$0xff]   ;;  %v19931_v24 = vld [vmem:[#allocation9 + $0x124] ss:$24 sps:$4 sm:$0xff]  }
 0x6d0   :  { %22321 = vst [vmem:[#allocation45_spill] sm:$0xff] %v21588_v35  ;;  %v21590_v31 = vadd.f32 %v11929_v8, %v11877_v52  ;;  %12957 = vmatpush1.bf16.msra.mxu0 %v19899_v28  ;;  %v19926_v32 = vld [vmem:[#allocation9 + $0x450] ss:$24 sps:$4 sm:$0xff]   ;;  %v19934_v39 = vld [vmem:[#allocation9 + $0x424] ss:$24 sps:$4 sm:$0xff]  }
 0x6d1   :  { %13010 = vmatpush1.bf16.msra.mxu1 %v19902_v27  ;;  %12958 = vmatprep.subr.bf16.mxu0 %v19907_v54  ;;  %v19929_v28 = vld [vmem:[#allocation9 + $0x120] ss:$24 sps:$4 sm:$0xff]   ;;  %v19937_v27 = vld [vmem:[#allocation9 + $0xf4] ss:$24 sps:$4 sm:$0xff]   ;;  %v19935_v14 = vld [vmem:[#allocation9 + $0xf0] ss:$24 sps:$4 sm:$0xff]  }
 0x6d2   :  { %22322 = vst [vmem:[#allocation54_spill] sm:$0xff] %v21590_v31  ;;  %13011 = vmatprep.subr.bf16.mxu1 %v19910_v2  ;;  %v22323_v8 = vld [vmem:[#allocation70_spill] sm:$0xff]  ;;  %v22324_v54 = vld [vmem:[#allocation71_spill] sm:$0xff] }
 0x6d3   :  { %v6834_v2 = vadd.f32 %v22324_v54, %v22323_v8  ;;  %v22348_v31 = vld [vmem:[#allocation34_spill] sm:$0xff]  ;;  %v22349_v35 = vld [vmem:[#allocation35_spill] sm:$0xff] }
 0x6d4   :  { %12959 = vmatpush1.bf16.msra.mxu0 %v19905_v60  ;;  %v5996_v37 = vadd.f32 %v22349_v35, %v22348_v31 }
 0x6d5   :  { %13012 = vmatpush1.bf16.msra.mxu1 %v19908_v26  ;;  %12960 = vmatprep.subr.bf16.mxu0 %v19913_v21  ;;  %v6887_v26 = vadd.f32 %v21206_v7, %v6834_v2  ;;  %v22325_v21 = vld [vmem:[#allocation74_spill] sm:$0xff]  ;;  %v22326_v7 = vld [vmem:[#allocation75_spill] sm:$0xff]  ;;  %v19947_v2 = vld [vmem:[#allocation9 + $0x90] ss:$24 sps:$4 sm:$0xff]  }
 0x6d6   :  { %13013 = vmatprep.subr.bf16.mxu1 %v19916_v30 }
 0x6d8   :  { %12961 = vmatpush1.bf16.msra.mxu0 %v19911_v22 }
 0x6d9   :  { %13014 = vmatpush1.bf16.msra.mxu1 %v19914_v10  ;;  %12962 = vmatprep.subr.bf16.mxu0 %v19919_v57  ;;  %v19943_v57 = vld [vmem:[#allocation9 + $0xc4] ss:$24 sps:$4 sm:$0xff]  }
 0x6da   :  { %13015 = vmatprep.subr.bf16.mxu1 %v19922_v0  ;;  %v19946_v0 = vld [vmem:[#allocation9 + $0x3c4] ss:$24 sps:$4 sm:$0xff]  }
 0x6dc   :  { %12963 = vmatpush1.bf16.msra.mxu0 %v19917_v43 }
 0x6dd   :  { %13016 = vmatpush1.bf16.msra.mxu1 %v19920_v51  ;;  %14458 = vmatprep.subr.bf16.mxu0 %v19925_v45  ;;  %v19944_v45 = vld [vmem:[#allocation9 + $0x3c0] ss:$24 sps:$4 sm:$0xff]  }
 0x6de   :  { %14511 = vmatprep.subr.bf16.mxu1 %v19928_v55 }
 0x6df   :  { %12981 = vmatmul.mubr.bf16.vlgmr.msra.gmra.mxu0 %v21545_v4 }
 0x6e0   :  { %13034 = vmatmul.mubr.bf16.vlgmr.msra.gmra.mxu1 %v21545_v4  ;;  %12990 = vmatprep.mubr.bf16.mxu0 %v20513_v13  ;;  %v19932_v4 = vld [vmem:[#allocation9 + $0x420] ss:$24 sps:$4 sm:$0xff]  }
 0x6e1   :  { %13043 = vmatprep.mubr.bf16.mxu1 %v20513_v13  ;;  %14459 = vmatpush1.bf16.msra.mxu0 %v19923_v5  ;;  %v19940_v13 = vld [vmem:[#allocation9 + $0x3f4] ss:$24 sps:$4 sm:$0xff]   ;;  %v19941_v5 = vld [vmem:[#allocation9 + $0xc0] ss:$24 sps:$4 sm:$0xff]  }
 0x6e2   :  { %14512 = vmatpush1.bf16.msra.mxu1 %v19926_v32  ;;  %14460 = vmatprep.subr.bf16.mxu0 %v19931_v24  ;;  %v6940_v24 = vadd.f32 %v21208_v42, %v6887_v26 }
 0x6e3   :  { %14513 = vmatprep.subr.bf16.mxu1 %v19934_v39 }
 0x6e5   :  { %14461 = vmatpush1.bf16.msra.mxu0 %v19929_v28 }
 0x6e6   :  { %14514 = vmatpush1.bf16.msra.mxu1 %v19932_v4  ;;  %14462 = vmatprep.subr.bf16.mxu0 %v19937_v27 }
 0x6e7   :  { %12991 = vmatmul.mubr.bf16.gmra.mxu0 %v21554_v6  ;;  %14515 = vmatprep.subr.bf16.mxu1 %v19940_v13 }
 0x6e8   :  { %13044 = vmatmul.mubr.bf16.gmra.mxu1 %v21554_v6  ;;  %v19938_v6 = vld [vmem:[#allocation9 + $0x3f0] ss:$24 sps:$4 sm:$0xff]  }
 0x6e9   :  { %14463 = vmatpush1.bf16.msra.mxu0 %v19935_v14 }
 0x6ea   :  { %14516 = vmatpush1.bf16.msra.mxu1 %v19938_v6  ;;  %14464 = vmatprep.subr.bf16.mxu0 %v19943_v57  ;;  %v19952_v6 = vld [vmem:[#allocation9 + $0x394] ss:$24 sps:$4 sm:$0xff]   ;;  %v19955_v57 = vld [vmem:[#allocation9 + $0x64] ss:$24 sps:$4 sm:$0xff]  }
 0x6eb   :  { %14517 = vmatprep.subr.bf16.mxu1 %v19946_v0  ;;  %v19956_v0 = vld [vmem:[#allocation9 + $0x360] ss:$24 sps:$4 sm:$0xff]  }
 0x6ed   :  { %14465 = vmatpush1.bf16.msra.mxu0 %v19941_v5 }
 0x6ee   :  { %14518 = vmatpush1.bf16.msra.mxu1 %v19944_v45  ;;  %v19959_v45 = vld [vmem:[#allocation9 + $0x30] ss:$24 sps:$4 sm:$0xff]  }
 0x6ef   :  { %14519 = vmatprep.subr.bf16.mxu1 %v19952_v6  ;;  %v19974_v6 = vld [vmem:[#allocation9 + $0x5d0] ss:$24 sps:$4 sm:$0xff]  }
 0x6ff   :  { %v11966_v52 = vpop.f32.mrf.mxu0 }
 0x700   :  { %v12019_v60 = vpop.f32.mrf.mxu1  ;;  %v11967_v30 = vadd.f32 %v11966_v52, %v22325_v21  ;;  %v19950_v52 = vld [vmem:[#allocation9 + $0x390] ss:$24 sps:$4 sm:$0xff]  }
 0x701   :  { %v11968_v22 = vpop.f32.mrf.mxu0  ;;  %14520 = vmatpush1.bf16.msra.mxu1 %v19950_v52  ;;  %v19982_v52 = vld [vmem:[#allocation9 + $0x5a4] ss:$24 sps:$4 sm:$0xff]  }
 0x702   :  { %v12021_v10 = vpop.f32.mrf.mxu1  ;;  %v21602_v43 = vadd.f32 %v12019_v60, %v11967_v30  ;;  %v11969_v51 = vadd.f32 %v11968_v22, %v21203_v9  ;;  %v19949_v9 = vld [vmem:[#allocation9 + $0x94] ss:$24 sps:$4 sm:$0xff]  }
 0x703   :  { %v11970_v32 = vpop.f32.mrf.mxu0  ;;  %14466 = vmatprep.subr.bf16.mxu0 %v19949_v9  ;;  %v19971_v9 = vld [vmem:[#allocation9 + $0x2d0] ss:$24 sps:$4 sm:$0xff]  }
 0x704   :  { %v12023_v55 = vpop.f32.mrf.mxu1  ;;  %v21606_v39 = vadd.f32 %v12021_v10, %v11969_v51  ;;  %v11971_v28 = vadd.f32 %v11970_v32, %v22326_v7  ;;  %14467 = vmatpush1.bf16.msra.mxu0 %v19947_v2  ;;  %v19953_v10 = vld [vmem:[#allocation9 + $0x60] ss:$24 sps:$4 sm:$0xff]   ;;  %v19958_v51 = vld [vmem:[#allocation9 + $0x364] ss:$24 sps:$4 sm:$0xff]   ;;  %v19961_v32 = vld [vmem:[#allocation9 + $0x34] ss:$24 sps:$4 sm:$0xff]  }
 0x705   :  { %v11972_v4 = vpop.f32.mrf.mxu0  ;;  %14468 = vmatprep.subr.bf16.mxu0 %v19955_v57  ;;  %14521 = vmatprep.subr.bf16.mxu1 %v19958_v51  ;;  %v19967_v7 = vld [vmem:[#allocation9 + $0x4] ss:$24 sps:$4 sm:$0xff]   ;;  %v19983_v57 = vld [vmem:[#allocation9 + $0x270] ss:$24 sps:$4 sm:$0xff]   ;;  %v19989_v51 = vld [vmem:[#allocation9 + $0x240] ss:$24 sps:$4 sm:$0xff]  }
 0x706   :  { %v12025_v27 = vpop.f32.mrf.mxu1  ;;  %v21609_v13 = vadd.f32 %v12023_v55, %v11971_v28  ;;  %v11973_v14 = vadd.f32 %v11972_v4, %v6940_v24  ;;  %14522 = vmatpush1.bf16.msra.mxu1 %v19956_v0  ;;  %v19962_v55 = vld [vmem:[#allocation9 + $0x330] ss:$24 sps:$4 sm:$0xff]   ;;  %v19964_v24 = vld [vmem:[#allocation9 + $0x334] ss:$24 sps:$4 sm:$0xff]   ;;  %v19970_v28 = vld [vmem:[#allocation9 + $0x304] ss:$24 sps:$4 sm:$0xff]  }
 0x707   :  { %v21611_v8 = vpop.f32.mrf.mxu0  ;;  %14523 = vmatprep.subr.bf16.mxu1 %v19964_v24  ;;  %v19968_v4 = vld [vmem:[#allocation9 + $0x300] ss:$24 sps:$4 sm:$0xff]   ;;  %v19979_v2 = vld [vmem:[#allocation9 + $0x2a4] ss:$24 sps:$4 sm:$0xff]   ;;  %v19986_v0 = vld [vmem:[#allocation9 + $0x570] ss:$24 sps:$4 sm:$0xff]  }
 0x708   :  { %v21613_v54 = vpop.f32.mrf.mxu1  ;;  %v21615_v42 = vadd.f32 %v12025_v27, %v11973_v14  ;;  %14469 = vmatpush1.bf16.msra.mxu0 %v19953_v10  ;;  %v19973_v27 = vld [vmem:[#allocation9 + $0x2d4] ss:$24 sps:$4 sm:$0xff]  }
 0x709   :  { %22327 = vst [vmem:[#allocation51_spill] sm:$0xff] %v21613_v54  ;;  %v21617_v60 = vpop.f32.mrf.mxu0  ;;  %14470 = vmatprep.subr.bf16.mxu0 %v19961_v32  ;;  %v19976_v14 = vld [vmem:[#allocation9 + $0x5d4] ss:$24 sps:$4 sm:$0xff]   ;;  %v19992_v32 = vld [vmem:[#allocation9 + $0x540] ss:$24 sps:$4 sm:$0xff]  }
 0x70a   :  { %22328 = vst [vmem:[#allocation52_spill] sm:$0xff] %v21615_v42  ;;  %v21619_v26 = vpop.f32.mrf.mxu1  ;;  %14524 = vmatpush1.bf16.msra.mxu1 %v19962_v55  ;;  %v19988_v10 = vld [vmem:[#allocation9 + $0x574] ss:$24 sps:$4 sm:$0xff]   ;;  %v19994_v55 = vld [vmem:[#allocation9 + $0x544] ss:$24 sps:$4 sm:$0xff]  }
 0x70b   :  { %22329 = vst [vmem:[#allocation55_spill] sm:$0xff] %v21619_v26  ;;  %v11980_v21 = vpop.f32.mrf.mxu0  ;;  %14525 = vmatprep.subr.bf16.mxu1 %v19970_v28  ;;  %v19997_v24 = vld [vmem:[#allocation9 + $0x214] ss:$24 sps:$4 sm:$0xff]   ;;  %v19995_v28 = vld [vmem:[#allocation9 + $0x210] ss:$24 sps:$4 sm:$0xff]  }
 0x70c   :  { %v12033_v30 = vpop.f32.mrf.mxu1  ;;  %v11981_v22 = vadd.f32 %v11980_v21, %v21223_v23  ;;  %14471 = vmatpush1.bf16.msra.mxu0 %v19959_v45  ;;  %v19965_v23 = vld [vmem:[#allocation9] ss:$24 sps:$4 sm:$0xff]   ;;  %v19991_v45 = vld [vmem:[#allocation9 + $0x244] ss:$24 sps:$4 sm:$0xff]  }
 0x70d   :  { %14472 = vmatprep.subr.bf16.mxu0 %v19967_v7  ;;  %v19977_v21 = vld [vmem:[#allocation9 + $0x2a0] ss:$24 sps:$4 sm:$0xff]   ;;  %v20000_v7 = vld [vmem:[#allocation9 + $0x514] ss:$24 sps:$4 sm:$0xff]  }
 0x70e   :  { %v21622_v5 = vadd.f32 %v12033_v30, %v11981_v22  ;;  %14526 = vmatpush1.bf16.msra.mxu1 %v19968_v4  ;;  %v19980_v30 = vld [vmem:[#allocation9 + $0x5a0] ss:$24 sps:$4 sm:$0xff]   ;;  %v19985_v22 = vld [vmem:[#allocation9 + $0x274] ss:$24 sps:$4 sm:$0xff]   ;;  %v20003_v4 = vld [vmem:[#allocation9 + $0x1e4] ss:$24 sps:$4 sm:$0xff]  }
 0x70f   :  { %14527 = vmatprep.subr.bf16.mxu1 %v19976_v14  ;;  %v20001_v14 = vld [vmem:[#allocation9 + $0x1e0] ss:$24 sps:$4 sm:$0xff]  }
 0x710   :  { %22330 = vst [vmem:[#allocation53_spill] sm:$0xff] %v21622_v5  ;;  %14473 = vmatpush1.bf16.msra.mxu0 %v19965_v23  ;;  %v19998_v23 = vld [vmem:[#allocation9 + $0x510] ss:$24 sps:$4 sm:$0xff]   ;;  %v22353_v5 = vld [vmem:[#allocation38_spill] sm:$0xff] }
 0x711   :  { %14474 = vmatprep.subr.bf16.mxu0 %v19973_v27  ;;  %v20006_v27 = vld [vmem:[#allocation9 + $0x4e4] ss:$24 sps:$4 sm:$0xff]  }
 0x712   :  { %14528 = vmatpush2.bf16.msra.mxu1 %v19974_v6  ;;  %v20009_v6 = vld [vmem:[#allocation9 + $0x1b4] ss:$24 sps:$4 sm:$0xff]  }
 0x713   :  { %14529 = vmatprep.subr.bf16.mxu1 %v19982_v52  ;;  %v20007_v52 = vld [vmem:[#allocation9 + $0x1b0] ss:$24 sps:$4 sm:$0xff]  }
 0x714   :  { %14475 = vmatpush2.bf16.msra.mxu0 %v19971_v9  ;;  %v20004_v9 = vld [vmem:[#allocation9 + $0x4e0] ss:$24 sps:$4 sm:$0xff]  }
 0x715   :  { %14476 = vmatprep.subr.bf16.mxu0 %v19979_v2  ;;  %v20012_v2 = vld [vmem:[#allocation9 + $0x4b4] ss:$24 sps:$4 sm:$0xff]  }
 0x716   :  { %14530 = vmatpush2.bf16.msra.mxu1 %v19980_v30  ;;  %v20015_v30 = vld [vmem:[#allocation9 + $0x184] ss:$24 sps:$4 sm:$0xff]  }
 0x717   :  { %14531 = vmatprep.subr.bf16.mxu1 %v19988_v10  ;;  %v20013_v10 = vld [vmem:[#allocation9 + $0x180] ss:$24 sps:$4 sm:$0xff]  }
 0x718   :  { %14477 = vmatpush2.bf16.msra.mxu0 %v19977_v21  ;;  %v20010_v21 = vld [vmem:[#allocation9 + $0x4b0] ss:$24 sps:$4 sm:$0xff]  }
 0x719   :  { %14478 = vmatprep.subr.bf16.mxu0 %v19985_v22  ;;  %v20018_v22 = vld [vmem:[#allocation9 + $0x484] ss:$24 sps:$4 sm:$0xff]  }
 0x71a   :  { %14532 = vmatpush2.bf16.msra.mxu1 %v19986_v0  ;;  %v20021_v0 = vld [vmem:[#allocation9 + $0x15c] ss:$24 sps:$4 sm:$0xff]  }
 0x71b   :  { %14533 = vmatprep.subr.bf16.mxu1 %v19994_v55 }
 0x71c   :  { %14479 = vmatpush2.bf16.msra.mxu0 %v19983_v57  ;;  %v20016_v57 = vld [vmem:[#allocation9 + $0x480] ss:$24 sps:$4 sm:$0xff]  }
 0x71d   :  { %14480 = vmatprep.subr.bf16.mxu0 %v19991_v45  ;;  %v20024_v45 = vld [vmem:[#allocation9 + $0x45c] ss:$24 sps:$4 sm:$0xff]  }
 0x71e   :  { %14534 = vmatpush2.bf16.msra.mxu1 %v19992_v32  ;;  %v21626_v32 = vpop.f32.mrf.mxu1 }
 0x71f   :  { %14535 = vmatprep.subr.bf16.mxu1 %v20000_v7  ;;  %22331 = vst [vmem:[#allocation56_spill] sm:$0xff] %v21626_v32 }
 0x720   :  { %14481 = vmatpush2.bf16.msra.mxu0 %v19989_v51  ;;  %v21624_v51 = vpop.f32.mrf.mxu0 }
 0x721   :  { %14482 = vmatprep.subr.bf16.mxu0 %v19997_v24 }
 0x722   :  { %14536 = vmatpush2.bf16.msra.mxu1 %v19998_v23 }
 0x723   :  { %14537 = vmatprep.subr.bf16.mxu1 %v20006_v27 }
 0x724   :  { %14483 = vmatpush2.bf16.msra.mxu0 %v19995_v28 }
 0x725   :  { %14484 = vmatprep.subr.bf16.mxu0 %v20003_v4 }
 0x726   :  { %14538 = vmatpush2.bf16.msra.mxu1 %v20004_v9 }
 0x727   :  { %14539 = vmatprep.subr.bf16.mxu1 %v20012_v2 }
 0x728   :  { %14485 = vmatpush2.bf16.msra.mxu0 %v20001_v14 }
 0x729   :  { %14486 = vmatprep.subr.bf16.mxu0 %v20009_v6 }
 0x72a   :  { %14540 = vmatpush2.bf16.msra.mxu1 %v20010_v21 }
 0x72b   :  { %14541 = vmatprep.subr.bf16.mxu1 %v20018_v22 }
 0x72c   :  { %14487 = vmatpush2.bf16.msra.mxu0 %v20007_v52 }
 0x72d   :  { %14488 = vmatprep.subr.bf16.mxu0 %v20015_v30 }
 0x72e   :  { %14542 = vmatpush2.bf16.msra.mxu1 %v20016_v57  ;;  %v22346_v57 = vld [vmem:[#allocation26_spill] sm:$0xff] }
 0x72f   :  { %14617 = vmatprep.subr.bf16.mxu1 %v20024_v45 }
 0x730   :  { %14489 = vmatpush2.bf16.msra.mxu0 %v20013_v10 }
 0x731   :  { %14564 = vmatprep.subr.bf16.mxu0 %v20021_v0  ;;  %v22347_v0 = vld [vmem:[#allocation27_spill] sm:$0xff] }
 0x732   :  { %v5784_v45 = vadd.f32 %v22347_v0, %v22346_v57  ;;  %v22356_v0 = vld [vmem:[#allocation28_spill] sm:$0xff] }
 0x73f   :  { %v21628_v55 = vpop.f32.mrf.mxu0 }
 0x740   :  { %v21630_v24 = vpop.f32.mrf.mxu1 }
 0x741   :  { %22332 = vst [vmem:[#allocation57_spill] sm:$0xff] %v21630_v24  ;;  %v21632_v7 = vpop.f32.mrf.mxu0  ;;  %v22371_v24 = vld [vmem:[#allocation82_spill] sm:$0xff] }
 0x742   :  { %v21634_v28 = vpop.f32.mrf.mxu1 }
 0x743   :  { %22333 = vst [vmem:[#allocation62_spill] sm:$0xff] %v21634_v28  ;;  %v21636_v23 = vpop.f32.mrf.mxu0  ;;  %v22359_v28 = vld [vmem:[#allocation39_spill] sm:$0xff] }
 0x744   :  { %22334 = vst [vmem:[#allocation60_spill] sm:$0xff] %v21636_v23  ;;  %v21638_v4 = vpop.f32.mrf.mxu1 }
 0x745   :  { %22335 = vst [vmem:[#allocation61_spill] sm:$0xff] %v21638_v4  ;;  %v21640_v27 = vpop.f32.mrf.mxu0 }
 0x746   :  { %22336 = vst [vmem:[#allocation63_spill] sm:$0xff] %v21640_v27  ;;  %v21642_v14 = vpop.f32.mrf.mxu1 }
 0x747   :  { %22337 = vst [vmem:[#allocation64_spill] sm:$0xff] %v21642_v14  ;;  %v21644_v9 = vpop.f32.mrf.mxu0  ;;  %v22351_v14 = vld [vmem:[#allocation25_spill] sm:$0xff] }
 0x748   :  { %22338 = vst [vmem:[#allocation58_spill] sm:$0xff] %v21644_v9  ;;  %v21646_v6 = vpop.f32.mrf.mxu1 }
 0x749   :  { %22339 = vst [vmem:[#allocation59_spill] sm:$0xff] %v21646_v6  ;;  %v21648_v2 = vpop.f32.mrf.mxu0  ;;  %v173_v6 = vlaneseq }
 0x74a   :  { %22340 = vst [vmem:[#allocation68_spill] sm:$0xff] %v21648_v2  ;;  %v21650_v52 = vpop.f32.mrf.mxu1 }
 0x74b   :  { %22341 = vst [vmem:[#allocation65_spill] sm:$0xff] %v21650_v52  ;;  %v21652_v21 = vpop.f32.mrf.mxu0  ;;  %v5774_v52 = vadd.f32 %v22351_v14, %v22350_v1  ;;  %v22357_v1 = vld [vmem:[#allocation36_spill] sm:$0xff] }
 0x74c   :  { %22342 = vst [vmem:[#allocation66_spill] sm:$0xff] %v21652_v21  ;;  %v21654_v30 = vpop.f32.mrf.mxu1  ;;  %v5837_v21 = vadd.f32 %v22352_v29, %v5784_v45  ;;  %v22358_v45 = vld [vmem:[#allocation31_spill] sm:$0xff] }
 0x74d   :  { %22343 = vst [vmem:[#allocation69_spill] sm:$0xff] %v21654_v30  ;;  %v21656_v22 = vpop.f32.mrf.mxu0  ;;  %v6049_v30 = vadd.f32 %v22353_v5, %v5996_v37  ;;  %v5827_v2 = vadd.f32 %v22356_v0, %v5774_v52  ;;  %v21680_v5 = vshrl.u32 %v173_v6, 7 }
 0x74e   :  { %22344 = vst [vmem:[#allocation67_spill] sm:$0xff] %v21656_v22  ;;  %v21658_v10 = vpop.f32.mrf.mxu1  ;;  %v5890_v42 = vadd.f32 %v22358_v45, %v5837_v21 }
 0x74f   :  { %22345 = vst [vmem:[#allocation70_spill] sm:$0xff] %v21658_v10  ;;  %v22354_v10 = vld [vmem:[#allocation32_spill] sm:$0xff]  ;;  %vm13144_vm0 = vcmp.lt.s32.totalorder %v21680_v5, 1  ;;  %vm13229_vm2 = vcmp.lt.s32.totalorder %v21680_v5, 7 }
 0x750   :  { %v5986_v57 = vadd.f32 %v22355_v48, %v22354_v10  ;;  %v6102_v48 = vadd.f32 %v22359_v28, %v6049_v30 }
 0x752   :  { %v6039_v14 = vadd.f32 %v22357_v1, %v5986_v57  ;;  %v22361_v57 = vld [vmem:[#allocation37_spill] sm:$0xff]  ;;  %v22362_v1 = vld [vmem:[#allocation40_spill] sm:$0xff] }
 0x754   :  { %v6092_v21 = vadd.f32 %v22361_v57, %v6039_v14 }
 0x75f   :  { %v12770_v59 = vpop.f32.mrf.mxu0 }
 0x760   :  { %v12823_v25 = vpop.f32.mrf.mxu1  ;;  %v13054_v35 = vadd.f32 %v12770_v59, %v21266_v61 }
 0x761   :  { %v21668_v4 = vpop.f32.mrf.mxu0  ;;  %v13056_v31 = vadd.f32 %v12823_v25, %v21334_v17  ;;  %v10923_v17 = vadd.f32 %v21259_v15, %v5890_v42  ;;  %v11135_v25 = vadd.f32 %v21327_v19, %v6102_v48 }
 0x762   :  { %v21670_v22 = vpop.f32.mrf.mxu1  ;;  %v13128_v59 = vrot.slane %v13054_v35, 7 }
 0x763   :  { %v12774_v9 = vpop.f32.mrf.mxu0 }
 0x764   :  { %v12827_v27 = vpop.f32.mrf.mxu1  ;;  %v13066_v29 = vadd.f32 %v12774_v9, %v21278_v58  ;;  %v13130_v58 = vrot.slane %v13056_v31, 7  ;;  %v11188_v31 = vadd.f32 %v21329_v50, %v11135_v25  ;;  %v22368_v25 = vld [vmem:[#allocation80_spill] sm:$0xff] }
 0x765   :  { %v13068_v37 = vadd.f32 %v12827_v27, %v21346_v53  ;;  %v12776_v10 = vpop.f32.mrf.mxu0  ;;  %v22360_v27 = vld [vmem:[#allocation29_spill] sm:$0xff] }
 0x766   :  { %v12829_v52 = vpop.f32.mrf.mxu1  ;;  %v13132_v0 = vrot.slane %v13066_v29, 7  ;;  %v5880_v6 = vadd.f32 %v22360_v27, %v5827_v2  ;;  %v22363_v29 = vld [vmem:[#allocation41_spill] sm:$0xff]  ;;  %v11125_v2 = vadd.f32 %v21308_v11, %v6092_v21 }
 0x767   :  { %v13134_v61 = vrot.slane %v13068_v37, 7  ;;  %v12780_v9 = vpop.f32.mrf.mxu0  ;;  %v6198_v37 = vadd.f32 %v22363_v29, %v22362_v1  ;;  %v22366_v21 = vld [vmem:[#allocation85_spill] sm:$0xff] }
 0x768   :  { %v12833_v53 = vpop.f32.mrf.mxu1  ;;  %v13078_v28 = vadd.f32 %v12780_v9, %v21284_v3  ;;  %v21695_v15 = vsel %vm13144_vm0, %v13128_v59, %v13132_v0  ;;  %v10913_v42 = vadd.f32 %v21240_v40, %v5880_v6  ;;  %v22364_v9 = vld [vmem:[#allocation42_spill] sm:$0xff]  ;;  %v11241_v6 = vadd.f32 %v21361_v34, %v11188_v31 }
 0x769   :  { %v13080_v30 = vadd.f32 %v12833_v53, %v21352_v56  ;;  %v12782_v45 = vpop.f32.mrf.mxu0  ;;  %v21699_v19 = vsel %vm13144_vm0, %v13130_v58, %v13134_v61  ;;  %v10976_v56 = vadd.f32 %v21261_v41, %v10923_v17  ;;  %v6251_v53 = vadd.f32 %v22364_v9, %v6198_v37  ;;  %v22365_v40 = vld [vmem:[#allocation86_spill] sm:$0xff]  ;;  %v22367_v17 = vld [vmem:[#allocation93_spill] sm:$0xff] }
 0x76a   :  { %v12835_v32 = vpop.f32.mrf.mxu1  ;;  %v13136_v3 = vrot.slane %v13078_v28, 7  ;;  %v10966_v28 = vadd.f32 %v22368_v25, %v10913_v42  ;;  %v22374_v31 = vld [vmem:[#allocation94_spill] sm:$0xff] }
 0x76b   :  { %v13138_v35 = vrot.slane %v13080_v30, 7  ;;  %v12784_v14 = vpop.f32.mrf.mxu0  ;;  %v11029_v11 = vadd.f32 %v22365_v40, %v10976_v56  ;;  %v22369_v30 = vld [vmem:[#allocation88_spill] sm:$0xff]  ;;  %v22373_v40 = vld [vmem:[#allocation87_spill] sm:$0xff] }
 0x76c   :  { %v12837_v48 = vpop.f32.mrf.mxu1  ;;  %v21708_v27 = vsel %vm13144_vm0, %v13132_v0, %v13136_v3  ;;  %v13090_v41 = vadd.f32 %v12784_v14, %v22366_v21  ;;  %v11178_v1 = vadd.f32 %v22369_v30, %v11125_v2  ;;  %v22370_v0 = vld [vmem:[#allocation43_spill] sm:$0xff]  ;;  %v11019_v26 = vadd.f32 %v22371_v24, %v10966_v28  ;;  %v22378_v28 = vld [vmem:[#allocation81_spill] sm:$0xff] }
 0x76d   :  { %v21712_v57 = vsel %vm13144_vm0, %v13134_v61, %v13138_v35  ;;  %v13092_v50 = vadd.f32 %v12837_v48, %v22367_v17  ;;  %v6304_v9 = vadd.f32 %v22370_v0, %v6251_v53  ;;  %v22372_v61 = vld [vmem:[#allocation90_spill] sm:$0xff]  ;;  %v12786_v23 = vpop.f32.mrf.mxu0  ;;  %v11082_v34 = vadd.f32 %v22373_v40, %v11029_v11  ;;  %v22375_v2 = vld [vmem:[#allocation95_spill] sm:$0xff] }
 0x76e   :  { %v13140_v29 = vrot.slane %v13090_v41, 7  ;;  %v11231_v54 = vadd.f32 %v22372_v61, %v11178_v1  ;;  %v12839_v56 = vpop.f32.mrf.mxu1  ;;  %v11294_v14 = vadd.f32 %v22374_v31, %v11241_v6  ;;  %v22376_v24 = vld [vmem:[#allocation83_spill] sm:$0xff]  ;;  %v13055_v11 = vadd.f32 %v21668_v4, %v22378_v28  ;;  %v22379_v6 = vld [vmem:[#allocation89_spill] sm:$0xff] }
 0x76f   :  { %v13142_v37 = vrot.slane %v13092_v50, 7  ;;  %v11337_v21 = vadd.f32 %v22375_v2, %v6304_v9  ;;  %v21730_v41 = vadd.f32 %v12786_v23, %v11082_v34  ;;  %v11072_v17 = vadd.f32 %v22376_v24, %v11019_v26  ;;  %v22377_v50 = vld [vmem:[#allocation91_spill] sm:$0xff] }
 0x770   :  { %v13157_v48 = vsel %vm13144_vm0, %v13140_v29, %v13128_v59  ;;  %v21732_v53 = vadd.f32 %v12839_v56, %v11294_v14  ;;  %v11284_v25 = vadd.f32 %v22377_v50, %v11231_v54  ;;  %v13057_v30 = vadd.f32 %v21670_v22, %v22379_v6 }
 0x771   :  { %v13159_v42 = vsel %vm13144_vm0, %v13142_v37, %v13130_v58  ;;  %v21742_v59 = vsel %vm13144_vm0, %v13136_v3, %v13140_v29  ;;  %v21746_v23 = vsel %vm13144_vm0, %v13138_v35, %v13142_v37  ;;  %v22380_v58 = vld [vmem:[#allocation96_spill] sm:$0xff]  ;;  %v13067_v0 = vadd.f32 %v12776_v10, %v11072_v17 }
 0x772   :  { %v11390_v1 = vadd.f32 %v22380_v58, %v11337_v21  ;;  %v13069_v26 = vadd.f32 %v12829_v52, %v11284_v25  ;;  %v13141_v54 = vrot.slane %v21730_v41, 7  ;;  %v13143_v9 = vrot.slane %v21732_v53, 7  ;;  %v22381_v29 = vld [vmem:[#allocation84_spill] sm:$0xff] }
 0x773   :  { %v21753_v22 = vadd.s32 4294967295, %v21680_v5  ;;  %v13129_v61 = vrot.slane %v13055_v11, 7  ;;  %v13131_v3 = vrot.slane %v13057_v30, 7  ;;  %v21756_v56 = vadd.f32 %v12782_v45, %v22381_v29  ;;  %v22382_v35 = vld [vmem:[#allocation92_spill] sm:$0xff]  ;;  %v13102_v45 = vld [vmem:[#allocation7] sm:$0xf] }
 0x774   :  { %v11443_v4 = vadd.f32 %v21411_v18, %v11390_v1  ;;  %v21759_v37 = vadd.f32 %v12835_v32, %v22382_v35  ;;  %v13106_v10 = vsub.s32 0, %v21680_v5  ;;  %v13114_v52 = vsub.s32 2, %v21680_v5 }
 0x775   :  { %v13110_v40 = vsub.s32 1, %v21680_v5  ;;  %v13118_v34 = vsub.s32 3, %v21680_v5  ;;  %v13133_v18 = vrot.slane %v13067_v0, 7  ;;  %v13135_v31 = vrot.slane %v13069_v26, 7 }
 0x776   :  { %v13158_v14 = vsel %vm13144_vm0, %v13141_v54, %v13129_v61  ;;  %v13160_v32 = vsel %vm13144_vm0, %v13143_v9, %v13131_v3  ;;  %v11496_v2 = vadd.f32 %v21413_v12, %v11443_v4  ;;  %vm178_vm1 = vcmp.ge.s32.totalorder %v21753_v22, 0 }
 0x777   :  { %v13137_v21 = vrot.slane %v21756_v56, 7  ;;  %v13139_v24 = vrot.slane %v21759_v37, 7  ;;  %v13165_v17 = vsel %vm178_vm1, %v13157_v48, 0.0  ;;  %v13167_v50 = vsel %vm178_vm1, %v13159_v42, 0.0 }
 0x778   :  { %v21783_v25 = vrot.slane %v13102_v45, %v13106_v10  ;;  %v21785_v28 = vrot.slane %v13102_v45, %v13114_v52  ;;  %v13166_v12 = vsel %vm178_vm1, %v13158_v14, 0.0  ;;  %v13168_v11 = vsel %vm178_vm1, %v13160_v32, 0.0 }
 0x779   :  { %v21793_v48 = vrot.slane %v13102_v45, %v13110_v40  ;;  %v21795_v58 = vrot.slane %v13102_v45, %v13118_v34  ;;  %v13154_v42 = vsel %vm13144_vm0, %v13129_v61, %v13133_v18  ;;  %v13156_v1 = vsel %vm13144_vm0, %v13131_v3, %v13135_v31 }
 0x77a   :  { %v13181_v26 = vadd.f32 %v13165_v17, %v21783_v25  ;;  %v13183_v29 = vadd.f32 %v13167_v50, %v21785_v28  ;;  %v13150_v56 = vsel %vm13144_vm0, %v13133_v18, %v13137_v21  ;;  %v13152_v35 = vsel %vm13144_vm0, %v13135_v31, %v13139_v24 }
 0x77b   :  { %v13182_v61 = vadd.f32 %v13166_v12, %v21793_v48  ;;  %v13184_v3 = vadd.f32 %v13168_v11, %v21795_v58  ;;  %v13185_v18 = vadd.f32 %v21695_v15, %v21783_v25  ;;  %v13187_v31 = vadd.f32 %v21699_v19, %v21785_v28 }
 0x77c   :  { %v13173_v17 = vsel %vm178_vm1, %v21708_v27, 0.0  ;;  %v13175_v50 = vsel %vm178_vm1, %v21712_v57, 0.0  ;;  %v13174_v27 = vsel %vm178_vm1, %v13150_v56, 0.0  ;;  %v13176_v57 = vsel %vm178_vm1, %v13152_v35, 0.0  ;;  %v22383_v56 = vld [vmem:[#allocation97_spill] sm:$0xff] }
 0x77d   :  { %v13193_v41 = vadd.f32 %v21742_v59, %v21783_v25 }
 0x77f   :  { %v12876_v6 = vpop.f32.mrf.mxu0 }
 0x780   :  { %v12929_v30 = vpop.f32.mrf.mxu1  ;;  %v13058_v0 = vadd.f32 %v12876_v6, %v21403_v33  ;;  %v13186_v6 = vadd.f32 %v13154_v42, %v21793_v48 }
 0x781   :  { %v13060_v4 = vadd.f32 %v12929_v30, %v21475_v20  ;;  %v12878_v37 = vpop.f32.mrf.mxu0  ;;  %v13188_v30 = vadd.f32 %v13156_v1, %v21795_v58 }
 0x782   :  { %v12931_v52 = vpop.f32.mrf.mxu1  ;;  %v21811_v34 = vadd.f32 %v13181_v26, %v13058_v0  ;;  %v13059_v20 = vadd.f32 %v12878_v37, %v21408_v16  ;;  %v13191_v37 = vadd.f32 %v13175_v50, %v21785_v28 }
 0x783   :  { %v21813_v33 = vadd.f32 %v13183_v29, %v13060_v4  ;;  %v13061_v14 = vadd.f32 %v12931_v52, %v21480_v44  ;;  %v12880_v32 = vpop.f32.mrf.mxu0  ;;  %v13189_v29 = vadd.f32 %v13173_v17, %v21783_v25  ;;  %v22386_v25 = vld [vmem:[#allocation100_spill] sm:$0xff] }
 0x784   :  { %v12933_v45 = vpop.f32.mrf.mxu1  ;;  %v21827_v12 = vadd.f32 %v13182_v61, %v13059_v20  ;;  %v13070_v44 = vadd.f32 %v12880_v32, %v21416_v63  ;;  %v13190_v20 = vadd.f32 %v13174_v27, %v21793_v48  ;;  %v13148_v32 = vsel %vm13144_vm0, %v13139_v24, %v13143_v9  ;;  %v22385_v9 = vld [vmem:[#allocation99_spill] sm:$0xff] }
 0x785   :  { %v21829_v16 = vadd.f32 %v13184_v3, %v13061_v14  ;;  %v13072_v15 = vadd.f32 %v12933_v45, %v21483_v36  ;;  %v12882_v11 = vpop.f32.mrf.mxu0  ;;  %v13146_v14 = vsel %vm13144_vm0, %v13137_v21, %v13141_v54  ;;  %v13195_v54 = vadd.f32 %v21746_v23, %v21785_v28 }
 0x786   :  { %v12935_v19 = vpop.f32.mrf.mxu1  ;;  %v21839_v0 = vadd.f32 %v13185_v18, %v13070_v44  ;;  %v13071_v4 = vadd.f32 %v12882_v11, %v11496_v2 }
 0x787   :  { %v21841_v26 = vadd.f32 %v13187_v31, %v13072_v15  ;;  %v13073_v63 = vadd.f32 %v12935_v19, %v21488_v38  ;;  %v12886_v36 = vpop.f32.mrf.mxu0  ;;  %v13192_v38 = vadd.f32 %v13176_v57, %v21795_v58  ;;  %v13196_v19 = vadd.f32 %v13148_v32, %v21795_v58  ;;  %v22391_v58 = vld [vmem:[#allocation76_spill] sm:$0xff] }
 0x788   :  { %v12939_v42 = vpop.f32.mrf.mxu1  ;;  %v21846_v1 = vadd.f32 %v13186_v6, %v13071_v4  ;;  %v13082_v52 = vadd.f32 %v12886_v36, %v22383_v56  ;;  %v13194_v6 = vadd.f32 %v13146_v14, %v21793_v48  ;;  %v22387_v4 = vld [vmem:[#allocation72_spill] sm:$0xff]  ;;  %v22389_v36 = vld [vmem:[#allocation78_spill] sm:$0xff]  ;;  %v22392_v56 = vld [vmem:[#allocation77_spill] sm:$0xff] }
 0x789   :  { %v21848_v61 = vadd.f32 %v13188_v30, %v13073_v63  ;;  %v13084_v35 = vadd.f32 %v12939_v42, %v21492_v49  ;;  %v12888_v3 = vpop.f32.mrf.mxu0  ;;  %v22384_v49 = vld [vmem:[#allocation98_spill] sm:$0xff]  ;;  %v22394_v14 = vld [vmem:[#allocation51_spill] sm:$0xff] }
 0x78a   :  { %v12941_v2 = vpop.f32.mrf.mxu1  ;;  %v21862_v18 = vadd.f32 %v13189_v29, %v13082_v52  ;;  %v13083_v31 = vadd.f32 %v12888_v3, %v22384_v49  ;;  %v22390_v29 = vld [vmem:[#allocation79_spill] sm:$0xff]  ;;  %v11979_v52 = vadd.f32 %v21617_v60, %v22392_v56  ;;  %v12075_v3 = vadd.f32 %v21632_v7, %v21606_v39 }
 0x78b   :  { %v21864_v45 = vadd.f32 %v13191_v37, %v13084_v35  ;;  %v13085_v17 = vadd.f32 %v12941_v2, %v21497_v62  ;;  %v12890_v50 = vpop.f32.mrf.mxu0  ;;  %v11977_v37 = vadd.f32 %v21611_v8, %v22391_v58  ;;  %v22393_v2 = vld [vmem:[#allocation60_spill] sm:$0xff]  ;;  %v22395_v49 = vld [vmem:[#allocation55_spill] sm:$0xff] }
 0x78c   :  { %v12943_v44 = vpop.f32.mrf.mxu1  ;;  %v21872_v53 = vadd.f32 %v13190_v20, %v13083_v31  ;;  %v13094_v24 = vadd.f32 %v12890_v50, %v22385_v9  ;;  %v175_v20 = vadd.s32 8, %v21680_v5  ;;  %v12032_v8 = vadd.f32 %v22395_v49, %v11979_v52  ;;  %v22396_v31 = vld [vmem:[#allocation57_spill] sm:$0xff]  ;;  %v22401_v9 = vld [vmem:[#allocation58_spill] sm:$0xff]  ;;  %v22409_v52 = vld [vmem:[#allocation64_spill] sm:$0xff] }
 0x78d   :  { %v21874_v21 = vadd.f32 %v13192_v38, %v13085_v17  ;;  %v13096_v15 = vadd.f32 %v12943_v44, %v21500_v46  ;;  %v12892_v11 = vpop.f32.mrf.mxu0  ;;  %v22388_v46 = vld [vmem:[#allocation73_spill] sm:$0xff]  ;;  %v12077_v38 = vadd.f32 %v22393_v2, %v21609_v13  ;;  %v12030_v32 = vadd.f32 %v22394_v14, %v11977_v37  ;;  %v22399_v44 = vld [vmem:[#allocation52_spill] sm:$0xff]  ;;  %v22411_v2 = vld [vmem:[#allocation59_spill] sm:$0xff] }
 0x78e   :  { %v12945_v62 = vpop.f32.mrf.mxu1  ;;  %v21880_v30 = vadd.f32 %v13193_v41, %v13094_v24  ;;  %v13095_v23 = vadd.f32 %v12892_v11, %v22386_v25  ;;  %v6844_v63 = vadd.f32 %v22388_v46, %v22387_v4  ;;  %v22397_v41 = vld [vmem:[#allocation56_spill] sm:$0xff]  ;;  %v21913_v7 = vadd.s32 1, %v175_v20  ;;  %v22405_v4 = vld [vmem:[#allocation53_spill] sm:$0xff]  ;;  %v22406_v46 = vld [vmem:[#allocation66_spill] sm:$0xff] }
 0x78f   :  { %v21882_v59 = vadd.f32 %v13195_v54, %v13096_v15  ;;  %v13097_v28 = vadd.f32 %v12945_v62, %v21502_v47  ;;  %v12073_v47 = vadd.f32 %v21628_v55, %v21602_v43  ;;  %v22398_v55 = vld [vmem:[#allocation62_spill] sm:$0xff]  ;;  %v22400_v54 = vld [vmem:[#allocation63_spill] sm:$0xff]  ;;  %v12083_v24 = vadd.f32 %v22401_v9, %v12030_v32  ;;  %v22402_v13 = vld [vmem:[#allocation68_spill] sm:$0xff] }
 0x790   :  { %v21886_v27 = vadd.f32 %v13194_v6, %v13095_v23  ;;  %v6897_v48 = vadd.f32 %v22389_v36, %v6844_v63  ;;  %v12079_v39 = vadd.f32 %v22400_v54, %v22399_v44  ;;  %v12085_v15 = vadd.f32 %v22402_v13, %v12032_v8  ;;  %v22403_v11 = vld [vmem:[#allocation48_spill] sm:$0xff]  ;;  %v22404_v23 = vld [vmem:[#allocation61_spill] sm:$0xff]  ;;  %v22407_v36 = vld [vmem:[#allocation67_spill] sm:$0xff] }
 0x791   :  { %v21888_v57 = vadd.f32 %v13196_v19, %v13097_v28  ;;  %v12126_v17 = vadd.f32 %v22396_v31, %v12073_v47  ;;  %v12130_v28 = vadd.f32 %v22404_v23, %v12077_v38  ;;  %v12087_v63 = vadd.f32 %v22406_v46, %v22405_v4  ;;  %v22412_v14 = vld [vmem:[#allocation65_spill] sm:$0xff]  ;;  %v22415_v54 = vld [vmem:[#allocation70_spill] sm:$0xff] }
 0x792   :  { %v6950_v42 = vadd.f32 %v22390_v29, %v6897_v48  ;;  %v22408_v29 = vld [vmem:[#allocation46_spill] sm:$0xff]  ;;  %v12132_v47 = vadd.f32 %v22409_v52, %v12079_v39  ;;  %vm189_vm3 = vcmp.lt.s32.totalorder %v21913_v7, 16  ;;  %v12136_v38 = vadd.f32 %v22411_v2, %v12083_v24 }
 0x793   :  { %v12138_v32 = vadd.f32 %v22412_v14, %v12085_v15  ;;  %v22416_v4 = vld [vmem:[#allocation50_spill] sm:$0xff] }
 0x794   :  { %v11983_v35 = vadd.f32 %v21624_v51, %v6950_v42  ;;  %v12128_v51 = vadd.f32 %v22398_v55, %v12075_v3 }
 0x796   :  { %v12036_v43 = vadd.f32 %v22397_v41, %v11983_v35  ;;  %v22410_v35 = vld [vmem:[#allocation47_spill] sm:$0xff]  ;;  %v22413_v41 = vld [vmem:[#allocation49_spill] sm:$0xff] }
 0x798   :  { %v12089_v48 = vadd.f32 %v22407_v36, %v12036_v43 }
 0x79a   :  { %v12142_v39 = vadd.f32 %v22415_v54, %v12089_v48 }
 0x79f   :  { %v12982_v60 = vpop.f32.mrf.mxu0 }
 0x7a0   :  { %v13035_v50 = vpop.f32.mrf.mxu1  ;;  %v21918_v6 = vadd.f32 %v12982_v60, %v22403_v11 }
 0x7a1   :  { %v21920_v62 = vadd.f32 %v13035_v50, %v12126_v17  ;;  %v12984_v19 = vpop.f32.mrf.mxu0 }
 0x7a2   :  { %v13037_v25 = vpop.f32.mrf.mxu1  ;;  %v21928_v42 = vadd.f32 %v12984_v19, %v22408_v29  ;;  %v13213_v49 = vrot.slane %v21918_v6, 1 }
 0x7a3   :  { %v21930_v58 = vadd.f32 %v13037_v25, %v12128_v51  ;;  %v12986_v37 = vpop.f32.mrf.mxu0  ;;  %v13215_v8 = vrot.slane %v21920_v62, 1  ;;  %v22414_v51 = vld [vmem:[#allocation69_spill] sm:$0xff] }
 0x7a4   :  { %v13039_v56 = vpop.f32.mrf.mxu1  ;;  %v13074_v3 = vadd.f32 %v12986_v37, %v22410_v35  ;;  %v12140_v44 = vadd.f32 %v22414_v51, %v12087_v63  ;;  %v13214_v9 = vrot.slane %v21928_v42, 1 }
 0x7a5   :  { %v13076_v20 = vadd.f32 %v13039_v56, %v12130_v28  ;;  %v12988_v31 = vpop.f32.mrf.mxu0  ;;  %v13216_v24 = vrot.slane %v21930_v58, 1  ;;  %v22417_v56 = vld [vmem:[#allocation44_spill] sm:$0xff] }
 0x7a6   :  { %v13041_v17 = vpop.f32.mrf.mxu1  ;;  %v13217_v60 = vrot.slane %v13074_v3, 1  ;;  %v13075_v43 = vadd.f32 %v12988_v31, %v22413_v41  ;;  %v22418_v31 = vld [vmem:[#allocation45_spill] sm:$0xff] }
 0x7a7   :  { %v13219_v50 = vrot.slane %v13076_v20, 1  ;;  %v13077_v55 = vadd.f32 %v13041_v17, %v12132_v47  ;;  %v12992_v13 = vpop.f32.mrf.mxu0  ;;  %v20027_v58 = vld [vmem:[#allocation9 + $0x12c] ss:$24 sps:$4 sm:$0xff]  }
 0x7a8   :  { %v13045_v15 = vpop.f32.mrf.mxu1  ;;  %v13238_v11 = vsel %vm13229_vm2, %v13213_v49, %v13217_v60  ;;  %v13218_v19 = vrot.slane %v13075_v43, 1  ;;  %v13086_v46 = vadd.f32 %v12992_v13, %v22416_v4  ;;  %v22419_v4 = vld [vmem:[#allocation54_spill] sm:$0xff] }
 0x7a9   :  { %v13240_v6 = vsel %vm13229_vm2, %v13215_v8, %v13219_v50  ;;  %v13220_v25 = vrot.slane %v13077_v55, 1  ;;  %v13266_v23 = vadd.f32 %v13238_v11, %v21811_v34  ;;  %v13088_v63 = vadd.f32 %v13045_v15, %v12136_v38  ;;  %v12994_v36 = vpop.f32.mrf.mxu0 }
 0x7aa   :  { %v13268_v28 = vadd.f32 %v13240_v6, %v21813_v33  ;;  %v13047_v48 = vpop.f32.mrf.mxu1  ;;  %v13239_v29 = vsel %vm13229_vm2, %v13214_v9, %v13218_v19  ;;  %v13087_v52 = vadd.f32 %v12994_v36, %v22417_v56  ;;  %v13221_v35 = vrot.slane %v13086_v46, 1 }
 0x7ab   :  { %v13241_v37 = vsel %vm13229_vm2, %v13216_v24, %v13220_v25  ;;  %v13089_v34 = vadd.f32 %v13047_v48, %v12138_v32  ;;  %v13282_v47 = vmax.f32 %v13266_v23, 0.0  ;;  %v13223_v3 = vrot.slane %v13088_v63, 1  ;;  %v12996_v20 = vpop.f32.mrf.mxu0 }
 0x7ac   :  { %v13284_v33 = vmax.f32 %v13268_v28, 0.0  ;;  %v13049_v2 = vpop.f32.mrf.mxu1  ;;  %v13222_v38 = vrot.slane %v13087_v52, 1  ;;  %v13098_v17 = vadd.f32 %v12996_v20, %v22418_v31  ;;  %v13234_v43 = vsel %vm13229_vm2, %v13217_v60, %v13221_v35 }
 0x7ad   :  { %v13224_v14 = vrot.slane %v13089_v34, 1  ;;  %v13100_v41 = vadd.f32 %v13049_v2, %v12140_v44  ;;  %v13236_v55 = vsel %vm13229_vm2, %v13219_v50, %v13223_v3  ;;  %v12998_v51 = vpop.f32.mrf.mxu0  ;;  %v13267_v32 = vadd.f32 %v13239_v29, %v21827_v12 }
 0x7ae   :  { %v13051_v54 = vpop.f32.mrf.mxu1  ;;  %v13269_v13 = vadd.f32 %v13241_v37, %v21829_v16  ;;  %v13254_v15 = vsel %vm189_vm3, %v13234_v43, 0.0  ;;  %v13256_v11 = vsel %vm189_vm3, %v13236_v55, 0.0  ;;  %v13235_v44 = vsel %vm13229_vm2, %v13218_v19, %v13222_v38 }
 0x7af   :  { %v13237_v60 = vsel %vm13229_vm2, %v13220_v25, %v13224_v14  ;;  %v13270_v50 = vadd.f32 %v13254_v15, %v21839_v0  ;;  %v13272_v6 = vadd.f32 %v13256_v11, %v21841_v26  ;;  %v13255_v12 = vsel %vm189_vm3, %v13235_v44, 0.0 }
 0x7b0   :  { %v13257_v16 = vsel %vm189_vm3, %v13237_v60, 0.0  ;;  %v13225_v23 = vrot.slane %v13098_v17, 1  ;;  %v13227_v28 = vrot.slane %v13100_v41, 1  ;;  %v13099_v46 = vadd.f32 %v12998_v51, %v22419_v4  ;;  %v20034_v4 = vld [vmem:[#allocation9 + $0x3f8] ss:$24 sps:$4 sm:$0xff]  }
 0x7b1   :  { %v13101_v63 = vadd.f32 %v13051_v54, %v12142_v39  ;;  %v13286_v36 = vmax.f32 %v13270_v50, 0.0  ;;  %v13288_v19 = vmax.f32 %v13272_v6, 0.0  ;;  %v13271_v48 = vadd.f32 %v13255_v12, %v21846_v1  ;;  %v20030_v50 = vld [vmem:[#allocation9 + $0x42c] ss:$24 sps:$4 sm:$0xff]   ;;  %v20033_v6 = vld [vmem:[#allocation9 + $0xfc] ss:$24 sps:$4 sm:$0xff]  }
 0x7b2   :  { %v13283_v25 = vmax.f32 %v13267_v32, 0.0  ;;  %v13230_v0 = vsel %vm13229_vm2, %v13221_v35, %v13225_v23  ;;  %v13242_v26 = vsel %vm13229_vm2, %v13225_v23, %v13213_v49  ;;  %v13232_v29 = vsel %vm13229_vm2, %v13223_v3, %v13227_v28  ;;  %v20028_v12 = vld [vmem:[#allocation9 + $0x428] ss:$24 sps:$4 sm:$0xff]   ;;  %v20036_v23 = vld [vmem:[#allocation9 + $0x3fc] ss:$24 sps:$4 sm:$0xff]  }
 0x7b3   :  { %v13244_v37 = vsel %vm13229_vm2, %v13227_v28, %v13215_v8  ;;  %v21995_v39 = vpack.c.bf16 %v13286_v36, %v13282_v47  ;;  %v21997_v56 = vpack.c.bf16 %v13288_v19, %v13284_v33  ;;  %v13262_v1 = vsel %vm189_vm3, %v13242_v26, 0.0  ;;  %v20039_v28 = vld [vmem:[#allocation9 + $0xcc] ss:$24 sps:$4 sm:$0xff]   ;;  %v20045_v36 = vld [vmem:[#allocation9 + $0x9c] ss:$24 sps:$4 sm:$0xff]  }
 0x7b4   :  { %v13274_v52 = vadd.f32 %v13230_v0, %v21862_v18  ;;  %v13278_v34 = vadd.f32 %v13262_v1, %v21880_v30  ;;  %v13264_v49 = vsel %vm189_vm3, %v13244_v37, 0.0  ;;  %v13276_v35 = vadd.f32 %v13232_v29, %v21864_v45  ;;  %v20040_v19 = vld [vmem:[#allocation9 + $0x3c8] ss:$24 sps:$4 sm:$0xff]   ;;  %v20051_v0 = vld [vmem:[#allocation9 + $0x6c] ss:$24 sps:$4 sm:$0xff]  }
 0x7b5   :  { %v13226_v62 = vrot.slane %v13099_v46, 1  ;;  %v13280_v8 = vadd.f32 %v13264_v49, %v21882_v59  ;;  %v13228_v47 = vrot.slane %v13101_v63, 1  ;;  %v13287_v20 = vmax.f32 %v13271_v48, 0.0  ;;  %v20037_v46 = vld [vmem:[#allocation9 + $0xc8] ss:$24 sps:$4 sm:$0xff]  }
 0x7b6   :  { %v13290_v3 = vmax.f32 %v13274_v52, 0.0  ;;  %v13294_v33 = vmax.f32 %v13278_v34, 0.0  ;;  %v13292_v2 = vmax.f32 %v13276_v35, 0.0  ;;  %v13273_v42 = vadd.f32 %v13257_v16, %v21848_v61  ;;  %v20031_v16 = vld [vmem:[#allocation9 + $0xf8] ss:$24 sps:$4 sm:$0xff]  }
 0x7b7   :  { %v13231_v31 = vsel %vm13229_vm2, %v13222_v38, %v13226_v62  ;;  %v13243_v18 = vsel %vm13229_vm2, %v13226_v62, %v13214_v9  ;;  %v13296_v30 = vmax.f32 %v13280_v8, 0.0  ;;  %v13233_v17 = vsel %vm13229_vm2, %v13224_v14, %v13228_v47  ;;  %v20019_v9 = vld [vmem:[#allocation9 + $0x158] ss:$24 sps:$4 sm:$0xff]   ;;  %v20042_v63 = vld [vmem:[#allocation9 + $0x3cc] ss:$24 sps:$4 sm:$0xff]  }
 0x7b8   :  { %v13263_v45 = vsel %vm189_vm3, %v13243_v18, 0.0  ;;  %v13245_v59 = vsel %vm13229_vm2, %v13228_v47, %v13216_v24  ;;  %v22023_v41 = vpack.c.bf16 %v13287_v20, %v13283_v25  ;;  %v13275_v43 = vadd.f32 %v13231_v31, %v21872_v53  ;;  %v20043_v48 = vld [vmem:[#allocation9 + $0x98] ss:$24 sps:$4 sm:$0xff]   ;;  %v20048_v25 = vld [vmem:[#allocation9 + $0x39c] ss:$24 sps:$4 sm:$0xff]  }
 0x7b9   :  { %v13265_v38 = vsel %vm189_vm3, %v13245_v59, 0.0  ;;  %v13279_v55 = vadd.f32 %v13263_v45, %v21886_v27  ;;  %v13277_v51 = vadd.f32 %v13233_v17, %v21874_v21  ;;  %v13285_v24 = vmax.f32 %v13269_v13, 0.0  ;;  %v20022_v21 = vld [vmem:[#allocation9 + $0x458] ss:$24 sps:$4 sm:$0xff]   ;;  %v20025_v13 = vld [vmem:[#allocation9 + $0x128] ss:$24 sps:$4 sm:$0xff]  }
 0x7ba   :  { %v13281_v14 = vadd.f32 %v13265_v38, %v21888_v57  ;;  %14490 = vmatprep.mubr.bf16.mxu0 %v22023_v41  ;;  %v13289_v54 = vmax.f32 %v13273_v42, 0.0  ;;  %v22031_v32 = vpack.c.bf16 %v13294_v33, %v13290_v3  ;;  %v22033_v15 = vpack.c.bf16 %v13296_v30, %v13292_v2  ;;  %v20046_v26 = vld [vmem:[#allocation9 + $0x398] ss:$24 sps:$4 sm:$0xff]   ;;  %v20049_v29 = vld [vmem:[#allocation9 + $0x68] ss:$24 sps:$4 sm:$0xff]  }
 0x7bb   :  { %14491 = vmatmul.mubr.bf16.vlgmr.msra.gmra.mxu0 %v21995_v39  ;;  %v13291_v61 = vmax.f32 %v13275_v43, 0.0  ;;  %v13295_v11 = vmax.f32 %v13279_v55, 0.0  ;;  %v13293_v53 = vmax.f32 %v13277_v51, 0.0  ;;  %v20054_v37 = vld [vmem:[#allocation9 + $0x36c] ss:$24 sps:$4 sm:$0xff]  }
 0x7bc   :  { %v13297_v44 = vmax.f32 %v13281_v14, 0.0  ;;  %v22036_v27 = vpack.c.bf16 %v13289_v54, %v13285_v24  ;;  %14565 = vmatpush1.bf16.msra.mxu0 %v20019_v9  ;;  %v20057_v1 = vld [vmem:[#allocation9 + $0x3c] ss:$24 sps:$4 sm:$0xff]   ;;  %v20052_v52 = vld [vmem:[#allocation9 + $0x368] ss:$24 sps:$4 sm:$0xff]  }
 0x7bd   :  { %v22038_v57 = vpack.c.bf16 %v13295_v11, %v13291_v61  ;;  %14566 = vmatprep.subr.bf16.mxu0 %v20027_v58  ;;  %v20055_v34 = vld [vmem:[#allocation9 + $0x38] ss:$24 sps:$4 sm:$0xff]   ;;  %v20060_v49 = vld [vmem:[#allocation9 + $0x33c] ss:$24 sps:$4 sm:$0xff]   ;;  %v20063_v35 = vld [vmem:[#allocation9 + $0xc] ss:$24 sps:$4 sm:$0xff]  }
 0x7be   :  { %v22040_v60 = vpack.c.bf16 %v13297_v44, %v13293_v53  ;;  %14543 = vmatprep.mubr.bf16.mxu1 %v22036_v27  ;;  %v20058_v62 = vld [vmem:[#allocation9 + $0x338] ss:$24 sps:$4 sm:$0xff]   ;;  %v20061_v3 = vld [vmem:[#allocation9 + $0x8] ss:$24 sps:$4 sm:$0xff]   ;;  %v20066_v8 = vld [vmem:[#allocation9 + $0x30c] ss:$24 sps:$4 sm:$0xff]  }
 0x7bf   :  { %14544 = vmatmul.mubr.bf16.vlgmr.msra.gmra.mxu1 %v21997_v56  ;;  %14500 = vmatprep.mubr.bf16.mxu0 %v22038_v57  ;;  %v20069_v47 = vld [vmem:[#allocation9 + $0x2dc] ss:$24 sps:$4 sm:$0xff]   ;;  %v20064_v20 = vld [vmem:[#allocation9 + $0x308] ss:$24 sps:$4 sm:$0xff]   ;;  %v20067_v33 = vld [vmem:[#allocation9 + $0x2d8] ss:$24 sps:$4 sm:$0xff]  }
 0x7c0   :  { %14618 = vmatpush1.bf16.msra.mxu1 %v20022_v21  ;;  %14553 = vmatprep.mubr.bf16.mxu1 %v22040_v60  ;;  %v20072_v2 = vld [vmem:[#allocation9 + $0x5dc] ss:$24 sps:$4 sm:$0xff]   ;;  %v20075_v31 = vld [vmem:[#allocation9 + $0x2ac] ss:$24 sps:$4 sm:$0xff]   ;;  %v20070_v18 = vld [vmem:[#allocation9 + $0x5d8] ss:$24 sps:$4 sm:$0xff]  }
 0x7c1   :  { %14619 = vmatprep.subr.bf16.mxu1 %v20030_v50  ;;  %14567 = vmatpush1.bf16.msra.mxu0 %v20025_v13  ;;  %v20073_v30 = vld [vmem:[#allocation9 + $0x2a8] ss:$24 sps:$4 sm:$0xff]   ;;  %v20078_v45 = vld [vmem:[#allocation9 + $0x5ac] ss:$24 sps:$4 sm:$0xff]   ;;  %v20081_v17 = vld [vmem:[#allocation9 + $0x27c] ss:$24 sps:$4 sm:$0xff]  }
 0x7c2   :  { %14568 = vmatprep.subr.bf16.mxu0 %v20033_v6  ;;  %v20076_v59 = vld [vmem:[#allocation9 + $0x5a8] ss:$24 sps:$4 sm:$0xff]   ;;  %v20079_v38 = vld [vmem:[#allocation9 + $0x278] ss:$24 sps:$4 sm:$0xff]   ;;  %v20084_v42 = vld [vmem:[#allocation9 + $0x57c] ss:$24 sps:$4 sm:$0xff]  }
 0x7c3   :  { %14501 = vmatmul.mubr.bf16.gmra.mxu0 %v22031_v32  ;;  %v20087_v9 = vld [vmem:[#allocation9 + $0x24c] ss:$24 sps:$4 sm:$0xff]   ;;  %v20082_v43 = vld [vmem:[#allocation9 + $0x578] ss:$24 sps:$4 sm:$0xff]   ;;  %v20085_v55 = vld [vmem:[#allocation9 + $0x248] ss:$24 sps:$4 sm:$0xff]  }
 0x7c4   :  { %14620 = vmatpush1.bf16.msra.mxu1 %v20028_v12  ;;  %14596 = vmatprep.mubr.bf16.mxu0 %v22023_v41  ;;  %v20090_v51 = vld [vmem:[#allocation9 + $0x54c] ss:$24 sps:$4 sm:$0xff]   ;;  %v20093_v14 = vld [vmem:[#allocation9 + $0x21c] ss:$24 sps:$4 sm:$0xff]   ;;  %v20088_v58 = vld [vmem:[#allocation9 + $0x548] ss:$24 sps:$4 sm:$0xff]  }
 0x7c5   :  { %14621 = vmatprep.subr.bf16.mxu1 %v20036_v23  ;;  %14569 = vmatpush1.bf16.msra.mxu0 %v20031_v16  ;;  %v20091_v24 = vld [vmem:[#allocation9 + $0x218] ss:$24 sps:$4 sm:$0xff]   ;;  %v20096_v54 = vld [vmem:[#allocation9 + $0x51c] ss:$24 sps:$4 sm:$0xff]   ;;  %v20099_v61 = vld [vmem:[#allocation9 + $0x1ec] ss:$24 sps:$4 sm:$0xff]  }
 0x7c6   :  { %14570 = vmatprep.subr.bf16.mxu0 %v20039_v28  ;;  %v20094_v11 = vld [vmem:[#allocation9 + $0x518] ss:$24 sps:$4 sm:$0xff]   ;;  %v20097_v53 = vld [vmem:[#allocation9 + $0x1e8] ss:$24 sps:$4 sm:$0xff]   ;;  %v20102_v44 = vld [vmem:[#allocation9 + $0x4ec] ss:$24 sps:$4 sm:$0xff]  }
 0x7c7   :  { %14554 = vmatmul.mubr.bf16.gmra.mxu1 %v22033_v15  ;;  %v20105_v21 = vld [vmem:[#allocation9 + $0x1bc] ss:$24 sps:$4 sm:$0xff]   ;;  %v20100_v13 = vld [vmem:[#allocation9 + $0x4e8] ss:$24 sps:$4 sm:$0xff]   ;;  %v20103_v50 = vld [vmem:[#allocation9 + $0x1b8] ss:$24 sps:$4 sm:$0xff]  }
 0x7c8   :  { %14622 = vmatpush1.bf16.msra.mxu1 %v20034_v4  ;;  %14649 = vmatprep.mubr.bf16.mxu1 %v22036_v27  ;;  %v20108_v6 = vld [vmem:[#allocation9 + $0x4bc] ss:$24 sps:$4 sm:$0xff]   ;;  %v20111_v12 = vld [vmem:[#allocation9 + $0x18c] ss:$24 sps:$4 sm:$0xff]   ;;  %v20106_v16 = vld [vmem:[#allocation9 + $0x4b8] ss:$24 sps:$4 sm:$0xff]  }
 0x7c9   :  { %14623 = vmatprep.subr.bf16.mxu1 %v20042_v63  ;;  %14571 = vmatpush1.bf16.msra.mxu0 %v20037_v46  ;;  %v20109_v23 = vld [vmem:[#allocation9 + $0x188] ss:$24 sps:$4 sm:$0xff]   ;;  %v20114_v28 = vld [vmem:[#allocation9 + $0x48c] ss:$24 sps:$4 sm:$0xff]  }
 0x7ca   :  { %14572 = vmatprep.subr.bf16.mxu0 %v20045_v36  ;;  %v20117_v4 = vld [vmem:[#allocation9 + $0x164] ss:$24 sps:$4 sm:$0xff]   ;;  %v20112_v46 = vld [vmem:[#allocation9 + $0x488] ss:$24 sps:$4 sm:$0xff]  }
 0x7cb   :  { %v20120_v63 = vld [vmem:[#allocation9 + $0x464] ss:$24 sps:$4 sm:$0xff]   ;;  %v20115_v36 = vld [vmem:[#allocation9 + $0x160] ss:$24 sps:$4 sm:$0xff]  }
 0x7cc   :  { %14624 = vmatpush1.bf16.msra.mxu1 %v20040_v19  ;;  %v20123_v19 = vld [vmem:[#allocation9 + $0x134] ss:$24 sps:$4 sm:$0xff]  }
 0x7cd   :  { %14625 = vmatprep.subr.bf16.mxu1 %v20048_v25  ;;  %14573 = vmatpush1.bf16.msra.mxu0 %v20043_v48  ;;  %v20118_v48 = vld [vmem:[#allocation9 + $0x460] ss:$24 sps:$4 sm:$0xff]   ;;  %v20126_v25 = vld [vmem:[#allocation9 + $0x434] ss:$24 sps:$4 sm:$0xff]  }
 0x7ce   :  { %14574 = vmatprep.subr.bf16.mxu0 %v20051_v0  ;;  %v20121_v0 = vld [vmem:[#allocation9 + $0x130] ss:$24 sps:$4 sm:$0xff]  }
 0x7d0   :  { %14626 = vmatpush1.bf16.msra.mxu1 %v20046_v26  ;;  %v20129_v26 = vld [vmem:[#allocation9 + $0x104] ss:$24 sps:$4 sm:$0xff]  }
 0x7d1   :  { %14627 = vmatprep.subr.bf16.mxu1 %v20054_v37  ;;  %14575 = vmatpush1.bf16.msra.mxu0 %v20049_v29  ;;  %v20124_v29 = vld [vmem:[#allocation9 + $0x430] ss:$24 sps:$4 sm:$0xff]   ;;  %v20132_v37 = vld [vmem:[#allocation9 + $0x404] ss:$24 sps:$4 sm:$0xff]  }
 0x7d2   :  { %14576 = vmatprep.subr.bf16.mxu0 %v20057_v1  ;;  %v20127_v1 = vld [vmem:[#allocation9 + $0x100] ss:$24 sps:$4 sm:$0xff]  }
 0x7d4   :  { %14628 = vmatpush1.bf16.msra.mxu1 %v20052_v52  ;;  %v20135_v52 = vld [vmem:[#allocation9 + $0xd4] ss:$24 sps:$4 sm:$0xff]  }
 0x7d5   :  { %14629 = vmatprep.subr.bf16.mxu1 %v20060_v49  ;;  %14577 = vmatpush1.bf16.msra.mxu0 %v20055_v34  ;;  %v20130_v34 = vld [vmem:[#allocation9 + $0x400] ss:$24 sps:$4 sm:$0xff]   ;;  %v20138_v49 = vld [vmem:[#allocation9 + $0x3d4] ss:$24 sps:$4 sm:$0xff]  }
 0x7d6   :  { %14578 = vmatprep.subr.bf16.mxu0 %v20063_v35  ;;  %v20133_v35 = vld [vmem:[#allocation9 + $0xd0] ss:$24 sps:$4 sm:$0xff]  }
 0x7d8   :  { %14630 = vmatpush1.bf16.msra.mxu1 %v20058_v62  ;;  %v20141_v62 = vld [vmem:[#allocation9 + $0xa4] ss:$24 sps:$4 sm:$0xff]  }
 0x7d9   :  { %14631 = vmatprep.subr.bf16.mxu1 %v20066_v8  ;;  %14579 = vmatpush1.bf16.msra.mxu0 %v20061_v3  ;;  %v20136_v3 = vld [vmem:[#allocation9 + $0x3d0] ss:$24 sps:$4 sm:$0xff]   ;;  %v20144_v8 = vld [vmem:[#allocation9 + $0x3a4] ss:$24 sps:$4 sm:$0xff]  }
 0x7da   :  { %14580 = vmatprep.subr.bf16.mxu0 %v20069_v47  ;;  %v20139_v47 = vld [vmem:[#allocation9 + $0xa0] ss:$24 sps:$4 sm:$0xff]  }
 0x7dc   :  { %14632 = vmatpush1.bf16.msra.mxu1 %v20064_v20  ;;  %v20147_v20 = vld [vmem:[#allocation9 + $0x74] ss:$24 sps:$4 sm:$0xff]  }
 0x7dd   :  { %14633 = vmatprep.subr.bf16.mxu1 %v20072_v2  ;;  %14581 = vmatpush2.bf16.msra.mxu0 %v20067_v33  ;;  %v20142_v33 = vld [vmem:[#allocation9 + $0x3a0] ss:$24 sps:$4 sm:$0xff]   ;;  %v20145_v2 = vld [vmem:[#allocation9 + $0x70] ss:$24 sps:$4 sm:$0xff]  }
 0x7de   :  { %14582 = vmatprep.subr.bf16.mxu0 %v20075_v31  ;;  %v20153_v31 = vld [vmem:[#allocation9 + $0x44] ss:$24 sps:$4 sm:$0xff]  }
 0x7e0   :  { %14634 = vmatpush2.bf16.msra.mxu1 %v20070_v18  ;;  %v20148_v18 = vld [vmem:[#allocation9 + $0x370] ss:$24 sps:$4 sm:$0xff]  }
 0x7e1   :  { %14635 = vmatprep.subr.bf16.mxu1 %v20078_v45  ;;  %14583 = vmatpush2.bf16.msra.mxu0 %v20073_v30  ;;  %v20156_v30 = vld [vmem:[#allocation9 + $0x344] ss:$24 sps:$4 sm:$0xff]   ;;  %v20159_v45 = vld [vmem:[#allocation9 + $0x14] ss:$24 sps:$4 sm:$0xff]  }
 0x7e2   :  { %14584 = vmatprep.subr.bf16.mxu0 %v20081_v17  ;;  %v20154_v17 = vld [vmem:[#allocation9 + $0x340] ss:$24 sps:$4 sm:$0xff]  }
 0x7e4   :  { %14636 = vmatpush2.bf16.msra.mxu1 %v20076_v59  ;;  %v20162_v59 = vld [vmem:[#allocation9 + $0x314] ss:$24 sps:$4 sm:$0xff]  }
 0x7e5   :  { %14637 = vmatprep.subr.bf16.mxu1 %v20084_v42  ;;  %14585 = vmatpush2.bf16.msra.mxu0 %v20079_v38  ;;  %v20157_v38 = vld [vmem:[#allocation9 + $0x10] ss:$24 sps:$4 sm:$0xff]   ;;  %v20165_v42 = vld [vmem:[#allocation9 + $0x2e4] ss:$24 sps:$4 sm:$0xff]  }
 0x7e6   :  { %14586 = vmatprep.subr.bf16.mxu0 %v20087_v9  ;;  %v20160_v9 = vld [vmem:[#allocation9 + $0x310] ss:$24 sps:$4 sm:$0xff]  }
 0x7e8   :  { %14638 = vmatpush2.bf16.msra.mxu1 %v20082_v43  ;;  %v20168_v43 = vld [vmem:[#allocation9 + $0x5e4] ss:$24 sps:$4 sm:$0xff]  }
 0x7e9   :  { %14639 = vmatprep.subr.bf16.mxu1 %v20090_v51  ;;  %14587 = vmatpush2.bf16.msra.mxu0 %v20085_v55  ;;  %v20163_v55 = vld [vmem:[#allocation9 + $0x2e0] ss:$24 sps:$4 sm:$0xff]   ;;  %v20171_v51 = vld [vmem:[#allocation9 + $0x2b4] ss:$24 sps:$4 sm:$0xff]  }
 0x7ea   :  { %14588 = vmatprep.subr.bf16.mxu0 %v20093_v14  ;;  %v20166_v14 = vld [vmem:[#allocation9 + $0x5e0] ss:$24 sps:$4 sm:$0xff]  }
 0x7ec   :  { %14640 = vmatpush2.bf16.msra.mxu1 %v20088_v58  ;;  %v20174_v58 = vld [vmem:[#allocation9 + $0x5b4] ss:$24 sps:$4 sm:$0xff]  }
 0x7ed   :  { %14641 = vmatprep.subr.bf16.mxu1 %v20096_v54  ;;  %14589 = vmatpush2.bf16.msra.mxu0 %v20091_v24  ;;  %v20169_v24 = vld [vmem:[#allocation9 + $0x2b0] ss:$24 sps:$4 sm:$0xff]   ;;  %v20177_v54 = vld [vmem:[#allocation9 + $0x284] ss:$24 sps:$4 sm:$0xff]  }
 0x7ee   :  { %14590 = vmatprep.subr.bf16.mxu0 %v20099_v61  ;;  %v20172_v61 = vld [vmem:[#allocation9 + $0x5b0] ss:$24 sps:$4 sm:$0xff]  }
 0x7f0   :  { %14642 = vmatpush2.bf16.msra.mxu1 %v20094_v11  ;;  %v20180_v11 = vld [vmem:[#allocation9 + $0x584] ss:$24 sps:$4 sm:$0xff]  }
 0x7f1   :  { %14643 = vmatprep.subr.bf16.mxu1 %v20102_v44  ;;  %14591 = vmatpush2.bf16.msra.mxu0 %v20097_v53  ;;  %v20175_v53 = vld [vmem:[#allocation9 + $0x280] ss:$24 sps:$4 sm:$0xff]   ;;  %v20183_v44 = vld [vmem:[#allocation9 + $0x254] ss:$24 sps:$4 sm:$0xff]  }
 0x7f2   :  { %14592 = vmatprep.subr.bf16.mxu0 %v20105_v21  ;;  %v20178_v21 = vld [vmem:[#allocation9 + $0x580] ss:$24 sps:$4 sm:$0xff]  }
 0x7f4   :  { %14644 = vmatpush2.bf16.msra.mxu1 %v20100_v13  ;;  %v20186_v13 = vld [vmem:[#allocation9 + $0x554] ss:$24 sps:$4 sm:$0xff]  }
 0x7f5   :  { %14645 = vmatprep.subr.bf16.mxu1 %v20108_v6  ;;  %14593 = vmatpush2.bf16.msra.mxu0 %v20103_v50  ;;  %v20181_v50 = vld [vmem:[#allocation9 + $0x250] ss:$24 sps:$4 sm:$0xff]   ;;  %v20189_v6 = vld [vmem:[#allocation9 + $0x224] ss:$24 sps:$4 sm:$0xff]  }
 0x7f6   :  { %14594 = vmatprep.subr.bf16.mxu0 %v20111_v12  ;;  %v20184_v12 = vld [vmem:[#allocation9 + $0x550] ss:$24 sps:$4 sm:$0xff]  }
 0x7f8   :  { %14646 = vmatpush2.bf16.msra.mxu1 %v20106_v16  ;;  %v20192_v16 = vld [vmem:[#allocation9 + $0x524] ss:$24 sps:$4 sm:$0xff]  }
 0x7f9   :  { %14647 = vmatprep.subr.bf16.mxu1 %v20114_v28  ;;  %14595 = vmatpush2.bf16.msra.mxu0 %v20109_v23  ;;  %v20187_v23 = vld [vmem:[#allocation9 + $0x220] ss:$24 sps:$4 sm:$0xff]   ;;  %v20195_v28 = vld [vmem:[#allocation9 + $0x1f4] ss:$24 sps:$4 sm:$0xff]  }
 0x7fa   :  { %14670 = vmatprep.subr.bf16.mxu0 %v20117_v4  ;;  %v20190_v4 = vld [vmem:[#allocation9 + $0x520] ss:$24 sps:$4 sm:$0xff]  }
 0x7fc   :  { %14648 = vmatpush2.bf16.msra.mxu1 %v20112_v46  ;;  %14597 = vmatmul.mubr.bf16.vlgmr.msra.gmra.mxu0 %v21995_v39  ;;  %v20198_v46 = vld [vmem:[#allocation9 + $0x4f4] ss:$24 sps:$4 sm:$0xff]  }
 0x7fd   :  { %14723 = vmatprep.subr.bf16.mxu1 %v20120_v63  ;;  %14606 = vmatprep.mubr.bf16.mxu0 %v22038_v57  ;;  %v20193_v63 = vld [vmem:[#allocation9 + $0x1f0] ss:$24 sps:$4 sm:$0xff]  }
 0x7fe   :  { %14671 = vmatpush1.bf16.msra.mxu0 %v20115_v36  ;;  %v20201_v36 = vld [vmem:[#allocation9 + $0x1c4] ss:$24 sps:$4 sm:$0xff]  }
 0x7ff   :  { %14650 = vmatmul.mubr.bf16.vlgmr.msra.gmra.mxu1 %v21997_v56  ;;  %14672 = vmatprep.subr.bf16.mxu0 %v20123_v19  ;;  %v20196_v19 = vld [vmem:[#allocation9 + $0x4f0] ss:$24 sps:$4 sm:$0xff]  }
 0x800   :  { %14659 = vmatprep.mubr.bf16.mxu1 %v22040_v60  ;;  %14724 = vmatpush1.bf16.msra.mxu1 %v20118_v48  ;;  %v20204_v48 = vld [vmem:[#allocation9 + $0x4c4] ss:$24 sps:$4 sm:$0xff]  }
 0x801   :  { %14725 = vmatprep.subr.bf16.mxu1 %v20126_v25  ;;  %v20199_v25 = vld [vmem:[#allocation9 + $0x1c0] ss:$24 sps:$4 sm:$0xff]  }
 0x802   :  { %14673 = vmatpush1.bf16.msra.mxu0 %v20121_v0  ;;  %v20207_v0 = vld [vmem:[#allocation9 + $0x194] ss:$24 sps:$4 sm:$0xff]  }
 0x803   :  { %14674 = vmatprep.subr.bf16.mxu0 %v20129_v26  ;;  %v20202_v26 = vld [vmem:[#allocation9 + $0x4c0] ss:$24 sps:$4 sm:$0xff]  }
 0x804   :  { %14726 = vmatpush1.bf16.msra.mxu1 %v20124_v29  ;;  %14607 = vmatmul.mubr.bf16.gmra.mxu0 %v22031_v32  ;;  %v20210_v29 = vld [vmem:[#allocation9 + $0x494] ss:$24 sps:$4 sm:$0xff]  }
 0x805   :  { %14727 = vmatprep.subr.bf16.mxu1 %v20132_v37  ;;  %14702 = vmatprep.mubr.bf16.mxu0 %v22023_v41  ;;  %v20150_v41 = vld [vmem:[#allocation9 + $0x374] ss:$24 sps:$4 sm:$0xff]   ;;  %v20205_v37 = vld [vmem:[#allocation9 + $0x190] ss:$24 sps:$4 sm:$0xff]  }
 0x806   :  { %14675 = vmatpush1.bf16.msra.mxu0 %v20127_v1  ;;  %v20208_v1 = vld [vmem:[#allocation9 + $0x490] ss:$24 sps:$4 sm:$0xff]  }
 0x807   :  { %14660 = vmatmul.mubr.bf16.gmra.mxu1 %v22033_v15  ;;  %14676 = vmatprep.subr.bf16.mxu0 %v20135_v52  ;;  %v20211_v52 = vld [vmem:[#allocation12 + $0xa8] ss:$12 sps:$4 sm:$0xff]  }
 0x808   :  { %14728 = vmatpush1.bf16.msra.mxu1 %v20130_v34  ;;  %14755 = vmatprep.mubr.bf16.mxu1 %v22036_v27  ;;  %v20151_v27 = vld [vmem:[#allocation9 + $0x40] ss:$24 sps:$4 sm:$0xff]  }
 0x809   :  { %14729 = vmatprep.subr.bf16.mxu1 %v20138_v49  ;;  %v20213_v34 = vld [vmem:[#allocation12 + $0xac] ss:$12 sps:$4 sm:$0xff]   ;;  %v20216_v49 = vld [vmem:[#allocation12 + $0x94] ss:$12 sps:$4 sm:$0xff]  }
 0x80a   :  { %14677 = vmatpush1.bf16.msra.mxu0 %v20133_v35  ;;  %v20214_v35 = vld [vmem:[#allocation12 + $0x90] ss:$12 sps:$4 sm:$0xff]  }
 0x80b   :  { %14678 = vmatprep.subr.bf16.mxu0 %v20141_v62  ;;  %v20219_v62 = vld [vmem:[#allocation12 + $0x7c] ss:$12 sps:$4 sm:$0xff]  }
 0x80c   :  { %14730 = vmatpush1.bf16.msra.mxu1 %v20136_v3  ;;  %v20238_v3 = vld [vmem:[#allocation12 + $0x170] ss:$12 sps:$4 sm:$0xff]  }
 0x80d   :  { %14731 = vmatprep.subr.bf16.mxu1 %v20144_v8  ;;  %v20243_v8 = vld [vmem:[#allocation12 + $0x158] ss:$12 sps:$4 sm:$0xff]  }
 0x80e   :  { %14679 = vmatpush1.bf16.msra.mxu0 %v20139_v47  ;;  %v20223_v47 = vld [vmem:[#allocation12 + $0x48] ss:$12 sps:$4 sm:$0xff]  }
 0x80f   :  { %14680 = vmatprep.subr.bf16.mxu0 %v20147_v20  ;;  %v20228_v20 = vld [vmem:[#allocation12 + $0x34] ss:$12 sps:$4 sm:$0xff]  }
 0x810   :  { %14732 = vmatpush1.bf16.msra.mxu1 %v20142_v33  ;;  %v20226_v33 = vld [vmem:[#allocation12 + $0x30] ss:$12 sps:$4 sm:$0xff]  }
 0x811   :  { %14733 = vmatprep.subr.bf16.mxu1 %v20150_v41  ;;  %v20231_v41 = vld [vmem:[#allocation12 + $0x1c] ss:$12 sps:$4 sm:$0xff]  }
 0x812   :  { %14681 = vmatpush1.bf16.msra.mxu0 %v20145_v2  ;;  %v20229_v2 = vld [vmem:[#allocation12 + $0x18] ss:$12 sps:$4 sm:$0xff]  }
 0x813   :  { %14682 = vmatprep.subr.bf16.mxu0 %v20153_v31  ;;  %v20234_v31 = vld [vmem:[#allocation12 + $0x4] ss:$12 sps:$4 sm:$0xff]  }
 0x814   :  { %14734 = vmatpush1.bf16.msra.mxu1 %v20148_v18  ;;  %v20232_v18 = vld [vmem:[#allocation12] ss:$12 sps:$4 sm:$0xff]  }
 0x815   :  { %14735 = vmatprep.subr.bf16.mxu1 %v20156_v30  ;;  %v20237_v30 = vld [vmem:[#allocation12 + $0x16c] ss:$12 sps:$4 sm:$0xff]  }
 0x816   :  { %14683 = vmatpush1.bf16.msra.mxu0 %v20151_v27  ;;  %v20235_v27 = vld [vmem:[#allocation12 + $0x168] ss:$12 sps:$4 sm:$0xff]  }
 0x817   :  { %14684 = vmatprep.subr.bf16.mxu0 %v20159_v45  ;;  %v20242_v45 = vld [vmem:[#allocation12 + $0x154] ss:$12 sps:$4 sm:$0xff]  }
 0x818   :  { %14736 = vmatpush1.bf16.msra.mxu1 %v20154_v17  ;;  %v20240_v17 = vld [vmem:[#allocation12 + $0x150] ss:$12 sps:$4 sm:$0xff]  }
 0x819   :  { %14737 = vmatprep.subr.bf16.mxu1 %v20162_v59  ;;  %v20247_v59 = vld [vmem:[#allocation12 + $0x13c] ss:$12 sps:$4 sm:$0xff]  }
 0x81a   :  { %14685 = vmatpush1.bf16.msra.mxu0 %v20157_v38  ;;  %v20248_v38 = vld [vmem:[#allocation12 + $0x140] ss:$12 sps:$4 sm:$0xff]  }
 0x81b   :  { %14686 = vmatprep.subr.bf16.mxu0 %v20165_v42  ;;  %v20245_v42 = vld [vmem:[#allocation12 + $0x138] ss:$12 sps:$4 sm:$0xff]  }
 0x81c   :  { %14738 = vmatpush1.bf16.msra.mxu1 %v20160_v9  ;;  %v20249_v9 = vld [vmem:[#allocation12 + $0x80] ss:$12 sps:$4 sm:$0xff]  }
 0x81d   :  { %14739 = vmatprep.subr.bf16.mxu1 %v20168_v43  ;;  %v20252_v43 = vld [vmem:[#allocation12 + $0x124] ss:$12 sps:$4 sm:$0xff]  }
 0x81e   :  { %14687 = vmatpush2.bf16.msra.mxu0 %v20163_v55  ;;  %v20253_v55 = vld [vmem:[#allocation12 + $0x128] ss:$12 sps:$4 sm:$0xff]  }
 0x81f   :  { %14688 = vmatprep.subr.bf16.mxu0 %v20171_v51  ;;  %v20250_v51 = vld [vmem:[#allocation12 + $0x120] ss:$12 sps:$4 sm:$0xff]  }
 0x820   :  { %14740 = vmatpush2.bf16.msra.mxu1 %v20166_v14  ;;  %v20254_v14 = vld [vmem:[#allocation12 + $0x68] ss:$12 sps:$4 sm:$0xff]  }
 0x821   :  { %14741 = vmatprep.subr.bf16.mxu1 %v20174_v58  ;;  %v20257_v58 = vld [vmem:[#allocation12 + $0x10c] ss:$12 sps:$4 sm:$0xff]  }
 0x822   :  { %14689 = vmatpush2.bf16.msra.mxu0 %v20169_v24  ;;  %v20258_v24 = vld [vmem:[#allocation12 + $0x110] ss:$12 sps:$4 sm:$0xff]  }
 0x823   :  { %14690 = vmatprep.subr.bf16.mxu0 %v20177_v54  ;;  %v20255_v54 = vld [vmem:[#allocation12 + $0x108] ss:$12 sps:$4 sm:$0xff]  }
 0x824   :  { %14742 = vmatpush2.bf16.msra.mxu1 %v20172_v61  ;;  %v20259_v61 = vld [vmem:[#allocation12 + $0x50] ss:$12 sps:$4 sm:$0xff]  }
 0x825   :  { %14743 = vmatprep.subr.bf16.mxu1 %v20180_v11  ;;  %v20262_v11 = vld [vmem:[#allocation12 + $0xf4] ss:$12 sps:$4 sm:$0xff]  }
 0x826   :  { %14691 = vmatpush2.bf16.msra.mxu0 %v20175_v53  ;;  %v20263_v53 = vld [vmem:[#allocation12 + $0xf8] ss:$12 sps:$4 sm:$0xff]  }
 0x827   :  { %14692 = vmatprep.subr.bf16.mxu0 %v20183_v44  ;;  %v20260_v44 = vld [vmem:[#allocation12 + $0xf0] ss:$12 sps:$4 sm:$0xff]  }
 0x828   :  { %14744 = vmatpush2.bf16.msra.mxu1 %v20178_v21  ;;  %v20264_v21 = vld [vmem:[#allocation12 + $0x38] ss:$12 sps:$4 sm:$0xff]  }
 0x829   :  { %14745 = vmatprep.subr.bf16.mxu1 %v20186_v13  ;;  %v20267_v13 = vld [vmem:[#allocation12 + $0xdc] ss:$12 sps:$4 sm:$0xff]  }
 0x82a   :  { %14693 = vmatpush2.bf16.msra.mxu0 %v20181_v50  ;;  %v20268_v50 = vld [vmem:[#allocation12 + $0xe0] ss:$12 sps:$4 sm:$0xff]  }
 0x82b   :  { %14694 = vmatprep.subr.bf16.mxu0 %v20189_v6  ;;  %v20265_v6 = vld [vmem:[#allocation12 + $0xd8] ss:$12 sps:$4 sm:$0xff]  }
 0x82c   :  { %14746 = vmatpush2.bf16.msra.mxu1 %v20184_v12  ;;  %v20269_v12 = vld [vmem:[#allocation12 + $0x20] ss:$12 sps:$4 sm:$0xff]  }
 0x82d   :  { %14747 = vmatprep.subr.bf16.mxu1 %v20192_v16  ;;  %v20272_v16 = vld [vmem:[#allocation12 + $0xc4] ss:$12 sps:$4 sm:$0xff]  }
 0x82e   :  { %14695 = vmatpush2.bf16.msra.mxu0 %v20187_v23  ;;  %v20273_v23 = vld [vmem:[#allocation12 + $0xc8] ss:$12 sps:$4 sm:$0xff]  }
 0x82f   :  { %14696 = vmatprep.subr.bf16.mxu0 %v20195_v28  ;;  %v20270_v28 = vld [vmem:[#allocation12 + $0xc0] ss:$12 sps:$4 sm:$0xff]  }
 0x830   :  { %14748 = vmatpush2.bf16.msra.mxu1 %v20190_v4  ;;  %v20274_v4 = vld [vmem:[#allocation12 + $0x8] ss:$12 sps:$4 sm:$0xff]  }
 0x831   :  { %14749 = vmatprep.subr.bf16.mxu1 %v20198_v46  ;;  %v22064_v46 = vld [vmem:[#allocation15 + $0x38] sm:$0xff]  }
 0x832   :  { %14697 = vmatpush2.bf16.msra.mxu0 %v20193_v63 }
 0x833   :  { %14698 = vmatprep.subr.bf16.mxu0 %v20201_v36 }
 0x834   :  { %14750 = vmatpush2.bf16.msra.mxu1 %v20196_v19 }
 0x835   :  { %14751 = vmatprep.subr.bf16.mxu1 %v20204_v48 }
 0x836   :  { %14699 = vmatpush2.bf16.msra.mxu0 %v20199_v25 }
 0x837   :  { %14700 = vmatprep.subr.bf16.mxu0 %v20207_v0 }
 0x838   :  { %14752 = vmatpush2.bf16.msra.mxu1 %v20202_v26 }
 0x839   :  { %14753 = vmatprep.subr.bf16.mxu1 %v20210_v29 }
 0x83a   :  { %14701 = vmatpush2.bf16.msra.mxu0 %v20205_v37 }
 0x83b   :  { %15194 = vmatprep.subr.bf16.mxu0 %v20213_v34 }
 0x83c   :  { %14754 = vmatpush2.bf16.msra.mxu1 %v20208_v1 }
 0x83d   :  { %14703 = vmatmul.mubr.bf16.vlgmr.msra.gmra.mxu0 %v21995_v39  ;;  %v20239_v39 = vld [vmem:[#allocation12 + $0xb0] ss:$12 sps:$4 sm:$0xff]   ;;  %17396 = vmatprep.subr.bf16.mxu1 %v20238_v3 }
 0x83e   :  { %14712 = vmatprep.mubr.bf16.mxu0 %v22038_v57  ;;  %15195 = vmatpush1.bf16.msra.mxu0 %v20211_v52  ;;  %v20217_v57 = vld [vmem:[#allocation12 + $0x78] ss:$12 sps:$4 sm:$0xff]  }
 0x83f   :  { %14756 = vmatmul.mubr.bf16.vlgmr.msra.gmra.mxu1 %v21997_v56  ;;  %15196 = vmatprep.subr.bf16.mxu0 %v20216_v49  ;;  %v20222_v56 = vld [vmem:[#allocation12 + $0x64] ss:$12 sps:$4 sm:$0xff]  }
 0x840   :  { %14765 = vmatprep.mubr.bf16.mxu1 %v22040_v60  ;;  %17397 = vmatpush3.bf16.msra.mxu1 %v20239_v39  ;;  %v20225_v60 = vld [vmem:[#allocation12 + $0x4c] ss:$12 sps:$4 sm:$0xff]  }
 0x841   :  { %17398 = vmatprep.subr.bf16.mxu1 %v20243_v8 }
 0x842   :  { %15197 = vmatpush1.bf16.msra.mxu0 %v20214_v35 }
 0x843   :  { %15198 = vmatprep.subr.bf16.mxu0 %v20219_v62 }
 0x845   :  { %14713 = vmatmul.mubr.bf16.gmra.mxu0 %v22031_v32  ;;  %v20244_v32 = vld [vmem:[#allocation12 + $0x98] ss:$12 sps:$4 sm:$0xff]  }
 0x846   :  { %15199 = vmatpush1.bf16.msra.mxu0 %v20217_v57  ;;  %17399 = vmatpush3.bf16.msra.mxu1 %v20244_v32 }
 0x847   :  { %14766 = vmatmul.mubr.bf16.gmra.mxu1 %v22033_v15  ;;  %v20220_v15 = vld [vmem:[#allocation12 + $0x60] ss:$12 sps:$4 sm:$0xff]   ;;  %15200 = vmatprep.subr.bf16.mxu0 %v20222_v56 }
 0x848   :  { %17400 = vmatprep.subr.bf16.mxu1 %v20248_v38 }
 0x84a   :  { %15201 = vmatpush1.bf16.msra.mxu0 %v20220_v15  ;;  %17401 = vmatpush3.bf16.msra.mxu1 %v20249_v9 }
 0x84b   :  { %15202 = vmatprep.subr.bf16.mxu0 %v20225_v60  ;;  %17402 = vmatprep.subr.bf16.mxu1 %v20253_v55 }
 0x84e   :  { %15203 = vmatpush1.bf16.msra.mxu0 %v20223_v47  ;;  %17403 = vmatpush3.bf16.msra.mxu1 %v20254_v14 }
 0x84f   :  { %15204 = vmatprep.subr.bf16.mxu0 %v20228_v20  ;;  %17404 = vmatprep.subr.bf16.mxu1 %v20258_v24 }
 0x852   :  { %15205 = vmatpush1.bf16.msra.mxu0 %v20226_v33  ;;  %17405 = vmatpush3.bf16.msra.mxu1 %v20259_v61 }
 0x853   :  { %15206 = vmatprep.subr.bf16.mxu0 %v20231_v41  ;;  %17406 = vmatprep.subr.bf16.mxu1 %v20263_v53 }
 0x856   :  { %15207 = vmatpush1.bf16.msra.mxu0 %v20229_v2  ;;  %17407 = vmatpush3.bf16.msra.mxu1 %v20264_v21 }
 0x857   :  { %15208 = vmatprep.subr.bf16.mxu0 %v20234_v31  ;;  %17408 = vmatprep.subr.bf16.mxu1 %v20268_v50 }
 0x85a   :  { %15209 = vmatpush1.bf16.msra.mxu0 %v20232_v18  ;;  %17409 = vmatpush3.bf16.msra.mxu1 %v20269_v12 }
 0x85b   :  { %15210 = vmatprep.subr.bf16.mxu0 %v20237_v30  ;;  %17410 = vmatprep.subr.bf16.mxu1 %v20273_v23 }
 0x85e   :  { %15211 = vmatpush2.bf16.msra.mxu0 %v20235_v27  ;;  %17411 = vmatpush3.bf16.msra.mxu1 %v20274_v4 }
 0x85f   :  { %15212 = vmatprep.subr.bf16.mxu0 %v20242_v45  ;;  %17434 = vmatprep.subr.bf16.mxu1 %v22064_v46 }
 0x862   :  { %15213 = vmatpush2.bf16.msra.mxu0 %v20240_v17 }
 0x863   :  { %15214 = vmatprep.subr.bf16.mxu0 %v20247_v59 }
 0x866   :  { %15215 = vmatpush2.bf16.msra.mxu0 %v20245_v42 }
 0x867   :  { %15216 = vmatprep.subr.bf16.mxu0 %v20252_v43 }
 0x86a   :  { %15217 = vmatpush2.bf16.msra.mxu0 %v20250_v51 }
 0x86b   :  { %15218 = vmatprep.subr.bf16.mxu0 %v20257_v58  ;;  %v14776_v58 = vld [vmem:[#allocation10] sm:$0x3] }
 0x86c   :  { %v14781_v12 = vrot.slane %v14776_v58, %v13106_v10  ;;  %v22095_v23 = vrot.slane %v14776_v58, %v13110_v40 }
 0x86e   :  { %15219 = vmatpush2.bf16.msra.mxu0 %v20255_v54 }
 0x86f   :  { %15220 = vmatprep.subr.bf16.mxu0 %v20262_v11 }
 0x872   :  { %15221 = vmatpush2.bf16.msra.mxu0 %v20260_v44 }
 0x873   :  { %15222 = vmatprep.subr.bf16.mxu0 %v20267_v13 }
 0x876   :  { %15223 = vmatpush2.bf16.msra.mxu0 %v20265_v6 }
 0x877   :  { %15224 = vmatprep.subr.bf16.mxu0 %v20272_v16 }
 0x87a   :  { %15225 = vmatpush2.bf16.msra.mxu0 %v20270_v28 }
 0x87b   :  { %v14492_v63 = vpop.f32.mrf.mxu0 }
 0x87d   :  { %v14494_v19 = vpop.f32.mrf.mxu0 }
 0x87f   :  { %v14545_v36 = vpop.f32.mrf.mxu1  ;;  %v14496_v25 = vpop.f32.mrf.mxu0 }
 0x880   :  { %v14546_v38 = vadd.f32 %v14545_v36, %v14492_v63 }
 0x881   :  { %v14547_v48 = vpop.f32.mrf.mxu1  ;;  %v14498_v26 = vpop.f32.mrf.mxu0 }
 0x882   :  { %v14548_v55 = vadd.f32 %v14547_v48, %v14494_v19  ;;  %v14790_v53 = vrot.slane %v14546_v38, 7 }
 0x883   :  { %v14549_v0 = vpop.f32.mrf.mxu1  ;;  %v14502_v37 = vpop.f32.mrf.mxu0 }
 0x884   :  { %v14550_v30 = vadd.f32 %v14549_v0, %v14496_v25  ;;  %v14791_v6 = vrot.slane %v14548_v55, 7 }
 0x885   :  { %v14551_v29 = vpop.f32.mrf.mxu1  ;;  %v14504_v52 = vpop.f32.mrf.mxu0 }
 0x886   :  { %v14552_v17 = vadd.f32 %v14551_v29, %v14498_v26  ;;  %v14792_v51 = vrot.slane %v14550_v30, 7 }
 0x887   :  { %v14555_v1 = vpop.f32.mrf.mxu1  ;;  %v14506_v49 = vpop.f32.mrf.mxu0 }
 0x888   :  { %v14556_v31 = vadd.f32 %v14555_v1, %v14502_v37  ;;  %v14793_v61 = vrot.slane %v14552_v17, 7  ;;  %v14802_v28 = vsel %vm13144_vm0, %v14790_v53, %v14792_v51 }
 0x889   :  { %v14557_v34 = vpop.f32.mrf.mxu1  ;;  %v14508_v62 = vpop.f32.mrf.mxu0  ;;  %v14816_v0 = vadd.f32 %v14802_v28, %v14781_v12 }
 0x88a   :  { %v14558_v27 = vadd.f32 %v14557_v34, %v14504_v52  ;;  %v14794_v42 = vrot.slane %v14556_v31, 7  ;;  %v14803_v19 = vsel %vm13144_vm0, %v14791_v6, %v14793_v61 }
 0x88b   :  { %v14559_v35 = vpop.f32.mrf.mxu1  ;;  %v14817_v1 = vadd.f32 %v14803_v19, %v22095_v23 }
 0x88c   :  { %v14560_v59 = vadd.f32 %v14559_v35, %v14506_v49  ;;  %v14795_v14 = vrot.slane %v14558_v27, 7  ;;  %v14800_v44 = vsel %vm13144_vm0, %v14792_v51, %v14794_v42 }
 0x88d   :  { %v14561_v3 = vpop.f32.mrf.mxu1  ;;  %v14810_v10 = vsel %vm178_vm1, %v14800_v44, 0.0 }
 0x88e   :  { %v14562_v9 = vadd.f32 %v14561_v3, %v14508_v62  ;;  %v14796_v11 = vrot.slane %v14560_v59, 7  ;;  %v14801_v16 = vsel %vm13144_vm0, %v14793_v61, %v14795_v14  ;;  %v22114_v52 = vadd.f32 %v14810_v10, %v14781_v12 }
 0x88f   :  { %v14811_v26 = vsel %vm178_vm1, %v14801_v16, 0.0 }
 0x890   :  { %v14797_v21 = vrot.slane %v14562_v9, 7  ;;  %v14804_v36 = vsel %vm13144_vm0, %v14796_v11, %v14790_v53  ;;  %v14798_v31 = vsel %vm13144_vm0, %v14794_v42, %v14796_v11  ;;  %v14819_v59 = vadd.f32 %v14811_v26, %v22095_v23 }
 0x891   :  { %v14806_v37 = vsel %vm178_vm1, %v14804_v36, 0.0 }
 0x892   :  { %v14805_v48 = vsel %vm13144_vm0, %v14797_v21, %v14791_v6  ;;  %v14814_v51 = vadd.f32 %v14806_v37, %v14781_v12  ;;  %v14799_v44 = vsel %vm13144_vm0, %v14795_v14, %v14797_v21 }
 0x893   :  { %v14807_v3 = vsel %vm178_vm1, %v14805_v48, 0.0 }
 0x8bc   :  { %v14598_v39 = vpop.f32.mrf.mxu0 }
 0x8be   :  { %v14600_v8 = vpop.f32.mrf.mxu0 }
 0x8bf   :  { %v14651_v57 = vpop.f32.mrf.mxu1 }
 0x8c0   :  { %v14602_v32 = vpop.f32.mrf.mxu0  ;;  %v14652_v62 = vadd.f32 %v14651_v57, %v14598_v39  ;;  %v14815_v39 = vadd.f32 %v14807_v3, %v22095_v23  ;;  %v14820_v57 = vadd.f32 %v14798_v31, %v14781_v12 }
 0x8c1   :  { %v14653_v56 = vpop.f32.mrf.mxu1 }
 0x8c2   :  { %v22067_v60 = vpop.f32.mrf.mxu0  ;;  %v14654_v27 = vadd.f32 %v14653_v56, %v14600_v8  ;;  %v14822_v56 = vadd.f32 %v14814_v51, %v14652_v62 }
 0x8c3   :  { %v14655_v15 = vpop.f32.mrf.mxu1 }
 0x8c4   :  { %v22071_v20 = vpop.f32.mrf.mxu0  ;;  %v14656_v17 = vadd.f32 %v14655_v15, %v14602_v32 }
 0x8c5   :  { %v22069_v47 = vpop.f32.mrf.mxu1 }
 0x8c6   :  { %v22075_v41 = vpop.f32.mrf.mxu0  ;;  %v14658_v6 = vadd.f32 %v22069_v47, %v22067_v60 }
 0x8c7   :  { %v22073_v33 = vpop.f32.mrf.mxu1 }
 0x8c8   :  { %v22079_v18 = vpop.f32.mrf.mxu0 }
 0x8c9   :  { %v22077_v2 = vpop.f32.mrf.mxu1 }
 0x8ca   :  { %v22083_v43 = vpop.f32.mrf.mxu0  ;;  %v14664_v14 = vadd.f32 %v22077_v2, %v22075_v41 }
 0x8cb   :  { %v22081_v45 = vpop.f32.mrf.mxu1 }
 0x8cc   :  { %v14666_v26 = vadd.f32 %v22081_v45, %v22079_v18 }
 0x8cd   :  { %v22085_v24 = vpop.f32.mrf.mxu1 }
 0x8ce   :  { %v14668_v36 = vadd.f32 %v22085_v24, %v22083_v43  ;;  %v14821_v43 = vadd.f32 %v14799_v44, %v22095_v23 }
 0x8fd   :  { %v14704_v54 = vpop.f32.mrf.mxu0 }
 0x8ff   :  { %v14757_v13 = vpop.f32.mrf.mxu1  ;;  %v14706_v50 = vpop.f32.mrf.mxu0 }
 0x900   :  { %v14758_v38 = vadd.f32 %v14757_v13, %v14704_v54  ;;  %v14823_v13 = vadd.f32 %v14815_v39, %v14654_v27 }
 0x901   :  { %v14759_v4 = vpop.f32.mrf.mxu1  ;;  %v14708_v63 = vpop.f32.mrf.mxu0 }
 0x902   :  { %v22109_v29 = vadd.f32 %v14759_v4, %v14706_v50  ;;  %v14824_v50 = vadd.f32 %v14816_v0, %v14656_v17  ;;  %v14830_v16 = vrot.slane %v14758_v38, 1  ;;  %v14662_v0 = vadd.f32 %v22073_v33, %v22071_v20 }
 0x903   :  { %v14761_v25 = vpop.f32.mrf.mxu1  ;;  %v14710_v40 = vpop.f32.mrf.mxu0  ;;  %v14828_v17 = vadd.f32 %v14820_v57, %v14666_v26  ;;  %v20276_v57 = vld [vmem:[#allocation15 + $0x30] sm:$0xff]  }
 0x904   :  { %v14762_v34 = vadd.f32 %v14761_v25, %v14708_v63  ;;  %v14831_v58 = vrot.slane %v22109_v29, 1  ;;  %v14826_v27 = vadd.f32 %v22114_v52, %v14662_v0 }
 0x905   :  { %v14763_v49 = vpop.f32.mrf.mxu1  ;;  %v14714_v35 = vpop.f32.mrf.mxu0 }
 0x906   :  { %v14764_v30 = vadd.f32 %v14763_v49, %v14710_v40  ;;  %v14832_v42 = vrot.slane %v14762_v34, 1  ;;  %v14825_v40 = vadd.f32 %v14817_v1, %v14658_v6  ;;  %v14827_v49 = vadd.f32 %v14819_v59, %v14664_v14 }
 0x907   :  { %v14767_v9 = vpop.f32.mrf.mxu1  ;;  %v14716_v55 = vpop.f32.mrf.mxu0 }
 0x908   :  { %v14833_v61 = vrot.slane %v14764_v30, 1  ;;  %v14768_v53 = vadd.f32 %v14767_v9, %v14714_v35  ;;  %v14842_v19 = vsel %vm13229_vm2, %v14830_v16, %v14832_v42  ;;  %v14829_v35 = vadd.f32 %v14821_v43, %v14668_v36 }
 0x909   :  { %v14769_v11 = vpop.f32.mrf.mxu1  ;;  %v14718_v8 = vpop.f32.mrf.mxu0  ;;  %v14854_v29 = vadd.f32 %v14842_v19, %v14822_v56  ;;  %v20279_v56 = vld [vmem:[#allocation15 + $0x18] sm:$0xff]  }
 0x90a   :  { %v14843_v32 = vsel %vm13229_vm2, %v14831_v58, %v14833_v61  ;;  %v14834_v15 = vrot.slane %v14768_v53, 1  ;;  %v14770_v54 = vadd.f32 %v14769_v11, %v14716_v55  ;;  %v20277_v11 = vld [vmem:[#allocation15 + $0x28] sm:$0xff]  }
 0x90b   :  { %v14771_v28 = vpop.f32.mrf.mxu1  ;;  %v14720_v12 = vpop.f32.mrf.mxu0  ;;  %v14855_v10 = vadd.f32 %v14843_v32, %v14823_v13  ;;  %v14862_v59 = vmax.f32 %v14854_v29, 0.0  ;;  %v20281_v32 = vld [vmem:[#allocation15 + $0x8] sm:$0xff]  }
 0x90c   :  { %v14840_v21 = vsel %vm13229_vm2, %v14832_v42, %v14834_v15  ;;  %v14835_v4 = vrot.slane %v14770_v54, 1  ;;  %v14772_v63 = vadd.f32 %v14771_v28, %v14718_v8  ;;  %v20278_v8 = vld [vmem:[#allocation15 + $0x20] sm:$0xff]  }
 0x90d   :  { %v14848_v60 = vsel %vm189_vm3, %v14840_v21, 0.0  ;;  %v14773_v47 = vpop.f32.mrf.mxu1  ;;  %v14863_v1 = vmax.f32 %v14855_v10, 0.0 }
 0x90e   :  { %v14856_v48 = vadd.f32 %v14848_v60, %v14824_v50  ;;  %v14841_v41 = vsel %vm13229_vm2, %v14833_v61, %v14835_v4  ;;  %v14836_v2 = vrot.slane %v14772_v63, 1  ;;  %v14774_v25 = vadd.f32 %v14773_v47, %v14720_v12  ;;  %v17386_v47 = vld [vmem:[#allocation13] ss:$0 sm:$0xff] }
 0x90f   :  { %v14849_v24 = vsel %vm189_vm3, %v14841_v41, 0.0 }
 0x910   :  { %v14844_v37 = vsel %vm13229_vm2, %v14836_v2, %v14830_v16  ;;  %v14837_v34 = vrot.slane %v14774_v25, 1  ;;  %v14857_v62 = vadd.f32 %v14849_v24, %v14825_v40  ;;  %v14864_v3 = vmax.f32 %v14856_v48, 0.0 }
 0x911   :  { %v14838_v20 = vsel %vm13229_vm2, %v14834_v15, %v14836_v2  ;;  %v14852_v18 = vsel %vm189_vm3, %v14844_v37, 0.0  ;;  %v20282_v15 = vld [vmem:[#allocation15] sm:$0xff]  }
 0x912   :  { %v14839_v33 = vsel %vm13229_vm2, %v14835_v4, %v14837_v34  ;;  %v14845_v23 = vsel %vm13229_vm2, %v14837_v34, %v14831_v58  ;;  %v14865_v31 = vmax.f32 %v14857_v62, 0.0  ;;  %v14870_v51 = vpack.c.bf16 %v14864_v3, %v14862_v59 }
 0x913   :  { %v14853_v45 = vsel %vm189_vm3, %v14845_v23, 0.0  ;;  %v14859_v30 = vadd.f32 %v14839_v33, %v14827_v49  ;;  %v14858_v61 = vadd.f32 %v14838_v20, %v14826_v27  ;;  %v14860_v53 = vadd.f32 %v14852_v18, %v14828_v17 }
 0x914   :  { %v14861_v38 = vadd.f32 %v14853_v45, %v14829_v35  ;;  %v14871_v9 = vpack.c.bf16 %v14865_v31, %v14863_v1 }
 0x915   :  { %v14867_v55 = vmax.f32 %v14859_v30, 0.0  ;;  %v14866_v44 = vmax.f32 %v14858_v61, 0.0  ;;  %v14868_v42 = vmax.f32 %v14860_v53, 0.0 }
 0x916   :  { %v14869_v39 = vmax.f32 %v14861_v38, 0.0  ;;  %15226 = vmatprep.mubr.bf16.mxu0 %v14871_v9  ;;  %15279 = vmatprep.mubr.bf16.mxu1 %v14871_v9 }
 0x917   :  { %15227 = vmatmul.mubr.bf16.vlgmr.msra.gmra.mxu0 %v14870_v51  ;;  %15280 = vmatmul.mubr.bf16.vlgmr.msra.gmra.mxu1 %v14870_v51  ;;  %v14872_v52 = vpack.c.bf16 %v14868_v42, %v14866_v44 }
 0x918   :  { %v14873_v58 = vpack.c.bf16 %v14869_v39, %v14867_v55  ;;  %17435 = vmatpush3.bf16.msra.mxu1 %v22064_v46  ;;  %v20280_v46 = vld [vmem:[#allocation15 + $0x10] sm:$0xff]  }
 0x919   :  { %17436 = vmatprep.subr.bf16.mxu1 %v20276_v57 }
 0x91a   :  { %15236 = vmatprep.mubr.bf16.mxu0 %v14873_v58  ;;  %15287 = vmatprep.mubr.bf16.mxu1 %v14873_v58 }
 0x91c   :  { %17437 = vmatpush3.bf16.msra.mxu1 %v20276_v57 }
 0x91d   :  { %17438 = vmatprep.subr.bf16.mxu1 %v20277_v11 }
 0x91f   :  { %15237 = vmatmul.mubr.bf16.gmra.mxu0 %v14872_v52  ;;  %15288 = vmatmul.mubr.bf16.gmra.mxu1 %v14872_v52 }
 0x920   :  { %17439 = vmatpush3.bf16.msra.mxu1 %v20277_v11 }
 0x921   :  { %17440 = vmatprep.subr.bf16.mxu1 %v20278_v8 }
 0x924   :  { %17441 = vmatpush3.bf16.msra.mxu1 %v20278_v8 }
 0x925   :  { %17442 = vmatprep.subr.bf16.mxu1 %v20279_v56 }
 0x928   :  { %17443 = vmatpush3.bf16.msra.mxu1 %v20279_v56 }
 0x929   :  { %17444 = vmatprep.subr.bf16.mxu1 %v20280_v46 }
 0x92c   :  { %17445 = vmatpush3.bf16.msra.mxu1 %v20280_v46  ;;  %v17387_v46 = vld [vmem:[#allocation16] ss:$0 sm:$0xff] }
 0x92d   :  { %17446 = vmatprep.subr.bf16.mxu1 %v20281_v32 }
 0x930   :  { %17447 = vmatpush3.bf16.msra.mxu1 %v20281_v32 }
 0x931   :  { %17448 = vmatprep.subr.bf16.mxu1 %v20282_v15 }
 0x934   :  { %17449 = vmatpush3.bf16.msra.mxu1 %v20282_v15 }
 0x9d7   :  { %v15228_v54 = vpop.f32.mrf.mxu0  ;;  %v17412_v13 = vpop.f32.mrf.mxu1 }
 0x9d8   :  { %v15304_v4 = vrot.slane %v15228_v54, 7 }
 0x9d9   :  { %v15230_v50 = vpop.f32.mrf.mxu0  ;;  %v17413_v6 = vpop.f32.mrf.mxu1 }
 0x9da   :  { %v17414_v34 = vadd.f32 %v17413_v6, %v17412_v13 }
 0x9db   :  { %v15232_v16 = vpop.f32.mrf.mxu0  ;;  %v17415_v28 = vpop.f32.mrf.mxu1 }
 0x9dc   :  { %v15305_v12 = vrot.slane %v15232_v16, 7  ;;  %v15324_v27 = vrot.slane %v17414_v34, 1 }
 0x9dd   :  { %v15234_v14 = vpop.f32.mrf.mxu0  ;;  %v17416_v21 = vpop.f32.mrf.mxu1 }
 0x9de   :  { %v17417_v19 = vadd.f32 %v17416_v21, %v17415_v28  ;;  %v15310_v10 = vsel %vm13144_vm0, %v15304_v4, %v15305_v12 }
 0x9df   :  { %v15238_v63 = vpop.f32.mrf.mxu0  ;;  %v17418_v36 = vpop.f32.mrf.mxu1  ;;  %v15317_v24 = vadd.f32 %v17386_v47, %v15310_v10 }
 0x9e0   :  { %v15306_v60 = vrot.slane %v15238_v63, 7  ;;  %v15325_v26 = vrot.slane %v17417_v19, 1 }
 0x9e1   :  { %v15240_v48 = vpop.f32.mrf.mxu0  ;;  %v17419_v41 = vpop.f32.mrf.mxu1  ;;  %v15321_v45 = vadd.f32 %v15317_v24, %v15234_v14 }
 0x9e2   :  { %v15309_v2 = vsel %vm13144_vm0, %v15305_v12, %v15306_v60  ;;  %v17420_v25 = vadd.f32 %v17419_v41, %v17418_v36  ;;  %v15330_v51 = vsel %vm13229_vm2, %v15324_v27, %v15325_v26 }
 0x9e3   :  { %v15314_v40 = vsel %vm178_vm1, %v15309_v2, 0.0  ;;  %v15242_v0 = vpop.f32.mrf.mxu0  ;;  %v17421_v43 = vpop.f32.mrf.mxu1 }
 0x9e4   :  { %v15326_v29 = vrot.slane %v17420_v25, 1  ;;  %v15307_v37 = vrot.slane %v15242_v0, 7  ;;  %v15318_v35 = vadd.f32 %v17386_v47, %v15314_v40 }
 0x9e5   :  { %v17422_v49 = vpop.f32.mrf.mxu1  ;;  %v15244_v30 = vpop.f32.mrf.mxu0 }
 0x9e6   :  { %v15329_v62 = vsel %vm13229_vm2, %v15325_v26, %v15326_v29  ;;  %v15311_v1 = vsel %vm13144_vm0, %v15307_v37, %v15304_v4  ;;  %v15308_v3 = vsel %vm13144_vm0, %v15306_v60, %v15307_v37  ;;  %v17423_v18 = vadd.f32 %v17422_v49, %v17421_v43 }
 0x9e7   :  { %v15333_v20 = vsel %vm189_vm3, %v15329_v62, 0.0  ;;  %v15312_v33 = vsel %vm178_vm1, %v15311_v1, 0.0  ;;  %v15319_v23 = vadd.f32 %v17386_v47, %v15308_v3  ;;  %v15322_v38 = vadd.f32 %v15318_v35, %v15240_v48 }
 0x9e8   :  { %v15316_v31 = vadd.f32 %v17386_v47, %v15312_v33  ;;  %v15327_v59 = vrot.slane %v17423_v18, 1  ;;  %v15337_v55 = vadd.f32 %v15333_v20, %v15321_v45 }
 0x9e9   :  { %v15323_v17 = vadd.f32 %v15319_v23, %v15244_v30 }
 0x9ea   :  { %v15320_v9 = vadd.f32 %v15316_v31, %v15230_v50  ;;  %v15328_v61 = vsel %vm13229_vm2, %v15326_v29, %v15327_v59  ;;  %v15331_v22 = vsel %vm13229_vm2, %v15327_v59, %v15324_v27  ;;  %v15341_v57 = vmax.f32 %v15337_v55, 0.0 }
 0x9eb   :  { %v15335_v53 = vsel %vm189_vm3, %v15331_v22, 0.0  ;;  %v15338_v39 = vadd.f32 %v15328_v61, %v15322_v38 }
 0x9ec   :  { %v15336_v58 = vadd.f32 %v15330_v51, %v15320_v9  ;;  %v15339_v44 = vadd.f32 %v15335_v53, %v15323_v17 }
 0x9ed   :  { %v15342_v42 = vmax.f32 %v15338_v39, 0.0 }
 0x9ee   :  { %v15340_v52 = vmax.f32 %v15336_v58, 0.0  ;;  %v15343_v11 = vmax.f32 %v15339_v44, 0.0 }
 0x9f0   :  { %v15344_v8 = vpack.c.bf16 %v15341_v57, %v15340_v52  ;;  %v15345_v56 = vpack.c.bf16 %v15343_v11, %v15342_v42 }
 0x9f2   :  { %17450 = vmatprep.mubr.bf16.mxu1 %v15344_v8 }
 0x9f3   :  { %17451 = vmatmul.mubr.bf16.vlgmr.msra.gmra.mxu1 %v15345_v56 }
 0xab3   :  { %v17452_v32 = vpop.f32.mrf.mxu1 }
 0xab4   :  { %v15460_v15 = vadd.f32 %v17452_v32, %v17387_v46 }
 0xab5   :  { %v15451_v54 = vpop.f32.mrf.mxu1 }
 0xab6   :  { %15468 = vst [vmem:[%s22211_s13 + $0x10] sm:$0xff] %v15460_v15  ;;  %v15452_v5 = vadd.f32 %v17387_v46, %v15451_v54 }
 0xab7   :  { %v17453_v7 = vpop.f32.mrf.mxu1 }
 0xab8   :  { %15466 = vst [vmem:[%s22211_s13] sm:$0xff] %v15452_v5  ;;  %v15463_v13 = vadd.f32 %v17453_v7, %v17387_v46 }
 0xab9   :  { %v15454_v50 = vpop.f32.mrf.mxu1 }
 0xaba   :  { %15469 = vst [vmem:[%s22211_s13 + $0x18] sm:$0xff] %v15463_v13  ;;  %v15455_v6 = vadd.f32 %v17387_v46, %v15454_v50 }
 0xabc   :  { %15467 = vst [vmem:[%s22211_s13 + $0x8] sm:$0xff] %v15455_v6 }
 0xabd   :  { %15474 = vsyncpa [#allocation3], 1 }
 0xabe   :  { %15475 = vsyncpa [#allocation5], 1 }
 0xabf   :  { %15476 = vsyncpa [#allocation8], 1 }
 0xac0   :  { %15477 = vsyncpa [#allocation11], 1 }
 0xac1   :  { %15478 = vsyncpa [#allocation14], 1 }
 0xac2   :  { %15479 = vsyncpa [#allocation17], 1 }

</bundles_post_ra>
